<compile_context>
chip_gen: v5e
topology: v5e:2x2
jax: 0.10.0
libtpu: 0.0.40
codegen_flags: <defaults>
</compile_context>

<pallas_src>
import functools

import numpy as np
import jax
import jax.numpy as jnp
from jax.experimental import pallas as pl
from jax.experimental.pallas import tpu as pltpu


# -----------------------------------------------------------------------------
# Fused kernel: stem + BasicBlock1 + BasicBlock2(stride 2) + avg-pool + fc head
# Activation layout: rows = image*(H+2) + padded_row, lanes = col*C + channel.
# -----------------------------------------------------------------------------
def _network_kernel(x_ref,
                    w_stem, b_stem, w_b1c1, b_b1c1, w_b1c2, b_b1c2,
                    sel_ref, w_b2c1, b_b2c1, w_b2ds, b_b2ds, w_b2c2, b_b2c2,
                    pool_r, w_fc1, b_fc1, w_fc2, b_fc2, w_fc3, b_fc3,
                    o_ref,
                    buf_a, buf_b, buf_c,
                    *, Bs, H, W, H2, W2, C1, C2):
    f32, bf16 = jnp.float32, jnp.bfloat16
    RPI1, RPI2 = H + 2, H2 + 2            # padded rows per image (16x16 / 8x8 maps)
    R1, R2 = Bs * RPI1, Bs * RPI2
    L1, L2 = W * C1, W2 * C2              # lane width of one activation row
    M1, M2 = R1 - 2, R2 - 2               # rows of the "every shifted row" conv outputs

    # ---- zero only the H-pad rows (real rows are fully overwritten below) ----
    z1 = jnp.zeros((1, L1), bf16)
    z2 = jnp.zeros((1, L2), bf16)
    for b in range(Bs):
        buf_a[pl.ds(b * RPI1, 1), :] = z1
        buf_a[pl.ds(b * RPI1 + H + 1, 1), :] = z1
        buf_b[pl.ds(b * RPI1, 1), :] = z1
        buf_b[pl.ds(b * RPI1 + H + 1, 1), :] = z1
        buf_c[pl.ds(b * RPI2, 1), :] = z2
        buf_c[pl.ds(b * RPI2 + H2 + 1, 1), :] = z2

    def conv_rows(src_ref, w3_ref, n_rows):
        """3x3 stride-1 conv (pad 1) as 3 row-shifted lane-Toeplitz matmuls.

        Result row k is the conv output centred on buffer row k+1; the W-direction
        zero padding and the 3 column taps are folded into the Toeplitz weights."""
        acc = None
        for di in range(3):
            xs = src_ref[pl.ds(di, n_rows), :]                        # bf16 slab
            t = jnp.dot(xs, w3_ref[di], preferred_element_type=f32)
            acc = t if acc is None else acc + t
        return acc

    def scatter_rows(dst_ref, val, rows_per_img, h):
        """store the real image rows of `val` (dense conv-output layout) into dst."""
        v = val.astype(bf16)
        for b in range(Bs):
            dst_ref[pl.ds(b * rows_per_img + 1, h), :] = \
                v[b * rows_per_img:b * rows_per_img + h, :]

    # ---- stem: conv3x3(3->C1) + folded BN + ReLU ----------------------------
    a0 = jnp.maximum(conv_rows(x_ref, w_stem, M1) + b_stem[...], 0.0)
    scatter_rows(buf_a, a0, RPI1, H)

    # ---- BasicBlock 1 (stride 1, identity residual) -------------------------
    a1 = jnp.maximum(conv_rows(buf_a, w_b1c1, M1) + b_b1c1[...], 0.0)
    scatter_rows(buf_b, a1, RPI1, H)

    y2 = conv_rows(buf_b, w_b1c2, M1) + b_b1c2[...]
    a2 = jnp.maximum(y2 + buf_a[pl.ds(1, M1), :].astype(f32), 0.0)    # (M1, L1)
    a2 = a2.astype(bf16)

    # ---- BasicBlock 2 (stride 2, 1x1 downsample residual) -------------------
    # stride-2 row gather: one constant selection matmul per kernel row di
    g = [jnp.dot(sel_ref[di], a2, preferred_element_type=f32).astype(bf16)
         for di in range(3)]                                          # (Bs*H2, L1)

    y3 = b_b2c1[...]
    for di in range(3):
        y3 = y3 + jnp.dot(g[di], w_b2c1[di], preferred_element_type=f32)
    c1 = jnp.maximum(y3, 0.0).astype(bf16)                            # (Bs*H2, L2)
    for b in range(Bs):
        buf_c[pl.ds(b * RPI2 + 1, H2), :] = c1[b * H2:(b + 1) * H2, :]

    ds = jnp.dot(g[1], w_b2ds[...], preferred_element_type=f32) + b_b2ds[...]

    y5 = conv_rows(buf_c, w_b2c2, M2) + b_b2c2[...]                   # (M2, L2)
    act = jnp.concatenate([y5[b * RPI2:b * RPI2 + H2, :] for b in range(Bs)], axis=0)
    act = jnp.maximum(act + ds, 0.0)                                  # (Bs*H2, L2)

    # ---- global average pool (rows via matmul; lane reduction folded into fc1_w)
    feat = jnp.dot(pool_r[...], act.astype(bf16), preferred_element_type=f32)

    # ---- replaced fc head: Linear-ReLU-Linear-ReLU-Dropout(eval)-Linear -----
    z = jnp.maximum(jnp.dot(feat.astype(bf16), w_fc1[...],
                            preferred_element_type=f32) + b_fc1[...], 0.0)
    z = jnp.maximum(jnp.dot(z.astype(bf16), w_fc2[...],
                            preferred_element_type=f32) + b_fc2[...], 0.0)
    # TODO(synk): Dropout(0.3) is identity at inference; training-mode RNG masking
    # is not implemented in the kernel.
    z = jnp.dot(z.astype(bf16), w_fc3[...], preferred_element_type=f32) + b_fc3[...]
    o_ref[...] = z


# ------------------------------ wrapper --------------------------------------

def _rep_spec(shape):
    zeros = (0,) * len(shape)
    return pl.BlockSpec(shape, lambda g: zeros)


def forward_batch(q, x_nchw, groups=None):
    """x_nchw: (B, 3, H, W) float32 -> (B, 32) embeddings, one fused pallas_call."""
    B, C0, H, W = x_nchw.shape
    H2, W2 = H // 2, W // 2
    assert q["stem_w"].shape[1] == W * C0, "params were prepared for a different input size"
    C1 = q["b1c1_b"].shape[-1] // W
    C2 = q["b2c2_b"].shape[-1] // W2
    n_emb = q["fc3_b"].shape[-1]

    if groups is None:
        groups = 2 if B % 2 == 0 else 1       # 2 grid steps -> both v7x TensorCores
    assert B % groups == 0
    Bs = B // groups
    RPI1, RPI2 = H + 2, H2 + 2
    R1 = Bs * RPI1
    M1 = R1 - 2

    # lane-dense, H-padded input layout: row = (image, padded_row), lane = col*C0 + c
    x = jnp.transpose(x_nchw, (0, 2, 3, 1))                 # NCHW -> NHWC
    x = jnp.pad(x, ((0, 0), (1, 1), (0, 0), (0, 0)))
    x = x.reshape(groups, R1, W * C0).astype(jnp.bfloat16)

    # constant stride-2 row-selection matrices over the dense block1-output rows
    sel = np.zeros((3, Bs * H2, M1), np.float32)
    for di in range(3):
        for b in range(Bs):
            for i2 in range(H2):
                p = 2 * i2 + di                              # padded source row
                if 1 <= p <= H:                              # pad rows contribute 0
                    sel[di, b * H2 + i2, b * RPI1 + p - 1] = 1.0
    sel = jnp.asarray(sel, jnp.bfloat16)

    # constant row-average matrix (1/(H2*W2)); the lane reduction lives in fc1_w
    pr = np.zeros((Bs, Bs * H2), np.float32)
    for b in range(Bs):
        pr[b, b * H2:(b + 1) * H2] = 1.0 / (H2 * W2)
    pr = jnp.asarray(pr, jnp.bfloat16)

    args = (x,
            q["stem_w"], q["stem_b"], q["b1c1_w"], q["b1c1_b"], q["b1c2_w"], q["b1c2_b"],
            sel, q["b2c1_w"], q["b2c1_b"], q["b2ds_w"], q["b2ds_b"], q["b2c2_w"], q["b2c2_b"],
            pr, q["fc1_w"], q["fc1_b"], q["fc2_w"], q["fc2_b"], q["fc3_w"], q["fc3_b"])

    in_specs = [pl.BlockSpec((None, R1, W * C0), lambda g: (g, 0, 0))]
    in_specs += [_rep_spec(a.shape) for a in args[1:]]

    out = pl.pallas_call(
        functools.partial(_network_kernel, Bs=Bs, H=H, W=W, H2=H2, W2=W2, C1=C1, C2=C2),
        out_shape=jax.ShapeDtypeStruct((groups, Bs, n_emb), jnp.float32),
        grid=(groups,),
        in_specs=in_specs,
        out_specs=pl.BlockSpec((None, Bs, n_emb), lambda g: (g, 0, 0)),
        scratch_shapes=[pltpu.VMEM((R1, W * C1), jnp.bfloat16),
                        pltpu.VMEM((R1, W * C1), jnp.bfloat16),
                        pltpu.VMEM((Bs * RPI2, W2 * C2), jnp.bfloat16)],
        compiler_params=pltpu.CompilerParams(dimension_semantics=("parallel",)),
    )(*args)
    return out.reshape(B, n_emb)


# ------------------------------ parameters -----------------------------------

def init_params(key):
    """Synthetic small ResNet backbone (stem + 2 BasicBlocks) + replaced fc head."""
    ks = list(jax.random.split(key, 40))
    it = iter(ks)

    def nrm(shape, scale=0.1):
        return scale * jax.random.normal(next(it), shape, dtype=jnp.float32)

    def bn(c):
        return dict(
            gamma=1.0 + 0.05 * jax.random.normal(next(it), (c,), jnp.float32),
            beta=0.05 * jax.random.normal(next(it), (c,), jnp.float32),
            mean=0.05 * jax.random.normal(next(it), (c,), jnp.float32),
            var=1.0 + 0.05 * jnp.abs(jax.random.normal(next(it), (c,), jnp.float32)),
        )

    p = {}
    p["stem"] = dict(w=nrm((16, 3, 3, 3)), bn=bn(16))
    p["b1c1"] = dict(w=nrm((16, 16, 3, 3)), bn=bn(16))
    p["b1c2"] = dict(w=nrm((16, 16, 3, 3)), bn=bn(16))
    p["b2c1"] = dict(w=nrm((32, 16, 3, 3)), bn=bn(32))
    p["b2c2"] = dict(w=nrm((32, 32, 3, 3)), bn=bn(32))
    p["b2ds"] = dict(w=nrm((32, 16, 1, 1)), bn=bn(32))
    # replaced fc head: Linear(32, 512) -> ReLU -> Linear(512, 256) -> ReLU
    #                   -> Dropout(0.3) -> Linear(256, 32)
    p["fc1"] = dict(w=nrm((32, 512)), b=nrm((512,)))
    p["fc2"] = dict(w=nrm((512, 256)), b=nrm((256,)))
    p["fc3"] = dict(w=nrm((256, 32)), b=nrm((32,)))
    return p


def prepare_params(p, H=16, W=16, eps=1e-5):
    """Fold BN into the convs and rebuild every conv as lane-Toeplitz matmul weights
    for the channels-in-lanes activation layout.  Done once, host side."""
    H2, W2 = H // 2, W // 2
    bf16 = jnp.bfloat16

    def fold(layer):
        bn = layer["bn"]
        g = np.asarray(bn["gamma"], np.float32)
        v = np.asarray(bn["var"], np.float32)
        m = np.asarray(bn["mean"], np.float32)
        be = np.asarray(bn["beta"], np.float32)
        scale = g / np.sqrt(v + eps)
        w = np.asarray(layer["w"], np.float32) * scale[:, None, None, None]
        b = be - m * scale                                   # correct BN fold
        return w, b

    def toeplitz(w, w_in, w_out, stride):
        """(3, w_in*Cin, w_out*Cout): per kernel row di, a lane-Toeplitz matrix that
        applies the 3 column taps (with zero padding and stride) in one matmul."""
        cout, cin = w.shape[0], w.shape[1]
        m = np.zeros((3, w_in * cin, w_out * cout), np.float32)
        for di in range(3):
            for jo in range(w_out):
                for dj in range(3):
                    ji = stride * jo + dj - 1
                    if 0 <= ji < w_in:
                        m[di, ji * cin:(ji + 1) * cin,
                          jo * cout:(jo + 1) * cout] = w[:, :, di, dj].T
        return m

    def ds1x1_s2(w, w_in, w_out):
        cout, cin = w.shape[0], w.shape[1]
        m = np.zeros((w_in * cin, w_out * cout), np.float32)
        for jo in range(w_out):
            ji = 2 * jo
            m[ji * cin:(ji + 1) * cin, jo * cout:(jo + 1) * cout] = w[:, :, 0, 0].T
        return m

    def tiled_bias(b, w_sp):
        return jnp.asarray(np.tile(b, w_sp).reshape(1, -1), jnp.float32)

    q = {}
    w, b = fold(p["stem"]); q["stem_w"] = jnp.asarray(toeplitz(w, W, W, 1), bf16);   q["stem_b"] = tiled_bias(b, W)
    w, b = fold(p["b1c1"]); q["b1c1_w"] = jnp.asarray(toeplitz(w, W, W, 1), bf16);   q["b1c1_b"] = tiled_bias(b, W)
    w, b = fold(p["b1c2"]); q["b1c2_w"] = jnp.asarray(toeplitz(w, W, W, 1), bf16);   q["b1c2_b"] = tiled_bias(b, W)
    w, b = fold(p["b2c1"]); q["b2c1_w"] = jnp.asarray(toeplitz(w, W, W2, 2), bf16);  q["b2c1_b"] = tiled_bias(b, W2)
    w, b = fold(p["b2c2"]); q["b2c2_w"] = jnp.asarray(toeplitz(w, W2, W2, 1), bf16); q["b2c2_b"] = tiled_bias(b, W2)
    w, b = fold(p["b2ds"]); q["b2ds_w"] = jnp.asarray(ds1x1_s2(w, W, W2), bf16);     q["b2ds_b"] = tiled_bias(b, W2)
    # fc head; the global-average-pool lane reduction is folded into fc1's weight
    q["fc1_w"] = jnp.asarray(np.tile(np.asarray(p["fc1"]["w"], np.float32), (W2, 1)), bf16)
    q["fc1_b"] = jnp.asarray(np.asarray(p["fc1"]["b"], np.float32).reshape(1, -1))
    q["fc2_w"] = jnp.asarray(np.asarray(p["fc2"]["w"], np.float32), bf16)
    q["fc2_b"] = jnp.asarray(np.asarray(p["fc2"]["b"], np.float32).reshape(1, -1))
    q["fc3_w"] = jnp.asarray(np.asarray(p["fc3"]["w"], np.float32), bf16)
    q["fc3_b"] = jnp.asarray(np.asarray(p["fc3"]["b"], np.float32).reshape(1, -1))
    return q


# ------------------------------ forward / reference --------------------------

def forward(q, x1, x2, x3=None):
    n = x1.shape[0]
    # NOTE: mirrors the original PyTorch module's guard: it tests x2 (not x3), so
    # calling with x3=None while x2 is given fails exactly like the original would.
    if x2 is not None:
        x = jnp.concatenate([x1, x2, x3], axis=0)       # one batched forward pass
        o = forward_batch(q, x)
        return o[:n], o[n:2 * n], o[2 * n:]
    x = jnp.concatenate([x1, x2], axis=0)
    o = forward_batch(q, x)
    return o[:n], o[n:]


def reference_forward(p, x, eps=1e-5):
    """Pure-JAX f32 reference of the same forward pass (validation only)."""
    def bn(y, b):
        s = b["gamma"] / jnp.sqrt(b["var"] + eps)
        return y * s[None, :, None, None] + (b["beta"] - b["mean"] * s)[None, :, None, None]

    def conv(y, w, stride=1, pad=1):
        return jax.lax.conv_general_dilated(
            y, w, (stride, stride), ((pad, pad), (pad, pad)),
            dimension_numbers=("NCHW", "OIHW", "NCHW"))

    a0 = jax.nn.relu(bn(conv(x, p["stem"]["w"]), p["stem"]["bn"]))
    a1 = jax.nn.relu(bn(conv(a0, p["b1c1"]["w"]), p["b1c1"]["bn"]))
    a2 = jax.nn.relu(bn(conv(a1, p["b1c2"]["w"]), p["b1c2"]["bn"]) + a0)
    c1 = jax.nn.relu(bn(conv(a2, p["b2c1"]["w"], stride=2), p["b2c1"]["bn"]))
    c2 = bn(conv(c1, p["b2c2"]["w"]), p["b2c2"]["bn"])
    ds = bn(conv(a2, p["b2ds"]["w"], stride=2, pad=0), p["b2ds"]["bn"])
    c = jax.nn.relu(c2 + ds)
    feat = c.mean(axis=(2, 3))
    z = jax.nn.relu(feat @ p["fc1"]["w"] + p["fc1"]["b"])
    z = jax.nn.relu(z @ p["fc2"]["w"] + p["fc2"]["b"])
    return z @ p["fc3"]["w"] + p["fc3"]["b"]


# ---------------------------------- main --------------------------------------

if __name__ == "__main__":
    key = jax.random.PRNGKey(0)
    kp, k1, k2, k3 = jax.random.split(key, 4)
    raw = init_params(kp)
    params = prepare_params(raw)

    x1 = jax.random.normal(k1, (2, 3, 16, 16), dtype=jnp.float32)
    x2 = jax.random.normal(k2, (2, 3, 16, 16), dtype=jnp.float32)
    x3 = jax.random.normal(k3, (2, 3, 16, 16), dtype=jnp.float32)

    fwd = jax.jit(forward)
    out1, out2, out3 = fwd(params, x1, x2, x3)
    jax.block_until_ready((out1, out2, out3))

    assert out1.shape == (2, 32) and out2.shape == (2, 32) and out3.shape == (2, 32)
    assert out1.dtype == jnp.float32
    assert bool(jnp.all(jnp.isfinite(out1))) and bool(jnp.all(jnp.isfinite(out3)))

    # correctness vs. a pure-JAX f32 reference (loose tolerance: bf16 MXU path)
    ref = reference_forward(raw, jnp.concatenate([x1, x2, x3], axis=0))
    got = jnp.concatenate([out1, out2, out3], axis=0)
    err = float(jnp.max(jnp.abs(got - ref)))
    scale = float(jnp.max(jnp.abs(ref)))
    assert err <= 0.05 * scale + 0.05, f"mismatch: max|err|={err:.4f}, scale={scale:.4f}"

    print("KERNEL_OK")
</pallas_src>

<mosaic_0001>
module attributes {stable_mosaic.version = 11 : i64} {
  func.func @_network_kernel(%arg0: i32, %arg1: memref<1x54x48xbf16, #tpu.memory_space<vmem>>, %arg2: memref<3x48x256xbf16, #tpu.memory_space<vmem>>, %arg3: memref<1x256xf32, #tpu.memory_space<vmem>>, %arg4: memref<3x256x256xbf16, #tpu.memory_space<vmem>>, %arg5: memref<1x256xf32, #tpu.memory_space<vmem>>, %arg6: memref<3x256x256xbf16, #tpu.memory_space<vmem>>, %arg7: memref<1x256xf32, #tpu.memory_space<vmem>>, %arg8: memref<3x24x52xbf16, #tpu.memory_space<vmem>>, %arg9: memref<3x256x256xbf16, #tpu.memory_space<vmem>>, %arg10: memref<1x256xf32, #tpu.memory_space<vmem>>, %arg11: memref<256x256xbf16, #tpu.memory_space<vmem>>, %arg12: memref<1x256xf32, #tpu.memory_space<vmem>>, %arg13: memref<3x256x256xbf16, #tpu.memory_space<vmem>>, %arg14: memref<1x256xf32, #tpu.memory_space<vmem>>, %arg15: memref<3x24xbf16, #tpu.memory_space<vmem>>, %arg16: memref<256x512xbf16, #tpu.memory_space<vmem>>, %arg17: memref<1x512xf32, #tpu.memory_space<vmem>>, %arg18: memref<512x256xbf16, #tpu.memory_space<vmem>>, %arg19: memref<1x256xf32, #tpu.memory_space<vmem>>, %arg20: memref<256x32xbf16, #tpu.memory_space<vmem>>, %arg21: memref<1x32xf32, #tpu.memory_space<vmem>>, %arg22: memref<1x3x32xf32, #tpu.memory_space<vmem>>, %arg23: memref<54x256xbf16, #tpu.memory_space<vmem>>, %arg24: memref<54x256xbf16, #tpu.memory_space<vmem>>, %arg25: memref<30x256xbf16, #tpu.memory_space<vmem>>) attributes {dimension_semantics = [#tpu.dimension_semantics<parallel>], iteration_bounds = array<i64: 2>, scalar_prefetch = 0 : i64, scratch_operands = 3 : i64, tpu.core_type = #tpu.core_type<tc>, window_params = [{transform_indices = @transform_0, window_bounds = array<i64: 1, 54, 48>}, {pipeline_mode = #tpu.pipeline_mode<synchronous>, transform_indices = @transform_1, window_bounds = array<i64: 3, 48, 256>}, {pipeline_mode = #tpu.pipeline_mode<synchronous>, transform_indices = @transform_2, window_bounds = array<i64: 1, 256>}, {pipeline_mode = #tpu.pipeline_mode<synchronous>, transform_indices = @transform_3, window_bounds = array<i64: 3, 256, 256>}, {pipeline_mode = #tpu.pipeline_mode<synchronous>, transform_indices = @transform_4, window_bounds = array<i64: 1, 256>}, {pipeline_mode = #tpu.pipeline_mode<synchronous>, transform_indices = @transform_5, window_bounds = array<i64: 3, 256, 256>}, {pipeline_mode = #tpu.pipeline_mode<synchronous>, transform_indices = @transform_6, window_bounds = array<i64: 1, 256>}, {pipeline_mode = #tpu.pipeline_mode<synchronous>, transform_indices = @transform_7, window_bounds = array<i64: 3, 24, 52>}, {pipeline_mode = #tpu.pipeline_mode<synchronous>, transform_indices = @transform_8, window_bounds = array<i64: 3, 256, 256>}, {pipeline_mode = #tpu.pipeline_mode<synchronous>, transform_indices = @transform_9, window_bounds = array<i64: 1, 256>}, {pipeline_mode = #tpu.pipeline_mode<synchronous>, transform_indices = @transform_10, window_bounds = array<i64: 256, 256>}, {pipeline_mode = #tpu.pipeline_mode<synchronous>, transform_indices = @transform_11, window_bounds = array<i64: 1, 256>}, {pipeline_mode = #tpu.pipeline_mode<synchronous>, transform_indices = @transform_12, window_bounds = array<i64: 3, 256, 256>}, {pipeline_mode = #tpu.pipeline_mode<synchronous>, transform_indices = @transform_13, window_bounds = array<i64: 1, 256>}, {pipeline_mode = #tpu.pipeline_mode<synchronous>, transform_indices = @transform_14, window_bounds = array<i64: 3, 24>}, {pipeline_mode = #tpu.pipeline_mode<synchronous>, transform_indices = @transform_15, window_bounds = array<i64: 256, 512>}, {pipeline_mode = #tpu.pipeline_mode<synchronous>, transform_indices = @transform_16, window_bounds = array<i64: 1, 512>}, {pipeline_mode = #tpu.pipeline_mode<synchronous>, transform_indices = @transform_17, window_bounds = array<i64: 512, 256>}, {pipeline_mode = #tpu.pipeline_mode<synchronous>, transform_indices = @transform_18, window_bounds = array<i64: 1, 256>}, {pipeline_mode = #tpu.pipeline_mode<synchronous>, transform_indices = @transform_19, window_bounds = array<i64: 256, 32>}, {pipeline_mode = #tpu.pipeline_mode<synchronous>, transform_indices = @transform_20, window_bounds = array<i64: 1, 32>}, {transform_indices = @transform_21, window_bounds = array<i64: 1, 3, 32>}]} {
    %cst = arith.constant 0.000000e+00 : bf16
    %0 = vector.broadcast %cst : bf16 to vector<1x256xbf16>
    %cst_0 = arith.constant 0.000000e+00 : bf16
    %1 = vector.broadcast %cst_0 : bf16 to vector<1x256xbf16>
    %c0 = arith.constant 0 : index
    %c0_1 = arith.constant 0 : index
    %2 = vector.load %arg23[%c0, %c0_1] : memref<54x256xbf16, #tpu.memory_space<vmem>>, vector<1x256xbf16>
    tpu.vector_store %arg23[%c0, %c0_1], %0 {strides = array<i32>} : memref<54x256xbf16, #tpu.memory_space<vmem>>, vector<1x256xbf16>,
    %c17 = arith.constant 17 : index
    %c0_2 = arith.constant 0 : index
    %3 = vector.load %arg23[%c17, %c0_2] : memref<54x256xbf16, #tpu.memory_space<vmem>>, vector<1x256xbf16>
    tpu.vector_store %arg23[%c17, %c0_2], %0 {strides = array<i32>} : memref<54x256xbf16, #tpu.memory_space<vmem>>, vector<1x256xbf16>,
    %c0_3 = arith.constant 0 : index
    %c0_4 = arith.constant 0 : index
    %4 = vector.load %arg24[%c0_3, %c0_4] : memref<54x256xbf16, #tpu.memory_space<vmem>>, vector<1x256xbf16>
    tpu.vector_store %arg24[%c0_3, %c0_4], %0 {strides = array<i32>} : memref<54x256xbf16, #tpu.memory_space<vmem>>, vector<1x256xbf16>,
    %c17_5 = arith.constant 17 : index
    %c0_6 = arith.constant 0 : index
    %5 = vector.load %arg24[%c17_5, %c0_6] : memref<54x256xbf16, #tpu.memory_space<vmem>>, vector<1x256xbf16>
    tpu.vector_store %arg24[%c17_5, %c0_6], %0 {strides = array<i32>} : memref<54x256xbf16, #tpu.memory_space<vmem>>, vector<1x256xbf16>,
    %c0_7 = arith.constant 0 : index
    %c0_8 = arith.constant 0 : index
    %6 = vector.load %arg25[%c0_7, %c0_8] : memref<30x256xbf16, #tpu.memory_space<vmem>>, vector<1x256xbf16>
    tpu.vector_store %arg25[%c0_7, %c0_8], %1 {strides = array<i32>} : memref<30x256xbf16, #tpu.memory_space<vmem>>, vector<1x256xbf16>,
    %c9 = arith.constant 9 : index
    %c0_9 = arith.constant 0 : index
    %7 = vector.load %arg25[%c9, %c0_9] : memref<30x256xbf16, #tpu.memory_space<vmem>>, vector<1x256xbf16>
    tpu.vector_store %arg25[%c9, %c0_9], %1 {strides = array<i32>} : memref<30x256xbf16, #tpu.memory_space<vmem>>, vector<1x256xbf16>,
    %c18 = arith.constant 18 : index
    %c0_10 = arith.constant 0 : index
    %8 = vector.load %arg23[%c18, %c0_10] : memref<54x256xbf16, #tpu.memory_space<vmem>>, vector<1x256xbf16>
    tpu.vector_store %arg23[%c18, %c0_10], %0 {strides = array<i32>} : memref<54x256xbf16, #tpu.memory_space<vmem>>, vector<1x256xbf16>,
    %c35 = arith.constant 35 : index
    %c0_11 = arith.constant 0 : index
    %9 = vector.load %arg23[%c35, %c0_11] : memref<54x256xbf16, #tpu.memory_space<vmem>>, vector<1x256xbf16>
    tpu.vector_store %arg23[%c35, %c0_11], %0 {strides = array<i32>} : memref<54x256xbf16, #tpu.memory_space<vmem>>, vector<1x256xbf16>,
    %c18_12 = arith.constant 18 : index
    %c0_13 = arith.constant 0 : index
    %10 = vector.load %arg24[%c18_12, %c0_13] : memref<54x256xbf16, #tpu.memory_space<vmem>>, vector<1x256xbf16>
    tpu.vector_store %arg24[%c18_12, %c0_13], %0 {strides = array<i32>} : memref<54x256xbf16, #tpu.memory_space<vmem>>, vector<1x256xbf16>,
    %c35_14 = arith.constant 35 : index
    %c0_15 = arith.constant 0 : index
    %11 = vector.load %arg24[%c35_14, %c0_15] : memref<54x256xbf16, #tpu.memory_space<vmem>>, vector<1x256xbf16>
    tpu.vector_store %arg24[%c35_14, %c0_15], %0 {strides = array<i32>} : memref<54x256xbf16, #tpu.memory_space<vmem>>, vector<1x256xbf16>,
    %c10 = arith.constant 10 : index
    %c0_16 = arith.constant 0 : index
    %12 = vector.load %arg25[%c10, %c0_16] : memref<30x256xbf16, #tpu.memory_space<vmem>>, vector<1x256xbf16>
    tpu.vector_store %arg25[%c10, %c0_16], %1 {strides = array<i32>} : memref<30x256xbf16, #tpu.memory_space<vmem>>, vector<1x256xbf16>,
    %c19 = arith.constant 19 : index
    %c0_17 = arith.constant 0 : index
    %13 = vector.load %arg25[%c19, %c0_17] : memref<30x256xbf16, #tpu.memory_space<vmem>>, vector<1x256xbf16>
    tpu.vector_store %arg25[%c19, %c0_17], %1 {strides = array<i32>} : memref<30x256xbf16, #tpu.memory_space<vmem>>, vector<1x256xbf16>,
    %c36 = arith.constant 36 : index
    %c0_18 = arith.constant 0 : index
    %14 = vector.load %arg23[%c36, %c0_18] : memref<54x256xbf16, #tpu.memory_space<vmem>>, vector<1x256xbf16>
    tpu.vector_store %arg23[%c36, %c0_18], %0 {strides = array<i32>} : memref<54x256xbf16, #tpu.memory_space<vmem>>, vector<1x256xbf16>,
    %c53 = arith.constant 53 : index
    %c0_19 = arith.constant 0 : index
    %15 = vector.load %arg23[%c53, %c0_19] : memref<54x256xbf16, #tpu.memory_space<vmem>>, vector<1x256xbf16>
    tpu.vector_store %arg23[%c53, %c0_19], %0 {strides = array<i32>} : memref<54x256xbf16, #tpu.memory_space<vmem>>, vector<1x256xbf16>,
    %c36_20 = arith.constant 36 : index
    %c0_21 = arith.constant 0 : index
    %16 = vector.load %arg24[%c36_20, %c0_21] : memref<54x256xbf16, #tpu.memory_space<vmem>>, vector<1x256xbf16>
    tpu.vector_store %arg24[%c36_20, %c0_21], %0 {strides = array<i32>} : memref<54x256xbf16, #tpu.memory_space<vmem>>, vector<1x256xbf16>,
    %c53_22 = arith.constant 53 : index
    %c0_23 = arith.constant 0 : index
    %17 = vector.load %arg24[%c53_22, %c0_23] : memref<54x256xbf16, #tpu.memory_space<vmem>>, vector<1x256xbf16>
    tpu.vector_store %arg24[%c53_22, %c0_23], %0 {strides = array<i32>} : memref<54x256xbf16, #tpu.memory_space<vmem>>, vector<1x256xbf16>,
    %c20 = arith.constant 20 : index
    %c0_24 = arith.constant 0 : index
    %18 = vector.load %arg25[%c20, %c0_24] : memref<30x256xbf16, #tpu.memory_space<vmem>>, vector<1x256xbf16>
    tpu.vector_store %arg25[%c20, %c0_24], %1 {strides = array<i32>} : memref<30x256xbf16, #tpu.memory_space<vmem>>, vector<1x256xbf16>,
    %c29 = arith.constant 29 : index
    %c0_25 = arith.constant 0 : index
    %19 = vector.load %arg25[%c29, %c0_25] : memref<30x256xbf16, #tpu.memory_space<vmem>>, vector<1x256xbf16>
    tpu.vector_store %arg25[%c29, %c0_25], %1 {strides = array<i32>} : memref<30x256xbf16, #tpu.memory_space<vmem>>, vector<1x256xbf16>,
    %c0_26 = arith.constant 0 : index
    %c0_27 = arith.constant 0 : index
    %c0_28 = arith.constant 0 : index
    %20 = vector.load %arg1[%c0_26, %c0_27, %c0_28] : memref<1x54x48xbf16, #tpu.memory_space<vmem>>, vector<1x52x48xbf16>
    %21 = vector.shape_cast %20 : vector<1x52x48xbf16> to vector<52x48xbf16>
    %c0_29 = arith.constant 0 : index
    %c0_30 = arith.constant 0 : index
    %c0_31 = arith.constant 0 : index
    %22 = vector.load %arg2[%c0_29, %c0_30, %c0_31] : memref<3x48x256xbf16, #tpu.memory_space<vmem>>, vector<1x48x256xbf16>
    %23 = vector.shape_cast %22 : vector<1x48x256xbf16> to vector<48x256xbf16>
    %cst_32 = arith.constant dense<0.000000e+00> : vector<52x256xf32>
    %24 = tpu.matmul %21, %23, %cst_32 {dimension_numbers = #tpu.dot_dimension_numbers<[1], [0], [0], [1], [0, 0, 1, 1], [], []>} : vector<52x48xbf16>, vector<48x256xbf16>, vector<52x256xf32> -> vector<52x256xf32>
    %c0_33 = arith.constant 0 : index
    %c1 = arith.constant 1 : index
    %c0_34 = arith.constant 0 : index
    %25 = vector.load %arg1[%c0_33, %c1, %c0_34] : memref<1x54x48xbf16, #tpu.memory_space<vmem>>, vector<1x52x48xbf16>
    %26 = vector.shape_cast %25 : vector<1x52x48xbf16> to vector<52x48xbf16>
    %c1_35 = arith.constant 1 : index
    %c0_36 = arith.constant 0 : index
    %c0_37 = arith.constant 0 : index
    %27 = vector.load %arg2[%c1_35, %c0_36, %c0_37] : memref<3x48x256xbf16, #tpu.memory_space<vmem>>, vector<1x48x256xbf16>
    %28 = vector.shape_cast %27 : vector<1x48x256xbf16> to vector<48x256xbf16>
    %cst_38 = arith.constant dense<0.000000e+00> : vector<52x256xf32>
    %29 = tpu.matmul %26, %28, %cst_38 {dimension_numbers = #tpu.dot_dimension_numbers<[1], [0], [0], [1], [0, 0, 1, 1], [], []>} : vector<52x48xbf16>, vector<48x256xbf16>, vector<52x256xf32> -> vector<52x256xf32>
    %30 = arith.addf %24, %29 : vector<52x256xf32>
    %c0_39 = arith.constant 0 : index
    %c2 = arith.constant 2 : index
    %c0_40 = arith.constant 0 : index
    %31 = vector.load %arg1[%c0_39, %c2, %c0_40] : memref<1x54x48xbf16, #tpu.memory_space<vmem>>, vector<1x52x48xbf16>
    %32 = vector.shape_cast %31 : vector<1x52x48xbf16> to vector<52x48xbf16>
    %c2_41 = arith.constant 2 : index
    %c0_42 = arith.constant 0 : index
    %c0_43 = arith.constant 0 : index
    %33 = vector.load %arg2[%c2_41, %c0_42, %c0_43] : memref<3x48x256xbf16, #tpu.memory_space<vmem>>, vector<1x48x256xbf16>
    %34 = vector.shape_cast %33 : vector<1x48x256xbf16> to vector<48x256xbf16>
    %cst_44 = arith.constant dense<0.000000e+00> : vector<52x256xf32>
    %35 = tpu.matmul %32, %34, %cst_44 {dimension_numbers = #tpu.dot_dimension_numbers<[1], [0], [0], [1], [0, 0, 1, 1], [], []>} : vector<52x48xbf16>, vector<48x256xbf16>, vector<52x256xf32> -> vector<52x256xf32>
    %36 = arith.addf %30, %35 : vector<52x256xf32>
    %c0_45 = arith.constant 0 : index
    %c0_46 = arith.constant 0 : index
    %37 = vector.load %arg3[%c0_45, %c0_46] : memref<1x256xf32, #tpu.memory_space<vmem>>, vector<1x256xf32>
    %38 = vector.broadcast %37 : vector<1x256xf32> to vector<52x256xf32>
    %39 = arith.addf %36, %38 : vector<52x256xf32>
    %cst_47 = arith.constant 0.000000e+00 : f32
    %40 = vector.broadcast %cst_47 : f32 to vector<52x256xf32>
    %41 = arith.maximumf %39, %40 : vector<52x256xf32>
    %42 = arith.truncf %41 : vector<52x256xf32> to vector<52x256xbf16>
    %43 = vector.extract_strided_slice %42 {offsets = [0, 0], sizes = [16, 256], strides = [1, 1]} : vector<52x256xbf16> to vector<16x256xbf16>
    %c1_48 = arith.constant 1 : index
    %c0_49 = arith.constant 0 : index
    %44 = vector.load %arg23[%c1_48, %c0_49] : memref<54x256xbf16, #tpu.memory_space<vmem>>, vector<16x256xbf16>
    tpu.vector_store %arg23[%c1_48, %c0_49], %43 {strides = array<i32>} : memref<54x256xbf16, #tpu.memory_space<vmem>>, vector<16x256xbf16>,
    %45 = vector.extract_strided_slice %42 {offsets = [18, 0], sizes = [16, 256], strides = [1, 1]} : vector<52x256xbf16> to vector<16x256xbf16>
    %c19_50 = arith.constant 19 : index
    %c0_51 = arith.constant 0 : index
    %46 = vector.load %arg23[%c19_50, %c0_51] : memref<54x256xbf16, #tpu.memory_space<vmem>>, vector<16x256xbf16>
    tpu.vector_store %arg23[%c19_50, %c0_51], %45 {strides = array<i32>} : memref<54x256xbf16, #tpu.memory_space<vmem>>, vector<16x256xbf16>,
    %47 = vector.extract_strided_slice %42 {offsets = [36, 0], sizes = [16, 256], strides = [1, 1]} : vector<52x256xbf16> to vector<16x256xbf16>
    %c37 = arith.constant 37 : index
    %c0_52 = arith.constant 0 : index
    %48 = vector.load %arg23[%c37, %c0_52] : memref<54x256xbf16, #tpu.memory_space<vmem>>, vector<16x256xbf16>
    tpu.vector_store %arg23[%c37, %c0_52], %47 {strides = array<i32>} : memref<54x256xbf16, #tpu.memory_space<vmem>>, vector<16x256xbf16>,
    %c0_53 = arith.constant 0 : index
    %c0_54 = arith.constant 0 : index
    %49 = vector.load %arg23[%c0_53, %c0_54] : memref<54x256xbf16, #tpu.memory_space<vmem>>, vector<52x256xbf16>
    %c0_55 = arith.constant 0 : index
    %c0_56 = arith.constant 0 : index
    %c0_57 = arith.constant 0 : index
    %50 = vector.load %arg4[%c0_55, %c0_56, %c0_57] : memref<3x256x256xbf16, #tpu.memory_space<vmem>>, vector<1x256x256xbf16>
    %51 = vector.shape_cast %50 : vector<1x256x256xbf16> to vector<256x256xbf16>
    %cst_58 = arith.constant dense<0.000000e+00> : vector<52x256xf32>
    %52 = tpu.matmul %49, %51, %cst_58 {dimension_numbers = #tpu.dot_dimension_numbers<[1], [0], [0], [1], [0, 0, 1, 1], [], []>} : vector<52x256xbf16>, vector<256x256xbf16>, vector<52x256xf32> -> vector<52x256xf32>
    %c1_59 = arith.constant 1 : index
    %c0_60 = arith.constant 0 : index
    %53 = vector.load %arg23[%c1_59, %c0_60] : memref<54x256xbf16, #tpu.memory_space<vmem>>, vector<52x256xbf16>
    %c1_61 = arith.constant 1 : index
    %c0_62 = arith.constant 0 : index
    %c0_63 = arith.constant 0 : index
    %54 = vector.load %arg4[%c1_61, %c0_62, %c0_63] : memref<3x256x256xbf16, #tpu.memory_space<vmem>>, vector<1x256x256xbf16>
    %55 = vector.shape_cast %54 : vector<1x256x256xbf16> to vector<256x256xbf16>
    %cst_64 = arith.constant dense<0.000000e+00> : vector<52x256xf32>
    %56 = tpu.matmul %53, %55, %cst_64 {dimension_numbers = #tpu.dot_dimension_numbers<[1], [0], [0], [1], [0, 0, 1, 1], [], []>} : vector<52x256xbf16>, vector<256x256xbf16>, vector<52x256xf32> -> vector<52x256xf32>
    %57 = arith.addf %52, %56 : vector<52x256xf32>
    %c2_65 = arith.constant 2 : index
    %c0_66 = arith.constant 0 : index
    %58 = vector.load %arg23[%c2_65, %c0_66] : memref<54x256xbf16, #tpu.memory_space<vmem>>, vector<52x256xbf16>
    %c2_67 = arith.constant 2 : index
    %c0_68 = arith.constant 0 : index
    %c0_69 = arith.constant 0 : index
    %59 = vector.load %arg4[%c2_67, %c0_68, %c0_69] : memref<3x256x256xbf16, #tpu.memory_space<vmem>>, vector<1x256x256xbf16>
    %60 = vector.shape_cast %59 : vector<1x256x256xbf16> to vector<256x256xbf16>
    %cst_70 = arith.constant dense<0.000000e+00> : vector<52x256xf32>
    %61 = tpu.matmul %58, %60, %cst_70 {dimension_numbers = #tpu.dot_dimension_numbers<[1], [0], [0], [1], [0, 0, 1, 1], [], []>} : vector<52x256xbf16>, vector<256x256xbf16>, vector<52x256xf32> -> vector<52x256xf32>
    %62 = arith.addf %57, %61 : vector<52x256xf32>
    %c0_71 = arith.constant 0 : index
    %c0_72 = arith.constant 0 : index
    %63 = vector.load %arg5[%c0_71, %c0_72] : memref<1x256xf32, #tpu.memory_space<vmem>>, vector<1x256xf32>
    %64 = vector.broadcast %63 : vector<1x256xf32> to vector<52x256xf32>
    %65 = arith.addf %62, %64 : vector<52x256xf32>
    %cst_73 = arith.constant 0.000000e+00 : f32
    %66 = vector.broadcast %cst_73 : f32 to vector<52x256xf32>
    %67 = arith.maximumf %65, %66 : vector<52x256xf32>
    %68 = arith.truncf %67 : vector<52x256xf32> to vector<52x256xbf16>
    %69 = vector.extract_strided_slice %68 {offsets = [0, 0], sizes = [16, 256], strides = [1, 1]} : vector<52x256xbf16> to vector<16x256xbf16>
    %c1_74 = arith.constant 1 : index
    %c0_75 = arith.constant 0 : index
    %70 = vector.load %arg24[%c1_74, %c0_75] : memref<54x256xbf16, #tpu.memory_space<vmem>>, vector<16x256xbf16>
    tpu.vector_store %arg24[%c1_74, %c0_75], %69 {strides = array<i32>} : memref<54x256xbf16, #tpu.memory_space<vmem>>, vector<16x256xbf16>,
    %71 = vector.extract_strided_slice %68 {offsets = [18, 0], sizes = [16, 256], strides = [1, 1]} : vector<52x256xbf16> to vector<16x256xbf16>
    %c19_76 = arith.constant 19 : index
    %c0_77 = arith.constant 0 : index
    %72 = vector.load %arg24[%c19_76, %c0_77] : memref<54x256xbf16, #tpu.memory_space<vmem>>, vector<16x256xbf16>
    tpu.vector_store %arg24[%c19_76, %c0_77], %71 {strides = array<i32>} : memref<54x256xbf16, #tpu.memory_space<vmem>>, vector<16x256xbf16>,
    %73 = vector.extract_strided_slice %68 {offsets = [36, 0], sizes = [16, 256], strides = [1, 1]} : vector<52x256xbf16> to vector<16x256xbf16>
    %c37_78 = arith.constant 37 : index
    %c0_79 = arith.constant 0 : index
    %74 = vector.load %arg24[%c37_78, %c0_79] : memref<54x256xbf16, #tpu.memory_space<vmem>>, vector<16x256xbf16>
    tpu.vector_store %arg24[%c37_78, %c0_79], %73 {strides = array<i32>} : memref<54x256xbf16, #tpu.memory_space<vmem>>, vector<16x256xbf16>,
    %c0_80 = arith.constant 0 : index
    %c0_81 = arith.constant 0 : index
    %75 = vector.load %arg24[%c0_80, %c0_81] : memref<54x256xbf16, #tpu.memory_space<vmem>>, vector<52x256xbf16>
    %c0_82 = arith.constant 0 : index
    %c0_83 = arith.constant 0 : index
    %c0_84 = arith.constant 0 : index
    %76 = vector.load %arg6[%c0_82, %c0_83, %c0_84] : memref<3x256x256xbf16, #tpu.memory_space<vmem>>, vector<1x256x256xbf16>
    %77 = vector.shape_cast %76 : vector<1x256x256xbf16> to vector<256x256xbf16>
    %cst_85 = arith.constant dense<0.000000e+00> : vector<52x256xf32>
    %78 = tpu.matmul %75, %77, %cst_85 {dimension_numbers = #tpu.dot_dimension_numbers<[1], [0], [0], [1], [0, 0, 1, 1], [], []>} : vector<52x256xbf16>, vector<256x256xbf16>, vector<52x256xf32> -> vector<52x256xf32>
    %c1_86 = arith.constant 1 : index
    %c0_87 = arith.constant 0 : index
    %79 = vector.load %arg24[%c1_86, %c0_87] : memref<54x256xbf16, #tpu.memory_space<vmem>>, vector<52x256xbf16>
    %c1_88 = arith.constant 1 : index
    %c0_89 = arith.constant 0 : index
    %c0_90 = arith.constant 0 : index
    %80 = vector.load %arg6[%c1_88, %c0_89, %c0_90] : memref<3x256x256xbf16, #tpu.memory_space<vmem>>, vector<1x256x256xbf16>
    %81 = vector.shape_cast %80 : vector<1x256x256xbf16> to vector<256x256xbf16>
    %cst_91 = arith.constant dense<0.000000e+00> : vector<52x256xf32>
    %82 = tpu.matmul %79, %81, %cst_91 {dimension_numbers = #tpu.dot_dimension_numbers<[1], [0], [0], [1], [0, 0, 1, 1], [], []>} : vector<52x256xbf16>, vector<256x256xbf16>, vector<52x256xf32> -> vector<52x256xf32>
    %83 = arith.addf %78, %82 : vector<52x256xf32>
    %c2_92 = arith.constant 2 : index
    %c0_93 = arith.constant 0 : index
    %84 = vector.load %arg24[%c2_92, %c0_93] : memref<54x256xbf16, #tpu.memory_space<vmem>>, vector<52x256xbf16>
    %c2_94 = arith.constant 2 : index
    %c0_95 = arith.constant 0 : index
    %c0_96 = arith.constant 0 : index
    %85 = vector.load %arg6[%c2_94, %c0_95, %c0_96] : memref<3x256x256xbf16, #tpu.memory_space<vmem>>, vector<1x256x256xbf16>
    %86 = vector.shape_cast %85 : vector<1x256x256xbf16> to vector<256x256xbf16>
    %cst_97 = arith.constant dense<0.000000e+00> : vector<52x256xf32>
    %87 = tpu.matmul %84, %86, %cst_97 {dimension_numbers = #tpu.dot_dimension_numbers<[1], [0], [0], [1], [0, 0, 1, 1], [], []>} : vector<52x256xbf16>, vector<256x256xbf16>, vector<52x256xf32> -> vector<52x256xf32>
    %88 = arith.addf %83, %87 : vector<52x256xf32>
    %c0_98 = arith.constant 0 : index
    %c0_99 = arith.constant 0 : index
    %89 = vector.load %arg7[%c0_98, %c0_99] : memref<1x256xf32, #tpu.memory_space<vmem>>, vector<1x256xf32>
    %90 = vector.broadcast %89 : vector<1x256xf32> to vector<52x256xf32>
    %91 = arith.addf %88, %90 : vector<52x256xf32>
    %c1_100 = arith.constant 1 : index
    %c0_101 = arith.constant 0 : index
    %92 = vector.load %arg23[%c1_100, %c0_101] : memref<54x256xbf16, #tpu.memory_space<vmem>>, vector<52x256xbf16>
    %93 = arith.extf %92 : vector<52x256xbf16> to vector<52x256xf32>
    %94 = arith.addf %91, %93 : vector<52x256xf32>
    %cst_102 = arith.constant 0.000000e+00 : f32
    %95 = vector.broadcast %cst_102 : f32 to vector<52x256xf32>
    %96 = arith.maximumf %94, %95 : vector<52x256xf32>
    %97 = arith.truncf %96 : vector<52x256xf32> to vector<52x256xbf16>
    %c0_103 = arith.constant 0 : index
    %c0_104 = arith.constant 0 : index
    %c0_105 = arith.constant 0 : index
    %98 = vector.load %arg8[%c0_103, %c0_104, %c0_105] : memref<3x24x52xbf16, #tpu.memory_space<vmem>>, vector<1x24x52xbf16>
    %99 = vector.shape_cast %98 : vector<1x24x52xbf16> to vector<24x52xbf16>
    %cst_106 = arith.constant dense<0.000000e+00> : vector<24x256xf32>
    %100 = tpu.matmul %99, %97, %cst_106 {dimension_numbers = #tpu.dot_dimension_numbers<[1], [0], [0], [1], [0, 0, 1, 1], [], []>} : vector<24x52xbf16>, vector<52x256xbf16>, vector<24x256xf32> -> vector<24x256xf32>
    %101 = arith.truncf %100 : vector<24x256xf32> to vector<24x256xbf16>
    %c1_107 = arith.constant 1 : index
    %c0_108 = arith.constant 0 : index
    %c0_109 = arith.constant 0 : index
    %102 = vector.load %arg8[%c1_107, %c0_108, %c0_109] : memref<3x24x52xbf16, #tpu.memory_space<vmem>>, vector<1x24x52xbf16>
    %103 = vector.shape_cast %102 : vector<1x24x52xbf16> to vector<24x52xbf16>
    %cst_110 = arith.constant dense<0.000000e+00> : vector<24x256xf32>
    %104 = tpu.matmul %103, %97, %cst_110 {dimension_numbers = #tpu.dot_dimension_numbers<[1], [0], [0], [1], [0, 0, 1, 1], [], []>} : vector<24x52xbf16>, vector<52x256xbf16>, vector<24x256xf32> -> vector<24x256xf32>
    %105 = arith.truncf %104 : vector<24x256xf32> to vector<24x256xbf16>
    %c2_111 = arith.constant 2 : index
    %c0_112 = arith.constant 0 : index
    %c0_113 = arith.constant 0 : index
    %106 = vector.load %arg8[%c2_111, %c0_112, %c0_113] : memref<3x24x52xbf16, #tpu.memory_space<vmem>>, vector<1x24x52xbf16>
    %107 = vector.shape_cast %106 : vector<1x24x52xbf16> to vector<24x52xbf16>
    %cst_114 = arith.constant dense<0.000000e+00> : vector<24x256xf32>
    %108 = tpu.matmul %107, %97, %cst_114 {dimension_numbers = #tpu.dot_dimension_numbers<[1], [0], [0], [1], [0, 0, 1, 1], [], []>} : vector<24x52xbf16>, vector<52x256xbf16>, vector<24x256xf32> -> vector<24x256xf32>
    %109 = arith.truncf %108 : vector<24x256xf32> to vector<24x256xbf16>
    %c0_115 = arith.constant 0 : index
    %c0_116 = arith.constant 0 : index
    %110 = vector.load %arg10[%c0_115, %c0_116] : memref<1x256xf32, #tpu.memory_space<vmem>>, vector<1x256xf32>
    %c0_117 = arith.constant 0 : index
    %c0_118 = arith.constant 0 : index
    %c0_119 = arith.constant 0 : index
    %111 = vector.load %arg9[%c0_117, %c0_118, %c0_119] : memref<3x256x256xbf16, #tpu.memory_space<vmem>>, vector<1x256x256xbf16>
    %112 = vector.shape_cast %111 : vector<1x256x256xbf16> to vector<256x256xbf16>
    %cst_120 = arith.constant dense<0.000000e+00> : vector<24x256xf32>
    %113 = tpu.matmul %101, %112, %cst_120 {dimension_numbers = #tpu.dot_dimension_numbers<[1], [0], [0], [1], [0, 0, 1, 1], [], []>} : vector<24x256xbf16>, vector<256x256xbf16>, vector<24x256xf32> -> vector<24x256xf32>
    %114 = vector.broadcast %110 : vector<1x256xf32> to vector<24x256xf32>
    %115 = arith.addf %114, %113 : vector<24x256xf32>
    %c1_121 = arith.constant 1 : index
    %c0_122 = arith.constant 0 : index
    %c0_123 = arith.constant 0 : index
    %116 = vector.load %arg9[%c1_121, %c0_122, %c0_123] : memref<3x256x256xbf16, #tpu.memory_space<vmem>>, vector<1x256x256xbf16>
    %117 = vector.shape_cast %116 : vector<1x256x256xbf16> to vector<256x256xbf16>
    %cst_124 = arith.constant dense<0.000000e+00> : vector<24x256xf32>
    %118 = tpu.matmul %105, %117, %cst_124 {dimension_numbers = #tpu.dot_dimension_numbers<[1], [0], [0], [1], [0, 0, 1, 1], [], []>} : vector<24x256xbf16>, vector<256x256xbf16>, vector<24x256xf32> -> vector<24x256xf32>
    %119 = arith.addf %115, %118 : vector<24x256xf32>
    %c2_125 = arith.constant 2 : index
    %c0_126 = arith.constant 0 : index
    %c0_127 = arith.constant 0 : index
    %120 = vector.load %arg9[%c2_125, %c0_126, %c0_127] : memref<3x256x256xbf16, #tpu.memory_space<vmem>>, vector<1x256x256xbf16>
    %121 = vector.shape_cast %120 : vector<1x256x256xbf16> to vector<256x256xbf16>
    %cst_128 = arith.constant dense<0.000000e+00> : vector<24x256xf32>
    %122 = tpu.matmul %109, %121, %cst_128 {dimension_numbers = #tpu.dot_dimension_numbers<[1], [0], [0], [1], [0, 0, 1, 1], [], []>} : vector<24x256xbf16>, vector<256x256xbf16>, vector<24x256xf32> -> vector<24x256xf32>
    %123 = arith.addf %119, %122 : vector<24x256xf32>
    %cst_129 = arith.constant 0.000000e+00 : f32
    %124 = vector.broadcast %cst_129 : f32 to vector<24x256xf32>
    %125 = arith.maximumf %123, %124 : vector<24x256xf32>
    %126 = arith.truncf %125 : vector<24x256xf32> to vector<24x256xbf16>
    %127 = vector.extract_strided_slice %126 {offsets = [0, 0], sizes = [8, 256], strides = [1, 1]} : vector<24x256xbf16> to vector<8x256xbf16>
    %c1_130 = arith.constant 1 : index
    %c0_131 = arith.constant 0 : index
    %128 = vector.load %arg25[%c1_130, %c0_131] : memref<30x256xbf16, #tpu.memory_space<vmem>>, vector<8x256xbf16>
    tpu.vector_store %arg25[%c1_130, %c0_131], %127 {strides = array<i32>} : memref<30x256xbf16, #tpu.memory_space<vmem>>, vector<8x256xbf16>,
    %129 = vector.extract_strided_slice %126 {offsets = [8, 0], sizes = [8, 256], strides = [1, 1]} : vector<24x256xbf16> to vector<8x256xbf16>
    %c11 = arith.constant 11 : index
    %c0_132 = arith.constant 0 : index
    %130 = vector.load %arg25[%c11, %c0_132] : memref<30x256xbf16, #tpu.memory_space<vmem>>, vector<8x256xbf16>
    tpu.vector_store %arg25[%c11, %c0_132], %129 {strides = array<i32>} : memref<30x256xbf16, #tpu.memory_space<vmem>>, vector<8x256xbf16>,
    %131 = vector.extract_strided_slice %126 {offsets = [16, 0], sizes = [8, 256], strides = [1, 1]} : vector<24x256xbf16> to vector<8x256xbf16>
    %c21 = arith.constant 21 : index
    %c0_133 = arith.constant 0 : index
    %132 = vector.load %arg25[%c21, %c0_133] : memref<30x256xbf16, #tpu.memory_space<vmem>>, vector<8x256xbf16>
    tpu.vector_store %arg25[%c21, %c0_133], %131 {strides = array<i32>} : memref<30x256xbf16, #tpu.memory_space<vmem>>, vector<8x256xbf16>,
    %c0_134 = arith.constant 0 : index
    %c0_135 = arith.constant 0 : index
    %133 = vector.load %arg11[%c0_134, %c0_135] : memref<256x256xbf16, #tpu.memory_space<vmem>>, vector<256x256xbf16>
    %cst_136 = arith.constant dense<0.000000e+00> : vector<24x256xf32>
    %134 = tpu.matmul %105, %133, %cst_136 {dimension_numbers = #tpu.dot_dimension_numbers<[1], [0], [0], [1], [0, 0, 1, 1], [], []>} : vector<24x256xbf16>, vector<256x256xbf16>, vector<24x256xf32> -> vector<24x256xf32>
    %c0_137 = arith.constant 0 : index
    %c0_138 = arith.constant 0 : index
    %135 = vector.load %arg12[%c0_137, %c0_138] : memref<1x256xf32, #tpu.memory_space<vmem>>, vector<1x256xf32>
    %136 = vector.broadcast %135 : vector<1x256xf32> to vector<24x256xf32>
    %137 = arith.addf %134, %136 : vector<24x256xf32>
    %c0_139 = arith.constant 0 : index
    %c0_140 = arith.constant 0 : index
    %138 = vector.load %arg25[%c0_139, %c0_140] : memref<30x256xbf16, #tpu.memory_space<vmem>>, vector<28x256xbf16>
    %c0_141 = arith.constant 0 : index
    %c0_142 = arith.constant 0 : index
    %c0_143 = arith.constant 0 : index
    %139 = vector.load %arg13[%c0_141, %c0_142, %c0_143] : memref<3x256x256xbf16, #tpu.memory_space<vmem>>, vector<1x256x256xbf16>
    %140 = vector.shape_cast %139 : vector<1x256x256xbf16> to vector<256x256xbf16>
    %cst_144 = arith.constant dense<0.000000e+00> : vector<28x256xf32>
    %141 = tpu.matmul %138, %140, %cst_144 {dimension_numbers = #tpu.dot_dimension_numbers<[1], [0], [0], [1], [0, 0, 1, 1], [], []>} : vector<28x256xbf16>, vector<256x256xbf16>, vector<28x256xf32> -> vector<28x256xf32>
    %c1_145 = arith.constant 1 : index
    %c0_146 = arith.constant 0 : index
    %142 = vector.load %arg25[%c1_145, %c0_146] : memref<30x256xbf16, #tpu.memory_space<vmem>>, vector<28x256xbf16>
    %c1_147 = arith.constant 1 : index
    %c0_148 = arith.constant 0 : index
    %c0_149 = arith.constant 0 : index
    %143 = vector.load %arg13[%c1_147, %c0_148, %c0_149] : memref<3x256x256xbf16, #tpu.memory_space<vmem>>, vector<1x256x256xbf16>
    %144 = vector.shape_cast %143 : vector<1x256x256xbf16> to vector<256x256xbf16>
    %cst_150 = arith.constant dense<0.000000e+00> : vector<28x256xf32>
    %145 = tpu.matmul %142, %144, %cst_150 {dimension_numbers = #tpu.dot_dimension_numbers<[1], [0], [0], [1], [0, 0, 1, 1], [], []>} : vector<28x256xbf16>, vector<256x256xbf16>, vector<28x256xf32> -> vector<28x256xf32>
    %146 = arith.addf %141, %145 : vector<28x256xf32>
    %c2_151 = arith.constant 2 : index
    %c0_152 = arith.constant 0 : index
    %147 = vector.load %arg25[%c2_151, %c0_152] : memref<30x256xbf16, #tpu.memory_space<vmem>>, vector<28x256xbf16>
    %c2_153 = arith.constant 2 : index
    %c0_154 = arith.constant 0 : index
    %c0_155 = arith.constant 0 : index
    %148 = vector.load %arg13[%c2_153, %c0_154, %c0_155] : memref<3x256x256xbf16, #tpu.memory_space<vmem>>, vector<1x256x256xbf16>
    %149 = vector.shape_cast %148 : vector<1x256x256xbf16> to vector<256x256xbf16>
    %cst_156 = arith.constant dense<0.000000e+00> : vector<28x256xf32>
    %150 = tpu.matmul %147, %149, %cst_156 {dimension_numbers = #tpu.dot_dimension_numbers<[1], [0], [0], [1], [0, 0, 1, 1], [], []>} : vector<28x256xbf16>, vector<256x256xbf16>, vector<28x256xf32> -> vector<28x256xf32>
    %151 = arith.addf %146, %150 : vector<28x256xf32>
    %c0_157 = arith.constant 0 : index
    %c0_158 = arith.constant 0 : index
    %152 = vector.load %arg14[%c0_157, %c0_158] : memref<1x256xf32, #tpu.memory_space<vmem>>, vector<1x256xf32>
    %153 = vector.broadcast %152 : vector<1x256xf32> to vector<28x256xf32>
    %154 = arith.addf %151, %153 : vector<28x256xf32>
    %155 = vector.extract_strided_slice %154 {offsets = [0, 0], sizes = [8, 256], strides = [1, 1]} : vector<28x256xf32> to vector<8x256xf32>
    %156 = vector.extract_strided_slice %154 {offsets = [10, 0], sizes = [8, 256], strides = [1, 1]} : vector<28x256xf32> to vector<8x256xf32>
    %157 = vector.extract_strided_slice %154 {offsets = [20, 0], sizes = [8, 256], strides = [1, 1]} : vector<28x256xf32> to vector<8x256xf32>
    %158 = tpu.concatenate %155, %156, %157 in 0 : vector<8x256xf32>, vector<8x256xf32>, vector<8x256xf32> -> vector<24x256xf32>
    %159 = arith.addf %158, %137 : vector<24x256xf32>
    %cst_159 = arith.constant 0.000000e+00 : f32
    %160 = vector.broadcast %cst_159 : f32 to vector<24x256xf32>
    %161 = arith.maximumf %159, %160 : vector<24x256xf32>
    %c0_160 = arith.constant 0 : index
    %c0_161 = arith.constant 0 : index
    %162 = vector.load %arg15[%c0_160, %c0_161] : memref<3x24xbf16, #tpu.memory_space<vmem>>, vector<3x24xbf16>
    %163 = arith.truncf %161 : vector<24x256xf32> to vector<24x256xbf16>
    %cst_162 = arith.constant dense<0.000000e+00> : vector<3x256xf32>
    %164 = tpu.matmul %162, %163, %cst_162 {dimension_numbers = #tpu.dot_dimension_numbers<[1], [0], [0], [1], [0, 0, 1, 1], [], []>} : vector<3x24xbf16>, vector<24x256xbf16>, vector<3x256xf32> -> vector<3x256xf32>
    %165 = arith.truncf %164 : vector<3x256xf32> to vector<3x256xbf16>
    %c0_163 = arith.constant 0 : index
    %c0_164 = arith.constant 0 : index
    %166 = vector.load %arg16[%c0_163, %c0_164] : memref<256x512xbf16, #tpu.memory_space<vmem>>, vector<256x512xbf16>
    %cst_165 = arith.constant dense<0.000000e+00> : vector<3x512xf32>
    %167 = tpu.matmul %165, %166, %cst_165 {dimension_numbers = #tpu.dot_dimension_numbers<[1], [0], [0], [1], [0, 0, 1, 1], [], []>} : vector<3x256xbf16>, vector<256x512xbf16>, vector<3x512xf32> -> vector<3x512xf32>
    %c0_166 = arith.constant 0 : index
    %c0_167 = arith.constant 0 : index
    %168 = vector.load %arg17[%c0_166, %c0_167] : memref<1x512xf32, #tpu.memory_space<vmem>>, vector<1x512xf32>
    %169 = vector.broadcast %168 : vector<1x512xf32> to vector<3x512xf32>
    %170 = arith.addf %167, %169 : vector<3x512xf32>
    %cst_168 = arith.constant 0.000000e+00 : f32
    %171 = vector.broadcast %cst_168 : f32 to vector<3x512xf32>
    %172 = arith.maximumf %170, %171 : vector<3x512xf32>
    %173 = arith.truncf %172 : vector<3x512xf32> to vector<3x512xbf16>
    %c0_169 = arith.constant 0 : index
    %c0_170 = arith.constant 0 : index
    %174 = vector.load %arg18[%c0_169, %c0_170] : memref<512x256xbf16, #tpu.memory_space<vmem>>, vector<512x256xbf16>
    %cst_171 = arith.constant dense<0.000000e+00> : vector<3x256xf32>
    %175 = tpu.matmul %173, %174, %cst_171 {dimension_numbers = #tpu.dot_dimension_numbers<[1], [0], [0], [1], [0, 0, 1, 1], [], []>} : vector<3x512xbf16>, vector<512x256xbf16>, vector<3x256xf32> -> vector<3x256xf32>
    %c0_172 = arith.constant 0 : index
    %c0_173 = arith.constant 0 : index
    %176 = vector.load %arg19[%c0_172, %c0_173] : memref<1x256xf32, #tpu.memory_space<vmem>>, vector<1x256xf32>
    %177 = vector.broadcast %176 : vector<1x256xf32> to vector<3x256xf32>
    %178 = arith.addf %175, %177 : vector<3x256xf32>
    %cst_174 = arith.constant 0.000000e+00 : f32
    %179 = vector.broadcast %cst_174 : f32 to vector<3x256xf32>
    %180 = arith.maximumf %178, %179 : vector<3x256xf32>
    %181 = arith.truncf %180 : vector<3x256xf32> to vector<3x256xbf16>
    %c0_175 = arith.constant 0 : index
    %c0_176 = arith.constant 0 : index
    %182 = vector.load %arg20[%c0_175, %c0_176] : memref<256x32xbf16, #tpu.memory_space<vmem>>, vector<256x32xbf16>
    %cst_177 = arith.constant dense<0.000000e+00> : vector<3x32xf32>
    %183 = tpu.matmul %181, %182, %cst_177 {dimension_numbers = #tpu.dot_dimension_numbers<[1], [0], [0], [1], [0, 0, 1, 1], [], []>} : vector<3x256xbf16>, vector<256x32xbf16>, vector<3x32xf32> -> vector<3x32xf32>
    %c0_178 = arith.constant 0 : index
    %c0_179 = arith.constant 0 : index
    %184 = vector.load %arg21[%c0_178, %c0_179] : memref<1x32xf32, #tpu.memory_space<vmem>>, vector<1x32xf32>
    %185 = vector.broadcast %184 : vector<1x32xf32> to vector<3x32xf32>
    %186 = arith.addf %183, %185 : vector<3x32xf32>
    %c0_180 = arith.constant 0 : index
    %c0_181 = arith.constant 0 : index
    %c0_182 = arith.constant 0 : index
    %187 = vector.load %arg22[%c0_180, %c0_181, %c0_182] : memref<1x3x32xf32, #tpu.memory_space<vmem>>, vector<1x3x32xf32>
    %188 = vector.shape_cast %187 : vector<1x3x32xf32> to vector<3x32xf32>
    %189 = vector.shape_cast %186 : vector<3x32xf32> to vector<1x3x32xf32>
    tpu.vector_store %arg22[%c0_180, %c0_181, %c0_182], %189 {strides = array<i32>} : memref<1x3x32xf32, #tpu.memory_space<vmem>>, vector<1x3x32xf32>,
    return
  }
  func.func @transform_0(%arg0: i32) -> (i32, i32, i32) {
    %c0_i32 = arith.constant 0 : i32
    %c0_i32_0 = arith.constant 0 : i32
    %c0_i32_1 = arith.constant 0 : i32
    return %arg0, %c0_i32, %c0_i32_0 : i32, i32, i32
  }
  func.func @transform_1(%arg0: i32) -> (i32, i32, i32) {
    %c0_i32 = arith.constant 0 : i32
    %c0_i32_0 = arith.constant 0 : i32
    %c0_i32_1 = arith.constant 0 : i32
    %c0_i32_2 = arith.constant 0 : i32
    return %c0_i32, %c0_i32_0, %c0_i32_1 : i32, i32, i32
  }
  func.func @transform_2(%arg0: i32) -> (i32, i32) {
    %c0_i32 = arith.constant 0 : i32
    %c0_i32_0 = arith.constant 0 : i32
    %c0_i32_1 = arith.constant 0 : i32
    return %c0_i32, %c0_i32_0 : i32, i32
  }
  func.func @transform_3(%arg0: i32) -> (i32, i32, i32) {
    %c0_i32 = arith.constant 0 : i32
    %c0_i32_0 = arith.constant 0 : i32
    %c0_i32_1 = arith.constant 0 : i32
    %c0_i32_2 = arith.constant 0 : i32
    return %c0_i32, %c0_i32_0, %c0_i32_1 : i32, i32, i32
  }
  func.func @transform_4(%arg0: i32) -> (i32, i32) {
    %c0_i32 = arith.constant 0 : i32
    %c0_i32_0 = arith.constant 0 : i32
    %c0_i32_1 = arith.constant 0 : i32
    return %c0_i32, %c0_i32_0 : i32, i32
  }
  func.func @transform_5(%arg0: i32) -> (i32, i32, i32) {
    %c0_i32 = arith.constant 0 : i32
    %c0_i32_0 = arith.constant 0 : i32
    %c0_i32_1 = arith.constant 0 : i32
    %c0_i32_2 = arith.constant 0 : i32
    return %c0_i32, %c0_i32_0, %c0_i32_1 : i32, i32, i32
  }
  func.func @transform_6(%arg0: i32) -> (i32, i32) {
    %c0_i32 = arith.constant 0 : i32
    %c0_i32_0 = arith.constant 0 : i32
    %c0_i32_1 = arith.constant 0 : i32
    return %c0_i32, %c0_i32_0 : i32, i32
  }
  func.func @transform_7(%arg0: i32) -> (i32, i32, i32) {
    %c0_i32 = arith.constant 0 : i32
    %c0_i32_0 = arith.constant 0 : i32
    %c0_i32_1 = arith.constant 0 : i32
    %c0_i32_2 = arith.constant 0 : i32
    return %c0_i32, %c0_i32_0, %c0_i32_1 : i32, i32, i32
  }
  func.func @transform_8(%arg0: i32) -> (i32, i32, i32) {
    %c0_i32 = arith.constant 0 : i32
    %c0_i32_0 = arith.constant 0 : i32
    %c0_i32_1 = arith.constant 0 : i32
    %c0_i32_2 = arith.constant 0 : i32
    return %c0_i32, %c0_i32_0, %c0_i32_1 : i32, i32, i32
  }
  func.func @transform_9(%arg0: i32) -> (i32, i32) {
    %c0_i32 = arith.constant 0 : i32
    %c0_i32_0 = arith.constant 0 : i32
    %c0_i32_1 = arith.constant 0 : i32
    return %c0_i32, %c0_i32_0 : i32, i32
  }
  func.func @transform_10(%arg0: i32) -> (i32, i32) {
    %c0_i32 = arith.constant 0 : i32
    %c0_i32_0 = arith.constant 0 : i32
    %c0_i32_1 = arith.constant 0 : i32
    return %c0_i32, %c0_i32_0 : i32, i32
  }
  func.func @transform_11(%arg0: i32) -> (i32, i32) {
    %c0_i32 = arith.constant 0 : i32
    %c0_i32_0 = arith.constant 0 : i32
    %c0_i32_1 = arith.constant 0 : i32
    return %c0_i32, %c0_i32_0 : i32, i32
  }
  func.func @transform_12(%arg0: i32) -> (i32, i32, i32) {
    %c0_i32 = arith.constant 0 : i32
    %c0_i32_0 = arith.constant 0 : i32
    %c0_i32_1 = arith.constant 0 : i32
    %c0_i32_2 = arith.constant 0 : i32
    return %c0_i32, %c0_i32_0, %c0_i32_1 : i32, i32, i32
  }
  func.func @transform_13(%arg0: i32) -> (i32, i32) {
    %c0_i32 = arith.constant 0 : i32
    %c0_i32_0 = arith.constant 0 : i32
    %c0_i32_1 = arith.constant 0 : i32
    return %c0_i32, %c0_i32_0 : i32, i32
  }
  func.func @transform_14(%arg0: i32) -> (i32, i32) {
    %c0_i32 = arith.constant 0 : i32
    %c0_i32_0 = arith.constant 0 : i32
    %c0_i32_1 = arith.constant 0 : i32
    return %c0_i32, %c0_i32_0 : i32, i32
  }
  func.func @transform_15(%arg0: i32) -> (i32, i32) {
    %c0_i32 = arith.constant 0 : i32
    %c0_i32_0 = arith.constant 0 : i32
    %c0_i32_1 = arith.constant 0 : i32
    return %c0_i32, %c0_i32_0 : i32, i32
  }
  func.func @transform_16(%arg0: i32) -> (i32, i32) {
    %c0_i32 = arith.constant 0 : i32
    %c0_i32_0 = arith.constant 0 : i32
    %c0_i32_1 = arith.constant 0 : i32
    return %c0_i32, %c0_i32_0 : i32, i32
  }
  func.func @transform_17(%arg0: i32) -> (i32, i32) {
    %c0_i32 = arith.constant 0 : i32
    %c0_i32_0 = arith.constant 0 : i32
    %c0_i32_1 = arith.constant 0 : i32
    return %c0_i32, %c0_i32_0 : i32, i32
  }
  func.func @transform_18(%arg0: i32) -> (i32, i32) {
    %c0_i32 = arith.constant 0 : i32
    %c0_i32_0 = arith.constant 0 : i32
    %c0_i32_1 = arith.constant 0 : i32
    return %c0_i32, %c0_i32_0 : i32, i32
  }
  func.func @transform_19(%arg0: i32) -> (i32, i32) {
    %c0_i32 = arith.constant 0 : i32
    %c0_i32_0 = arith.constant 0 : i32
    %c0_i32_1 = arith.constant 0 : i32
    return %c0_i32, %c0_i32_0 : i32, i32
  }
  func.func @transform_20(%arg0: i32) -> (i32, i32) {
    %c0_i32 = arith.constant 0 : i32
    %c0_i32_0 = arith.constant 0 : i32
    %c0_i32_1 = arith.constant 0 : i32
    return %c0_i32, %c0_i32_0 : i32, i32
  }
  func.func @transform_21(%arg0: i32) -> (i32, i32, i32) {
    %c0_i32 = arith.constant 0 : i32
    %c0_i32_0 = arith.constant 0 : i32
    %c0_i32_1 = arith.constant 0 : i32
    return %arg0, %c0_i32, %c0_i32_0 : i32, i32, i32
  }
}

</mosaic_0001>

<bundles_post_ra>
// kernel: forward.1
= control target key start
LH: loop header
LB: loop body
LE: loop exit
PB: predicated region body
PF: predicated region fallthrough
CT: control target
= control target key end

     0   :  { %s13246_s0 = inlined_call_operand.vmem [shape: bf16[2,54,48], index: 0, kind: input, shape index: {}]   ;;  %s13247_s1 = inlined_call_operand.vmem [shape: bf16[3,48,256], index: 1, kind: input, shape index: {}]   ;;  %s13248_s2 = inlined_call_operand.vmem [shape: f32[1,256], index: 2, kind: input, shape index: {}]   ;;  %s13249_s3 = inlined_call_operand.vmem [shape: bf16[3,256,256], index: 3, kind: input, shape index: {}]   ;;  %s13250_s4 = inlined_call_operand.vmem [shape: f32[1,256], index: 4, kind: input, shape index: {}]   ;;  %s13251_s5 = inlined_call_operand.hbm [shape: bf16[3,256,256], index: 5, kind: input, shape index: {}]   ;;  %s13252_s6 = inlined_call_operand.vmem [shape: f32[1,256], index: 6, kind: input, shape index: {}]   ;;  %s13253_s7 = inlined_call_operand.vmem [shape: bf16[3,24,52], index: 7, kind: input, shape index: {}]   ;;  %s13254_s8 = inlined_call_operand.hbm [shape: bf16[3,256,256], index: 8, kind: input, shape index: {}]   ;;  %s13255_s9 = inlined_call_operand.vmem [shape: f32[1,256], index: 9, kind: input, shape index: {}]   ;;  %s13256_s10 = inlined_call_operand.hbm [shape: bf16[256,256], index: 10, kind: input, shape index: {}]   ;;  %s13257_s11 = inlined_call_operand.vmem [shape: f32[1,256], index: 11, kind: input, shape index: {}]   ;;  %s13258_s12 = inlined_call_operand.hbm [shape: bf16[3,256,256], index: 12, kind: input, shape index: {}]   ;;  %s13259_s13 = inlined_call_operand.vmem [shape: f32[1,256], index: 13, kind: input, shape index: {}]   ;;  %s13260_s14 = inlined_call_operand.vmem [shape: bf16[3,24], index: 14, kind: input, shape index: {}]   ;;  %s13261_s15 = inlined_call_operand.vmem [shape: bf16[256,512], index: 15, kind: input, shape index: {}]   ;;  %s13262_s16 = inlined_call_operand.vmem [shape: f32[1,512], index: 16, kind: input, shape index: {}]   ;;  %s13263_s17 = inlined_call_operand.hbm [shape: bf16[512,256], index: 17, kind: input, shape index: {}]   ;;  %s13264_s18 = inlined_call_operand.vmem [shape: f32[1,256], index: 18, kind: input, shape index: {}]   ;;  %s13265_s19 = inlined_call_operand.vmem [shape: bf16[256,32], index: 19, kind: input, shape index: {}]   ;;  %s13266_s20 = inlined_call_operand.vmem [shape: f32[1,32], index: 20, kind: input, shape index: {}]   ;;  %s13267_s21 = inlined_call_operand.vmem [shape: f32[2,3,32], index: 21, kind: output, shape index: {}]  }
   0x1   :  { %13283 = sst [smem:[#allocation40_spill]] %s13246_s0 }
   0x2   :  { %13284 = sst [smem:[#allocation41_spill]] %s13247_s1 }
   0x3   :  { %13285 = sst [smem:[#allocation42_spill]] %s13248_s2 }
   0x4   :  { %13286 = sst [smem:[#allocation43_spill]] %s13249_s3 }
   0x5   :  { %13287 = sst [smem:[#allocation44_spill]] %s13250_s4 }
   0x6   :  { %13288 = sst [smem:[#allocation45_spill]] %s13251_s5 }
   0x7   :  { %13289 = sst [smem:[#allocation46_spill]] %s13254_s8 }
   0x8   :  { %13290 = sst [smem:[#allocation47_spill]] %s13258_s12 }
   0x9   :  { %13291 = sst [smem:[#allocation48_spill]] %s13266_s20 }
   0xa   :  { %13292 = sst [smem:[#allocation49_spill]] %s13267_s21 }
   0xb   :  { %26 = vsyncpa [#allocation6], 0 }
   0xc   :  { %27 = vsyncpa [#allocation8], 0 }
   0xd   :  { %28 = vsyncpa [#allocation11], 0  ;;  %s10840_s2 = smov 0  }
   0xe LB: > { %13293 = sst [smem:[#allocation16_spill]] %s10721_s2  ;;  %s10846_s25 = sadd.s32 4294967295, %s10721_s2   ;;  %s10721_s2 = sphi %s10840_s2, %s34_s2  }
   0xf   : > { %p7385_p0 = scmp.ge.s32.totalorder %s10721_s2, 1  ;;  %p511_p1 = scmp.lt.s32.totalorder %s10721_s2, 3 }
  0x10   : > { %p10527_p2 = scmp.eq.s32.totalorder %s10846_s25, 0  ;;  %s13294_s8 = sld [smem:[#allocation46_spill]] }
  0x11   : > { %p10854_p3 = pnand %p7385_p0, %p511_p1  ;;  %s13296_s12 = sld [smem:[#allocation47_spill]] }
  0x12   : > { %s10723_s30 = smov [#allocation7]   ;;  %s10724_s23 = smov [#allocation10]  }
  0x13   : > { %p10511_p4 = pneg %p10854_p3  ;;  %s556_s5 = sshll.u32 %s10723_s30, 4  ;;  %s557_s5 = int_to_ptr.vmem [resolvable:$true] %s556_s5 }
  0x14   : > { %s590_s1 = sshll.u32 %s10724_s23, 4  ;;  %s13298_s27 = sld [smem:[#allocation45_spill]]  ;;  %s591_s1 = int_to_ptr.vmem [resolvable:$true] %s590_s1 }
  0x15   : > { %p10865_p5 = pnand %p10527_p2, %p10511_p4  ;;  %s10725_s0 = smov 128  }
  0x16   : > { %s554_s3 = sshll.u32 %s13294_s8, 4  ;;  %s10726_s30 = smov 8   ;;  %s555_s3 = int_to_ptr.hbm [resolvable:$true] %s554_s3 }
  0x17   : > { %s588_s4 = sshll.u32 %s13296_s12, 4  ;;  %s10727_s8 = smov [#allocation5]   ;;  %s589_s4 = int_to_ptr.hbm [resolvable:$true] %s588_s4 }
  0x18   : > { %10517 = dma.hbm_to_vmem [thread:$0]  (!%p10865_p5), %s555_s3, 12288, %s557_s5, [#allocation8], %s10725_s0, %s10725_s0, %s10726_s30  }
  0x19   : > { %10523 = dma.hbm_to_vmem [thread:$0]  (!%p10865_p5), %s589_s4, 12288, %s591_s1, [#allocation11], %s10725_s0, %s10725_s0, %s10726_s30  }
  0x1a   : > { %s534_s29 = sshll.u32 %s13298_s27, 4  ;;  %s536_s12 = sshll.u32 %s10727_s8, 4  ;;  %s535_s29 = int_to_ptr.hbm [resolvable:$true] %s534_s29  ;;  %s537_s12 = int_to_ptr.vmem [resolvable:$true] %s536_s12 }
  0x1b   : > { %s571_s23 = sshll.u32 %s13256_s10, 4  ;;  %s614_s27 = sshll.u32 %s13263_s17, 4  ;;  %s572_s23 = int_to_ptr.hbm [resolvable:$true] %s571_s23  ;;  %s615_s27 = int_to_ptr.hbm [resolvable:$true] %s614_s27 }
  0x1c   : > { %10514 = dma.hbm_to_vmem [thread:$0]  (!%p10865_p5), %s535_s29, 12288, %s537_s12, [#allocation6], %s10725_s0, %s10725_s0, %s10726_s30  }
  0x1d   : > { %s10728_s20 = smov [#allocation9]   ;;  %s10729_s4 = smov [#allocation12]  }
  0x1e   : > { %s573_s3 = sshll.u32 %s10728_s20, 4  ;;  %s616_s8 = sshll.u32 %s10729_s4, 4  ;;  %s574_s3 = int_to_ptr.vmem [resolvable:$true] %s573_s3  ;;  %s617_s8 = int_to_ptr.vmem [resolvable:$true] %s616_s8 }
  0x1f   : > { %10520 = dma.hbm_to_vmem [thread:$0]  (!%p10865_p5), %s572_s23, 4096, %s574_s3, [#allocation8], %s10725_s0, %s10725_s0, %s10726_s30  }
  0x20   : > { %10526 = dma.hbm_to_vmem [thread:$0]  (!%p10865_p5), %s615_s27, 8192, %s617_s8, [#allocation11], %s10725_s0, %s10725_s0, %s10726_s30  }
  0x21   : > { %649 = sbr.rel (%p10854_p3) target bundleno = 2154 (0x86a), region = 104 }
  0x26   : > { %10708 = dma.done.wait (%p10527_p2), [#allocation6], 12288  }
  0x27   : > { %10710 = vsyncadd (%p10527_p2), [#allocation6], 4294955008 }
  0x28   : > { %10712 = dma.done.wait (%p10527_p2), [#allocation8], 16384  }
  0x29   : > { %10714 = vsyncadd (%p10527_p2), [#allocation8], 4294950912 }
  0x2a   : > { %10716 = dma.done.wait (%p10527_p2), [#allocation11], 20480  }
  0x2b   : > { %10718 = vsyncadd (%p10527_p2), [#allocation11], 4294946816  ;;  %p729_p6 = scmp.lt.s32.totalorder %s10846_s25, 1  ;;  %s13299_s2 = sld [smem:[#allocation41_spill]]  ;;  %vm13275_vm0 = vsmask.f32 7424 }
  0x2c   : > { %s13301_s8 = sld [smem:[#allocation40_spill]]  ;;  %vm930_vm1 = vcmask 392192   ;;  %vm13272_vm2 = vcmask 1046528   ;;  %vm739_vm3 = vcmask 1040384   ;;  %vm740_vm4 = vsmask.f32 256 }
  0x2d   : > { %s13435_s25 = smov (!%p729_p6, %s10846_s25), 1  ;;  %vm742_vm5 = vcmask 1044484   ;;  %vm743_vm6 = vsmask.f32 4352  ;;  %vm741_vm7 = vmand %vm739_vm3, %vm740_vm4  ;;  %vm749_vm8 = vsmask.f32 7938 }
  0x2e   : > { %s10490_s12 = smul.u32 28, %s13435_s25  ;;  %vm744_vm9 = vmand %vm742_vm5, %vm743_vm6  ;;  %vm751_vm10 = vsmask.f32 7954  ;;  %vm769_vm15 = vcmask 1041409   ;;  %vm773_vm6 = vsmask.f32 5376 }
  0x2f   : > { %vm11107_vm11 = vmor %vm744_vm9, %vm741_vm7  ;;  %s13305_s3 = sld [smem:[#allocation43_spill]] }
  0x30   : > { %vm750_vm12 = vmand %vm739_vm3, %vm749_vm8  ;;  %vm772_vm3 = vcmask 1045509   ;;  %s13431_s4 = sld [smem:[#allocation48_spill]] }
  0x31   : > { %s13300_s28 = smov %s13299_s2  ;;  %v7432_v0 = vld [vmem:[%s13299_s2 + $0x50] sm:$0xf]  ;;  %vm752_vm13 = vmand %vm742_vm5, %vm751_vm10  ;;  %s13361_s2 = sld [smem:[#allocation44_spill]] }
  0x32   : > { %v9899_v1 = vld [vmem:[%s13300_s28 + $0x54] sm:$0xf0]  ;;  %v9898_v2 = vld [vmem:[%s13300_s28 + $0x54] sm:$0xf]  ;;  %v7434_v4 = vld [vmem:[%s13300_s28 + $0x58] sm:$0xf0]  ;;  %s10928_s20 = scalar_lea.vmem %s13301_s8, %s10490_s12 }
  0x33   : > { %v7433_v3 = vor.u32 %v9899_v1, %v7432_v0  ;;  %v7424_v5 = vld [vmem:[%s13300_s28 + $0x40] sm:$0xf]  ;;  %v9897_v6 = vld [vmem:[%s13300_s28 + $0x44] sm:$0xf0]  ;;  %v7437_v7 = vor.u32 %v9898_v2, %v7434_v4  ;;  %v9896_v8 = vld [vmem:[%s13300_s28 + $0x44] sm:$0xf] }
  0x34   : > { %v7426_v9 = vld [vmem:[%s13300_s28 + $0x48] sm:$0xf0]  ;;  %v7416_v10 = vld [vmem:[%s13300_s28 + $0x30] sm:$0xf]  ;;  %v7425_v11 = vor.u32 %v9897_v6, %v7424_v5  ;;  %v9895_v12 = vld [vmem:[%s13300_s28 + $0x34] sm:$0xf0] }
  0x35   : > { %948 = vmatpush.bf16.msra.mxu0 %v7433_v3  ;;  %10484 = vmatpush.bf16.msra.mxu2 %v7433_v3  ;;  %v9894_v13 = vld [vmem:[%s13300_s28 + $0x34] sm:$0xf]  ;;  %v7418_v14 = vld [vmem:[%s13300_s28 + $0x38] sm:$0xf0]  ;;  %v7429_v15 = vor.u32 %v9896_v8, %v7426_v9  ;;  %v10949_v16 = vld [vmem:[%s10928_s20] sm:$0xff]   ;;  %v7417_v27 = vor.u32 %v9895_v12, %v7416_v10  ;;  %s13308_s12 = sld [smem:[#allocation42_spill]] }
  0x36   : > { %976 = vmatpush.bf16.msra.mxu1 %v7437_v7  ;;  %10487 = vmatpush.bf16.msra.mxu3 %v7437_v7  ;;  %v10952_v17 = vld [vmem:[%s10928_s20 + $0x8] sm:$0xff]  ;;  %v842_v18 = vld [vmem:[%s10928_s20 + $0x18] sm:$0x7]  ;;  %v870_v19 = vshrl.u32 %v10949_v16, 16  ;;  %v872_v20 = vshll.u32 %v10949_v16, 16  ;;  %v7421_v30 = vor.u32 %v9894_v13, %v7418_v14  ;;  %v11003_v50 = vld [vmem:[%s10928_s20 + $0x10] sm:$0xff] }
  0x37   : > { %v863_v21 = vunpack.c.l.b16 %v842_v18  ;;  %v7464_v22 = vld [vmem:[%s13300_s28 + $0x20] sm:$0xf]  ;;  %v9893_v23 = vld [vmem:[%s13300_s28 + $0x24] sm:$0xf0]  ;;  %v877_v24 = vshll.u32 %v10952_v17, 16  ;;  %v881_v63 = vshrl.u32 %v10952_v17, 16  ;;  %vm753_vm14 = vmor %vm752_vm13, %vm750_vm12 }
  0x38   : > { %v9892_v25 = vld [vmem:[%s13300_s28 + $0x24] sm:$0xf]  ;;  %v7466_v26 = vld [vmem:[%s13300_s28 + $0x28] sm:$0xf0]  ;;  %v874_v28 = vrot.slane %v872_v20, 1  ;;  %v7465_v32 = vor.u32 %v9893_v23, %v7464_v22  ;;  %v885_v0 = vshll.u32 %v11003_v50, 16  ;;  %vm774_vm7 = vmand %vm772_vm3, %vm773_vm6 }
  0x39   : > { %949 = vmatpush.bf16.msra.mxu0 %v7425_v11  ;;  %10485 = vmatpush.bf16.msra.mxu2 %v7425_v11  ;;  %v10970_v29 = vpack.c.b16 %v863_v21, %v863_v21  ;;  %v879_v31 = vrot.slane %v877_v24, 1  ;;  %v7469_v36 = vor.u32 %v9892_v25, %v7466_v26  ;;  %v7456_v37 = vld [vmem:[%s13300_s28 + $0x10] sm:$0xf]  ;;  %v9891_v38 = vld [vmem:[%s13300_s28 + $0x14] sm:$0xf0]  ;;  %v889_v12 = vshrl.u32 %v11003_v50, 16 }
  0x3a   : > { %977 = vmatpush.bf16.msra.mxu1 %v7429_v15  ;;  %10488 = vmatpush.bf16.msra.mxu3 %v7429_v15  ;;  %v875_v33 = vor.u32 %v874_v28, %v870_v19  ;;  %v9890_v39 = vld [vmem:[%s13300_s28 + $0x14] sm:$0xf]  ;;  %v7458_v40 = vld [vmem:[%s13300_s28 + $0x18] sm:$0xf0]  ;;  %v7457_v44 = vor.u32 %v9891_v38, %v7456_v37  ;;  %v7448_v46 = vld [vmem:[%s13300_s28] sm:$0xf] }
  0x3b   : > { %v893_v34 = vshll.u32 %v10970_v29, 16  ;;  %v897_v35 = vshrl.u32 %v10970_v29, 16  ;;  %v7461_v45 = vor.u32 %v9890_v39, %v7458_v40  ;;  %v9889_v47 = vld [vmem:[%s13300_s28 + $0x4] sm:$0xf0]  ;;  %v9888_v48 = vld [vmem:[%s13300_s28 + $0x4] sm:$0xf]  ;;  %v883_v7 = vor.u32 %v881_v63, %v879_v31 }
  0x3c   : > { %v880_v41 = vsel %vm13275_vm0, %v875_v33, %v879_v31  ;;  %v7450_v49 = vld [vmem:[%s13300_s28 + $0x8] sm:$0xf0]  ;;  %v7502_v51 = vld [vmem:[%s13300_s28 + $0x80] sm:$0xf]  ;;  %v9905_v52 = vld [vmem:[%s13300_s28 + $0x84] sm:$0xf0]  ;;  %v7449_v54 = vor.u32 %v9889_v47, %v7448_v46 }
  0x3d   : > { %950 = vmatpush.bf16.msra.mxu0 %v7417_v27  ;;  %10486 = vmatpush.bf16.msra.mxu2 %v7417_v27  ;;  %v895_v42 = vrot.slane %v893_v34, 1  ;;  %v9904_v53 = vld [vmem:[%s13300_s28 + $0x84] sm:$0xf]  ;;  %v7453_v55 = vor.u32 %v9888_v48, %v7450_v49  ;;  %v7503_v56 = vor.u32 %v9905_v52, %v7502_v51  ;;  %v7504_v57 = vld [vmem:[%s13300_s28 + $0x88] sm:$0xf0]  ;;  %v887_v8 = vrot.slane %v885_v0, 1 }
  0x3e   : > { %978 = vmatpush.bf16.msra.mxu1 %v7421_v30  ;;  %10489 = vmatpush.bf16.msra.mxu3 %v7421_v30  ;;  %v7494_v58 = vld [vmem:[%s13300_s28 + $0x70] sm:$0xf]  ;;  %v9903_v59 = vld [vmem:[%s13300_s28 + $0x74] sm:$0xf0]  ;;  %v7507_v60 = vor.u32 %v9904_v53, %v7504_v57  ;;  %v9902_v61 = vld [vmem:[%s13300_s28 + $0x74] sm:$0xf] }
  0x3f   : > { %v899_v43 = vor.u32 %v897_v35, %v895_v42  ;;  %v7496_v62 = vld [vmem:[%s13300_s28 + $0x78] sm:$0xf0]  ;;  %v7495_v1 = vor.u32 %v9903_v59, %v7494_v58  ;;  %v7486_v3 = vld [vmem:[%s13300_s28 + $0x60] sm:$0xf]  ;;  %v9901_v4 = vld [vmem:[%s13300_s28 + $0x64] sm:$0xf0]  ;;  %v888_v11 = vsel %vm13275_vm0, %v883_v7, %v887_v8  ;;  %v891_v13 = vor.u32 %v889_v12, %v887_v8 }
  0x40   : > { %7438 = vmatmul.msk.bf16.vlgmr.msra.gmra.mxu0 %vm930_vm1, %v880_v41  ;;  %v7499_v2 = vor.u32 %v9902_v61, %v7496_v62  ;;  %v9900_v5 = vld [vmem:[%s13300_s28 + $0x64] sm:$0xf]  ;;  %v7488_v6 = vld [vmem:[%s13300_s28 + $0x68] sm:$0xf0]  ;;  %v7487_v9 = vor.u32 %v9901_v4, %v7486_v3  ;;  %v10482_v18 = vld [vmem:[%s10928_s20] sm:$0xe] }
  0x41   : > { %1046 = vmatpush.bf16.msrb.mxu2 %v7465_v32  ;;  %7442 = vmatmul.msk.bf16.vlgmr.msra.gmra.mxu1 %vm930_vm1, %v880_v41  ;;  %v7491_v10 = vor.u32 %v9900_v5, %v7488_v6  ;;  %v896_v14 = vsel %vm13275_vm0, %v891_v13, %v895_v42  ;;  %v10481_v15 = vld [vmem:[%s10928_s20] sm:$0xf0]  ;;  %v1110_v20 = vrot.slane %v10952_v17, 1  ;;  %v835_v22 = vld [vmem:[%s10928_s20 + $0x18] sm:$0x3]  ;;  %v1112_v24 = vrot.slane %v11003_v50, 1 }
  0x42   : > { %1074 = vmatpush.bf16.msrb.mxu3 %v7469_v36  ;;  %7441 = vmatmul.msk.bf16.vlgmr.msra.gmra.mxu2 %vm930_vm1, %v899_v43  ;;  %v10483_v19 = vor.u32 %v10482_v18, %v10481_v15  ;;  %v1000_v23 = vunpack.c.l.b16 %v835_v22  ;;  %v1114_v26 = vrot.slane %v10970_v29, 1  ;;  %v746_v38 = vld [vmem:[#allocation2] sm:$0x11]  ;;  %v13302_v42 = vmov 0  ;;  %v760_v46 = vld [vmem:[#allocation3 + $0x10] sm:$0x11] }
  0x43   : > { %7445 = vmatmul.msk.bf16.vlgmr.msra.gmra.mxu3 %vm930_vm1, %v899_v43  ;;  %1163 = vmatpush.bf16.msrb.mxu0 %v7503_v56  ;;  %v13303_v42 = vsel %vm11107_vm11, 4294967295, %v13302_v42  ;;  %v754_v43 = vld [vmem:[#allocation2 + $0x10] sm:$0x11]  ;;  %v761_v49 = vsel %vm753_vm14, 0, %v760_v46  ;;  %v776_v56 = vld [vmem:[#allocation2 + $0x10] sm:$0x22] }
  0x44   : > { %1191 = vmatpush.bf16.msrb.mxu1 %v7507_v60  ;;  %v1001_v25 = vpack.c.b16 %v1000_v23, %v1000_v23  ;;  %v1115_v27 = vsel %vm13272_vm2, %v1112_v24, %v1114_v26  ;;  %13304 = vst [vmem:[#allocation17_spill] sm:$0xff] %v13303_v42  ;;  %v766_v47 = vld [vmem:[#allocation4] sm:$0x11]  ;;  %v755_v48 = vsel %vm753_vm14, 0, %v754_v43  ;;  %v9957_v61 = vld [vmem:[%s13305_s3 + $0x174] sm:$0xf0] }
  0x45   : > { %1047 = vmatpush.bf16.msrb.mxu2 %v7457_v44  ;;  %756 = vst [vmem:[#allocation2 + $0x10] sm:$0x11] %v755_v48  ;;  %v7622_v57 = vld [vmem:[%s13305_s3 + $0x170] sm:$0xf]  ;;  %v1228_v3 = vld [vmem:[%s13308_s12] sm:$0x3] }
  0x46   : > { %1075 = vmatpush.bf16.msrb.mxu3 %v7461_v45  ;;  %v747_v45 = vsel %vm11107_vm11, 0, %v746_v38  ;;  %762 = vst [vmem:[#allocation3 + $0x10] sm:$0x11] %v761_v49  ;;  %v7623_v0 = vor.u32 %v9957_v61, %v7622_v57  ;;  %vm779_vm12 = vsmask.f32 7942  ;;  %s7399_s8 = sshll.u32 %s13435_s25, 2 }
  0x47   : > { %1164 = vmatpush.bf16.msrb.mxu0 %v7495_v1  ;;  %748 = vst [vmem:[#allocation2] sm:$0x11] %v747_v45  ;;  %v7686_v1 = vld [vmem:[%s13305_s3 + $0x1f0] sm:$0xf]  ;;  %vm780_vm13 = vmand %vm769_vm15, %vm779_vm12  ;;  %v784_v5 = vld [vmem:[#allocation2 + $0x20] sm:$0x22] }
  0x48   : > { %1192 = vmatpush.bf16.msrb.mxu1 %v7499_v2  ;;  %v9973_v2 = vld [vmem:[%s13305_s3 + $0x1f4] sm:$0xf0]  ;;  %v787_v6 = vld [vmem:[#allocation3 + $0x10] sm:$0x22]  ;;  %v7614_v38 = vld [vmem:[%s13305_s3 + $0x160] sm:$0xf] }
  0x49   : > { %1048 = vmatpush.bf16.msrb.mxu2 %v7449_v54  ;;  %v7687_v4 = vor.u32 %v9973_v2, %v7686_v1  ;;  %v790_v8 = vld [vmem:[#allocation3 + $0x20] sm:$0x22]  ;;  %v796_v12 = vld [vmem:[#allocation4 + $0x18] sm:$0x22]  ;;  %v9970_v57 = vld [vmem:[%s13305_s3 + $0x1e4] sm:$0xf] }
  0x4a   : > { %1076 = vmatpush.bf16.msrb.mxu3 %v7453_v55  ;;  %v9971_v46 = vld [vmem:[%s13305_s3 + $0x1e4] sm:$0xf0]  ;;  %v7616_v48 = vld [vmem:[%s13305_s3 + $0x168] sm:$0xf0]  ;;  %v7606_v61 = vld [vmem:[%s13305_s3 + $0x150] sm:$0xf] }
  0x4b   : > { %1165 = vmatpush.bf16.msrb.mxu0 %v7487_v9  ;;  %v793_v9 = vld [vmem:[#allocation4] sm:$0x22]  ;;  %v7680_v60 = vld [vmem:[%s13305_s3 + $0x1e8] sm:$0xf0]  ;;  %v9953_v2 = vld [vmem:[%s13305_s3 + $0x154] sm:$0xf0] }
  0x4c   : > { %1193 = vmatpush.bf16.msrb.mxu1 %v7491_v10  ;;  %v7683_v1 = vor.u32 %v9970_v57, %v7680_v60  ;;  %v9969_v10 = vld [vmem:[%s13305_s3 + $0x1d4] sm:$0xf0]  ;;  %vm811_vm0 = vsmask.f32 7962  ;;  %s13432_s5 = sld [smem:[#allocation49_spill]] }
  0x4d   : > { %1718 = vmatpush.bf16.msra.mxu2 %v7623_v0 }
  0x4e   : > { %1746 = vmatpush.bf16.msra.mxu3 %v7687_v4 }
  0x50   : > { %7439 = vmatmul.msk.bf16.gmra.mxu0 %vm930_vm1, %v888_v11 }
  0x51   : > { %7443 = vmatmul.msk.bf16.gmra.mxu1 %vm930_vm1, %v888_v11 }
  0x52   : > { %7470 = vmatmul.msk.bf16.vlgmr.msrb.gmra.mxu2 %vm930_vm1, %v10949_v16  ;;  %s737_s22 = scalar_lea.vmem %s13432_s5, %s7399_s8 }
  0x53   : > { %7474 = vmatmul.msk.bf16.vlgmr.msrb.gmra.mxu3 %vm930_vm1, %v10949_v16  ;;  %v1109_v16 = vrot.slane %v10483_v19, 1 }
  0x55   : > { %v1111_v21 = vsel %vm13272_vm2, %v1109_v16, %v1110_v20  ;;  %v11182_v16 = vperm.slane %v1228_v3, 0 }
  0x60   : > { %7440 = vmatmul.msk.bf16.gmra.mxu0 %vm930_vm1, %v896_v14 }
  0x61   : > { %7444 = vmatmul.msk.bf16.gmra.mxu1 %vm930_vm1, %v896_v14 }
  0x62   : > { %7471 = vmatmul.msk.bf16.gmra.mxu2 %vm930_vm1, %v10952_v17 }
  0x63   : > { %7475 = vmatmul.msk.bf16.gmra.mxu3 %vm930_vm1, %v10952_v17  ;;  %v1113_v17 = vsel %vm13272_vm2, %v1110_v20, %v1112_v24  ;;  %v11184_v20 = vperm.slane %v1228_v3, 1 }
  0x70   : > { %7508 = vmatmul.msk.bf16.vlgmr.msrb.gmra.mxu0 %vm930_vm1, %v1111_v21 }
  0x71   : > { %7512 = vmatmul.msk.bf16.vlgmr.msrb.gmra.mxu1 %vm930_vm1, %v1111_v21  ;;  %v9956_v21 = vld [vmem:[%s13305_s3 + $0x174] sm:$0xf] }
  0x72   : > { %7472 = vmatmul.msk.bf16.gmra.mxu2 %vm930_vm1, %v11003_v50 }
  0x73   : > { %7476 = vmatmul.msk.bf16.gmra.mxu3 %vm930_vm1, %v11003_v50  ;;  %v767_v50 = vsel %vm753_vm14, 0, %v766_v47  ;;  %vm781_vm14 = vsmask.f32 7958  ;;  %v9954_v47 = vld [vmem:[%s13305_s3 + $0x164] sm:$0xf] }
  0x74   : > { %768 = vst [vmem:[#allocation4] sm:$0x11] %v767_v50 }
  0x80   : > { %7509 = vmatmul.msk.bf16.gmra.mxu0 %vm930_vm1, %v1113_v17 }
  0x81   : > { %7513 = vmatmul.msk.bf16.gmra.mxu1 %vm930_vm1, %v1113_v17  ;;  %v9972_v17 = vld [vmem:[%s13305_s3 + $0x1f4] sm:$0xf] }
  0x82   : > { %7473 = vmatmul.msk.bf16.gmra.mxu2 %vm930_vm1, %v1001_v25 }
  0x83   : > { %7477 = vmatmul.msk.bf16.gmra.mxu3 %vm930_vm1, %v1001_v25  ;;  %v7624_v25 = vld [vmem:[%s13305_s3 + $0x178] sm:$0xf0] }
  0x90   : > { %7510 = vmatmul.msk.bf16.gmra.mxu0 %vm930_vm1, %v1115_v27 }
  0x91   : > { %7514 = vmatmul.msk.bf16.gmra.mxu1 %vm930_vm1, %v1115_v27 }
  0xa0   : > { %7511 = vmatmul.msk.bf16.gmra.mxu0 %vm930_vm1, %v1114_v26 }
  0xa1   : > { %7515 = vmatmul.msk.bf16.gmra.mxu1 %vm930_vm1, %v1114_v26  ;;  %vm770_vm1 = vsmask.f32 1280 }
  0xa2   : > { %vm771_vm5 = vmand %vm769_vm15, %vm770_vm1  ;;  %vm13271_vm15 = vcmask 1043456  }
  0xa3   : > { %vm11140_vm9 = vmor %vm774_vm7, %vm771_vm5 }
  0xa4   : > { %v777_v63 = vsel %vm11140_vm9, 0, %v776_v56  ;;  %vm782_vm5 = vmand %vm772_vm3, %vm781_vm14  ;;  %v788_v7 = vsel %vm11140_vm9, 0, %v787_v6  ;;  %v794_v11 = vsel %vm11140_vm9, 0, %v793_v9  ;;  %vm1293_vm3 = vcmask 1047556   ;;  %v7670_v6 = vld [vmem:[%s13305_s3 + $0x1d0] sm:$0xf] }
  0xa5   : > { %778 = vst [vmem:[#allocation2 + $0x10] sm:$0x22] %v777_v63  ;;  %vm11166_vm7 = vmor %vm782_vm5, %vm780_vm13  ;;  %v7619_v56 = vor.u32 %v9954_v47, %v7616_v48  ;;  %vm799_vm13 = vcmask 1042434   ;;  %vm13273_vm5 = vsmask.f32 2304  ;;  %v13321_v47 = vmov 0 }
  0xa6   : > { %789 = vst [vmem:[#allocation3 + $0x10] sm:$0x22] %v788_v7  ;;  %v785_v13 = vsel %vm11166_vm7, 0, %v784_v5  ;;  %v791_v14 = vsel %vm11166_vm7, 0, %v790_v8  ;;  %v797_v15 = vsel %vm11166_vm7, 0, %v796_v12  ;;  %vm11233_vm9 = vmand %vm13271_vm15, %vm749_vm8  ;;  %vm802_vm8 = vcmask 1046534  }
  0xa7   : > { %795 = vst [vmem:[#allocation4] sm:$0x22] %v794_v11  ;;  %vm11242_vm7 = vmand %vm799_vm13, %vm13273_vm5  ;;  %vm13274_vm15 = vsmask.f32 6400  ;;  %v7607_v5 = vor.u32 %v9953_v2, %v7606_v61  ;;  %v806_v9 = vld [vmem:[#allocation2 + $0x20] sm:$0x44] }
  0xa8   : > { %786 = vst [vmem:[#allocation2 + $0x20] sm:$0x22] %v785_v13  ;;  %vm804_vm2 = vmand %vm802_vm8, %vm13274_vm15 }
  0xa9   : > { %792 = vst [vmem:[#allocation3 + $0x20] sm:$0x22] %v791_v14  ;;  %vm11264_vm5 = vmor %vm804_vm2, %vm11242_vm7  ;;  %vm809_vm2 = vsmask.f32 7946 }
  0xaa   : > { %798 = vst [vmem:[#allocation4 + $0x18] sm:$0x22] %v797_v15  ;;  %v9952_v15 = vld [vmem:[%s13305_s3 + $0x154] sm:$0xf]  ;;  %vm11276_vm15 = vmand %vm1293_vm3, %vm751_vm10 }
  0xab   : > { %vm810_vm7 = vmand %vm799_vm13, %vm809_vm2 }
  0xac   : > { %vm812_vm10 = vmand %vm802_vm8, %vm811_vm0 }
  0xad   : > { %vm11290_vm3 = vmor %vm812_vm10, %vm810_vm7  ;;  %vm1340_vm7 = vcmask 1041408   ;;  %vm1369_vm10 = vcmask 1043458  }
  0xae   : > { %vm11300_vm13 = vmor %vm11276_vm15, %vm11233_vm9  ;;  %vm1269_vm15 = vsmask.f32 4368  ;;  %vm1331_vm9 = vcmask 1043457  }
  0xaf   : > { %v13322_v47 = vsel %vm11300_vm13, 4294967295, %v13321_v47  ;;  %vm11351_vm8 = vmor %vm740_vm4, %vm1269_vm15 }
  0xb0   : > { %13323 = vst [vmem:[#allocation18_spill] sm:$0xff] %v13322_v47  ;;  %vm11403_vm4 = vmand %vm1331_vm9, %vm779_vm12  ;;  %vm1342_vm9 = vcmask 1045508  }
  0xb1   : > { %vm11530_vm15 = vmand %vm1340_vm7, %vm770_vm1 }
  0xbd   : > { %v11082_v28 = vpop.f32.mrf.mxu0 }
  0xbe   : > { %v11084_v30 = vpop.f32.mrf.mxu1 }
  0xc5   : > { %v11086_v31 = vpop.f32.mrf.mxu2  ;;  %v11090_v33 = vpop.f32.mrf.mxu0 }
  0xc6   : > { %v11088_v32 = vpop.f32.mrf.mxu3  ;;  %v11092_v29 = vpop.f32.mrf.mxu1 }
  0xcd   : > { %v969_v34 = vpop.f32.mrf.mxu2  ;;  %v11094_v36 = vpop.f32.mrf.mxu0 }
  0xce   : > { %v997_v35 = vpop.f32.mrf.mxu3  ;;  %v11096_v37 = vpop.f32.mrf.mxu1 }
  0xd5   : > { %v11100_v39 = vpop.f32.mrf.mxu2  ;;  %v11105_v41 = vpop.f32.mrf.mxu0 }
  0xd6   : > { %v11103_v40 = vpop.f32.mrf.mxu3  ;;  %v11111_v44 = vpop.f32.mrf.mxu1  ;;  %v1051_v18 = vadd.f32 %v11100_v39, %v11082_v28  ;;  %v7627_v28 = vor.u32 %v9956_v21, %v7624_v25  ;;  %v9955_v39 = vld [vmem:[%s13305_s3 + $0x164] sm:$0xf0] }
  0xd7   : > { %v1079_v22 = vadd.f32 %v11103_v40, %v11084_v30  ;;  %v7688_v30 = vld [vmem:[%s13305_s3 + $0x1f8] sm:$0xf0]  ;;  %v7678_v40 = vld [vmem:[%s13305_s3 + $0x1e0] sm:$0xf]  ;;  %v7615_v45 = vor.u32 %v9955_v39, %v7614_v38 }
  0xd8   : > { %v7691_v35 = vor.u32 %v9972_v17, %v7688_v30  ;;  %1774 = vmatpush.bf16.msra.mxu0 %v7627_v28  ;;  %v7679_v50 = vor.u32 %v9971_v46, %v7678_v40  ;;  %v817_v30 = vld [vmem:[#allocation3 + $0x20] sm:$0x44] }
  0xd9   : > { %1719 = vmatpush.bf16.msra.mxu2 %v7615_v45  ;;  %v823_v45 = vld [vmem:[#allocation4 + $0x18] sm:$0x44]  ;;  %v826_v46 = vld [vmem:[#allocation4 + $0x8] sm:$0x44] }
  0xda   : > { %1802 = vmatpush.bf16.msra.mxu1 %v7691_v35  ;;  %1747 = vmatpush.bf16.msra.mxu3 %v7679_v50  ;;  %v827_v0 = vsel %vm11290_vm3, 0, %v826_v46  ;;  %v9949_v46 = vld [vmem:[%s13305_s3 + $0x134] sm:$0xf0] }
  0xdb   : > { %828 = vst [vmem:[#allocation4 + $0x8] sm:$0x44] %v827_v0 }
  0xdc   : > { %1775 = vmatpush.bf16.msra.mxu0 %v7619_v56  ;;  %v824_v56 = vsel %vm11264_vm5, 0, %v823_v45 }
  0xdd   : > { %v11119_v51 = vpop.f32.mrf.mxu2  ;;  %v11123_v53 = vpop.f32.mrf.mxu0  ;;  %1720 = vmatpush.bf16.msra.mxu2 %v7607_v5  ;;  %825 = vst [vmem:[#allocation4 + $0x18] sm:$0x44] %v824_v56 }
  0xde   : > { %v11121_v52 = vpop.f32.mrf.mxu3  ;;  %v11125_v54 = vpop.f32.mrf.mxu1  ;;  %v1053_v7 = vadd.f32 %v11119_v51, %v11090_v33  ;;  %1803 = vmatpush.bf16.msra.mxu1 %v7683_v1  ;;  %v7671_v51 = vor.u32 %v9969_v10, %v7670_v6  ;;  %v7598_v10 = vld [vmem:[%s13305_s3 + $0x140] sm:$0xf] }
  0xdf   : > { %v1081_v11 = vadd.f32 %v11121_v52, %v11092_v29  ;;  %v7608_v29 = vld [vmem:[%s13305_s3 + $0x158] sm:$0xf0]  ;;  %v7662_v33 = vld [vmem:[%s13305_s3 + $0x1c0] sm:$0xf] }
  0xe0   : > { %1748 = vmatpush.bf16.msra.mxu3 %v7671_v51  ;;  %v7611_v35 = vor.u32 %v9952_v15, %v7608_v29 }
  0xe2   : > { %1776 = vmatpush.bf16.msra.mxu0 %v7611_v35 }
  0xe5   : > { %v11129_v55 = vpop.f32.mrf.mxu2  ;;  %v11138_v59 = vpop.f32.mrf.mxu0 }
  0xe6   : > { %v11136_v58 = vpop.f32.mrf.mxu3  ;;  %v11147_v62 = vpop.f32.mrf.mxu1  ;;  %v1056_v61 = vadd.f32 %v11129_v55, %v11094_v36  ;;  %v9968_v36 = vld [vmem:[%s13305_s3 + $0x1d4] sm:$0xf] }
  0xe7   : > { %v1084_v1 = vadd.f32 %v11136_v58, %v11096_v37  ;;  %v7672_v37 = vld [vmem:[%s13305_s3 + $0x1d8] sm:$0xf0] }
  0xed   : > { %v11180_v19 = vpop.f32.mrf.mxu2  ;;  %v1167_v24 = vpop.f32.mrf.mxu0 }
  0xee   : > { %v11191_v23 = vpop.f32.mrf.mxu3  ;;  %v1214_v26 = vadd.f32 %v1167_v24, %v1051_v18  ;;  %v1195_v27 = vpop.f32.mrf.mxu1  ;;  %v814_v24 = vld [vmem:[#allocation2 + $0x30] sm:$0x44]  ;;  %v1058_v40 = vadd.f32 %v11180_v19, %v11105_v41 }
  0xef   : > { %v1215_v34 = vadd.f32 %v1195_v27, %v1079_v22  ;;  %v807_v22 = vsel %vm11264_vm5, 0, %v806_v9  ;;  %v1296_v27 = vld [vmem:[#allocation2] sm:$0xff]  ;;  %v7675_v9 = vor.u32 %v9968_v36, %v7672_v37  ;;  %v7656_v36 = vld [vmem:[%s13305_s3 + $0x1b8] sm:$0xf0]  ;;  %v9943_v37 = vld [vmem:[%s13305_s3 + $0x104] sm:$0xf0] }
  0xf0   : > { %v1234_v43 = vadd.f32 %v11182_v16, %v1214_v26  ;;  %808 = vst [vmem:[#allocation2 + $0x20] sm:$0x44] %v807_v22 }
  0xf1   : > { %v1235_v49 = vadd.f32 %v11184_v20, %v1215_v34  ;;  %v820_v34 = vld [vmem:[#allocation3 + $0x30] sm:$0x44]  ;;  %1804 = vmatpush.bf16.msra.mxu1 %v7675_v9 }
  0xf2   : > { %v1248_v63 = vmax.f32 %v1234_v43, 0.0  ;;  %v818_v43 = vsel %vm11264_vm5, 0, %v817_v30  ;;  %v821_v50 = vsel %vm11290_vm3, 0, %v820_v34  ;;  %vm1333_vm5 = vcmask 1047557   ;;  %v9947_v9 = vld [vmem:[%s13305_s3 + $0x124] sm:$0xf0] }
  0xf3   : > { %v1249_v3 = vmax.f32 %v1235_v49, 0.0  ;;  %v815_v49 = vsel %vm11290_vm3, 0, %v814_v24  ;;  %819 = vst [vmem:[#allocation3 + $0x20] sm:$0x44] %v818_v43  ;;  %vm11415_vm12 = vmand %vm1333_vm5, %vm781_vm14  ;;  %vm1371_vm3 = vcmask 1047558  }
  0xf4   : > { %816 = vst [vmem:[#allocation2 + $0x30] sm:$0x44] %v815_v49  ;;  %v9965_v49 = vld [vmem:[%s13305_s3 + $0x1b4] sm:$0xf0]  ;;  %vm11445_vm14 = vmor %vm11415_vm12, %vm11403_vm4  ;;  %vm1380_vm12 = vcmask 1046532  }
  0xf5   : > { %v11251_v8 = vpop.f32.mrf.mxu2  ;;  %v1262_v12 = vpack.c.bf16 %v1249_v3, %v1248_v63  ;;  %v1169_v14 = vpop.f32.mrf.mxu0  ;;  %822 = vst [vmem:[#allocation3 + $0x30] sm:$0x44] %v821_v50  ;;  %v1086_v50 = vadd.f32 %v11191_v23, %v11111_v44  ;;  %v7592_v44 = vld [vmem:[%s13305_s3 + $0x138] sm:$0xf0]  ;;  %v9964_v23 = vld [vmem:[%s13305_s3 + $0x1b4] sm:$0xf]  ;;  %vm11536_vm5 = vmand %vm1369_vm10, %vm809_vm2 }
  0xf6   : > { %v11260_v13 = vpop.f32.mrf.mxu3  ;;  %v1216_v18 = vadd.f32 %v1169_v14, %v1053_v7  ;;  %v1197_v21 = vpop.f32.mrf.mxu1  ;;  %v9951_v14 = vld [vmem:[%s13305_s3 + $0x144] sm:$0xf0]  ;;  %vm1372_vm1 = vmand %vm1371_vm3, %vm811_vm0  ;;  %vm13343_vm10 = vsmask.f32 7424 }
  0xf7   : > { %v1272_v25 = vshrl.u32 %v1262_v12, 16  ;;  %v1217_v17 = vadd.f32 %v1197_v21, %v1081_v11  ;;  %v1275_v26 = vshll.u32 %v1262_v12, 16  ;;  %v1300_v11 = vld [vmem:[#allocation2 + $0x10] sm:$0x11]  ;;  %v7599_v52 = vor.u32 %v9951_v14, %v7598_v10  ;;  %v9950_v21 = vld [vmem:[%s13305_s3 + $0x144] sm:$0xf]  ;;  %vm1343_vm4 = vmand %vm1342_vm9, %vm773_vm6 }
  0xf8   : > { %v1236_v28 = vadd.f32 %v11182_v16, %v1216_v18  ;;  %v9967_v18 = vld [vmem:[%s13305_s3 + $0x1c4] sm:$0xf0]  ;;  %v1336_v10 = vld [vmem:[#allocation2 + $0x10] sm:$0xee]  ;;  %v7659_v14 = vor.u32 %v9964_v23, %v7656_v36  ;;  %vm11549_vm2 = vmor %vm1372_vm1, %vm11536_vm5  ;;  %vm1378_vm6 = vcmask 1042432  }
  0xf9   : > { %v11287_v38 = vrot.slane %v1272_v25, 7  ;;  %v1237_v39 = vadd.f32 %v11184_v20, %v1217_v17  ;;  %v7663_v17 = vor.u32 %v9967_v18, %v7662_v33  ;;  %1721 = vmatpush.bf16.msra.mxu2 %v7599_v52  ;;  %vm11555_vm0 = vmor %vm1343_vm4, %vm11530_vm15  ;;  %vm13345_vm15 = vsmask.f32 2304 }
  0xfa   : > { %v1250_v48 = vmax.f32 %v1236_v28, 0.0  ;;  %vm13344_vm3 = vmmov %vm13343_vm10  ;;  %vm13348_vm5 = vsmask.f32 6400 }
  0xfb   : > { %v1277_v57 = vor.u32 %v1275_v26, %v11287_v38  ;;  %v1251_v60 = vmax.f32 %v1237_v39, 0.0  ;;  %v1278_v24 = vrot.slane %v11287_v38, 4  ;;  %v7600_v26 = vld [vmem:[%s13305_s3 + $0x148] sm:$0xf0]  ;;  %v7590_v38 = vld [vmem:[%s13305_s3 + $0x130] sm:$0xf]  ;;  %1749 = vmatpush.bf16.msra.mxu3 %v7663_v17  ;;  %vm11591_vm9 = vmand %vm1378_vm6, %vm13345_vm15 }
  0xfc   : > { %v7603_v35 = vor.u32 %v9950_v21, %v7600_v26  ;;  %v7664_v39 = vld [vmem:[%s13305_s3 + $0x1c8] sm:$0xf0]  ;;  %v9962_v17 = vld [vmem:[%s13305_s3 + $0x1a4] sm:$0xf]  ;;  %v13330_v26 = vmov 0  ;;  %vm1381_vm1 = vmand %vm1380_vm12, %vm13348_vm5  ;;  %vm13355_vm15 = vcmask 1046528  }
  0xfd   : > { %v11313_v63 = vpop.f32.mrf.mxu2  ;;  %v11321_v2 = vsel %vm11300_vm13, %v1277_v57, %v1296_v27  ;;  %v1263_v3 = vpack.c.bf16 %v1251_v60, %v1250_v48  ;;  %v1172_v5 = vpop.f32.mrf.mxu0  ;;  %v9966_v27 = vld [vmem:[%s13305_s3 + $0x1c4] sm:$0xf]  ;;  %v7654_v48 = vld [vmem:[%s13305_s3 + $0x1b0] sm:$0xf]  ;;  %v13331_v26 = vsel %vm11445_vm14, 4294967295, %v13330_v26  ;;  %vm11613_vm4 = vmor %vm1381_vm1, %vm11591_vm9 }
  0xfe   : > { %v11323_v4 = vpop.f32.mrf.mxu3  ;;  %1298 = vst [vmem:[#allocation2] sm:$0xff] %v11321_v2  ;;  %v1218_v55 = vadd.f32 %v1172_v5, %v1056_v61  ;;  %v1200_v6 = vpop.f32.mrf.mxu1  ;;  %v7667_v45 = vor.u32 %v9966_v27, %v7664_v39  ;;  %1777 = vmatpush.bf16.msra.mxu0 %v7603_v35  ;;  %v9948_v61 = vld [vmem:[%s13305_s3 + $0x134] sm:$0xf]  ;;  %v7591_v5 = vor.u32 %v9949_v46, %v7590_v38  ;;  %vm13352_vm6 = vmmov %vm13344_vm3 }
  0xff   : > { %v1280_v58 = vshrl.u32 %v1263_v3, 16  ;;  %v1219_v7 = vadd.f32 %v1200_v6, %v1084_v1  ;;  %v1283_v15 = vshll.u32 %v1263_v3, 16  ;;  %13332 = vst [vmem:[#allocation19_spill] sm:$0xff] %v13331_v26  ;;  %v1061_v46 = vadd.f32 %v11251_v8, %v11123_v53  ;;  %vm13353_vm12 = vmmov %vm13344_vm3 }
 0x100   : > { %v1238_v12 = vadd.f32 %v11182_v16, %v1218_v55  ;;  %1805 = vmatpush.bf16.msra.mxu1 %v7667_v45  ;;  %v7582_v55 = vld [vmem:[%s13305_s3 + $0x120] sm:$0xf]  ;;  %1722 = vmatpush.bf16.msra.mxu2 %v7591_v5  ;;  %v7638_v45 = vld [vmem:[%s13305_s3 + $0x190] sm:$0xf]  ;;  %vm13356_vm9 = vmmov %vm13355_vm15 }
 0x101   : > { %v1282_v51 = vrot.slane %v1280_v58, 7  ;;  %v1239_v29 = vadd.f32 %v11184_v20, %v1219_v7  ;;  %v7655_v7 = vor.u32 %v9965_v49, %v7654_v48  ;;  %v7583_v33 = vor.u32 %v9947_v9, %v7582_v55  ;;  %v7630_v9 = vld [vmem:[%s13305_s3 + $0x180] sm:$0xf]  ;;  %vm13357_vm5 = vmmov %vm13356_vm9 }
 0x102   : > { %v1252_v25 = vmax.f32 %v1238_v12, 0.0  ;;  %v7595_v12 = vor.u32 %v9948_v61, %v7592_v44  ;;  %v1089_v48 = vadd.f32 %v11260_v13, %v11125_v54  ;;  %v7576_v54 = vld [vmem:[%s13305_s3 + $0x118] sm:$0xf0]  ;;  %vm13358_vm1 = vmmov %vm13357_vm5 }
 0x103   : > { %v1285_v28 = vor.u32 %v1283_v15, %v1282_v51  ;;  %v1287_v30 = vrot.slane %v1282_v51, 4  ;;  %v1253_v34 = vmax.f32 %v1239_v29, 0.0  ;;  %v7646_v51 = vld [vmem:[%s13305_s3 + $0x1a0] sm:$0xf]  ;;  %v9963_v15 = vld [vmem:[%s13305_s3 + $0x1a4] sm:$0xf0]  ;;  %1750 = vmatpush.bf16.msra.mxu3 %v7655_v7 }
 0x104   : > { %v9946_v29 = vld [vmem:[%s13305_s3 + $0x124] sm:$0xf]  ;;  %1778 = vmatpush.bf16.msra.mxu0 %v7595_v12  ;;  %1806 = vmatpush.bf16.msra.mxu1 %v7659_v14 }
 0x105   : > { %v11370_v43 = vpop.f32.mrf.mxu2  ;;  %v11385_v41 = vsel %vm11351_vm8, %v1278_v24, %v1285_v28  ;;  %v1301_v19 = vsel %vm11107_vm11, %v1287_v30, %v1300_v11  ;;  %v1264_v56 = vpack.c.bf16 %v1253_v34, %v1252_v25  ;;  %v1174_v60 = vpop.f32.mrf.mxu0  ;;  %v7647_v24 = vor.u32 %v9963_v15, %v7646_v51  ;;  %v7584_v25 = vld [vmem:[%s13305_s3 + $0x128] sm:$0xf0]  ;;  %v7574_v34 = vld [vmem:[%s13305_s3 + $0x110] sm:$0xf]  ;;  %1723 = vmatpush.bf16.msra.mxu2 %v7583_v33 }
 0x106   : > { %v11389_v57 = vpop.f32.mrf.mxu3  ;;  %1299 = vst [vmem:[#allocation2 + $0x8] sm:$0xff] %v11385_v41  ;;  %v1220_v1 = vadd.f32 %v1174_v60, %v1058_v40  ;;  %v1202_v3 = vpop.f32.mrf.mxu1  ;;  %v7587_v28 = vor.u32 %v9946_v29, %v7584_v25  ;;  %v7648_v30 = vld [vmem:[%s13305_s3 + $0x1a8] sm:$0xf0]  ;;  %v9945_v40 = vld [vmem:[%s13305_s3 + $0x114] sm:$0xf0]  ;;  %v1468_v12 = vunpack.c.l.b16 %v11385_v41  ;;  %v1469_v14 = vunpack.c.h.b16 %v11385_v41 }
 0x107   : > { %1302 = vst [vmem:[#allocation2 + $0x10] sm:$0x11] %v1301_v19  ;;  %v1304_v6 = vshrl.u32 %v1264_v56, 16  ;;  %v1221_v58 = vadd.f32 %v1202_v3, %v1086_v50  ;;  %v1307_v18 = vshll.u32 %v1264_v56, 16  ;;  %v7651_v38 = vor.u32 %v9962_v17, %v7648_v30  ;;  %v9961_v50 = vld [vmem:[%s13305_s3 + $0x194] sm:$0xf0]  ;;  %1751 = vmatpush.bf16.msra.mxu3 %v7647_v24 }
 0x108   : > { %v1240_v11 = vadd.f32 %v11182_v16, %v1220_v1  ;;  %v7575_v49 = vor.u32 %v9945_v40, %v7574_v34  ;;  %v9944_v19 = vld [vmem:[%s13305_s3 + $0x114] sm:$0xf]  ;;  %v7639_v53 = vor.u32 %v9961_v50, %v7638_v45  ;;  %1779 = vmatpush.bf16.msra.mxu0 %v7587_v28  ;;  %v7640_v3 = vld [vmem:[%s13305_s3 + $0x198] sm:$0xf0]  ;;  %v7632_v17 = vld [vmem:[%s13305_s3 + $0x188] sm:$0xf0]  ;;  %v1467_v28 = vunpack.c.h.b16 %v11321_v2 }
 0x109   : > { %v11432_v52 = vrot.slane %v1304_v6, 7  ;;  %v1241_v21 = vadd.f32 %v11184_v20, %v1221_v58  ;;  %1807 = vmatpush.bf16.msra.mxu1 %v7651_v38  ;;  %v7579_v0 = vor.u32 %v9944_v19, %v7576_v54  ;;  %v9960_v1 = vld [vmem:[%s13305_s3 + $0x194] sm:$0xf]  ;;  %v7566_v6 = vld [vmem:[%s13305_s3 + $0x100] sm:$0xf]  ;;  %v1063_v38 = vadd.f32 %v11313_v63, %v11138_v59 }
 0x10a   : > { %v1254_v27 = vmax.f32 %v1240_v11, 0.0  ;;  %v7643_v55 = vor.u32 %v9960_v1, %v7640_v3  ;;  %1724 = vmatpush.bf16.msra.mxu2 %v7575_v49  ;;  %v7567_v7 = vor.u32 %v9943_v37, %v7566_v6  ;;  %v9942_v11 = vld [vmem:[%s13305_s3 + $0x104] sm:$0xf]  ;;  %v11522_v45 = vpack.c.b16 %v1469_v14, %v1467_v28 }
 0x10b   : > { %v1309_v35 = vor.u32 %v1307_v18, %v11432_v52  ;;  %v1255_v39 = vmax.f32 %v1241_v21, 0.0  ;;  %1752 = vmatpush.bf16.msra.mxu3 %v7639_v53  ;;  %v7568_v18 = vld [vmem:[%s13305_s3 + $0x108] sm:$0xf0]  ;;  %v9958_v21 = vld [vmem:[%s13305_s3 + $0x184] sm:$0xf]  ;;  %v1310_v30 = vrot.slane %v11432_v52, 4 }
 0x10c   : > { %1780 = vmatpush.bf16.msra.mxu0 %v7579_v0  ;;  %v7571_v25 = vor.u32 %v9942_v11, %v7568_v18  ;;  %v13337_v54 = vmov 0  ;;  %v13340_v1 = vmov 0  ;;  %v1345_v3 = vld [vmem:[#allocation2 + $0x20] sm:$0x33] }
 0x10d   : > { %v1067_v56 = vpop.f32.mrf.mxu2  ;;  %v1337_v60 = vsel %vm11445_vm14, %v1309_v35, %v1336_v10  ;;  %v1265_v61 = vpack.c.bf16 %v1255_v39, %v1254_v27  ;;  %v1177_v44 = vpop.f32.mrf.mxu0  ;;  %v9959_v10 = vld [vmem:[%s13305_s3 + $0x184] sm:$0xf0]  ;;  %1808 = vmatpush.bf16.msra.mxu1 %v7643_v55  ;;  %v1466_v27 = vunpack.c.l.b16 %v11321_v2  ;;  %v7635_v39 = vor.u32 %v9958_v21, %v7632_v17 }
 0x10e   : > { %v1095_v8 = vpop.f32.mrf.mxu3  ;;  %1338 = vst [vmem:[#allocation2 + $0x10] sm:$0xee] %v1337_v60  ;;  %v1222_v13 = vadd.f32 %v1177_v44, %v1061_v46  ;;  %v1205_v23 = vpop.f32.mrf.mxu1  ;;  %v7631_v29 = vor.u32 %v9959_v10, %v7630_v9  ;;  %1725 = vmatpush.bf16.msra.mxu2 %v7567_v7  ;;  %v1091_v2 = vadd.f32 %v11323_v4, %v11147_v62  ;;  %v1503_v60 = vshll.u32 %v11522_v45, 16 }
 0x10f   : > { %v1312_v5 = vshrl.u32 %v1265_v61, 16  ;;  %v1223_v36 = vadd.f32 %v1205_v23, %v1089_v48  ;;  %v1315_v51 = vshll.u32 %v1265_v61, 16  ;;  %v11518_v40 = vpack.c.b16 %v1468_v12, %v1466_v27  ;;  %v1374_v8 = vld [vmem:[#allocation2 + $0x20] sm:$0xcc] }
 0x110   : > { %v1242_v58 = vadd.f32 %v11182_v16, %v1222_v13  ;;  %1753 = vmatpush.bf16.msra.mxu3 %v7631_v29  ;;  %1781 = vmatpush.bf16.msra.mxu0 %v7571_v25  ;;  %v13338_v54 = vsel %vm11549_vm2, 4294967295, %v13337_v54  ;;  %v13341_v1 = vsel %vm11555_vm0, 4294967295, %v13340_v1  ;;  %v1505_v37 = vrot.slane %v1503_v60, 1 }
 0x111   : > { %v1314_v33 = vrot.slane %v1312_v5, 7  ;;  %v1243_v15 = vadd.f32 %v11184_v20, %v1223_v36  ;;  %1809 = vmatpush.bf16.msra.mxu1 %v7635_v39  ;;  %v1491_v56 = vshll.u32 %v11518_v40, 16  ;;  %13339 = vst [vmem:[#allocation20_spill] sm:$0xff] %v13338_v54  ;;  %v1066_v36 = vadd.f32 %v11370_v43, %v11086_v31 }
 0x112   : > { %v1256_v24 = vmax.f32 %v1242_v58, 0.0  ;;  %13342 = vst [vmem:[#allocation21_spill] sm:$0xff] %v13341_v1  ;;  %v1094_v58 = vadd.f32 %v11389_v57, %v11088_v32  ;;  %v1501_v27 = vshrl.u32 %v11522_v45, 16 }
 0x113   : > { %v1317_v34 = vor.u32 %v1315_v51, %v1314_v33  ;;  %v1257_v35 = vmax.f32 %v1243_v15, 0.0  ;;  %v1319_v23 = vrot.slane %v1314_v33, 4  ;;  %v1493_v6 = vrot.slane %v1491_v56, 1 }
 0x115   : > { %v1318_v52 = vsel %vm11351_vm8, %v1310_v30, %v1317_v34  ;;  %v1266_v46 = vpack.c.bf16 %v1257_v35, %v1256_v24  ;;  %v1179_v63 = vpop.f32.mrf.mxu0  ;;  %v7550_v55 = vld [vmem:[#allocation2 + $0x10] sm:$0xf]  ;;  %v9906_v51 = vld [vmem:[#allocation2 + $0x14] sm:$0xf]  ;;  %v1489_v24 = vshrl.u32 %v11518_v40, 16 }
 0x116   : > { %1339 = vst [vmem:[#allocation2 + $0x18] sm:$0xff] %v1318_v52  ;;  %v1224_v62 = vadd.f32 %v1179_v63, %v1063_v38  ;;  %v1207_v4 = vpop.f32.mrf.mxu1  ;;  %v1506_v52 = vor.u32 %v1505_v37, %v1501_v27  ;;  %v9940_v37 = vld [vmem:[%s13305_s3 + $0xf4] sm:$0xf] }
 0x117   : > { %v1321_v49 = vshrl.u32 %v1266_v46, 16  ;;  %v1225_v50 = vadd.f32 %v1207_v4, %v1091_v2  ;;  %v1324_v44 = vshll.u32 %v1266_v46, 16  ;;  %v1494_v39 = vor.u32 %v1493_v6, %v1489_v24  ;;  %v7752_v6 = vld [vmem:[%s13305_s3 + $0x78] sm:$0xf0]  ;;  %v7744_v24 = vld [vmem:[%s13305_s3 + $0x68] sm:$0xf0] }
 0x118   : > { %v1244_v19 = vadd.f32 %v11182_v16, %v1224_v62 }
 0x119   : > { %v1323_v61 = vrot.slane %v1321_v49, 7  ;;  %v1245_v53 = vadd.f32 %v11184_v20, %v1225_v50  ;;  %v7736_v49 = vld [vmem:[%s13305_s3 + $0x58] sm:$0xf0] }
 0x11a   : > { %v1258_v13 = vmax.f32 %v1244_v19, 0.0 }
 0x11b   : > { %v1326_v0 = vor.u32 %v1324_v44, %v1323_v61  ;;  %v1259_v5 = vmax.f32 %v1245_v53, 0.0  ;;  %v1348_v59 = vrot.slane %v1323_v61, 4  ;;  %v7750_v61 = vld [vmem:[%s13305_s3 + $0x70] sm:$0xf]  ;;  %v9925_v44 = vld [vmem:[%s13305_s3 + $0x74] sm:$0xf0] }
 0x11c   : > { %v7751_v53 = vor.u32 %v9925_v44, %v7750_v61  ;;  %v9936_v61 = vld [vmem:[%s13305_s3 + $0xd4] sm:$0xf] }
 0x11d   : > { %v1327_v7 = vsel %vm11351_vm8, %v1319_v23, %v1326_v0  ;;  %v1375_v9 = vsel %vm11549_vm2, %v1326_v0, %v1374_v8  ;;  %v1267_v10 = vpack.c.bf16 %v1259_v5, %v1258_v13  ;;  %v1182_v11 = vpop.f32.mrf.mxu0  ;;  %v9907_v33 = vld [vmem:[#allocation2 + $0x14] sm:$0xf0]  ;;  %v7552_v15 = vld [vmem:[#allocation2 + $0x18] sm:$0xf0]  ;;  %v7814_v8 = vld [vmem:[%s13305_s3 + $0xf0] sm:$0xf] }
 0x11e   : > { %v1346_v31 = vsel %vm11555_vm0, %v1327_v7, %v1345_v3  ;;  %1376 = vst [vmem:[#allocation2 + $0x20] sm:$0xcc] %v1375_v9  ;;  %v1226_v43 = vadd.f32 %v1182_v11, %v1066_v36  ;;  %v1210_v29 = vpop.f32.mrf.mxu1  ;;  %v11569_v18 = vor.u32 %v9907_v33, %v7550_v55  ;;  %v11571_v32 = vor.u32 %v9906_v51, %v7552_v15  ;;  %v9941_v13 = vld [vmem:[%s13305_s3 + $0xf4] sm:$0xf0]  ;;  %v9924_v23 = vld [vmem:[%s13305_s3 + $0x74] sm:$0xf] }
 0x11f   : > { %1347 = vst [vmem:[#allocation2 + $0x20] sm:$0x33] %v1346_v31  ;;  %v1350_v57 = vshrl.u32 %v1267_v10, 16  ;;  %v1227_v21 = vadd.f32 %v1210_v29, %v1094_v58  ;;  %v1353_v34 = vshll.u32 %v1267_v10, 16  ;;  %v13349_v5 = vmov 0  ;;  %2003 = vmatpush.bf16.msrb.mxu2 %v7751_v53 }
 0x120   : > { %v1246_v25 = vadd.f32 %v11182_v16, %v1226_v43  ;;  %v1496_v17 = vshll.u32 %v11569_v18, 16  ;;  %v1508_v28 = vshll.u32 %v11571_v32, 16  ;;  %v13350_v5 = vsel %vm11613_vm4, 4294967295, %v13349_v5  ;;  %v1383_v36 = vld [vmem:[#allocation2 + $0x30] sm:$0x77] }
 0x121   : > { %v1352_v30 = vrot.slane %v1350_v57, 7  ;;  %v1247_v35 = vadd.f32 %v11184_v20, %v1227_v21  ;;  %13351 = vst [vmem:[#allocation22_spill] sm:$0xff] %v13350_v5  ;;  %v7815_v55 = vor.u32 %v9941_v13, %v7814_v8  ;;  %v7755_v58 = vor.u32 %v9924_v23, %v7752_v6  ;;  %v7816_v7 = vld [vmem:[%s13305_s3 + $0xf8] sm:$0xf0]  ;;  %v7742_v9 = vld [vmem:[%s13305_s3 + $0x60] sm:$0xf] }
 0x122   : > { %v1260_v38 = vmax.f32 %v1246_v25, 0.0  ;;  %v11579_v2 = vrot.slane %v1496_v17, 1  ;;  %v11581_v46 = vrot.slane %v1508_v28, 1  ;;  %v9923_v10 = vld [vmem:[%s13305_s3 + $0x64] sm:$0xf0]  ;;  %v7819_v15 = vor.u32 %v9940_v37, %v7816_v7 }
 0x123   : > { %v1355_v63 = vor.u32 %v1353_v34, %v1352_v30  ;;  %v1261_v16 = vmax.f32 %v1247_v35, 0.0  ;;  %v1357_v56 = vrot.slane %v1352_v30, 4  ;;  %2031 = vmatpush.bf16.msrb.mxu3 %v7815_v55  ;;  %v7743_v31 = vor.u32 %v9923_v10, %v7742_v9  ;;  %v7806_v43 = vld [vmem:[%s13305_s3 + $0xe0] sm:$0xf]  ;;  %v9939_v29 = vld [vmem:[%s13305_s3 + $0xe4] sm:$0xf0]  ;;  %2059 = vmatpush.bf16.msrb.mxu0 %v7755_v58 }
 0x124   : > { %v1499_v48 = vsel %vm13343_vm10, %v1494_v39, %v11579_v2  ;;  %v1511_v62 = vsel %vm13344_vm3, %v1506_v52, %v11581_v46  ;;  %v9922_v57 = vld [vmem:[%s13305_s3 + $0x64] sm:$0xf]  ;;  %v7807_v21 = vor.u32 %v9939_v29, %v7806_v43  ;;  %v7808_v17 = vld [vmem:[%s13305_s3 + $0xe8] sm:$0xf0]  ;;  %2087 = vmatpush.bf16.msrb.mxu1 %v7819_v15  ;;  %v7734_v39 = vld [vmem:[%s13305_s3 + $0x50] sm:$0xf] }
 0x125   : > { %v1356_v20 = vsel %vm11351_vm8, %v1348_v59, %v1355_v63  ;;  %v1268_v4 = vpack.c.bf16 %v1261_v16, %v1260_v38  ;;  %1726 = vmatmul.bf16.vlgmr.msra.gmra.mxu2 %v1499_v48  ;;  %1754 = vmatmul.bf16.vlgmr.msra.gmra.mxu3 %v1511_v62  ;;  %v1184_v50 = vpop.f32.mrf.mxu0  ;;  %v9938_v25 = vld [vmem:[%s13305_s3 + $0xe4] sm:$0xf]  ;;  %v7747_v34 = vor.u32 %v9922_v57, %v7744_v24  ;;  %v9921_v63 = vld [vmem:[%s13305_s3 + $0x54] sm:$0xf0]  ;;  %v7798_v16 = vld [vmem:[%s13305_s3 + $0xd0] sm:$0xf] }
 0x126   : > { %1377 = vst [vmem:[#allocation2 + $0x28] sm:$0xff] %v1356_v20  ;;  %1782 = vmatmul.bf16.vlgmr.msra.gmra.mxu0 %v1499_v48  ;;  %1810 = vmatmul.bf16.vlgmr.msra.gmra.mxu1 %v1511_v62  ;;  %v1212_v19 = vpop.f32.mrf.mxu1  ;;  %v7558_v33 = vld [vmem:[#allocation2 + $0x20] sm:$0xf]  ;;  %v9908_v51 = vld [vmem:[#allocation2 + $0x24] sm:$0xf]  ;;  %v7811_v35 = vor.u32 %v9938_v25, %v7808_v17  ;;  %v7735_v62 = vor.u32 %v9921_v63, %v7734_v39  ;;  %v1512_v50 = vshrl.u32 %v11569_v18, 16  ;;  %vm13354_vm10 = vmmov %vm13344_vm3 }
 0x127   : > { %v1359_v60 = vshrl.u32 %v1268_v4, 16  ;;  %v1362_v3 = vshll.u32 %v1268_v4, 16  ;;  %2004 = vmatpush.bf16.msrb.mxu2 %v7743_v31  ;;  %v9937_v48 = vld [vmem:[%s13305_s3 + $0xd4] sm:$0xf0]  ;;  %2032 = vmatpush.bf16.msrb.mxu3 %v7807_v21  ;;  %v9920_v4 = vld [vmem:[%s13305_s3 + $0x54] sm:$0xf] }
 0x128   : > { %v7799_v20 = vor.u32 %v9937_v48, %v7798_v16  ;;  %2060 = vmatpush.bf16.msrb.mxu0 %v7747_v34  ;;  %2088 = vmatpush.bf16.msrb.mxu1 %v7811_v35  ;;  %v7739_v44 = vor.u32 %v9920_v4, %v7736_v49  ;;  %v7800_v53 = vld [vmem:[%s13305_s3 + $0xd8] sm:$0xf0]  ;;  %v7726_v8 = vld [vmem:[%s13305_s3 + $0x40] sm:$0xf]  ;;  %v9919_v13 = vld [vmem:[%s13305_s3 + $0x44] sm:$0xf0]  ;;  %v1514_v23 = vor.u32 %v1512_v50, %v11579_v2 }
 0x129   : > { %v1361_v0 = vrot.slane %v1359_v60, 7  ;;  %v7790_v55 = vld [vmem:[%s13305_s3 + $0xc0] sm:$0xf]  ;;  %v9935_v6 = vld [vmem:[%s13305_s3 + $0xc4] sm:$0xf0]  ;;  %v7803_v37 = vor.u32 %v9936_v61, %v7800_v53  ;;  %v7727_v58 = vor.u32 %v9919_v13, %v7726_v8 }
 0x12a   : > { %v9918_v2 = vld [vmem:[%s13305_s3 + $0x44] sm:$0xf]  ;;  %v7791_v10 = vor.u32 %v9935_v6, %v7790_v55  ;;  %v7718_v31 = vld [vmem:[%s13305_s3 + $0x30] sm:$0xf]  ;;  %v9917_v43 = vld [vmem:[%s13305_s3 + $0x34] sm:$0xf0] }
 0x12b   : > { %v1364_v11 = vor.u32 %v1362_v3, %v1361_v0  ;;  %2005 = vmatpush.bf16.msrb.mxu2 %v7735_v62  ;;  %2033 = vmatpush.bf16.msrb.mxu3 %v7799_v20  ;;  %v7719_v24 = vor.u32 %v9917_v43, %v7718_v31  ;;  %v7782_v25 = vld [vmem:[%s13305_s3 + $0xb0] sm:$0xf]  ;;  %v9933_v17 = vld [vmem:[%s13305_s3 + $0xb4] sm:$0xf0]  ;;  %v9932_v34 = vld [vmem:[%s13305_s3 + $0xb4] sm:$0xf] }
 0x12c   : > { %2061 = vmatpush.bf16.msrb.mxu0 %v7739_v44  ;;  %2089 = vmatpush.bf16.msrb.mxu1 %v7803_v37  ;;  %v7784_v35 = vld [vmem:[%s13305_s3 + $0xb8] sm:$0xf0]  ;;  %v7710_v16 = vld [vmem:[%s13305_s3 + $0x20] sm:$0xf]  ;;  %v9915_v48 = vld [vmem:[%s13305_s3 + $0x24] sm:$0xf0] }
 0x12d   : > { %v1365_v27 = vsel %vm11351_vm8, %v1357_v56, %v1364_v11  ;;  %v9909_v28 = vld [vmem:[#allocation2 + $0x24] sm:$0xf0]  ;;  %v7560_v30 = vld [vmem:[#allocation2 + $0x28] sm:$0xf0]  ;;  %v1520_v56 = vshrl.u32 %v11571_v32, 16 }
 0x12e   : > { %v1384_v38 = vsel %vm11613_vm4, %v1365_v27, %v1383_v36  ;;  %v11657_v52 = vor.u32 %v9909_v28, %v7558_v33  ;;  %v11659_v59 = vor.u32 %v9908_v51, %v7560_v30  ;;  %v9934_v11 = vld [vmem:[%s13305_s3 + $0xc4] sm:$0xf]  ;;  %v7792_v33 = vld [vmem:[%s13305_s3 + $0xc8] sm:$0xf0]  ;;  %v9916_v27 = vld [vmem:[%s13305_s3 + $0x34] sm:$0xf]  ;;  %v7783_v28 = vor.u32 %v9933_v17, %v7782_v25 }
 0x12f   : > { %1385 = vst [vmem:[#allocation2 + $0x30] sm:$0x77] %v1384_v38  ;;  %v1522_v3 = vor.u32 %v1520_v56, %v11581_v46  ;;  %v7728_v46 = vld [vmem:[%s13305_s3 + $0x48] sm:$0xf0]  ;;  %2006 = vmatpush.bf16.msrb.mxu2 %v7727_v58  ;;  %v7795_v21 = vor.u32 %v9934_v11, %v7792_v33  ;;  %2034 = vmatpush.bf16.msrb.mxu3 %v7791_v10  ;;  %v7720_v30 = vld [vmem:[%s13305_s3 + $0x38] sm:$0xf0] }
 0x130   : > { %v1516_v19 = vshll.u32 %v11657_v52, 16  ;;  %v1524_v60 = vshll.u32 %v11659_v59, 16  ;;  %v7731_v51 = vor.u32 %v9918_v2, %v7728_v46  ;;  %v7723_v63 = vor.u32 %v9916_v27, %v7720_v30  ;;  %v7774_v62 = vld [vmem:[%s13305_s3 + $0xa0] sm:$0xf]  ;;  %v9931_v20 = vld [vmem:[%s13305_s3 + $0xa4] sm:$0xf0] }
 0x131   : > { %v9914_v4 = vld [vmem:[%s13305_s3 + $0x24] sm:$0xf]  ;;  %v7712_v49 = vld [vmem:[%s13305_s3 + $0x28] sm:$0xf0]  ;;  %2090 = vmatpush.bf16.msrb.mxu1 %v7795_v21  ;;  %v7787_v56 = vor.u32 %v9932_v34, %v7784_v35  ;;  %v7775_v61 = vor.u32 %v9931_v20, %v7774_v62  ;;  %v7702_v8 = vld [vmem:[%s13305_s3 + $0x10] sm:$0xf] }
 0x132   : > { %v11693_v0 = vrot.slane %v1516_v19, 1  ;;  %v11696_v36 = vrot.slane %v1524_v60, 1  ;;  %2062 = vmatpush.bf16.msrb.mxu0 %v7731_v51  ;;  %v7711_v60 = vor.u32 %v9915_v48, %v7710_v16  ;;  %v9930_v44 = vld [vmem:[%s13305_s3 + $0xa4] sm:$0xf]  ;;  %v7776_v53 = vld [vmem:[%s13305_s3 + $0xa8] sm:$0xf0]  ;;  %v7715_v13 = vor.u32 %v9914_v4, %v7712_v49 }
 0x133   : > { %2007 = vmatpush.bf16.msrb.mxu2 %v7719_v24  ;;  %2035 = vmatpush.bf16.msrb.mxu3 %v7783_v28  ;;  %v9929_v55 = vld [vmem:[%s13305_s3 + $0x94] sm:$0xf0]  ;;  %v1528_v6 = vshrl.u32 %v11657_v52, 16  ;;  %v1536_v37 = vshrl.u32 %v11659_v59, 16  ;;  %v7779_v46 = vor.u32 %v9930_v44, %v7776_v53  ;;  %v9928_v33 = vld [vmem:[%s13305_s3 + $0x94] sm:$0xf] }
 0x134   : > { %v1519_v7 = vsel %vm13352_vm6, %v1514_v23, %v11693_v0  ;;  %v1527_v9 = vsel %vm13353_vm12, %v1522_v3, %v11696_v36  ;;  %v9913_v23 = vld [vmem:[%s13305_s3 + $0x14] sm:$0xf0]  ;;  %v7766_v3 = vld [vmem:[%s13305_s3 + $0x90] sm:$0xf]  ;;  %v7768_v51 = vld [vmem:[%s13305_s3 + $0x98] sm:$0xf0] }
 0x135   : > { %1731 = vmatmul.bf16.gmra.mxu2 %v1519_v7  ;;  %1759 = vmatmul.bf16.gmra.mxu3 %v1527_v9  ;;  %v7703_v10 = vor.u32 %v9913_v23, %v7702_v8  ;;  %v7767_v11 = vor.u32 %v9929_v55, %v7766_v3  ;;  %v1530_v31 = vor.u32 %v1528_v6, %v11693_v0  ;;  %v9911_v43 = vld [vmem:[%s13305_s3 + $0x4] sm:$0xf0]  ;;  %v9910_v17 = vld [vmem:[%s13305_s3 + $0x4] sm:$0xf]  ;;  %v7696_v34 = vld [vmem:[%s13305_s3 + $0x8] sm:$0xf0] }
 0x136   : > { %1787 = vmatmul.bf16.gmra.mxu0 %v1519_v7  ;;  %1815 = vmatmul.bf16.gmra.mxu1 %v1527_v9  ;;  %v1425_v15 = vld [vmem:[#allocation2 + $0x30] sm:$0x77]  ;;  %v7704_v9 = vld [vmem:[%s13305_s3 + $0x18] sm:$0xf0]  ;;  %v1538_v21 = vor.u32 %v1536_v37, %v11696_v36  ;;  %v7771_v0 = vor.u32 %v9928_v33, %v7768_v51  ;;  %v9926_v36 = vld [vmem:[%s13305_s3 + $0x84] sm:$0xf] }
 0x137   : > { %v1478_v29 = vunpack.c.l.b16 %v1425_v15  ;;  %v1479_v57 = vunpack.c.h.b16 %v1425_v15  ;;  %2063 = vmatpush.bf16.msrb.mxu0 %v7723_v63  ;;  %2091 = vmatpush.bf16.msrb.mxu1 %v7787_v56  ;;  %v9912_v7 = vld [vmem:[%s13305_s3 + $0x14] sm:$0xf]  ;;  %v7694_v15 = vld [vmem:[%s13305_s3] sm:$0xf]  ;;  %v7760_v35 = vld [vmem:[%s13305_s3 + $0x88] sm:$0xf0]  ;;  %v7699_v63 = vor.u32 %v9910_v17, %v7696_v34 }
 0x138   : > { %2008 = vmatpush.bf16.msrb.mxu2 %v7711_v60  ;;  %2036 = vmatpush.bf16.msrb.mxu3 %v7775_v61  ;;  %v7707_v25 = vor.u32 %v9912_v7, %v7704_v9  ;;  %v7695_v28 = vor.u32 %v9911_v43, %v7694_v15  ;;  %v7763_v16 = vor.u32 %v9926_v36, %v7760_v35  ;;  %v7910_v49 = vld [vmem:[%s13305_s3 + $0x270] sm:$0xf]  ;;  %v10005_v60 = vld [vmem:[%s13305_s3 + $0x2f4] sm:$0xf0]  ;;  %v10004_v53 = vld [vmem:[%s13305_s3 + $0x2f4] sm:$0xf] }
 0x139   : > { %v11744_v39 = vpack.c.b16 %v1478_v29, %v1478_v29  ;;  %v11746_v38 = vpack.c.b16 %v1479_v57, %v1479_v57  ;;  %v7758_v29 = vld [vmem:[%s13305_s3 + $0x80] sm:$0xf]  ;;  %v9927_v57 = vld [vmem:[%s13305_s3 + $0x84] sm:$0xf0]  ;;  %v7976_v8 = vld [vmem:[%s13305_s3 + $0x2f8] sm:$0xf0] }
 0x13a   : > { %v7759_v30 = vor.u32 %v9927_v57, %v7758_v29  ;;  %v7979_v23 = vor.u32 %v10004_v53, %v7976_v8  ;;  %v9987_v3 = vld [vmem:[%s13305_s3 + $0x264] sm:$0xf0]  ;;  %v7966_v55 = vld [vmem:[%s13305_s3 + $0x2e0] sm:$0xf]  ;;  %v10002_v7 = vld [vmem:[%s13305_s3 + $0x2e4] sm:$0xf] }
 0x13b   : > { %v1532_v50 = vshll.u32 %v11744_v39, 16  ;;  %v1540_v19 = vshll.u32 %v11746_v38, 16  ;;  %2064 = vmatpush.bf16.msrb.mxu0 %v7715_v13  ;;  %2092 = vmatpush.bf16.msrb.mxu1 %v7779_v46  ;;  %v1544_v48 = vshrl.u32 %v11744_v39, 16  ;;  %v1547_v62 = vshrl.u32 %v11746_v38, 16  ;;  %v7902_v13 = vld [vmem:[%s13305_s3 + $0x260] sm:$0xf]  ;;  %vm13359_vm6 = vmmov %vm13358_vm1 }
 0x13c   : > { %2009 = vmatpush.bf16.msrb.mxu2 %v7703_v10  ;;  %2037 = vmatpush.bf16.msrb.mxu3 %v7767_v11  ;;  %v10003_v6 = vld [vmem:[%s13305_s3 + $0x2e4] sm:$0xf0]  ;;  %v7903_v37 = vor.u32 %v9987_v3, %v7902_v13  ;;  %v7904_v46 = vld [vmem:[%s13305_s3 + $0x268] sm:$0xf0]  ;;  %v7894_v11 = vld [vmem:[%s13305_s3 + $0x250] sm:$0xf] }
 0x13d   : > { %v1534_v58 = vrot.slane %v1532_v50, 1  ;;  %v1542_v2 = vrot.slane %v1540_v19, 1  ;;  %v9989_v50 = vld [vmem:[%s13305_s3 + $0x274] sm:$0xf0]  ;;  %v7974_v19 = vld [vmem:[%s13305_s3 + $0x2f0] sm:$0xf]  ;;  %vm13360_vm12 = vmmov %vm13358_vm1 }
 0x13e   : > { %v7911_v56 = vor.u32 %v9989_v50, %v7910_v49  ;;  %v7975_v61 = vor.u32 %v10005_v60, %v7974_v19  ;;  %v7968_v10 = vld [vmem:[%s13305_s3 + $0x2e8] sm:$0xf0]  ;;  %v9985_v33 = vld [vmem:[%s13305_s3 + $0x254] sm:$0xf0]  ;;  %v7958_v15 = vld [vmem:[%s13305_s3 + $0x2d0] sm:$0xf] }
 0x13f   : > { %v1535_v24 = vsel %vm13354_vm10, %v1530_v31, %v1534_v58  ;;  %v1543_v27 = vsel %vm13344_vm3, %v1538_v21, %v1542_v2  ;;  %2065 = vmatpush.bf16.msrb.mxu0 %v7707_v25  ;;  %2093 = vmatpush.bf16.msrb.mxu1 %v7771_v0  ;;  %v1546_v20 = vor.u32 %v1544_v48, %v1534_v58  ;;  %v10001_v31 = vld [vmem:[%s13305_s3 + $0x2d4] sm:$0xf0]  ;;  %v9984_v43 = vld [vmem:[%s13305_s3 + $0x254] sm:$0xf]  ;;  %v7896_v57 = vld [vmem:[%s13305_s3 + $0x258] sm:$0xf0] }
 0x140   : > { %2010 = vmatpush.bf16.msrb.mxu2 %v7695_v28  ;;  %2038 = vmatpush.bf16.msrb.mxu3 %v7759_v30  ;;  %v1549_v4 = vor.u32 %v1547_v62, %v1542_v2  ;;  %v7967_v58 = vor.u32 %v10003_v6, %v7966_v55  ;;  %v9986_v2 = vld [vmem:[%s13305_s3 + $0x264] sm:$0xf]  ;;  %v7971_v51 = vor.u32 %v10002_v7, %v7968_v10  ;;  %v10000_v21 = vld [vmem:[%s13305_s3 + $0x2d4] sm:$0xf]  ;;  %v9983_v28 = vld [vmem:[%s13305_s3 + $0x244] sm:$0xf0] }
 0x141   : > { %v7907_v9 = vor.u32 %v9986_v2, %v7904_v46  ;;  %v7895_v29 = vor.u32 %v9985_v33, %v7894_v11  ;;  %v7959_v25 = vor.u32 %v10001_v31, %v7958_v15  ;;  %v7899_v0 = vor.u32 %v9984_v43, %v7896_v57  ;;  %v7950_v30 = vld [vmem:[%s13305_s3 + $0x2c0] sm:$0xf]  ;;  %v9999_v34 = vld [vmem:[%s13305_s3 + $0x2c4] sm:$0xf0]  ;;  %v9982_v36 = vld [vmem:[%s13305_s3 + $0x244] sm:$0xf] }
 0x142   : > { %v7888_v35 = vld [vmem:[%s13305_s3 + $0x248] sm:$0xf0]  ;;  %v7951_v62 = vor.u32 %v9999_v34, %v7950_v30  ;;  %v7878_v49 = vld [vmem:[%s13305_s3 + $0x230] sm:$0xf]  ;;  %v9981_v50 = vld [vmem:[%s13305_s3 + $0x234] sm:$0xf0] }
 0x143   : > { %2066 = vmatpush.bf16.msrb.mxu0 %v7699_v63  ;;  %2094 = vmatpush.bf16.msrb.mxu1 %v7763_v16  ;;  %v9998_v63 = vld [vmem:[%s13305_s3 + $0x2c4] sm:$0xf]  ;;  %v7952_v16 = vld [vmem:[%s13305_s3 + $0x2c8] sm:$0xf0]  ;;  %v7942_v19 = vld [vmem:[%s13305_s3 + $0x2b0] sm:$0xf] }
 0x144   : > { %2336 = vmatpush.bf16.msra.mxu2 %v7911_v56  ;;  %2364 = vmatpush.bf16.msra.mxu3 %v7975_v61  ;;  %v7879_v56 = vor.u32 %v9981_v50, %v7878_v49  ;;  %v9997_v60 = vld [vmem:[%s13305_s3 + $0x2b4] sm:$0xf0]  ;;  %v9996_v53 = vld [vmem:[%s13305_s3 + $0x2b4] sm:$0xf]  ;;  %v7944_v8 = vld [vmem:[%s13305_s3 + $0x2b8] sm:$0xf0] }
 0x145   : > { %1736 = vmatmul.bf16.gmra.mxu2 %v1535_v24  ;;  %1764 = vmatmul.bf16.gmra.mxu3 %v1543_v27  ;;  %v7943_v61 = vor.u32 %v9997_v60, %v7942_v19  ;;  %v7870_v13 = vld [vmem:[%s13305_s3 + $0x220] sm:$0xf]  ;;  %v9979_v3 = vld [vmem:[%s13305_s3 + $0x224] sm:$0xf0]  ;;  %v9994_v2 = vld [vmem:[%s13305_s3 + $0x2a4] sm:$0xf] }
 0x146   : > { %1792 = vmatmul.bf16.gmra.mxu0 %v1535_v24  ;;  %1820 = vmatmul.bf16.gmra.mxu1 %v1543_v27  ;;  %v7960_v24 = vld [vmem:[%s13305_s3 + $0x2d8] sm:$0xf0]  ;;  %v7886_v27 = vld [vmem:[%s13305_s3 + $0x240] sm:$0xf]  ;;  %v9995_v6 = vld [vmem:[%s13305_s3 + $0x2a4] sm:$0xf0]  ;;  %v7871_v46 = vor.u32 %v9979_v3, %v7870_v13 }
 0x147   : > { %2420 = vmatpush.bf16.msra.mxu1 %v7979_v23  ;;  %v7963_v17 = vor.u32 %v10000_v21, %v7960_v24  ;;  %v7887_v48 = vor.u32 %v9983_v28, %v7886_v27  ;;  %v7947_v23 = vor.u32 %v9996_v53, %v7944_v8  ;;  %v7934_v55 = vld [vmem:[%s13305_s3 + $0x2a0] sm:$0xf]  ;;  %v7862_v10 = vld [vmem:[%s13305_s3 + $0x210] sm:$0xf]  ;;  %v9977_v11 = vld [vmem:[%s13305_s3 + $0x214] sm:$0xf0] }
 0x148   : > { %2337 = vmatpush.bf16.msra.mxu2 %v7903_v37  ;;  %2365 = vmatpush.bf16.msra.mxu3 %v7967_v58  ;;  %v9978_v37 = vld [vmem:[%s13305_s3 + $0x224] sm:$0xf]  ;;  %v7872_v58 = vld [vmem:[%s13305_s3 + $0x228] sm:$0xf0]  ;;  %v7935_v7 = vor.u32 %v9995_v6, %v7934_v55  ;;  %v7926_v15 = vld [vmem:[%s13305_s3 + $0x290] sm:$0xf]  ;;  %v7863_v24 = vor.u32 %v9977_v11, %v7862_v10 }
 0x149   : > { %v7875_v33 = vor.u32 %v9978_v37, %v7872_v58  ;;  %v9993_v31 = vld [vmem:[%s13305_s3 + $0x294] sm:$0xf0]  ;;  %v9976_v43 = vld [vmem:[%s13305_s3 + $0x214] sm:$0xf]  ;;  %v7928_v21 = vld [vmem:[%s13305_s3 + $0x298] sm:$0xf0] }
 0x14a   : > { %v9992_v57 = vld [vmem:[%s13305_s3 + $0x294] sm:$0xf]  ;;  %v7854_v27 = vld [vmem:[%s13305_s3 + $0x200] sm:$0xf]  ;;  %v9975_v28 = vld [vmem:[%s13305_s3 + $0x204] sm:$0xf0] }
 0x14b   : > { %2421 = vmatpush.bf16.msra.mxu1 %v7971_v51  ;;  %v7918_v30 = vld [vmem:[%s13305_s3 + $0x280] sm:$0xf]  ;;  %v7855_v34 = vor.u32 %v9975_v28, %v7854_v27  ;;  %v1392_v49 = vld [vmem:[#allocation2 + $0x30] sm:$0x33]  ;;  %v2155_v8 = vrot.slane %v11569_v18, 1  ;;  %v2158_v13 = vrot.slane %v11571_v32, 1  ;;  %vm13362_vm10 = vmmov %vm13344_vm3 }
 0x14c   : > { %2338 = vmatpush.bf16.msra.mxu2 %v7895_v29  ;;  %2366 = vmatpush.bf16.msra.mxu3 %v7959_v25  ;;  %v7864_v29 = vld [vmem:[%s13305_s3 + $0x218] sm:$0xf0]  ;;  %v7927_v25 = vor.u32 %v9993_v31, %v7926_v15  ;;  %v1831_v50 = vunpack.c.l.b16 %v1392_v49  ;;  %v1832_v19 = vunpack.c.h.b16 %v1392_v49  ;;  %v2162_v10 = vrot.slane %v11659_v59, 1  ;;  %v3695_v26 = vld [vmem:[#allocation2 + $0x30] sm:$0x77] }
 0x14e   : > { %v1834_v60 = vpack.c.b16 %v1832_v19, %v1832_v19  ;;  %v2163_v31 = vsel %vm13358_vm1, %v2158_v13, %v2162_v10 }
 0x14f   : > { %2422 = vmatpush.bf16.msra.mxu1 %v7963_v17  ;;  %v7931_v17 = vor.u32 %v9992_v57, %v7928_v21 }
 0x150   : > { %2339 = vmatpush.bf16.msra.mxu2 %v7887_v48  ;;  %2367 = vmatpush.bf16.msra.mxu3 %v7951_v62  ;;  %v9990_v62 = vld [vmem:[%s13305_s3 + $0x284] sm:$0xf] }
 0x154   : > { %2340 = vmatpush.bf16.msra.mxu2 %v7879_v56  ;;  %2368 = vmatpush.bf16.msra.mxu3 %v7943_v61  ;;  %v1833_v56 = vpack.c.b16 %v1831_v50, %v1831_v50 }
 0x155   : > { %1741 = vmatmul.bf16.gmra.mxu2 %v1546_v20  ;;  %1769 = vmatmul.bf16.gmra.mxu3 %v1549_v4 }
 0x156   : > { %1797 = vmatmul.bf16.gmra.mxu0 %v1546_v20  ;;  %1825 = vmatmul.bf16.gmra.mxu1 %v1549_v4  ;;  %v7891_v20 = vor.u32 %v9982_v36, %v7888_v35  ;;  %v7955_v4 = vor.u32 %v9998_v63, %v7952_v16  ;;  %v9991_v36 = vld [vmem:[%s13305_s3 + $0x284] sm:$0xf0]  ;;  %v9974_v35 = vld [vmem:[%s13305_s3 + $0x204] sm:$0xf]  ;;  %v7856_v63 = vld [vmem:[%s13305_s3 + $0x208] sm:$0xf0] }
 0x157   : > { %v7919_v16 = vor.u32 %v9991_v36, %v7918_v30  ;;  %v7859_v48 = vor.u32 %v9974_v35, %v7856_v63 }
 0x158   : > { %2423 = vmatpush.bf16.msra.mxu1 %v7955_v4  ;;  %2341 = vmatpush.bf16.msra.mxu2 %v7871_v46 }
 0x159   : > { %2369 = vmatpush.bf16.msra.mxu3 %v7935_v7 }
 0x15c   : > { %2424 = vmatpush.bf16.msra.mxu1 %v7947_v23  ;;  %2342 = vmatpush.bf16.msra.mxu2 %v7863_v24 }
 0x15d   : > { %2370 = vmatpush.bf16.msra.mxu3 %v7927_v25  ;;  %v2164_v25 = vrot.slane %v11744_v39, 1 }
 0x160   : > { %2343 = vmatpush.bf16.msra.mxu2 %v7855_v34 }
 0x161   : > { %2371 = vmatpush.bf16.msra.mxu3 %v7919_v16 }
 0x165   : > { %2011 = vmatmul.bf16.vlgmr.msrb.gmra.mxu2 %v11518_v40  ;;  %2039 = vmatmul.bf16.vlgmr.msrb.gmra.mxu3 %v11522_v45 }
 0x166   : > { %2067 = vmatmul.bf16.vlgmr.msrb.gmra.mxu0 %v11518_v40  ;;  %2095 = vmatmul.bf16.vlgmr.msrb.gmra.mxu1 %v11522_v45  ;;  %v9988_v40 = vld [vmem:[%s13305_s3 + $0x274] sm:$0xf]  ;;  %v7912_v45 = vld [vmem:[%s13305_s3 + $0x278] sm:$0xf0] }
 0x167   : > { %v7915_v44 = vor.u32 %v9988_v40, %v7912_v45  ;;  %v9980_v40 = vld [vmem:[%s13305_s3 + $0x234] sm:$0xf]  ;;  %v7880_v45 = vld [vmem:[%s13305_s3 + $0x238] sm:$0xf0] }
 0x169   : > { %2392 = vmatpush.bf16.msra.mxu0 %v7915_v44  ;;  %v7883_v44 = vor.u32 %v9980_v40, %v7880_v45  ;;  %v2115_v40 = vld [vmem:[#allocation2] sm:$0xee] }
 0x16a   : > { %v2150_v45 = vunpack.c.l.b16 %v2115_v40  ;;  %v2151_v61 = vunpack.c.h.b16 %v2115_v40 }
 0x16c   : > { %v2153_v53 = vpack.c.b16 %v1469_v14, %v2151_v61 }
 0x16d   : > { %2393 = vmatpush.bf16.msra.mxu0 %v7907_v9  ;;  %v7936_v9 = vld [vmem:[%s13305_s3 + $0x2a8] sm:$0xf0] }
 0x16e   : > { %v7939_v51 = vor.u32 %v9994_v2, %v7936_v9  ;;  %v2157_v3 = vrot.slane %v2153_v53, 1  ;;  %v2160_v9 = vrot.slane %v11657_v52, 1 }
 0x170   : > { %2425 = vmatpush.bf16.msra.mxu1 %v7939_v51  ;;  %v2159_v2 = vsel %vm13356_vm9, %v2157_v3, %v2158_v13  ;;  %v2161_v15 = vsel %vm13357_vm5, %v2155_v8, %v2160_v9  ;;  %v2165_v30 = vsel %vm13359_vm6, %v2160_v9, %v2164_v25  ;;  %vm13365_vm9 = vmmov %vm13344_vm3 }
 0x171   : > { %2394 = vmatpush.bf16.msra.mxu0 %v7899_v0  ;;  %v7867_v0 = vor.u32 %v9976_v43, %v7864_v29  ;;  %vm13366_vm5 = vmmov %vm13344_vm3 }
 0x172   : > { %vm13367_vm6 = vmmov %vm13358_vm1 }
 0x174   : > { %2426 = vmatpush.bf16.msra.mxu1 %v7931_v17 }
 0x175   : > { %2016 = vmatmul.bf16.gmra.mxu2 %v11569_v18  ;;  %2044 = vmatmul.bf16.gmra.mxu3 %v11571_v32 }
 0x176   : > { %2072 = vmatmul.bf16.gmra.mxu0 %v11569_v18  ;;  %2100 = vmatmul.bf16.gmra.mxu1 %v11571_v32 }
 0x177   : > { %2395 = vmatpush.bf16.msra.mxu0 %v7891_v20  ;;  %v7920_v20 = vld [vmem:[%s13305_s3 + $0x288] sm:$0xf0] }
 0x178   : > { %v7923_v4 = vor.u32 %v9990_v62, %v7920_v20 }
 0x17a   : > { %2427 = vmatpush.bf16.msra.mxu1 %v7923_v4 }
 0x17b   : > { %2396 = vmatpush.bf16.msra.mxu0 %v7883_v44  ;;  %v2152_v44 = vpack.c.b16 %v1468_v12, %v2150_v45 }
 0x17d   : > { %v2154_v23 = vrot.slane %v2152_v44, 1 }
 0x17f   : > { %2397 = vmatpush.bf16.msra.mxu0 %v7875_v33  ;;  %v2156_v58 = vsel %vm13355_vm15, %v2154_v23, %v2155_v8  ;;  %vm13364_vm15 = vmmov %vm13344_vm3 }
 0x183   : > { %2398 = vmatpush.bf16.msra.mxu0 %v7867_v0  ;;  %v2166_v0 = vrot.slane %v11746_v38, 1 }
 0x185   : > { %2021 = vmatmul.bf16.gmra.mxu2 %v11657_v52  ;;  %2049 = vmatmul.bf16.gmra.mxu3 %v11659_v59  ;;  %v2167_v34 = vsel %vm13360_vm12, %v2162_v10, %v2166_v0  ;;  %vm13368_vm12 = vmmov %vm13358_vm1 }
 0x186   : > { %2077 = vmatmul.bf16.gmra.mxu0 %v11657_v52  ;;  %2105 = vmatmul.bf16.gmra.mxu1 %v11659_v59 }
 0x187   : > { %2399 = vmatpush.bf16.msra.mxu0 %v7859_v48 }
 0x195   : > { %2026 = vmatmul.bf16.gmra.mxu2 %v1833_v56  ;;  %2054 = vmatmul.bf16.gmra.mxu3 %v1834_v60 }
 0x196   : > { %2082 = vmatmul.bf16.gmra.mxu0 %v1833_v56  ;;  %2110 = vmatmul.bf16.gmra.mxu1 %v1834_v60 }
 0x1a3   : > { %v1783_v55 = vpop.f32.mrf.mxu0  ;;  %v1811_v6 = vpop.f32.mrf.mxu1 }
 0x1a4   : > { %v12040_v37 = vadd.f32 %v1811_v6, %v1783_v55 }
 0x1a5   : > { %2344 = vmatmul.bf16.vlgmr.msra.gmra.mxu2 %v2156_v58  ;;  %2372 = vmatmul.bf16.vlgmr.msra.gmra.mxu3 %v2159_v2 }
 0x1a6   : > { %2400 = vmatmul.bf16.vlgmr.msra.gmra.mxu0 %v2156_v58  ;;  %2428 = vmatmul.bf16.vlgmr.msra.gmra.mxu1 %v2159_v2 }
 0x1a8   : > { %v1727_v41 = vpop.f32.mrf.mxu2  ;;  %v1755_v12 = vpop.f32.mrf.mxu3 }
 0x1a9   : > { %v1756_v14 = vadd.f32 %v1755_v12, %v1727_v41 }
 0x1ab   : > { %v12044_v18 = vpop.f32.mrf.mxu0  ;;  %v12046_v32 = vpop.f32.mrf.mxu1 }
 0x1b0   : > { %v12048_v46 = vpop.f32.mrf.mxu2  ;;  %v12050_v7 = vpop.f32.mrf.mxu3 }
 0x1b3   : > { %v1788_v11 = vpop.f32.mrf.mxu0  ;;  %v1816_v33 = vpop.f32.mrf.mxu1 }
 0x1b4   : > { %v1817_v51 = vadd.f32 %v1816_v33, %v1788_v11 }
 0x1b5   : > { %2349 = vmatmul.bf16.gmra.mxu2 %v2161_v15  ;;  %2377 = vmatmul.bf16.gmra.mxu3 %v2163_v31 }
 0x1b6   : > { %2405 = vmatmul.bf16.gmra.mxu0 %v2161_v15  ;;  %2433 = vmatmul.bf16.gmra.mxu1 %v2163_v31 }
 0x1b8   : > { %v1732_v43 = vpop.f32.mrf.mxu2  ;;  %v1760_v29 = vpop.f32.mrf.mxu3 }
 0x1b9   : > { %v1761_v57 = vadd.f32 %v1760_v29, %v1732_v43 }
 0x1bb   : > { %v12056_v21 = vpop.f32.mrf.mxu0  ;;  %v12058_v24 = vpop.f32.mrf.mxu1 }
 0x1c0   : > { %v12060_v52 = vpop.f32.mrf.mxu2  ;;  %v12062_v59 = vpop.f32.mrf.mxu3 }
 0x1c3   : > { %v1793_v17 = vpop.f32.mrf.mxu0  ;;  %v1821_v27 = vpop.f32.mrf.mxu1 }
 0x1c4   : > { %v1822_v28 = vadd.f32 %v1821_v27, %v1793_v17 }
 0x1c5   : > { %2354 = vmatmul.bf16.gmra.mxu2 %v2165_v30  ;;  %2382 = vmatmul.bf16.gmra.mxu3 %v2167_v34 }
 0x1c6   : > { %2410 = vmatmul.bf16.gmra.mxu0 %v2165_v30  ;;  %2438 = vmatmul.bf16.gmra.mxu1 %v2167_v34 }
 0x1c8   : > { %v1737_v36 = vpop.f32.mrf.mxu2  ;;  %v1765_v35 = vpop.f32.mrf.mxu3 }
 0x1c9   : > { %v1766_v63 = vadd.f32 %v1765_v35, %v1737_v36  ;;  %v757_v35 = vld [vmem:[#allocation3] sm:$0x11] }
 0x1cb   : > { %v12068_v16 = vpop.f32.mrf.mxu0  ;;  %v12070_v48 = vpop.f32.mrf.mxu1 }
 0x1d0   : > { %v12072_v39 = vpop.f32.mrf.mxu2  ;;  %v12074_v38 = vpop.f32.mrf.mxu3 }
 0x1d3   : > { %v1798_v62 = vpop.f32.mrf.mxu0  ;;  %v1826_v20 = vpop.f32.mrf.mxu1 }
 0x1d4   : > { %v1827_v4 = vadd.f32 %v1826_v20, %v1798_v62 }
 0x1d5   : > { %2359 = vmatmul.bf16.gmra.mxu2 %v2164_v25  ;;  %2387 = vmatmul.bf16.gmra.mxu3 %v2166_v0 }
 0x1d6   : > { %2415 = vmatmul.bf16.gmra.mxu0 %v2164_v25  ;;  %2443 = vmatmul.bf16.gmra.mxu1 %v2166_v0 }
 0x1d8   : > { %v1742_v49 = vpop.f32.mrf.mxu2  ;;  %v1770_v50 = vpop.f32.mrf.mxu3 }
 0x1d9   : > { %v1771_v19 = vadd.f32 %v1770_v50, %v1742_v49  ;;  %v758_v49 = vsel %vm11107_vm11, 0, %v757_v35 }
 0x1da   : > { %759 = vst [vmem:[#allocation3] sm:$0x11] %v758_v49 }
 0x1db   : > { %v1800_v56 = vpop.f32.mrf.mxu0  ;;  %v1828_v60 = vpop.f32.mrf.mxu1 }
 0x1e0   : > { %v1744_v40 = vpop.f32.mrf.mxu2  ;;  %v1772_v45 = vpop.f32.mrf.mxu3 }
 0x1e3   : > { %v2068_v61 = vpop.f32.mrf.mxu0  ;;  %v2096_v44 = vpop.f32.mrf.mxu1 }
 0x1e4   : > { %v2069_v53 = vadd.f32 %v2068_v61, %v12040_v37 }
 0x1e6   : > { %v2097_v8 = vadd.f32 %v2096_v44, %v2069_v53 }
 0x1e8   : > { %v2012_v13 = vpop.f32.mrf.mxu2  ;;  %v2040_v23 = vpop.f32.mrf.mxu3 }
 0x1e9   : > { %v2013_v3 = vadd.f32 %v2012_v13, %v1756_v14 }
 0x1eb   : > { %v2041_v55 = vadd.f32 %v2040_v23, %v2013_v3  ;;  %v2070_v6 = vpop.f32.mrf.mxu0  ;;  %v2098_v58 = vpop.f32.mrf.mxu1 }
 0x1f0   : > { %v2014_v2 = vpop.f32.mrf.mxu2  ;;  %v12077_v41 = vpop.f32.mrf.mxu3 }
 0x1f3   : > { %v2073_v12 = vpop.f32.mrf.mxu0  ;;  %v2101_v9 = vpop.f32.mrf.mxu1 }
 0x1f4   : > { %v2074_v10 = vadd.f32 %v2073_v12, %v1817_v51 }
 0x1f6   : > { %v12079_v11 = vadd.f32 %v2101_v9, %v2074_v10 }
 0x1f8   : > { %v2017_v33 = vpop.f32.mrf.mxu2  ;;  %v2045_v15 = vpop.f32.mrf.mxu3 }
 0x1f9   : > { %v2018_v31 = vadd.f32 %v2017_v33, %v1761_v57 }
 0x1fb   : > { %v12081_v43 = vadd.f32 %v2045_v15, %v2018_v31  ;;  %v12083_v37 = vpop.f32.mrf.mxu0  ;;  %v12085_v29 = vpop.f32.mrf.mxu1  ;;  %v2462_v15 = vld [vmem:[%s13361_s2] sm:$0x3] }
 0x200   : > { %v12087_v14 = vpop.f32.mrf.mxu2  ;;  %v12089_v25 = vpop.f32.mrf.mxu3 }
 0x203   : > { %v2078_v0 = vpop.f32.mrf.mxu0  ;;  %v2106_v17 = vpop.f32.mrf.mxu1 }
 0x204   : > { %v2079_v27 = vadd.f32 %v2078_v0, %v1822_v28  ;;  %v12114_v0 = vperm.slane %v2462_v15, 1 }
 0x206   : > { %v12091_v30 = vadd.f32 %v2106_v17, %v2079_v27 }
 0x208   : > { %v2022_v51 = vpop.f32.mrf.mxu2  ;;  %v2050_v34 = vpop.f32.mrf.mxu3 }
 0x209   : > { %v2023_v36 = vadd.f32 %v2022_v51, %v1766_v63 }
 0x20b   : > { %v12093_v57 = vadd.f32 %v2050_v34, %v2023_v36  ;;  %v12095_v62 = vpop.f32.mrf.mxu0  ;;  %v12097_v20 = vpop.f32.mrf.mxu1  ;;  %v12116_v34 = vperm.slane %v2462_v15, 0  ;;  %v1758_v36 = vadd.f32 %v12050_v7, %v12048_v46  ;;  %v10073_v46 = vld [vmem:[#allocation5 + $0x1f4] sm:$0xf0]  ;;  %v10056_v7 = vld [vmem:[#allocation5 + $0x174] sm:$0xf] }
 0x210   : > { %v12101_v50 = vpop.f32.mrf.mxu2  ;;  %v12103_v56 = vpop.f32.mrf.mxu3 }
 0x213   : > { %v2083_v28 = vpop.f32.mrf.mxu0  ;;  %v2111_v60 = vpop.f32.mrf.mxu1 }
 0x214   : > { %v2084_v40 = vadd.f32 %v2083_v28, %v1827_v4  ;;  %v1814_v4 = vadd.f32 %v12046_v32, %v12044_v18  ;;  %v2015_v18 = vadd.f32 %v2014_v2, %v1758_v36  ;;  %v10072_v2 = vld [vmem:[#allocation5 + $0x1f4] sm:$0xf] }
 0x216   : > { %v12105_v45 = vadd.f32 %v2111_v60, %v2084_v40  ;;  %v2071_v27 = vadd.f32 %v2070_v6, %v1814_v4  ;;  %v8054_v6 = vld [vmem:[#allocation5 + $0x170] sm:$0xf]  ;;  %v8120_v4 = vld [vmem:[#allocation5 + $0x1f8] sm:$0xf0] }
 0x218   : > { %v2027_v63 = vpop.f32.mrf.mxu2  ;;  %v2055_v61 = vpop.f32.mrf.mxu3 }
 0x219   : > { %v2028_v44 = vadd.f32 %v2027_v63, %v1771_v19  ;;  %v2099_v63 = vadd.f32 %v2098_v58, %v2071_v27  ;;  %v8056_v58 = vld [vmem:[#allocation5 + $0x178] sm:$0xf0]  ;;  %v10055_v27 = vld [vmem:[#allocation5 + $0x164] sm:$0xf0] }
 0x21b   : > { %v12107_v53 = vadd.f32 %v2055_v61, %v2028_v44  ;;  %v2085_v13 = vpop.f32.mrf.mxu0  ;;  %v2113_v23 = vpop.f32.mrf.mxu1 }
 0x21c   : > { %v10057_v13 = vld [vmem:[#allocation5 + $0x174] sm:$0xf0] }
 0x220   : > { %v2029_v3 = vpop.f32.mrf.mxu2  ;;  %v2057_v12 = vpop.f32.mrf.mxu3 }
 0x221   : > { %v8055_v12 = vor.u32 %v10057_v13, %v8054_v6 }
 0x223   : > { %v2401_v9 = vpop.f32.mrf.mxu0  ;;  %v2429_v10 = vpop.f32.mrf.mxu1  ;;  %2925 = vmatpush.bf16.msrb.mxu2 %v8055_v12  ;;  %v1819_v12 = vadd.f32 %v12058_v24, %v12056_v21  ;;  %v8102_v21 = vld [vmem:[#allocation5 + $0x1d0] sm:$0xf]  ;;  %v10069_v24 = vld [vmem:[#allocation5 + $0x1d4] sm:$0xf0] }
 0x224   : > { %v2430_v33 = vadd.f32 %v2429_v10, %v2401_v9  ;;  %v8118_v9 = vld [vmem:[#allocation5 + $0x1f0] sm:$0xf] }
 0x225   : > { %v8119_v15 = vor.u32 %v10073_v46, %v8118_v9  ;;  %v2523_v9 = vld [vmem:[#allocation3] sm:$0xff] }
 0x226   : > { %v2449_v31 = vadd.f32 %v2430_v33, %v2097_v8 }
 0x227   : > { %2953 = vmatpush.bf16.msrb.mxu3 %v8119_v15 }
 0x228   : > { %v2345_v19 = vpop.f32.mrf.mxu2  ;;  %v2373_v17 = vpop.f32.mrf.mxu3  ;;  %v2469_v35 = vadd.f32 %v12114_v0, %v2449_v31  ;;  %v8059_v31 = vor.u32 %v10056_v7, %v8056_v58  ;;  %v8038_v58 = vld [vmem:[#allocation5 + $0x150] sm:$0xf] }
 0x229   : > { %v2374_v51 = vadd.f32 %v2373_v17, %v2345_v19  ;;  %v8123_v19 = vor.u32 %v10072_v2, %v8120_v4  ;;  %v8046_v17 = vld [vmem:[#allocation5 + $0x160] sm:$0xf]  ;;  %v10053_v2 = vld [vmem:[#allocation5 + $0x154] sm:$0xf0] }
 0x22a   : > { %v2483_v8 = vmax.f32 %v2469_v35, 0.0  ;;  %2981 = vmatpush.bf16.msrb.mxu0 %v8059_v31 }
 0x22b   : > { %v2448_v49 = vadd.f32 %v2374_v51, %v2041_v55  ;;  %v2403_v28 = vpop.f32.mrf.mxu0  ;;  %v2431_v60 = vpop.f32.mrf.mxu1  ;;  %v2043_v55 = vadd.f32 %v12077_v41, %v2015_v18  ;;  %v8110_v41 = vld [vmem:[#allocation5 + $0x1e0] sm:$0xf]  ;;  %3009 = vmatpush.bf16.msrb.mxu1 %v8123_v19  ;;  %v8039_v19 = vor.u32 %v10053_v2, %v8038_v58 }
 0x22c   : > { %v2432_v40 = vadd.f32 %v2431_v60, %v2403_v28  ;;  %v8047_v60 = vor.u32 %v10055_v27, %v8046_v17  ;;  %v10052_v17 = vld [vmem:[#allocation5 + $0x154] sm:$0xf] }
 0x22d   : > { %v2468_v32 = vadd.f32 %v12116_v34, %v2448_v49 }
 0x22e   : > { %v2451_v44 = vadd.f32 %v2432_v40, %v2099_v63  ;;  %v10071_v40 = vld [vmem:[#allocation5 + $0x1e4] sm:$0xf0]  ;;  %2926 = vmatpush.bf16.msrb.mxu2 %v8047_v60 }
 0x22f   : > { %v2482_v61 = vmax.f32 %v2468_v32, 0.0  ;;  %v8111_v18 = vor.u32 %v10071_v40, %v8110_v41  ;;  %v10054_v32 = vld [vmem:[#allocation5 + $0x164] sm:$0xf]  ;;  %v8104_v41 = vld [vmem:[#allocation5 + $0x1d8] sm:$0xf0] }
 0x230   : > { %v2347_v23 = vpop.f32.mrf.mxu2  ;;  %v2375_v3 = vpop.f32.mrf.mxu3  ;;  %v2471_v36 = vadd.f32 %v12114_v0, %v2451_v44 }
 0x231   : > { %v2496_v10 = vpack.c.bf16 %v2483_v8, %v2482_v61  ;;  %v2376_v33 = vadd.f32 %v2375_v3, %v2347_v23  ;;  %v8048_v8 = vld [vmem:[#allocation5 + $0x168] sm:$0xf0]  ;;  %v10070_v61 = vld [vmem:[#allocation5 + $0x1e4] sm:$0xf]  ;;  %2954 = vmatpush.bf16.msrb.mxu3 %v8111_v18 }
 0x232   : > { %v8051_v44 = vor.u32 %v10054_v32, %v8048_v8  ;;  %v8112_v3 = vld [vmem:[#allocation5 + $0x1e8] sm:$0xf0]  ;;  %2927 = vmatpush.bf16.msrb.mxu2 %v8039_v19 }
 0x233   : > { %v2504_v51 = vshrl.u32 %v2496_v10, 16  ;;  %v2450_v35 = vadd.f32 %v2376_v33, %v2043_v55  ;;  %v2406_v49 = vpop.f32.mrf.mxu0  ;;  %v2434_v28 = vpop.f32.mrf.mxu1  ;;  %v2507_v13 = vshll.u32 %v2496_v10, 16  ;;  %v8115_v7 = vor.u32 %v10070_v61, %v8112_v3  ;;  %v10051_v3 = vld [vmem:[#allocation5 + $0x144] sm:$0xf0] }
 0x234   : > { %v2435_v63 = vadd.f32 %v2434_v28, %v2406_v49  ;;  %v2485_v33 = vmax.f32 %v2471_v36, 0.0  ;;  %v2076_v10 = vadd.f32 %v12083_v37, %v1819_v12  ;;  %2982 = vmatpush.bf16.msrb.mxu0 %v8051_v44  ;;  %v8103_v36 = vor.u32 %v10069_v24, %v8102_v21  ;;  %v10068_v49 = vld [vmem:[#allocation5 + $0x1d4] sm:$0xf]  ;;  %v8094_v12 = vld [vmem:[#allocation5 + $0x1c0] sm:$0xf] }
 0x235   : > { %v12124_v6 = vrot.slane %v2504_v51, 7  ;;  %v2470_v23 = vadd.f32 %v12116_v34, %v2450_v35  ;;  %3010 = vmatpush.bf16.msrb.mxu1 %v8115_v7  ;;  %v8040_v35 = vld [vmem:[#allocation5 + $0x158] sm:$0xf0]  ;;  %v1763_v37 = vadd.f32 %v12062_v59, %v12060_v52  ;;  %v8107_v61 = vor.u32 %v10068_v49, %v8104_v41 }
 0x236   : > { %v2453_v46 = vadd.f32 %v2435_v63, %v12079_v11  ;;  %v8043_v60 = vor.u32 %v10052_v17, %v8040_v35  ;;  %2955 = vmatpush.bf16.msrb.mxu3 %v8103_v36  ;;  %v2527_v59 = vld [vmem:[#allocation3 + $0x10] sm:$0x11]  ;;  %v8022_v17 = vld [vmem:[#allocation5 + $0x130] sm:$0xf] }
 0x237   : > { %v2509_v55 = vor.u32 %v2507_v13, %v12124_v6  ;;  %v2484_v15 = vmax.f32 %v2470_v23, 0.0  ;;  %v8030_v13 = vld [vmem:[#allocation5 + $0x140] sm:$0xf]  ;;  %v2104_v23 = vadd.f32 %v12085_v29, %v2076_v10  ;;  %v2020_v52 = vadd.f32 %v12087_v14, %v1763_v37  ;;  %v10066_v14 = vld [vmem:[#allocation5 + $0x1c4] sm:$0xf] }
 0x238   : > { %v2350_v4 = vpop.f32.mrf.mxu2  ;;  %v2378_v31 = vpop.f32.mrf.mxu3  ;;  %v2473_v28 = vadd.f32 %v12114_v0, %v2453_v46  ;;  %2983 = vmatpush.bf16.msrb.mxu0 %v8043_v60  ;;  %v2510_v58 = vrot.slane %v12124_v6, 4  ;;  %v8086_v6 = vld [vmem:[#allocation5 + $0x1b0] sm:$0xf]  ;;  %v10065_v37 = vld [vmem:[#allocation5 + $0x1b4] sm:$0xf0] }
 0x239   : > { %v12134_v11 = vsel %vm11300_vm13, %v2509_v55, %v2523_v9  ;;  %v2497_v27 = vpack.c.bf16 %v2485_v33, %v2484_v15  ;;  %v2379_v51 = vadd.f32 %v2378_v31, %v2350_v4  ;;  %v10067_v9 = vld [vmem:[#allocation5 + $0x1c4] sm:$0xf0]  ;;  %3011 = vmatpush.bf16.msrb.mxu1 %v8107_v61  ;;  %v10050_v33 = vld [vmem:[#allocation5 + $0x144] sm:$0xf]  ;;  %v8032_v15 = vld [vmem:[#allocation5 + $0x148] sm:$0xf0]  ;;  %v8087_v61 = vor.u32 %v10065_v37, %v8086_v6 }
 0x23a   : > { %2525 = vst [vmem:[#allocation3] sm:$0xff] %v12134_v11  ;;  %v8095_v55 = vor.u32 %v10067_v9, %v8094_v12  ;;  %v2487_v2 = vmax.f32 %v2473_v28, 0.0  ;;  %v8035_v10 = vor.u32 %v10050_v33, %v8032_v15  ;;  %v8096_v4 = vld [vmem:[#allocation5 + $0x1c8] sm:$0xf0]  ;;  %v10048_v28 = vld [vmem:[#allocation5 + $0x134] sm:$0xf] }
 0x23b   : > { %v2512_v40 = vshrl.u32 %v2497_v27, 16  ;;  %v2515_v63 = vshll.u32 %v2497_v27, 16  ;;  %v2452_v18 = vadd.f32 %v2379_v51, %v12081_v43  ;;  %v2408_v32 = vpop.f32.mrf.mxu0  ;;  %v2436_v8 = vpop.f32.mrf.mxu1  ;;  %v8031_v43 = vor.u32 %v10051_v3, %v8030_v13  ;;  %v10049_v27 = vld [vmem:[#allocation5 + $0x134] sm:$0xf0]  ;;  %v10063_v15 = vld [vmem:[#allocation5 + $0x1a4] sm:$0xf0] }
 0x23c   : > { %v2437_v44 = vadd.f32 %v2436_v8, %v2408_v32  ;;  %2956 = vmatpush.bf16.msrb.mxu3 %v8095_v55  ;;  %v8099_v24 = vor.u32 %v10066_v14, %v8096_v4  ;;  %v2048_v51 = vadd.f32 %v12089_v25, %v2020_v52  ;;  %2984 = vmatpush.bf16.msrb.mxu0 %v8035_v10  ;;  %v10064_v32 = vld [vmem:[#allocation5 + $0x1b4] sm:$0xf]  ;;  %v8088_v25 = vld [vmem:[#allocation5 + $0x1b8] sm:$0xf0]  ;;  %v8014_v52 = vld [vmem:[#allocation5 + $0x120] sm:$0xf] }
 0x23d   : > { %v2514_v46 = vrot.slane %v2512_v40, 7  ;;  %v2472_v7 = vadd.f32 %v12116_v34, %v2452_v18  ;;  %2928 = vmatpush.bf16.msrb.mxu2 %v8031_v43  ;;  %v8023_v49 = vor.u32 %v10049_v27, %v8022_v17  ;;  %v8024_v18 = vld [vmem:[#allocation5 + $0x138] sm:$0xf0]  ;;  %v8078_v43 = vld [vmem:[#allocation5 + $0x1a0] sm:$0xf]  ;;  %v1824_v55 = vadd.f32 %v12070_v48, %v12068_v16 }
 0x23e   : > { %v2455_v29 = vadd.f32 %v2437_v44, %v2104_v23  ;;  %3012 = vmatpush.bf16.msrb.mxu1 %v8099_v24  ;;  %v8027_v13 = vor.u32 %v10048_v28, %v8024_v18  ;;  %v8091_v23 = vor.u32 %v10064_v32, %v8088_v25  ;;  %v10047_v44 = vld [vmem:[#allocation5 + $0x124] sm:$0xf0]  ;;  %v8079_v14 = vor.u32 %v10063_v15, %v8078_v43  ;;  %v2558_v24 = vld [vmem:[#allocation3 + $0x10] sm:$0xee]  ;;  %v8062_v43 = vld [vmem:[#allocation5 + $0x180] sm:$0xf] }
 0x23f   : > { %v2517_v31 = vor.u32 %v2515_v63, %v2514_v46  ;;  %v2519_v19 = vrot.slane %v2514_v46, 4  ;;  %v2486_v21 = vmax.f32 %v2472_v7, 0.0  ;;  %v8008_v25 = vld [vmem:[#allocation5 + $0x118] sm:$0xf0]  ;;  %v2673_v15 = vunpack.c.l.b16 %v12134_v11 }
 0x240   : > { %v2352_v36 = vpop.f32.mrf.mxu2  ;;  %v2380_v35 = vpop.f32.mrf.mxu3  ;;  %v2475_v8 = vadd.f32 %v12114_v0, %v2455_v29  ;;  %2957 = vmatpush.bf16.msrb.mxu3 %v8087_v61  ;;  %2985 = vmatpush.bf16.msrb.mxu0 %v8027_v13  ;;  %v8072_v13 = vld [vmem:[#allocation5 + $0x198] sm:$0xf0] }
 0x241   : > { %v12148_v60 = vsel %vm11351_vm8, %v2510_v58, %v2517_v31  ;;  %v2528_v41 = vsel %vm11107_vm11, %v2519_v19, %v2527_v59  ;;  %v2498_v40 = vpack.c.bf16 %v2487_v2, %v2486_v21  ;;  %v2381_v63 = vadd.f32 %v2380_v35, %v2352_v36  ;;  %2929 = vmatpush.bf16.msrb.mxu2 %v8023_v49  ;;  %v10046_v58 = vld [vmem:[#allocation5 + $0x124] sm:$0xf]  ;;  %v8016_v2 = vld [vmem:[#allocation5 + $0x128] sm:$0xf0]  ;;  %v8006_v36 = vld [vmem:[#allocation5 + $0x110] sm:$0xf] }
 0x242   : > { %2529 = vst [vmem:[#allocation3 + $0x10] sm:$0x11] %v2528_v41  ;;  %v8015_v59 = vor.u32 %v10047_v44, %v8014_v52  ;;  %3013 = vmatpush.bf16.msrb.mxu1 %v8091_v23  ;;  %v8019_v4 = vor.u32 %v10046_v58, %v8016_v2  ;;  %v10062_v31 = vld [vmem:[#allocation5 + $0x1a4] sm:$0xf]  ;;  %v8080_v19 = vld [vmem:[#allocation5 + $0x1a8] sm:$0xf0]  ;;  %v2081_v21 = vadd.f32 %v12095_v62, %v1824_v55 }
 0x243   : > { %v2531_v3 = vshrl.u32 %v2498_v40, 16  ;;  %v2534_v12 = vshll.u32 %v2498_v40, 16  ;;  %v2454_v9 = vadd.f32 %v2381_v63, %v2048_v51  ;;  %v2411_v46 = vpop.f32.mrf.mxu0  ;;  %v2439_v7 = vpop.f32.mrf.mxu1  ;;  %v8083_v48 = vor.u32 %v10062_v31, %v8080_v19  ;;  %v10045_v35 = vld [vmem:[#allocation5 + $0x114] sm:$0xf0]  ;;  %v8070_v62 = vld [vmem:[#allocation5 + $0x190] sm:$0xf] }
 0x244   : > { %v2440_v33 = vadd.f32 %v2439_v7, %v2411_v46  ;;  %v2489_v27 = vmax.f32 %v2475_v8, 0.0  ;;  %v1768_v49 = vadd.f32 %v12074_v38, %v12072_v39  ;;  %2958 = vmatpush.bf16.msrb.mxu3 %v8079_v14  ;;  %2986 = vmatpush.bf16.msrb.mxu0 %v8019_v4  ;;  %v8007_v28 = vor.u32 %v10045_v35, %v8006_v36  ;;  %v10061_v41 = vld [vmem:[#allocation5 + $0x194] sm:$0xf0]  ;;  %v10044_v40 = vld [vmem:[#allocation5 + $0x114] sm:$0xf] }
 0x245   : > { %v12155_v29 = vrot.slane %v2531_v3, 7  ;;  %v2474_v10 = vadd.f32 %v12116_v34, %v2454_v9  ;;  %2930 = vmatpush.bf16.msrb.mxu2 %v8015_v59  ;;  %v8071_v32 = vor.u32 %v10061_v41, %v8070_v62  ;;  %v10060_v8 = vld [vmem:[#allocation5 + $0x194] sm:$0xf]  ;;  %v2109_v61 = vadd.f32 %v12097_v20, %v2081_v21  ;;  %v7998_v46 = vld [vmem:[#allocation5 + $0x100] sm:$0xf] }
 0x246   : > { %v2457_v16 = vadd.f32 %v2440_v33, %v12091_v30  ;;  %3014 = vmatpush.bf16.msrb.mxu1 %v8083_v48  ;;  %v8011_v38 = vor.u32 %v10044_v40, %v8008_v25  ;;  %v2025_v23 = vadd.f32 %v12101_v50, %v1768_v49  ;;  %v8075_v9 = vor.u32 %v10060_v8, %v8072_v13  ;;  %v10043_v7 = vld [vmem:[#allocation5 + $0x104] sm:$0xf0]  ;;  %v10042_v33 = vld [vmem:[#allocation5 + $0x104] sm:$0xf]  ;;  %v8000_v14 = vld [vmem:[#allocation5 + $0x108] sm:$0xf0] }
 0x247   : > { %v2536_v17 = vor.u32 %v2534_v12, %v12155_v29  ;;  %v2488_v51 = vmax.f32 %v2474_v10, 0.0  ;;  %v7999_v20 = vor.u32 %v10043_v7, %v7998_v46  ;;  %v10059_v55 = vld [vmem:[#allocation5 + $0x184] sm:$0xf0]  ;;  %v2675_v50 = vunpack.c.l.b16 %v12148_v60  ;;  %v10058_v4 = vld [vmem:[#allocation5 + $0x184] sm:$0xf] }
 0x248   : > { %v2355_v6 = vpop.f32.mrf.mxu2  ;;  %v2383_v37 = vpop.f32.mrf.mxu3  ;;  %v2477_v39 = vadd.f32 %v12114_v0, %v2457_v16  ;;  %2959 = vmatpush.bf16.msrb.mxu3 %v8071_v32  ;;  %2987 = vmatpush.bf16.msrb.mxu0 %v8011_v38  ;;  %v8063_v10 = vor.u32 %v10059_v55, %v8062_v43  ;;  %v2537_v31 = vrot.slane %v12155_v29, 4  ;;  %v8003_v21 = vor.u32 %v10042_v33, %v8000_v14  ;;  %v2586_v38 = vld [vmem:[#allocation3 + $0x20] sm:$0xcc] }
 0x249   : > { %v2559_v30 = vsel %vm11445_vm14, %v2536_v17, %v2558_v24  ;;  %v2499_v63 = vpack.c.bf16 %v2489_v27, %v2488_v51  ;;  %v2384_v18 = vadd.f32 %v2383_v37, %v2355_v6  ;;  %2931 = vmatpush.bf16.msrb.mxu2 %v8007_v28  ;;  %v8064_v24 = vld [vmem:[#allocation5 + $0x188] sm:$0xf0]  ;;  %v2676_v16 = vunpack.c.h.b16 %v12148_v60 }
 0x24a   : > { %2560 = vst [vmem:[#allocation3 + $0x10] sm:$0xee] %v2559_v30  ;;  %3015 = vmatpush.bf16.msrb.mxu1 %v8075_v9  ;;  %v2491_v19 = vmax.f32 %v2477_v39, 0.0  ;;  %v8067_v51 = vor.u32 %v10058_v4, %v8064_v24  ;;  %v12176_v49 = vpack.c.b16 %v2675_v50, %v2673_v15  ;;  %v2674_v29 = vunpack.c.h.b16 %v12134_v11 }
 0x24b   : > { %v2539_v52 = vshrl.u32 %v2499_v63, 16  ;;  %v2456_v44 = vadd.f32 %v2384_v18, %v12093_v57  ;;  %v2413_v3 = vpop.f32.mrf.mxu0  ;;  %v2441_v12 = vpop.f32.mrf.mxu1  ;;  %v2542_v2 = vshll.u32 %v2499_v63, 16  ;;  %v2053_v6 = vadd.f32 %v12103_v56, %v2025_v23 }
 0x24c   : > { %v2442_v59 = vadd.f32 %v2441_v12, %v2413_v3  ;;  %2960 = vmatpush.bf16.msrb.mxu3 %v8063_v10  ;;  %2988 = vmatpush.bf16.msrb.mxu0 %v8003_v21  ;;  %v12184_v41 = vpack.c.b16 %v2676_v16, %v2674_v29  ;;  %v2698_v56 = vshll.u32 %v12176_v49, 16 }
 0x24d   : > { %v2541_v58 = vrot.slane %v2539_v52, 7  ;;  %v2476_v57 = vadd.f32 %v12116_v34, %v2456_v44  ;;  %2932 = vmatpush.bf16.msrb.mxu2 %v7999_v20  ;;  %v2562_v52 = vld [vmem:[#allocation3 + $0x20] sm:$0x33] }
 0x24e   : > { %v2459_v27 = vadd.f32 %v2442_v59, %v2109_v61  ;;  %3016 = vmatpush.bf16.msrb.mxu1 %v8067_v51  ;;  %v2710_v13 = vshll.u32 %v12184_v41, 16  ;;  %v2700_v59 = vrot.slane %v2698_v56, 1 }
 0x24f   : > { %v2544_v48 = vor.u32 %v2542_v2, %v2541_v58  ;;  %v2490_v17 = vmax.f32 %v2476_v57, 0.0  ;;  %v2546_v39 = vrot.slane %v2541_v58, 4 }
 0x250   : > { %v2357_v36 = vpop.f32.mrf.mxu2  ;;  %v2385_v35 = vpop.f32.mrf.mxu3  ;;  %v2479_v30 = vadd.f32 %v12114_v0, %v2459_v27  ;;  %v2712_v14 = vrot.slane %v2710_v13, 1  ;;  %v2708_v27 = vshrl.u32 %v12184_v41, 16  ;;  %v8246_v13 = vld [vmem:[#allocation5 + $0xf0] sm:$0xf] }
 0x251   : > { %v2545_v37 = vsel %vm11351_vm8, %v2537_v31, %v2544_v48  ;;  %v2500_v28 = vpack.c.bf16 %v2491_v19, %v2490_v17  ;;  %v2386_v62 = vadd.f32 %v2385_v35, %v2357_v36  ;;  %v7982_v7 = vld [vmem:[#allocation3 + $0x10] sm:$0xf]  ;;  %v10006_v58 = vld [vmem:[#allocation3 + $0x14] sm:$0xf]  ;;  %v2696_v48 = vshrl.u32 %v12176_v49, 16 }
 0x252   : > { %2561 = vst [vmem:[#allocation3 + $0x18] sm:$0xff] %v2545_v37  ;;  %v2493_v44 = vmax.f32 %v2479_v30, 0.0 }
 0x253   : > { %v2548_v40 = vshrl.u32 %v2500_v28, 16  ;;  %v2458_v63 = vadd.f32 %v2386_v62, %v2053_v6  ;;  %v2416_v18 = vpop.f32.mrf.mxu0  ;;  %v2444_v32 = vpop.f32.mrf.mxu1  ;;  %v2551_v8 = vshll.u32 %v2500_v28, 16  ;;  %v2701_v6 = vor.u32 %v2700_v59, %v2696_v48  ;;  %v8240_v48 = vld [vmem:[#allocation5 + $0xe8] sm:$0xf0] }
 0x254   : > { %v2445_v11 = vadd.f32 %v2444_v32, %v2416_v18 }
 0x255   : > { %v2550_v25 = vrot.slane %v2548_v40, 7  ;;  %v2478_v61 = vadd.f32 %v12116_v34, %v2458_v63 }
 0x256   : > { %v2461_v12 = vadd.f32 %v2445_v11, %v12105_v45 }
 0x257   : > { %v2553_v23 = vor.u32 %v2551_v8, %v2550_v25  ;;  %v2492_v3 = vmax.f32 %v2478_v61, 0.0  ;;  %v8182_v61 = vld [vmem:[#allocation5 + $0x70] sm:$0xf] }
 0x258   : > { %v2360_v9 = vpop.f32.mrf.mxu2  ;;  %v2388_v46 = vpop.f32.mrf.mxu3  ;;  %v2481_v31 = vadd.f32 %v12114_v0, %v2461_v12  ;;  %v2713_v0 = vor.u32 %v2712_v14, %v2708_v27  ;;  %v2590_v12 = vld [vmem:[#allocation3 + $0x30] sm:$0x77]  ;;  %v8238_v14 = vld [vmem:[#allocation5 + $0xe0] sm:$0xf] }
 0x259   : > { %v2554_v20 = vsel %vm11351_vm8, %v2546_v39, %v2553_v23  ;;  %v2587_v43 = vsel %vm11549_vm2, %v2553_v23, %v2586_v38  ;;  %v2501_v55 = vpack.c.bf16 %v2493_v44, %v2492_v3  ;;  %v2389_v33 = vadd.f32 %v2388_v46, %v2360_v9  ;;  %v10007_v15 = vld [vmem:[#allocation3 + $0x14] sm:$0xf0]  ;;  %v7984_v2 = vld [vmem:[#allocation3 + $0x18] sm:$0xf0]  ;;  %v10025_v39 = vld [vmem:[#allocation5 + $0x74] sm:$0xf0] }
 0x25a   : > { %v2563_v57 = vsel %vm11555_vm0, %v2554_v20, %v2562_v52  ;;  %2588 = vst [vmem:[#allocation3 + $0x20] sm:$0xcc] %v2587_v43  ;;  %v12197_v45 = vor.u32 %v10007_v15, %v7982_v7  ;;  %v12199_v10 = vor.u32 %v10006_v58, %v7984_v2  ;;  %v2495_v40 = vmax.f32 %v2481_v31, 0.0  ;;  %v10041_v23 = vld [vmem:[#allocation5 + $0xf4] sm:$0xf0] }
 0x25b   : > { %2564 = vst [vmem:[#allocation3 + $0x20] sm:$0x33] %v2563_v57  ;;  %v2567_v4 = vshrl.u32 %v2501_v55, 16  ;;  %v2460_v19 = vadd.f32 %v2389_v33, %v12107_v53  ;;  %v2418_v21 = vpop.f32.mrf.mxu0  ;;  %v2446_v24 = vpop.f32.mrf.mxu1  ;;  %v2570_v35 = vshll.u32 %v2501_v55, 16  ;;  %v2565_v53 = vrot.slane %v2550_v25, 4 }
 0x25c   : > { %v2703_v17 = vshll.u32 %v12197_v45, 16  ;;  %v2715_v51 = vshll.u32 %v12199_v10, 16  ;;  %v8183_v38 = vor.u32 %v10025_v39, %v8182_v61  ;;  %v10024_v52 = vld [vmem:[#allocation5 + $0x74] sm:$0xf]  ;;  %v8247_v9 = vor.u32 %v10041_v23, %v8246_v13  ;;  %v8184_v46 = vld [vmem:[#allocation5 + $0x78] sm:$0xf0] }
 0x25d   : > { %v2569_v36 = vrot.slane %v2567_v4, 7  ;;  %v2480_v29 = vadd.f32 %v12116_v34, %v2460_v19  ;;  %v10040_v7 = vld [vmem:[#allocation5 + $0xf4] sm:$0xf]  ;;  %v8187_v59 = vor.u32 %v10024_v52, %v8184_v46  ;;  %v8248_v20 = vld [vmem:[#allocation5 + $0xf8] sm:$0xf0] }
 0x25e   : > { %v12208_v37 = vrot.slane %v2703_v17, 1  ;;  %v12210_v28 = vrot.slane %v2715_v51, 1  ;;  %3210 = vmatpush.bf16.msra.mxu2 %v8183_v38  ;;  %v8174_v43 = vld [vmem:[#allocation5 + $0x60] sm:$0xf]  ;;  %v10023_v55 = vld [vmem:[#allocation5 + $0x64] sm:$0xf0]  ;;  %3238 = vmatpush.bf16.msra.mxu3 %v8247_v9  ;;  %v8251_v2 = vor.u32 %v10040_v7, %v8248_v20 }
 0x25f   : > { %v2572_v62 = vor.u32 %v2570_v35, %v2569_v36  ;;  %v2494_v30 = vmax.f32 %v2480_v29, 0.0  ;;  %v2574_v25 = vrot.slane %v2569_v36, 4  ;;  %v8175_v57 = vor.u32 %v10023_v55, %v8174_v43  ;;  %v10039_v4 = vld [vmem:[#allocation5 + $0xe4] sm:$0xf0]  ;;  %v10022_v31 = vld [vmem:[#allocation5 + $0x64] sm:$0xf]  ;;  %3266 = vmatpush.bf16.msra.mxu0 %v8187_v59 }
 0x260   : > { %v2362_v63 = vpop.f32.mrf.mxu2  ;;  %v2390_v18 = vpop.f32.mrf.mxu3  ;;  %v2706_v32 = vsel %vm13362_vm10, %v2701_v6, %v12208_v37  ;;  %v2718_v11 = vsel %vm13344_vm3, %v2713_v0, %v12210_v28  ;;  %v8239_v19 = vor.u32 %v10039_v4, %v8238_v14  ;;  %v8176_v21 = vld [vmem:[#allocation5 + $0x68] sm:$0xf0]  ;;  %v10038_v24 = vld [vmem:[#allocation5 + $0xe4] sm:$0xf]  ;;  %3294 = vmatpush.bf16.msra.mxu1 %v8251_v2  ;;  %v8166_v29 = vld [vmem:[#allocation5 + $0x50] sm:$0xf] }
 0x261   : > { %v2573_v34 = vsel %vm11351_vm8, %v2565_v53, %v2572_v62  ;;  %v2502_v56 = vpack.c.bf16 %v2495_v40, %v2494_v30  ;;  %2933 = vmatmul.bf16.vlgmr.msrb.gmra.mxu2 %v2706_v32  ;;  %2961 = vmatmul.bf16.vlgmr.msrb.gmra.mxu3 %v2718_v11  ;;  %v8179_v36 = vor.u32 %v10022_v31, %v8176_v21  ;;  %v10021_v62 = vld [vmem:[#allocation5 + $0x54] sm:$0xf0]  ;;  %v8230_v40 = vld [vmem:[#allocation5 + $0xd0] sm:$0xf]  ;;  %v10020_v18 = vld [vmem:[#allocation5 + $0x54] sm:$0xf] }
 0x262   : > { %2589 = vst [vmem:[#allocation3 + $0x28] sm:$0xff] %v2573_v34  ;;  %2989 = vmatmul.bf16.vlgmr.msrb.gmra.mxu0 %v2706_v32  ;;  %3017 = vmatmul.bf16.vlgmr.msrb.gmra.mxu1 %v2718_v11  ;;  %v7990_v15 = vld [vmem:[#allocation3 + $0x20] sm:$0xf]  ;;  %v10008_v58 = vld [vmem:[#allocation3 + $0x24] sm:$0xf]  ;;  %v8243_v35 = vor.u32 %v10038_v24, %v8240_v48  ;;  %v8167_v22 = vor.u32 %v10021_v62, %v8166_v29  ;;  %v2719_v11 = vshrl.u32 %v12197_v45, 16  ;;  %vm13369_vm10 = vmmov %vm13358_vm1 }
 0x263   : > { %v2576_v8 = vshrl.u32 %v2502_v56, 16  ;;  %v2579_v3 = vshll.u32 %v2502_v56, 16  ;;  %3211 = vmatpush.bf16.msra.mxu2 %v8175_v57  ;;  %v10037_v30 = vld [vmem:[#allocation5 + $0xd4] sm:$0xf0]  ;;  %3239 = vmatpush.bf16.msra.mxu3 %v8239_v19  ;;  %v8168_v32 = vld [vmem:[#allocation5 + $0x58] sm:$0xf0] }
 0x264   : > { %v8231_v63 = vor.u32 %v10037_v30, %v8230_v40  ;;  %v2727_v56 = vshrl.u32 %v12199_v10, 16  ;;  %3267 = vmatpush.bf16.msra.mxu0 %v8179_v36  ;;  %3295 = vmatpush.bf16.msra.mxu1 %v8243_v35  ;;  %v8171_v61 = vor.u32 %v10020_v18, %v8168_v32  ;;  %v8232_v39 = vld [vmem:[#allocation5 + $0xd8] sm:$0xf0]  ;;  %v8158_v38 = vld [vmem:[#allocation5 + $0x40] sm:$0xf]  ;;  %v2721_v23 = vor.u32 %v2719_v11, %v12208_v37 }
 0x265   : > { %v2578_v44 = vrot.slane %v2576_v8, 7  ;;  %v10036_v8 = vld [vmem:[#allocation5 + $0xd4] sm:$0xf]  ;;  %v10019_v13 = vld [vmem:[#allocation5 + $0x44] sm:$0xf0] }
 0x266   : > { %v10035_v9 = vld [vmem:[#allocation5 + $0xc4] sm:$0xf0]  ;;  %v8235_v46 = vor.u32 %v10036_v8, %v8232_v39  ;;  %v8159_v7 = vor.u32 %v10019_v13, %v8158_v38  ;;  %v10018_v59 = vld [vmem:[#allocation5 + $0x44] sm:$0xf]  ;;  %v8160_v20 = vld [vmem:[#allocation5 + $0x48] sm:$0xf0] }
 0x267   : > { %v2581_v33 = vor.u32 %v2579_v3, %v2578_v44  ;;  %v2729_v44 = vor.u32 %v2727_v56, %v12210_v28  ;;  %3212 = vmatpush.bf16.msra.mxu2 %v8167_v22  ;;  %3240 = vmatpush.bf16.msra.mxu3 %v8231_v63  ;;  %v8224_v28 = vld [vmem:[#allocation5 + $0xc8] sm:$0xf0]  ;;  %v8150_v2 = vld [vmem:[#allocation5 + $0x30] sm:$0xf]  ;;  %v10017_v57 = vld [vmem:[#allocation5 + $0x34] sm:$0xf0] }
 0x268   : > { %3268 = vmatpush.bf16.msra.mxu0 %v8171_v61  ;;  %3296 = vmatpush.bf16.msra.mxu1 %v8235_v46  ;;  %v8151_v19 = vor.u32 %v10017_v57, %v8150_v2  ;;  %v8214_v21 = vld [vmem:[#allocation5 + $0xb0] sm:$0xf]  ;;  %v10033_v24 = vld [vmem:[#allocation5 + $0xb4] sm:$0xf0]  ;;  %v10016_v48 = vld [vmem:[#allocation5 + $0x34] sm:$0xf] }
 0x269   : > { %v2582_v17 = vsel %vm11351_vm8, %v2574_v25, %v2581_v33  ;;  %v10009_v27 = vld [vmem:[#allocation3 + $0x24] sm:$0xf0]  ;;  %v7992_v51 = vld [vmem:[#allocation3 + $0x28] sm:$0xf0]  ;;  %vm13363_vm8 = vmmov %vm13344_vm3 }
 0x26a   : > { %v2591_v6 = vsel %vm11613_vm4, %v2582_v17, %v2590_v12  ;;  %v12222_v0 = vor.u32 %v10009_v27, %v7990_v15  ;;  %v12224_v53 = vor.u32 %v10008_v58, %v7992_v51  ;;  %v8222_v12 = vld [vmem:[#allocation5 + $0xc0] sm:$0xf]  ;;  %v10034_v33 = vld [vmem:[#allocation5 + $0xc4] sm:$0xf]  ;;  %v8163_v15 = vor.u32 %v10018_v59, %v8160_v20  ;;  %v8152_v27 = vld [vmem:[#allocation5 + $0x38] sm:$0xf0] }
 0x26b   : > { %2592 = vst [vmem:[#allocation3 + $0x30] sm:$0x77] %v2591_v6  ;;  %v8223_v55 = vor.u32 %v10035_v9, %v8222_v12  ;;  %3213 = vmatpush.bf16.msra.mxu2 %v8159_v7  ;;  %v8227_v31 = vor.u32 %v10034_v33, %v8224_v28  ;;  %v8215_v17 = vor.u32 %v10033_v24, %v8214_v21  ;;  %v10032_v51 = vld [vmem:[#allocation5 + $0xb4] sm:$0xf]  ;;  %v8216_v36 = vld [vmem:[#allocation5 + $0xb8] sm:$0xf0]  ;;  %vm13370_vm3 = vmmov %vm13358_vm1 }
 0x26c   : > { %v2723_v34 = vshll.u32 %v12222_v0, 16  ;;  %v2731_v25 = vshll.u32 %v12224_v53, 16  ;;  %3269 = vmatpush.bf16.msra.mxu0 %v8163_v15  ;;  %v8155_v6 = vor.u32 %v10016_v48, %v8152_v27  ;;  %v8142_v62 = vld [vmem:[#allocation5 + $0x20] sm:$0xf]  ;;  %v10015_v40 = vld [vmem:[#allocation5 + $0x24] sm:$0xf0] }
 0x26d   : > { %3241 = vmatpush.bf16.msra.mxu3 %v8223_v55  ;;  %v8206_v30 = vld [vmem:[#allocation5 + $0xa0] sm:$0xf]  ;;  %v10031_v22 = vld [vmem:[#allocation5 + $0xa4] sm:$0xf0]  ;;  %v10014_v63 = vld [vmem:[#allocation5 + $0x24] sm:$0xf]  ;;  %3297 = vmatpush.bf16.msra.mxu1 %v8227_v31  ;;  %v8143_v56 = vor.u32 %v10015_v40, %v8142_v62 }
 0x26e   : > { %v12231_v52 = vrot.slane %v2723_v34, 1  ;;  %v12234_v3 = vrot.slane %v2731_v25, 1  ;;  %v8144_v18 = vld [vmem:[#allocation5 + $0x28] sm:$0xf0]  ;;  %v8219_v34 = vor.u32 %v10032_v51, %v8216_v36  ;;  %v8207_v25 = vor.u32 %v10031_v22, %v8206_v30  ;;  %v10030_v8 = vld [vmem:[#allocation5 + $0xa4] sm:$0xf] }
 0x26f   : > { %3214 = vmatpush.bf16.msra.mxu2 %v8151_v19  ;;  %v8208_v61 = vld [vmem:[#allocation5 + $0xa8] sm:$0xf0]  ;;  %v8134_v39 = vld [vmem:[#allocation5 + $0x10] sm:$0xf]  ;;  %v8147_v38 = vor.u32 %v10014_v63, %v8144_v18  ;;  %v10013_v13 = vld [vmem:[#allocation5 + $0x14] sm:$0xf0] }
 0x270   : > { %v2726_v43 = vsel %vm13363_vm8, %v2721_v23, %v12231_v52  ;;  %v2734_v37 = vsel %vm13364_vm15, %v2729_v44, %v12234_v3  ;;  %3270 = vmatpush.bf16.msra.mxu0 %v8155_v6  ;;  %v8198_v23 = vld [vmem:[#allocation5 + $0x90] sm:$0xf]  ;;  %v10029_v44 = vld [vmem:[#allocation5 + $0x94] sm:$0xf0]  ;;  %v2735_v12 = vshrl.u32 %v12222_v0, 16  ;;  %v2743_v9 = vshrl.u32 %v12224_v53, 16  ;;  %vm13371_vm8 = vmmov %vm13358_vm1 }
 0x271   : > { %2938 = vmatmul.bf16.gmra.mxu2 %v2726_v43  ;;  %2966 = vmatmul.bf16.gmra.mxu3 %v2734_v37  ;;  %v8211_v59 = vor.u32 %v10030_v8, %v8208_v61  ;;  %v10012_v20 = vld [vmem:[#allocation5 + $0x14] sm:$0xf]  ;;  %v8199_v55 = vor.u32 %v10029_v44, %v8198_v23  ;;  %v8200_v28 = vld [vmem:[#allocation5 + $0x98] sm:$0xf0]  ;;  %v8126_v15 = vld [vmem:[#allocation5] sm:$0xf] }
 0x272   : > { %2994 = vmatmul.bf16.gmra.mxu0 %v2726_v43  ;;  %3022 = vmatmul.bf16.gmra.mxu1 %v2734_v37  ;;  %v2632_v58 = vld [vmem:[#allocation3 + $0x30] sm:$0x77]  ;;  %v8135_v37 = vor.u32 %v10013_v13, %v8134_v39  ;;  %v10028_v33 = vld [vmem:[#allocation5 + $0x94] sm:$0xf]  ;;  %v10011_v2 = vld [vmem:[#allocation5 + $0x4] sm:$0xf0] }
 0x273   : > { %v2685_v14 = vunpack.c.l.b16 %v2632_v58  ;;  %v2686_v4 = vunpack.c.h.b16 %v2632_v58  ;;  %3242 = vmatpush.bf16.msra.mxu3 %v8215_v17  ;;  %3298 = vmatpush.bf16.msra.mxu1 %v8219_v34  ;;  %v8136_v43 = vld [vmem:[#allocation5 + $0x18] sm:$0xf0]  ;;  %v2737_v58 = vor.u32 %v2735_v12, %v12231_v52  ;;  %v8190_v57 = vld [vmem:[#allocation5 + $0x80] sm:$0xf]  ;;  %v8203_v21 = vor.u32 %v10028_v33, %v8200_v28  ;;  %v10010_v24 = vld [vmem:[#allocation5 + $0x4] sm:$0xf] }
 0x274   : > { %3215 = vmatpush.bf16.msra.mxu2 %v8143_v56  ;;  %3271 = vmatpush.bf16.msra.mxu0 %v8147_v38  ;;  %v8139_v19 = vor.u32 %v10012_v20, %v8136_v43  ;;  %v8127_v17 = vor.u32 %v10011_v2, %v8126_v15  ;;  %v8128_v51 = vld [vmem:[#allocation5 + $0x8] sm:$0xf0]  ;;  %v10026_v52 = vld [vmem:[#allocation5 + $0x84] sm:$0xf]  ;;  %v8310_v63 = vld [vmem:[#allocation5 + $0x270] sm:$0xf] }
 0x275   : > { %v12240_v35 = vpack.c.b16 %v2685_v14, %v2685_v14  ;;  %v12242_v29 = vpack.c.b16 %v2686_v4, %v2686_v4  ;;  %v10027_v14 = vld [vmem:[#allocation5 + $0x84] sm:$0xf0]  ;;  %v2745_v4 = vor.u32 %v2743_v9, %v12234_v3  ;;  %v8192_v36 = vld [vmem:[#allocation5 + $0x88] sm:$0xf0]  ;;  %v8131_v3 = vor.u32 %v10010_v24, %v8128_v51  ;;  %v10089_v18 = vld [vmem:[#allocation5 + $0x274] sm:$0xf0] }
 0x276   : > { %v8191_v27 = vor.u32 %v10027_v14, %v8190_v57  ;;  %v8195_v6 = vor.u32 %v10026_v52, %v8192_v36  ;;  %v10105_v34 = vld [vmem:[#allocation5 + $0x2f4] sm:$0xf0]  ;;  %v10088_v56 = vld [vmem:[#allocation5 + $0x274] sm:$0xf]  ;;  %v8376_v38 = vld [vmem:[#allocation5 + $0x2f8] sm:$0xf0] }
 0x277   : > { %v2739_v32 = vshll.u32 %v12240_v35, 16  ;;  %v2747_v11 = vshll.u32 %v12242_v29, 16  ;;  %3243 = vmatpush.bf16.msra.mxu3 %v8207_v25  ;;  %3299 = vmatpush.bf16.msra.mxu1 %v8211_v59  ;;  %v2751_v62 = vshrl.u32 %v12240_v35, 16  ;;  %v2754_v40 = vshrl.u32 %v12242_v29, 16  ;;  %v8312_v25 = vld [vmem:[#allocation5 + $0x278] sm:$0xf0]  ;;  %vm13389_vm15 = vmmov %vm13358_vm1 }
 0x278   : > { %3216 = vmatpush.bf16.msra.mxu2 %v8135_v37  ;;  %3272 = vmatpush.bf16.msra.mxu0 %v8139_v19  ;;  %v8315_v61 = vor.u32 %v10088_v56, %v8312_v25  ;;  %v10104_v39 = vld [vmem:[#allocation5 + $0x2f4] sm:$0xf]  ;;  %v8302_v13 = vld [vmem:[#allocation5 + $0x260] sm:$0xf]  ;;  %v10087_v44 = vld [vmem:[#allocation5 + $0x264] sm:$0xf0] }
 0x279   : > { %v2741_v46 = vrot.slane %v2739_v32, 1  ;;  %v2749_v7 = vrot.slane %v2747_v11, 1  ;;  %v8374_v32 = vld [vmem:[#allocation5 + $0x2f0] sm:$0xf]  ;;  %v8311_v11 = vor.u32 %v10089_v18, %v8310_v63  ;;  %v8379_v23 = vor.u32 %v10104_v39, %v8376_v38  ;;  %v8366_v12 = vld [vmem:[#allocation5 + $0x2e0] sm:$0xf] }
 0x27a   : > { %v8375_v8 = vor.u32 %v10105_v34, %v8374_v32  ;;  %v10103_v9 = vld [vmem:[#allocation5 + $0x2e4] sm:$0xf0]  ;;  %v10102_v59 = vld [vmem:[#allocation5 + $0x2e4] sm:$0xf]  ;;  %v8368_v43 = vld [vmem:[#allocation5 + $0x2e8] sm:$0xf0] }
 0x27b   : > { %v2742_v31 = vsel %vm13365_vm9, %v2737_v58, %v2741_v46  ;;  %v2750_v48 = vsel %vm13366_vm5, %v2745_v4, %v2749_v7  ;;  %3244 = vmatpush.bf16.msra.mxu3 %v8199_v55  ;;  %3300 = vmatpush.bf16.msra.mxu1 %v8203_v21  ;;  %v2753_v30 = vor.u32 %v2751_v62, %v2741_v46  ;;  %v10086_v46 = vld [vmem:[#allocation5 + $0x264] sm:$0xf]  ;;  %v8294_v37 = vld [vmem:[#allocation5 + $0x250] sm:$0xf]  ;;  %v10085_v55 = vld [vmem:[#allocation5 + $0x254] sm:$0xf0] }
 0x27c   : > { %3217 = vmatpush.bf16.msra.mxu2 %v8127_v17  ;;  %3273 = vmatpush.bf16.msra.mxu0 %v8131_v3  ;;  %v2756_v22 = vor.u32 %v2754_v40, %v2749_v7  ;;  %v8304_v7 = vld [vmem:[#allocation5 + $0x268] sm:$0xf0]  ;;  %v8371_v33 = vor.u32 %v10102_v59, %v8368_v43  ;;  %v8358_v28 = vld [vmem:[#allocation5 + $0x2d0] sm:$0xf]  ;;  %v10101_v15 = vld [vmem:[#allocation5 + $0x2d4] sm:$0xf0]  ;;  %v8295_v2 = vor.u32 %v10085_v55, %v8294_v37 }
 0x27d   : > { %v8307_v20 = vor.u32 %v10086_v46, %v8304_v7  ;;  %v10084_v58 = vld [vmem:[#allocation5 + $0x254] sm:$0xf]  ;;  %v8296_v57 = vld [vmem:[#allocation5 + $0x258] sm:$0xf0]  ;;  %v8286_v24 = vld [vmem:[#allocation5 + $0x240] sm:$0xf] }
 0x27e   : > { %v10100_v14 = vld [vmem:[#allocation5 + $0x2d4] sm:$0xf]  ;;  %v8360_v4 = vld [vmem:[#allocation5 + $0x2d8] sm:$0xf0]  ;;  %v8299_v19 = vor.u32 %v10084_v58, %v8296_v57  ;;  %v8350_v17 = vld [vmem:[#allocation5 + $0x2c0] sm:$0xf] }
 0x27f   : > { %3245 = vmatpush.bf16.msra.mxu3 %v8191_v27  ;;  %3301 = vmatpush.bf16.msra.mxu1 %v8195_v6  ;;  %v8363_v21 = vor.u32 %v10100_v14, %v8360_v4  ;;  %v10099_v27 = vld [vmem:[#allocation5 + $0x2c4] sm:$0xf0]  ;;  %v10082_v51 = vld [vmem:[#allocation5 + $0x244] sm:$0xf]  ;;  %v8288_v52 = vld [vmem:[#allocation5 + $0x248] sm:$0xf0] }
 0x280   : > { %3543 = vmatpush.bf16.msrb.mxu2 %v8311_v11  ;;  %3599 = vmatpush.bf16.msrb.mxu0 %v8315_v61  ;;  %v10098_v36 = vld [vmem:[#allocation5 + $0x2c4] sm:$0xf]  ;;  %v8352_v3 = vld [vmem:[#allocation5 + $0x2c8] sm:$0xf0]  ;;  %v8351_v62 = vor.u32 %v10099_v27, %v8350_v17  ;;  %v8291_v40 = vor.u32 %v10082_v51, %v8288_v52  ;;  %v10081_v63 = vld [vmem:[#allocation5 + $0x234] sm:$0xf0] }
 0x281   : > { %2943 = vmatmul.bf16.gmra.mxu2 %v2742_v31  ;;  %2971 = vmatmul.bf16.gmra.mxu3 %v2750_v48  ;;  %v8342_v18 = vld [vmem:[#allocation5 + $0x2b0] sm:$0xf]  ;;  %v10097_v11 = vld [vmem:[#allocation5 + $0x2b4] sm:$0xf0]  ;;  %v10080_v34 = vld [vmem:[#allocation5 + $0x234] sm:$0xf] }
 0x282   : > { %2999 = vmatmul.bf16.gmra.mxu0 %v2742_v31  ;;  %3027 = vmatmul.bf16.gmra.mxu1 %v2750_v48  ;;  %v8359_v31 = vor.u32 %v10101_v15, %v8358_v28  ;;  %v10083_v48 = vld [vmem:[#allocation5 + $0x244] sm:$0xf0]  ;;  %v8280_v56 = vld [vmem:[#allocation5 + $0x238] sm:$0xf0]  ;;  %v8343_v25 = vor.u32 %v10097_v11, %v8342_v18  ;;  %v10096_v61 = vld [vmem:[#allocation5 + $0x2b4] sm:$0xf] }
 0x283   : > { %3571 = vmatpush.bf16.msrb.mxu3 %v8375_v8  ;;  %3627 = vmatpush.bf16.msrb.mxu1 %v8379_v23  ;;  %v8287_v6 = vor.u32 %v10083_v48, %v8286_v24  ;;  %v8283_v8 = vor.u32 %v10080_v34, %v8280_v56  ;;  %v8344_v39 = vld [vmem:[#allocation5 + $0x2b8] sm:$0xf0]  ;;  %v8270_v38 = vld [vmem:[#allocation5 + $0x220] sm:$0xf]  ;;  %v10079_v23 = vld [vmem:[#allocation5 + $0x224] sm:$0xf0] }
 0x284   : > { %3600 = vmatpush.bf16.msrb.mxu0 %v8307_v20  ;;  %v8271_v46 = vor.u32 %v10079_v23, %v8270_v38  ;;  %v8336_v59 = vld [vmem:[#allocation5 + $0x2a8] sm:$0xf0]  ;;  %v8262_v20 = vld [vmem:[#allocation5 + $0x210] sm:$0xf]  ;;  %v10077_v43 = vld [vmem:[#allocation5 + $0x214] sm:$0xf0] }
 0x285   : > { %v10093_v28 = vld [vmem:[#allocation5 + $0x294] sm:$0xf0]  ;;  %v10076_v15 = vld [vmem:[#allocation5 + $0x214] sm:$0xf]  ;;  %v8264_v58 = vld [vmem:[#allocation5 + $0x218] sm:$0xf0]  ;;  %v8263_v14 = vor.u32 %v10077_v43, %v8262_v20 }
 0x286   : > { %v8328_v57 = vld [vmem:[#allocation5 + $0x298] sm:$0xf0]  ;;  %v10075_v24 = vld [vmem:[#allocation5 + $0x204] sm:$0xf0]  ;;  %v8318_v48 = vld [vmem:[#allocation5 + $0x280] sm:$0xf] }
 0x287   : > { %3628 = vmatpush.bf16.msrb.mxu1 %v8371_v33  ;;  %v8326_v33 = vld [vmem:[#allocation5 + $0x290] sm:$0xf]  ;;  %v10091_v27 = vld [vmem:[#allocation5 + $0x284] sm:$0xf0]  ;;  %v10074_v51 = vld [vmem:[#allocation5 + $0x204] sm:$0xf] }
 0x288   : > { %3601 = vmatpush.bf16.msrb.mxu0 %v8299_v19  ;;  %v8327_v4 = vor.u32 %v10093_v28, %v8326_v33  ;;  %v8256_v52 = vld [vmem:[#allocation5 + $0x208] sm:$0xf0]  ;;  %vm13390_vm9 = vmmov %vm13358_vm1 }
 0x289   : > { %v3322_v11 = vld [vmem:[#allocation3] sm:$0xee]  ;;  %vm13391_vm5 = vmmov %vm13358_vm1 }
 0x28a   : > { %v3357_v34 = vunpack.c.l.b16 %v3322_v11  ;;  %v3358_v56 = vunpack.c.h.b16 %v3322_v11 }
 0x28b   : > { %3629 = vmatpush.bf16.msrb.mxu1 %v8363_v21  ;;  %v8254_v21 = vld [vmem:[#allocation5 + $0x200] sm:$0xf] }
 0x28c   : > { %3602 = vmatpush.bf16.msrb.mxu0 %v8291_v40  ;;  %v8255_v17 = vor.u32 %v10075_v24, %v8254_v21 }
 0x290   : > { %3603 = vmatpush.bf16.msrb.mxu0 %v8283_v8  ;;  %v3360_v8 = vpack.c.b16 %v2676_v16, %v3358_v56 }
 0x291   : > { %2948 = vmatmul.bf16.gmra.mxu2 %v2753_v30  ;;  %2976 = vmatmul.bf16.gmra.mxu3 %v2756_v22 }
 0x292   : > { %3004 = vmatmul.bf16.gmra.mxu0 %v2753_v30  ;;  %3032 = vmatmul.bf16.gmra.mxu1 %v2756_v22  ;;  %v8355_v30 = vor.u32 %v10098_v36, %v8352_v3  ;;  %v8278_v22 = vld [vmem:[#allocation5 + $0x230] sm:$0xf]  ;;  %v8319_v36 = vor.u32 %v10091_v27, %v8318_v48  ;;  %v8259_v3 = vor.u32 %v10074_v51, %v8256_v52 }
 0x293   : > { %v8279_v32 = vor.u32 %v10081_v63, %v8278_v22 }
 0x294   : > { %3630 = vmatpush.bf16.msrb.mxu1 %v8355_v30  ;;  %v2599_v30 = vld [vmem:[#allocation3 + $0x30] sm:$0x33] }
 0x295   : > { %v3038_v22 = vunpack.c.l.b16 %v2599_v30  ;;  %v3039_v63 = vunpack.c.h.b16 %v2599_v30 }
 0x297   : > { %v3040_v18 = vpack.c.b16 %v3038_v22, %v3038_v22 }
 0x2a1   : > { %3218 = vmatmul.bf16.vlgmr.msra.gmra.mxu2 %v12176_v49  ;;  %3246 = vmatmul.bf16.vlgmr.msra.gmra.mxu3 %v12184_v41 }
 0x2a2   : > { %3274 = vmatmul.bf16.vlgmr.msra.gmra.mxu0 %v12176_v49  ;;  %3302 = vmatmul.bf16.vlgmr.msra.gmra.mxu1 %v12184_v41  ;;  %v8303_v49 = vor.u32 %v10087_v44, %v8302_v13  ;;  %v8367_v41 = vor.u32 %v10103_v9, %v8366_v12  ;;  %v8347_v13 = vor.u32 %v10096_v61, %v8344_v39  ;;  %v8334_v44 = vld [vmem:[#allocation5 + $0x2a0] sm:$0xf]  ;;  %v10095_v12 = vld [vmem:[#allocation5 + $0x2a4] sm:$0xf0]  ;;  %v10078_v9 = vld [vmem:[#allocation5 + $0x224] sm:$0xf] }
 0x2a3   : > { %v8335_v7 = vor.u32 %v10095_v12, %v8334_v44  ;;  %v3362_v61 = vrot.slane %v12197_v45, 1  ;;  %v3365_v39 = vrot.slane %v12199_v10, 1 }
 0x2a4   : > { %3544 = vmatpush.bf16.msrb.mxu2 %v8303_v49  ;;  %3572 = vmatpush.bf16.msrb.mxu3 %v8367_v41  ;;  %v8272_v49 = vld [vmem:[#allocation5 + $0x228] sm:$0xf0]  ;;  %v10094_v41 = vld [vmem:[#allocation5 + $0x2a4] sm:$0xf] }
 0x2a5   : > { %3631 = vmatpush.bf16.msrb.mxu1 %v8347_v13  ;;  %v8275_v37 = vor.u32 %v10078_v9, %v8272_v49  ;;  %v8339_v55 = vor.u32 %v10094_v41, %v8336_v59  ;;  %v3364_v13 = vrot.slane %v3360_v8, 1  ;;  %v3369_v59 = vrot.slane %v12224_v53, 1 }
 0x2a7   : > { %3604 = vmatpush.bf16.msrb.mxu0 %v8275_v37  ;;  %v3366_v49 = vsel %vm13367_vm6, %v3364_v13, %v3365_v39  ;;  %v3370_v33 = vsel %vm13369_vm10, %v3365_v39, %v3369_v59  ;;  %vm13392_vm6 = vmmov %vm13358_vm1 }
 0x2a8   : > { %3545 = vmatpush.bf16.msrb.mxu2 %v8295_v2  ;;  %3573 = vmatpush.bf16.msrb.mxu3 %v8359_v31  ;;  %v10092_v2 = vld [vmem:[#allocation5 + $0x294] sm:$0xf]  ;;  %v8267_v31 = vor.u32 %v10076_v15, %v8264_v58  ;;  %vm13394_vm10 = vmmov %vm13358_vm1 }
 0x2a9   : > { %3632 = vmatpush.bf16.msrb.mxu1 %v8339_v55  ;;  %v8331_v19 = vor.u32 %v10092_v2, %v8328_v57 }
 0x2ab   : > { %3605 = vmatpush.bf16.msrb.mxu0 %v8267_v31 }
 0x2ac   : > { %3546 = vmatpush.bf16.msrb.mxu2 %v8287_v6  ;;  %3574 = vmatpush.bf16.msrb.mxu3 %v8351_v62  ;;  %v10090_v6 = vld [vmem:[#allocation5 + $0x284] sm:$0xf]  ;;  %v8320_v62 = vld [vmem:[#allocation5 + $0x288] sm:$0xf0] }
 0x2ad   : > { %3633 = vmatpush.bf16.msrb.mxu1 %v8331_v19  ;;  %v8323_v40 = vor.u32 %v10090_v6, %v8320_v62 }
 0x2af   : > { %3606 = vmatpush.bf16.msrb.mxu0 %v8259_v3 }
 0x2b0   : > { %3547 = vmatpush.bf16.msrb.mxu2 %v8279_v32  ;;  %3575 = vmatpush.bf16.msrb.mxu3 %v8343_v25  ;;  %v3041_v32 = vpack.c.b16 %v3039_v63, %v3039_v63  ;;  %v3359_v25 = vpack.c.b16 %v2675_v50, %v3357_v34 }
 0x2b1   : > { %3223 = vmatmul.bf16.gmra.mxu2 %v12197_v45  ;;  %3251 = vmatmul.bf16.gmra.mxu3 %v12199_v10 }
 0x2b2   : > { %3279 = vmatmul.bf16.gmra.mxu0 %v12197_v45  ;;  %3307 = vmatmul.bf16.gmra.mxu1 %v12199_v10  ;;  %v3361_v38 = vrot.slane %v3359_v25, 1 }
 0x2b3   : > { %3634 = vmatpush.bf16.msrb.mxu1 %v8323_v40 }
 0x2b4   : > { %3548 = vmatpush.bf16.msrb.mxu2 %v8271_v46  ;;  %3576 = vmatpush.bf16.msrb.mxu3 %v8335_v7  ;;  %v3363_v9 = vsel %vm13358_vm1, %v3361_v38, %v3362_v61  ;;  %v3367_v7 = vrot.slane %v12222_v0, 1 }
 0x2b6   : > { %v3368_v55 = vsel %vm13368_vm12, %v3362_v61, %v3367_v7  ;;  %vm13393_vm12 = vmmov %vm13358_vm1 }
 0x2b8   : > { %3549 = vmatpush.bf16.msrb.mxu2 %v8263_v14  ;;  %3577 = vmatpush.bf16.msrb.mxu3 %v8327_v4  ;;  %v3371_v14 = vrot.slane %v12240_v35, 1  ;;  %v3373_v4 = vrot.slane %v12242_v29, 1 }
 0x2ba   : > { %v3372_v24 = vsel %vm13370_vm3, %v3367_v7, %v3371_v14  ;;  %v3374_v48 = vsel %vm13371_vm8, %v3369_v59, %v3373_v4  ;;  %vm13395_vm3 = vmmov %vm13358_vm1 }
 0x2bb   : > { %vm13413_vm8 = vmmov %vm13358_vm1 }
 0x2bc   : > { %3550 = vmatpush.bf16.msrb.mxu2 %v8255_v17  ;;  %3578 = vmatpush.bf16.msrb.mxu3 %v8319_v36 }
 0x2c1   : > { %3228 = vmatmul.bf16.gmra.mxu2 %v12222_v0  ;;  %3256 = vmatmul.bf16.gmra.mxu3 %v12224_v53 }
 0x2c2   : > { %3284 = vmatmul.bf16.gmra.mxu0 %v12222_v0  ;;  %3312 = vmatmul.bf16.gmra.mxu1 %v12224_v53 }
 0x2d1   : > { %3233 = vmatmul.bf16.gmra.mxu2 %v3040_v18  ;;  %3261 = vmatmul.bf16.gmra.mxu3 %v3041_v32 }
 0x2d2   : > { %3289 = vmatmul.bf16.gmra.mxu0 %v3040_v18  ;;  %3317 = vmatmul.bf16.gmra.mxu1 %v3041_v32 }
 0x2df   : > { %v2990_v23 = vpop.f32.mrf.mxu0  ;;  %v3018_v44 = vpop.f32.mrf.mxu1 }
 0x2e0   : > { %v12272_v12 = vadd.f32 %v3018_v44, %v2990_v23 }
 0x2e1   : > { %3551 = vmatmul.bf16.vlgmr.msrb.gmra.mxu2 %v3363_v9  ;;  %3579 = vmatmul.bf16.vlgmr.msrb.gmra.mxu3 %v3366_v49 }
 0x2e2   : > { %3607 = vmatmul.bf16.vlgmr.msrb.gmra.mxu0 %v3363_v9  ;;  %3635 = vmatmul.bf16.vlgmr.msrb.gmra.mxu1 %v3366_v49 }
 0x2e4   : > { %v2934_v60 = vpop.f32.mrf.mxu2  ;;  %v2962_v50 = vpop.f32.mrf.mxu3 }
 0x2e5   : > { %v2963_v16 = vadd.f32 %v2962_v50, %v2934_v60 }
 0x2e7   : > { %v12276_v45 = vpop.f32.mrf.mxu0  ;;  %v12278_v10 = vpop.f32.mrf.mxu1 }
 0x2ec   : > { %v12280_v41 = vpop.f32.mrf.mxu2  ;;  %v12282_v46 = vpop.f32.mrf.mxu3 }
 0x2ef   : > { %v2995_v20 = vpop.f32.mrf.mxu0  ;;  %v3023_v43 = vpop.f32.mrf.mxu1 }
 0x2f0   : > { %v3024_v37 = vadd.f32 %v3023_v43, %v2995_v20 }
 0x2f1   : > { %3556 = vmatmul.bf16.gmra.mxu2 %v3368_v55  ;;  %3584 = vmatmul.bf16.gmra.mxu3 %v3370_v33 }
 0x2f2   : > { %3612 = vmatmul.bf16.gmra.mxu0 %v3368_v55  ;;  %3640 = vmatmul.bf16.gmra.mxu1 %v3370_v33 }
 0x2f4   : > { %v2939_v28 = vpop.f32.mrf.mxu2  ;;  %v2967_v15 = vpop.f32.mrf.mxu3 }
 0x2f5   : > { %v2968_v58 = vadd.f32 %v2967_v15, %v2939_v28 }
 0x2f7   : > { %v12288_v2 = vpop.f32.mrf.mxu0  ;;  %v12290_v57 = vpop.f32.mrf.mxu1 }
 0x2fc   : > { %v12292_v0 = vpop.f32.mrf.mxu2  ;;  %v12294_v53 = vpop.f32.mrf.mxu3 }
 0x2ff   : > { %v3000_v31 = vpop.f32.mrf.mxu0  ;;  %v3028_v19 = vpop.f32.mrf.mxu1 }
 0x300   : > { %v3029_v21 = vadd.f32 %v3028_v19, %v3000_v31 }
 0x301   : > { %3561 = vmatmul.bf16.gmra.mxu2 %v3372_v24  ;;  %3589 = vmatmul.bf16.gmra.mxu3 %v3374_v48 }
 0x302   : > { %3617 = vmatmul.bf16.gmra.mxu0 %v3372_v24  ;;  %3645 = vmatmul.bf16.gmra.mxu1 %v3374_v48 }
 0x304   : > { %v2944_v17 = vpop.f32.mrf.mxu2  ;;  %v2972_v27 = vpop.f32.mrf.mxu3 }
 0x305   : > { %v2973_v51 = vadd.f32 %v2972_v27, %v2944_v17 }
 0x307   : > { %v12300_v52 = vpop.f32.mrf.mxu0  ;;  %v12302_v36 = vpop.f32.mrf.mxu1 }
 0x30c   : > { %v12304_v35 = vpop.f32.mrf.mxu2  ;;  %v12306_v29 = vpop.f32.mrf.mxu3 }
 0x30f   : > { %v3005_v3 = vpop.f32.mrf.mxu0  ;;  %v3033_v6 = vpop.f32.mrf.mxu1 }
 0x310   : > { %v3034_v62 = vadd.f32 %v3033_v6, %v3005_v3 }
 0x311   : > { %3566 = vmatmul.bf16.gmra.mxu2 %v3371_v14  ;;  %3594 = vmatmul.bf16.gmra.mxu3 %v3373_v4 }
 0x312   : > { %3622 = vmatmul.bf16.gmra.mxu0 %v3371_v14  ;;  %3650 = vmatmul.bf16.gmra.mxu1 %v3373_v4 }
 0x314   : > { %v2949_v40 = vpop.f32.mrf.mxu2  ;;  %v2977_v30 = vpop.f32.mrf.mxu3 }
 0x315   : > { %v2978_v22 = vadd.f32 %v2977_v30, %v2949_v40 }
 0x317   : > { %v3007_v63 = vpop.f32.mrf.mxu0  ;;  %v3035_v18 = vpop.f32.mrf.mxu1 }
 0x31c   : > { %v2951_v32 = vpop.f32.mrf.mxu2  ;;  %v2979_v11 = vpop.f32.mrf.mxu3 }
 0x31f   : > { %v3275_v34 = vpop.f32.mrf.mxu0  ;;  %v3303_v56 = vpop.f32.mrf.mxu1 }
 0x320   : > { %v3276_v25 = vadd.f32 %v3275_v34, %v12272_v12 }
 0x322   : > { %v12309_v8 = vadd.f32 %v3303_v56, %v3276_v25 }
 0x324   : > { %13372 = vst [vmem:[#allocation23_spill] sm:$0xff] %v12309_v8  ;;  %v3219_v61 = vpop.f32.mrf.mxu2  ;;  %v3247_v39 = vpop.f32.mrf.mxu3 }
 0x325   : > { %v3220_v38 = vadd.f32 %v3219_v61, %v2963_v16 }
 0x327   : > { %v12311_v13 = vadd.f32 %v3247_v39, %v3220_v38  ;;  %v12313_v23 = vpop.f32.mrf.mxu0  ;;  %v12315_v44 = vpop.f32.mrf.mxu1 }
 0x329   : > { %13373 = vst [vmem:[#allocation24_spill] sm:$0xff] %v12311_v13 }
 0x32c   : > { %v12317_v9 = vpop.f32.mrf.mxu2  ;;  %v12319_v49 = vpop.f32.mrf.mxu3 }
 0x32f   : > { %v3280_v60 = vpop.f32.mrf.mxu0  ;;  %v3308_v50 = vpop.f32.mrf.mxu1 }
 0x330   : > { %v3281_v7 = vadd.f32 %v3280_v60, %v3024_v37 }
 0x332   : > { %v12321_v59 = vadd.f32 %v3308_v50, %v3281_v7 }
 0x334   : > { %13374 = vst [vmem:[#allocation25_spill] sm:$0xff] %v12321_v59  ;;  %v3224_v12 = vpop.f32.mrf.mxu2  ;;  %v3252_v20 = vpop.f32.mrf.mxu3 }
 0x335   : > { %v3225_v43 = vadd.f32 %v3224_v12, %v2968_v58 }
 0x337   : > { %v12323_v55 = vadd.f32 %v3252_v20, %v3225_v43  ;;  %v12325_v16 = vpop.f32.mrf.mxu0  ;;  %v12327_v33 = vpop.f32.mrf.mxu1 }
 0x339   : > { %13375 = vst [vmem:[#allocation26_spill] sm:$0xff] %v12323_v55 }
 0x33c   : > { %v12329_v28 = vpop.f32.mrf.mxu2  ;;  %v12331_v15 = vpop.f32.mrf.mxu3 }
 0x33d   : > { %13376 = vst [vmem:[#allocation27_spill] sm:$0xff] %v12331_v15 }
 0x33f   : > { %v3285_v14 = vpop.f32.mrf.mxu0  ;;  %v3313_v4 = vpop.f32.mrf.mxu1 }
 0x340   : > { %v3286_v31 = vadd.f32 %v3285_v14, %v3029_v21 }
 0x342   : > { %v12333_v19 = vadd.f32 %v3313_v4, %v3286_v31 }
 0x344   : > { %v3229_v37 = vpop.f32.mrf.mxu2  ;;  %v3257_v24 = vpop.f32.mrf.mxu3 }
 0x345   : > { %v3230_v48 = vadd.f32 %v3229_v37, %v2973_v51 }
 0x347   : > { %v12335_v17 = vadd.f32 %v3257_v24, %v3230_v48  ;;  %v12337_v58 = vpop.f32.mrf.mxu0  ;;  %v12339_v27 = vpop.f32.mrf.mxu1 }
 0x349   : > { %13377 = vst [vmem:[#allocation28_spill] sm:$0xff] %v12335_v17 }
 0x34c   : > { %v12341_v3 = vpop.f32.mrf.mxu2  ;;  %v12343_v6 = vpop.f32.mrf.mxu3 }
 0x34f   : > { %v3290_v40 = vpop.f32.mrf.mxu0  ;;  %v3318_v30 = vpop.f32.mrf.mxu1 }
 0x350   : > { %v3291_v63 = vadd.f32 %v3290_v40, %v3034_v62  ;;  %v12381_v40 = vld [vmem:[#allocation2 + $0x8] sm:$0xff] }
 0x352   : > { %v12345_v18 = vadd.f32 %v3318_v30, %v3291_v63  ;;  %v3691_v30 = vld [vmem:[#allocation2 + $0x10] sm:$0xff]  ;;  %v12383_v63 = vld [vmem:[#allocation2] sm:$0xff] }
 0x353   : > { %v3697_v5 = vunpack.c.h.bf16 %v12383_v63  ;;  %v3700_v8 = vunpack.c.l.bf16 %v3691_v30 }
 0x354   : > { %v3234_v21 = vpop.f32.mrf.mxu2  ;;  %v3262_v32 = vpop.f32.mrf.mxu3 }
 0x355   : > { %v3235_v11 = vadd.f32 %v3234_v21, %v2978_v22 }
 0x357   : > { %v12347_v34 = vadd.f32 %v3262_v32, %v3235_v11  ;;  %v3292_v51 = vpop.f32.mrf.mxu0  ;;  %v3320_v56 = vpop.f32.mrf.mxu1  ;;  %v3693_v11 = vld [vmem:[#allocation2 + $0x20] sm:$0xff] }
 0x358   : > { %v3692_v51 = vld [vmem:[#allocation2 + $0x18] sm:$0xff]  ;;  %v3694_v56 = vld [vmem:[#allocation2 + $0x28] sm:$0xff]  ;;  %v3705_v54 = vunpack.c.h.bf16 %v3693_v11  ;;  %v3704_v17 = vunpack.c.l.bf16 %v3693_v11 }
 0x359   : > { %13378 = vst [vmem:[#allocation29_spill] sm:$0xff] %v12347_v34  ;;  %v3703_v1 = vunpack.c.h.bf16 %v3692_v51  ;;  %v3707_v47 = vunpack.c.h.bf16 %v3694_v56  ;;  %v3702_v15 = vunpack.c.l.bf16 %v3692_v51 }
 0x35b   : > { %v3737_v34 = vrot.slane %v3703_v1, 1  ;;  %v12397_v1 = vrot.slane %v3700_v8, 1 }
 0x35c   : > { %v3236_v25 = vpop.f32.mrf.mxu2  ;;  %v3264_v61 = vpop.f32.mrf.mxu3 }
 0x35d   : > { %v3699_v25 = vunpack.c.h.bf16 %v12381_v40  ;;  %v3701_v61 = vunpack.c.h.bf16 %v3691_v30  ;;  %v3026_v30 = vadd.f32 %v12290_v57, %v12288_v2  ;;  %v2965_v2 = vadd.f32 %v12282_v46, %v12280_v41 }
 0x35f   : > { %v12349_v39 = vpop.f32.mrf.mxu0  ;;  %v12351_v38 = vpop.f32.mrf.mxu1  ;;  %v3729_v55 = vrot.slane %v3699_v25, 1  ;;  %v3696_v25 = vunpack.c.l.bf16 %v12383_v63  ;;  %v3283_v57 = vadd.f32 %v12325_v16, %v3026_v30  ;;  %v3222_v41 = vadd.f32 %v12317_v9, %v2965_v2  ;;  %v10106_v63 = vld [vmem:[%s13253_s7] sm:$0xff] }
 0x360   : > { %13379 = vst [vmem:[#allocation30_spill] sm:$0xff] %v12349_v39  ;;  %v3706_v39 = vunpack.c.l.bf16 %v3694_v56 }
 0x361   : > { %13380 = vst [vmem:[#allocation31_spill] sm:$0xff] %v12351_v38  ;;  %v3745_v38 = vrot.slane %v3707_v47, 1  ;;  %v3250_v51 = vadd.f32 %v12319_v49, %v3222_v41 }
 0x362   : > { %v3743_v8 = vrot.slane %v3706_v39, 1 }
 0x364   : > { %v12353_v60 = vpop.f32.mrf.mxu2  ;;  %v12355_v50 = vpop.f32.mrf.mxu3 }
 0x365   : > { %13381 = vst [vmem:[#allocation32_spill] sm:$0xff] %v12353_v60  ;;  %v3728_v60 = vrot.slane %v3697_v5, 1 }
 0x366   : > { %13382 = vst [vmem:[#allocation33_spill] sm:$0xff] %v12355_v50  ;;  %v3733_v50 = vrot.slane %v3701_v61, 1 }
 0x367   : > { %v12357_v62 = vpop.f32.mrf.mxu0  ;;  %v12359_v7 = vpop.f32.mrf.mxu1 }
 0x368   : > { %v12401_v47 = vsel %vm13391_vm5, %v3733_v50, %v3737_v34  ;;  %v3639_v56 = vadd.f32 %v12359_v7, %v12357_v62  ;;  %vm3812_vm5 = vcmask 424960  }
 0x36c   : > { %v12361_v12 = vpop.f32.mrf.mxu2  ;;  %v12363_v22 = vpop.f32.mrf.mxu3 }
 0x36d   : > { %13383 = vst [vmem:[#allocation34_spill] sm:$0xff] %v12361_v12  ;;  %v3741_v12 = vrot.slane %v3705_v54, 1  ;;  %v12395_v54 = vsel %vm13390_vm9, %v3729_v55, %v3733_v50  ;;  %v2975_v50 = vadd.f32 %v12306_v29, %v12304_v35  ;;  %v3669_v29 = vld [vmem:[%s13252_s6] sm:$0x3]  ;;  %vm13415_vm9 = vmmov %vm13358_vm1 }
 0x36e   : > { %13384 = vst [vmem:[#allocation35_spill] sm:$0xff] %v12363_v22  ;;  %v3709_v22 = vunpack.c.h.bf16 %v3695_v26  ;;  %v3672_v9 = vperm.slane %v3669_v29, 1 }
 0x36f   : > { %v12365_v20 = vpop.f32.mrf.mxu0  ;;  %v12367_v43 = vpop.f32.mrf.mxu1  ;;  %v3232_v35 = vadd.f32 %v12341_v3, %v2975_v50 }
 0x374   : > { %v12369_v14 = vpop.f32.mrf.mxu2  ;;  %v12371_v4 = vpop.f32.mrf.mxu3 }
 0x375   : > { %13385 = vst [vmem:[#allocation36_spill] sm:$0xff] %v12369_v14 }
 0x376   : > { %13386 = vst [vmem:[#allocation37_spill] sm:$0xff] %v12371_v4  ;;  %v3031_v4 = vadd.f32 %v12302_v36, %v12300_v52  ;;  %v3698_v52 = vunpack.c.l.bf16 %v12381_v40  ;;  %v3749_v36 = vrot.slane %v3709_v22, 1  ;;  %v3725_v40 = vrot.slane %v3696_v25, 1 }
 0x377   : > { %v12373_v31 = vpop.f32.mrf.mxu0  ;;  %v12375_v37 = vpop.f32.mrf.mxu1 }
 0x378   : > { %v3288_v5 = vadd.f32 %v12337_v58, %v3031_v4  ;;  %v3021_v4 = vadd.f32 %v12278_v10, %v12276_v45  ;;  %v2970_v45 = vadd.f32 %v12294_v53, %v12292_v0  ;;  %v3644_v46 = vadd.f32 %v12375_v37, %v12373_v31 }
 0x379   : > { %v3642_v31 = vadd.f32 %v12367_v43, %v12365_v20 }
 0x37a   : > { %v3278_v10 = vadd.f32 %v12313_v23, %v3021_v4  ;;  %v3227_v53 = vadd.f32 %v12329_v28, %v2970_v45 }
 0x37c   : > { %v12377_v24 = vpop.f32.mrf.mxu2  ;;  %v12379_v48 = vpop.f32.mrf.mxu3  ;;  %v13402_v62 = vld [vmem:[#allocation36_spill] sm:$0xff] }
 0x37d   : > { %13387 = vst [vmem:[#allocation38_spill] sm:$0xff] %v12377_v24  ;;  %v12390_v24 = vsel %vm13389_vm15, %v3728_v60, %v3729_v55  ;;  %v12406_v60 = vrot.slane %v3704_v17, 1  ;;  %v12411_v55 = vsel %vm13392_vm6, %v3741_v12, %v3745_v38  ;;  %v12419_v17 = vrot.slane %v3702_v15, 1  ;;  %v13403_v7 = vld [vmem:[#allocation37_spill] sm:$0xff]  ;;  %vm13414_vm15 = vmmov %vm13358_vm1 }
 0x37e   : > { %13388 = vst [vmem:[#allocation39_spill] sm:$0xff] %v12379_v48  ;;  %v3708_v48 = vunpack.c.l.bf16 %v3695_v26  ;;  %v12404_v26 = vsel %vm13358_vm1, %v3737_v34, %v3741_v12  ;;  %v3750_v15 = vsel %vm13393_vm12, %v3745_v38, %v3749_v36  ;;  %v3311_v38 = vadd.f32 %v12327_v33, %v3283_v57  ;;  %v13404_v57 = vld [vmem:[#allocation28_spill] sm:$0xff] }
 0x37f   : > { %v3618_v21 = vpop.f32.mrf.mxu0  ;;  %v3646_v32 = vpop.f32.mrf.mxu1  ;;  %v12438_v0 = vsel %vm13394_vm10, %v12406_v60, %v3743_v8  ;;  %v3586_v2 = vadd.f32 %v13403_v7, %v13402_v62  ;;  %vm6078_vm10 = vcmask 195584  }
 0x380   : > { %v12417_v34 = vrot.slane %v3708_v48, 1  ;;  %v3647_v39 = vadd.f32 %v3646_v32, %v3618_v21  ;;  %v3306_v48 = vadd.f32 %v12315_v44, %v3278_v10  ;;  %v3260_v21 = vadd.f32 %v12343_v6, %v3232_v35  ;;  %v13399_v6 = vld [vmem:[#allocation30_spill] sm:$0xff]  ;;  %v13405_v35 = vld [vmem:[#allocation29_spill] sm:$0xff] }
 0x381   : > { %v3662_v61 = vadd.f32 %v3644_v46, %v3311_v38 }
 0x382   : > { %v3664_v37 = vadd.f32 %v3647_v39, %v12333_v19  ;;  %v3658_v45 = vadd.f32 %v3639_v56, %v3306_v48  ;;  %v13410_v48 = vld [vmem:[#allocation33_spill] sm:$0xff] }
 0x383   : > { %v3682_v10 = vadd.f32 %v3672_v9, %v3662_v61  ;;  %v13411_v61 = vld [vmem:[#allocation26_spill] sm:$0xff] }
 0x384   : > { %v3562_v42 = vpop.f32.mrf.mxu2  ;;  %v3590_v13 = vpop.f32.mrf.mxu3  ;;  %v3684_v49 = vadd.f32 %v3672_v9, %v3664_v37 }
 0x385   : > { %v3591_v32 = vadd.f32 %v3590_v13, %v3562_v42  ;;  %v13398_v20 = vld [vmem:[#allocation39_spill] sm:$0xff] }
 0x386   : > { %v13400_v42 = vld [vmem:[#allocation31_spill] sm:$0xff] }
 0x387   : > { %v3620_v14 = vpop.f32.mrf.mxu0  ;;  %v3648_v59 = vpop.f32.mrf.mxu1  ;;  %v3637_v13 = vadd.f32 %v13400_v42, %v13399_v6 }
 0x388   : > { %v3649_v58 = vadd.f32 %v3648_v59, %v3620_v14  ;;  %v3316_v59 = vadd.f32 %v12339_v27, %v3288_v5  ;;  %v3748_v14 = vsel %vm13395_vm3, %v3743_v8, %v12417_v34  ;;  %v13396_v5 = vld [vmem:[#allocation27_spill] sm:$0xff]  ;;  %vm7278_vm3 = vcmask 256000  }
 0x389   : > { %v3255_v30 = vadd.f32 %v13396_v5, %v3227_v53  ;;  %v13407_v53 = vld [vmem:[#allocation35_spill] sm:$0xff]  ;;  %v3659_v5 = vadd.f32 %v3586_v2, %v13411_v61 }
 0x38a   : > { %v3666_v16 = vadd.f32 %v3649_v58, %v3316_v59  ;;  %v13397_v58 = vld [vmem:[#allocation38_spill] sm:$0xff]  ;;  %v3663_v59 = vadd.f32 %v3591_v32, %v13404_v57  ;;  %v3774_v32 = vadd.f32 %v12411_v55, %v3684_v49  ;;  %v13412_v49 = vld [vmem:[#allocation24_spill] sm:$0xff] }
 0x38b   : > { %v3588_v43 = vadd.f32 %v13398_v20, %v13397_v58 }
 0x38c   : > { %v3564_v22 = vpop.f32.mrf.mxu2  ;;  %v3592_v11 = vpop.f32.mrf.mxu3  ;;  %v3686_v33 = vadd.f32 %v3672_v9, %v3666_v16 }
 0x38d   : > { %v3593_v23 = vadd.f32 %v3592_v11, %v3564_v22  ;;  %v3671_v11 = vperm.slane %v3669_v29, 0  ;;  %v13408_v29 = vld [vmem:[#allocation23_spill] sm:$0xff] }
 0x38e   : > { %v3656_v37 = vadd.f32 %v3637_v13, %v13408_v29  ;;  %v3788_v13 = vmax.f32 %v3774_v32, 0.0  ;;  %v10140_v32 = vld [vmem:[#allocation7 + $0xf4] sm:$0xf0] }
 0x38f   : > { %v3623_v27 = vpop.f32.mrf.mxu0  ;;  %v3651_v12 = vpop.f32.mrf.mxu1  ;;  %v3665_v19 = vadd.f32 %v3593_v23, %v3260_v21  ;;  %v3683_v58 = vadd.f32 %v3671_v11, %v3663_v59  ;;  %v3679_v62 = vadd.f32 %v3671_v11, %v3659_v5  ;;  %v8524_v5 = vld [vmem:[#allocation7 + $0xe0] sm:$0xf] }
 0x390   : > { %v3652_v3 = vadd.f32 %v3651_v12, %v3623_v27  ;;  %v3776_v27 = vadd.f32 %v3750_v15, %v3686_v33  ;;  %v13406_v12 = vld [vmem:[#allocation34_spill] sm:$0xff]  ;;  %v3678_v15 = vadd.f32 %v3672_v9, %v3658_v45  ;;  %v3676_v42 = vadd.f32 %v3672_v9, %v3656_v37 }
 0x391   : > { %v3583_v23 = vadd.f32 %v13407_v53, %v13406_v12  ;;  %v3685_v38 = vadd.f32 %v3671_v11, %v3665_v19 }
 0x392   : > { %v3668_v28 = vadd.f32 %v3652_v3, %v12345_v18  ;;  %v13401_v18 = vld [vmem:[#allocation25_spill] sm:$0xff]  ;;  %v3661_v3 = vadd.f32 %v3588_v43, %v3255_v30  ;;  %v3790_v33 = vmax.f32 %v3776_v27, 0.0  ;;  %v3772_v30 = vadd.f32 %v12404_v26, %v3682_v10 }
 0x393   : > { %v3660_v50 = vadd.f32 %v3642_v31, %v13401_v18  ;;  %v3657_v43 = vadd.f32 %v3583_v23, %v3250_v51  ;;  %v3775_v55 = vadd.f32 %v3748_v14, %v3685_v38  ;;  %v3740_v26 = vsel %vm13413_vm8, %v12419_v17, %v12406_v60 }
 0x394   : > { %v3688_v8 = vadd.f32 %v3672_v9, %v3668_v28  ;;  %v3567_v44 = vpop.f32.mrf.mxu2  ;;  %v3595_v4 = vpop.f32.mrf.mxu3  ;;  %v3681_v19 = vadd.f32 %v3671_v11, %v3661_v3  ;;  %v3798_v51 = vpack.c.bf16 %v3790_v33, %v3788_v13  ;;  %v3786_v2 = vmax.f32 %v3772_v30, 0.0  ;;  %v8468_v33 = vld [vmem:[#allocation7 + $0x70] sm:$0xf]  ;;  %v10135_v13 = vld [vmem:[#allocation7 + $0xd4] sm:$0xf] }
 0x395   : > { %v3596_v22 = vadd.f32 %v3595_v4, %v3567_v44  ;;  %v3680_v21 = vadd.f32 %v3672_v9, %v3660_v50  ;;  %v3768_v14 = vadd.f32 %v12395_v54, %v3678_v15  ;;  %v3677_v9 = vadd.f32 %v3671_v11, %v3657_v43  ;;  %v8526_v15 = vld [vmem:[#allocation7 + $0xe8] sm:$0xf0] }
 0x396   : > { %v3778_v39 = vadd.f32 %v3749_v36, %v3688_v8  ;;  %v13409_v36 = vld [vmem:[#allocation32_spill] sm:$0xff]  ;;  %v3789_v57 = vmax.f32 %v3775_v55, 0.0  ;;  %v3771_v59 = vadd.f32 %v3740_v26, %v3681_v19  ;;  %v3766_v45 = vadd.f32 %v12390_v24, %v3676_v42 }
 0x397   : > { %v3667_v41 = vadd.f32 %v3596_v22, %v13405_v35  ;;  %v3625_v46 = vpop.f32.mrf.mxu0  ;;  %v3653_v16 = vpop.f32.mrf.mxu1  ;;  %v3581_v56 = vadd.f32 %v13410_v48, %v13409_v36  ;;  %v3770_v50 = vadd.f32 %v12401_v47, %v3680_v21  ;;  %v3726_v47 = vrot.slane %v3698_v52, 1  ;;  %v10108_v21 = vld [vmem:[%s13253_s7 + $0x18] sm:$0xff]  ;;  %v10139_v36 = vld [vmem:[#allocation7 + $0xf4] sm:$0xf]  ;;  %v8534_v48 = vld [vmem:[#allocation7 + $0xf8] sm:$0xf0] }
 0x398   : > { %v3792_v31 = vmax.f32 %v3778_v39, 0.0  ;;  %v3736_v60 = vsel %vm13414_vm15, %v12397_v1, %v12419_v17  ;;  %v3782_v46 = vmax.f32 %v3768_v14, 0.0  ;;  %v3785_v27 = vmax.f32 %v3771_v59, 0.0  ;;  %v10136_v42 = vld [vmem:[#allocation7 + $0xd4] sm:$0xf0] }
 0x399   : > { %v3687_v28 = vadd.f32 %v3671_v11, %v3667_v41  ;;  %v3655_v22 = vadd.f32 %v3581_v56, %v13412_v49  ;;  %v3769_v35 = vadd.f32 %v3736_v60, %v3679_v62  ;;  %v3732_v52 = vsel %vm13415_vm9, %v3726_v47, %v12397_v1  ;;  %v10122_v49 = vld [vmem:[#allocation7 + $0x64] sm:$0xf0]  ;;  %v10107_v62 = vld [vmem:[%s13253_s7 + $0xc] sm:$0xff]  ;;  %v8452_v59 = vld [vmem:[#allocation7 + $0x50] sm:$0xf] }
 0x39a   : > { %v3800_v20 = vpack.c.bf16 %v3792_v31, %v3792_v31  ;;  %v3767_v24 = vadd.f32 %v3732_v52, %v3677_v9  ;;  %v3780_v12 = vmax.f32 %v3766_v45, 0.0  ;;  %v3803_v31 = vld [vmem:[%s13253_s7 + $0x8] sm:$0xf]  ;;  %v8537_v61 = vor.u32 %v10139_v36, %v8534_v48  ;;  %v8508_v9 = vld [vmem:[#allocation7 + $0xc0] sm:$0xf] }
 0x39b   : > { %v3777_v8 = vadd.f32 %v12417_v34, %v3687_v28  ;;  %v3773_v34 = vadd.f32 %v12438_v0, %v3683_v58  ;;  %v3784_v0 = vmax.f32 %v3770_v50, 0.0  ;;  %v3675_v10 = vadd.f32 %v3671_v11, %v3655_v22  ;;  %v8532_v28 = vld [vmem:[#allocation7 + $0xf0] sm:$0xf]  ;;  %v10138_v58 = vld [vmem:[#allocation7 + $0xe4] sm:$0xf0] }
 0x39c   : > { %v3569_v44 = vpop.f32.mrf.mxu2  ;;  %v3597_v4 = vpop.f32.mrf.mxu3  ;;  %v3824_v6 = vsel %vm1340_vm7, %v3800_v20, 0  ;;  %v3783_v11 = vmax.f32 %v3769_v35, 0.0  ;;  %v3794_v23 = vpack.c.bf16 %v3782_v46, %v3780_v12  ;;  %v3781_v25 = vmax.f32 %v3767_v24, 0.0  ;;  %v10137_v20 = vld [vmem:[#allocation7 + $0xe4] sm:$0xf] }
 0x39d   : > { %3848 = vmatpush.bf16.msra.mxu3 %v3824_v6  ;;  %3964 = vmatpush.bf16.msra.mxu1 %v3824_v6  ;;  %v3791_v18 = vmax.f32 %v3777_v8, 0.0  ;;  %v3787_v54 = vmax.f32 %v3773_v34, 0.0  ;;  %v3796_v41 = vpack.c.bf16 %v3786_v2, %v3784_v0  ;;  %v3809_v29 = vunpack.c.l.b16 %v3803_v31  ;;  %v10124_v8 = vld [vmem:[#allocation7 + $0x74] sm:$0xf0]  ;;  %v10123_v44 = vld [vmem:[#allocation7 + $0x74] sm:$0xf] }
 0x39e   : > { %v3795_v3 = vpack.c.bf16 %v3785_v27, %v3783_v11  ;;  %v8533_v56 = vor.u32 %v10140_v32, %v8532_v28  ;;  %v8525_v30 = vor.u32 %v10138_v58, %v8524_v5  ;;  %v8529_v43 = vor.u32 %v10137_v20, %v8526_v15  ;;  %v8470_v4 = vld [vmem:[#allocation7 + $0x78] sm:$0xf0]  ;;  %v8460_v50 = vld [vmem:[#allocation7 + $0x60] sm:$0xf]  ;;  %v10121_v22 = vld [vmem:[#allocation7 + $0x64] sm:$0xf] }
 0x39f   : > { %v3799_v7 = vpack.c.bf16 %v3791_v18, %v3791_v18  ;;  %v3797_v16 = vpack.c.bf16 %v3789_v57, %v3787_v54  ;;  %v3811_v37 = vpack.c.b16 %v3809_v29, %v3809_v29  ;;  %v8469_v19 = vor.u32 %v10124_v8, %v8468_v33  ;;  %v8518_v18 = vld [vmem:[#allocation7 + $0xd8] sm:$0xf0]  ;;  %v8401_v34 = vld [vmem:[%s13253_s7 + $0x20] sm:$0xf]  ;;  %v10134_v57 = vld [vmem:[#allocation7 + $0xc4] sm:$0xf0] }
 0x3a0   : > { %v8473_v55 = vor.u32 %v10123_v44, %v8470_v4  ;;  %v8461_v26 = vor.u32 %v10122_v49, %v8460_v50  ;;  %v8521_v2 = vor.u32 %v10135_v13, %v8518_v18  ;;  %v8454_v0 = vld [vmem:[#allocation7 + $0x58] sm:$0xf0]  ;;  %v3933_v45 = vunpack.c.l.b16 %v8401_v34  ;;  %v10133_v60 = vld [vmem:[#allocation7 + $0xc4] sm:$0xf]  ;;  %v8500_v24 = vld [vmem:[#allocation7 + $0xb0] sm:$0xf] }
 0x3a1   : > { %3849 = vmatpush.bf16.msra.mxu3 %v3798_v51  ;;  %3965 = vmatpush.bf16.msra.mxu1 %v3798_v51  ;;  %v3821_v39 = vsel %vm1340_vm7, %v3799_v7, 0  ;;  %vm13416_vm7 = vmmov %vm13358_vm1  ;;  %v8509_v46 = vor.u32 %v10134_v57, %v8508_v9  ;;  %v10117_v52 = vld [vmem:[#allocation7 + $0x44] sm:$0xf]  ;;  %v10132_v12 = vld [vmem:[#allocation7 + $0xb4] sm:$0xf0] }
 0x3a2   : > { %3830 = vmatpush.bf16.msra.mxu2 %v3821_v39  ;;  %3946 = vmatpush.bf16.msra.mxu0 %v3821_v39  ;;  %v3727_v17 = vsel %vm13416_vm7, %v3725_v40, %v3726_v47  ;;  %v10120_v47 = vld [vmem:[#allocation7 + $0x54] sm:$0xf0]  ;;  %v10118_v40 = vld [vmem:[#allocation7 + $0x44] sm:$0xf0]  ;;  %v10131_v11 = vld [vmem:[#allocation7 + $0xb4] sm:$0xf] }
 0x3a3   : > { %v3765_v53 = vadd.f32 %v3727_v17, %v3675_v10  ;;  %v8510_v10 = vld [vmem:[#allocation7 + $0xc8] sm:$0xf0]  ;;  %v8453_v54 = vor.u32 %v10120_v47, %v8452_v59  ;;  %v3935_v17 = vpack.c.b16 %v3933_v45, %v3933_v45  ;;  %v8492_v29 = vld [vmem:[#allocation7 + $0xa0] sm:$0xf]  ;;  %v8436_v36 = vld [vmem:[#allocation7 + $0x30] sm:$0xf] }
 0x3a4   : > { %v8513_v27 = vor.u32 %v10133_v60, %v8510_v10  ;;  %v8494_v32 = vld [vmem:[#allocation7 + $0xa8] sm:$0xf0]  ;;  %v10116_v48 = vld [vmem:[#allocation7 + $0x34] sm:$0xf0]  ;;  %v10115_v5 = vld [vmem:[#allocation7 + $0x34] sm:$0xf] }
 0x3a5   : > { %3850 = vmatpush.bf16.msra.mxu3 %v3796_v41  ;;  %3966 = vmatpush.bf16.msra.mxu1 %v3796_v41  ;;  %v3779_v1 = vmax.f32 %v3765_v53, 0.0  ;;  %v8502_v53 = vld [vmem:[#allocation7 + $0xb8] sm:$0xf0]  ;;  %v8484_v20 = vld [vmem:[#allocation7 + $0x90] sm:$0xf] }
 0x3a6   : > { %3831 = vmatpush.bf16.msra.mxu2 %v3797_v16  ;;  %3947 = vmatpush.bf16.msra.mxu0 %v3797_v16  ;;  %v8438_v58 = vld [vmem:[#allocation7 + $0x38] sm:$0xf0]  ;;  %v10128_v33 = vld [vmem:[#allocation7 + $0x94] sm:$0xf0]  ;;  %v10127_v8 = vld [vmem:[#allocation7 + $0x94] sm:$0xf] }
 0x3a7   : > { %v3793_v38 = vpack.c.bf16 %v3781_v25, %v3779_v1  ;;  %v8501_v25 = vor.u32 %v10132_v12, %v8500_v24  ;;  %v8505_v1 = vor.u32 %v10131_v11, %v8502_v53  ;;  %v8441_v15 = vor.u32 %v10115_v5, %v8438_v58  ;;  %v8428_v44 = vld [vmem:[#allocation7 + $0x20] sm:$0xf]  ;;  %v10114_v4 = vld [vmem:[#allocation7 + $0x24] sm:$0xf0]  ;;  %v10125_v49 = vld [vmem:[#allocation7 + $0x84] sm:$0xf] }
 0x3a8   : > { %v8476_v18 = vld [vmem:[#allocation7 + $0x80] sm:$0xf]  ;;  %v10126_v50 = vld [vmem:[#allocation7 + $0x84] sm:$0xf0]  ;;  %v8420_v34 = vld [vmem:[#allocation7 + $0x10] sm:$0xf] }
 0x3a9   : > { %3851 = vmatpush.bf16.msra.mxu3 %v3794_v23  ;;  %3967 = vmatpush.bf16.msra.mxu1 %v3794_v23  ;;  %v8660_v9 = vld [vmem:[#allocation7 + $0x1f0] sm:$0xf]  ;;  %v10172_v59 = vld [vmem:[#allocation7 + $0x1f4] sm:$0xf0]  ;;  %v10171_v47 = vld [vmem:[#allocation7 + $0x1f4] sm:$0xf] }
 0x3aa   : > { %3832 = vmatpush.bf16.msra.mxu2 %v3795_v3  ;;  %3948 = vmatpush.bf16.msra.mxu0 %v3795_v3  ;;  %v8412_v60 = vld [vmem:[#allocation7] sm:$0xf]  ;;  %v10110_v10 = vld [vmem:[#allocation7 + $0x4] sm:$0xf0]  ;;  %v8654_v24 = vld [vmem:[#allocation7 + $0x1e8] sm:$0xf0] }
 0x3ab   : > { %v8596_v12 = vld [vmem:[#allocation7 + $0x170] sm:$0xf]  ;;  %v10166_v5 = vld [vmem:[#allocation7 + $0x1c4] sm:$0xf0]  ;;  %v10165_v58 = vld [vmem:[#allocation7 + $0x1c4] sm:$0xf] }
 0x3ac   : > { %8386 = vmatmul.msk.bf16.vlgmr.msra.gmra.mxu3 %vm3812_vm5, %v10106_v63  ;;  %8408 = vmatmul.msk.bf16.vlgmr.msra.gmra.mxu1 %vm3812_vm5, %v10108_v21 }
 0x3ad   : > { %3906 = vmatpush.bf16.msrb.mxu3 %v3824_v6  ;;  %4229 = vmatpush.bf16.msrb.mxu1 %v8537_v61  ;;  %v8516_v6 = vld [vmem:[#allocation7 + $0xd0] sm:$0xf]  ;;  %v8437_v61 = vor.u32 %v10116_v48, %v8436_v36  ;;  %v8590_v48 = vld [vmem:[#allocation7 + $0x168] sm:$0xf0] }
 0x3ae   : > { %3833 = vmatpush.bf16.msra.mxu2 %v3793_v38  ;;  %3949 = vmatpush.bf16.msra.mxu0 %v3793_v38  ;;  %v8517_v7 = vor.u32 %v10136_v42, %v8516_v6  ;;  %v10113_v6 = vld [vmem:[#allocation7 + $0x24] sm:$0xf]  ;;  %v8430_v42 = vld [vmem:[#allocation7 + $0x28] sm:$0xf0] }
 0x3af   : > { %v8433_v13 = vor.u32 %v10113_v6, %v8430_v42  ;;  %v8628_v6 = vld [vmem:[#allocation7 + $0x1b0] sm:$0xf]  ;;  %v10163_v42 = vld [vmem:[#allocation7 + $0x1b4] sm:$0xf] }
 0x3b1   : > { %3907 = vmatpush.bf16.msrb.mxu3 %v3798_v51  ;;  %8384 = vmatmul.msk.bf16.vlgmr.msra.gmra.mxu2 %vm3812_vm5, %v10106_v63  ;;  %v8462_v51 = vld [vmem:[#allocation7 + $0x68] sm:$0xf0]  ;;  %v8390_v63 = vld [vmem:[%s13253_s7 + $0x14] sm:$0xf] }
 0x3b2   : > { %3888 = vmatpush.bf16.msrb.mxu2 %v3821_v39  ;;  %8406 = vmatmul.msk.bf16.vlgmr.msra.gmra.mxu0 %vm3812_vm5, %v10108_v21  ;;  %v8465_v14 = vor.u32 %v10121_v22, %v8462_v51  ;;  %v10119_v39 = vld [vmem:[#allocation7 + $0x54] sm:$0xf]  ;;  %v10129_v21 = vld [vmem:[#allocation7 + $0xa4] sm:$0xf]  ;;  %v8477_v22 = vor.u32 %v10126_v50, %v8476_v18  ;;  %v8630_v18 = vld [vmem:[#allocation7 + $0x1b8] sm:$0xf0] }
 0x3b3   : > { %4211 = vmatpush.bf16.msrb.mxu0 %v8473_v55  ;;  %4230 = vmatpush.bf16.msrb.mxu1 %v8529_v43  ;;  %v8457_v35 = vor.u32 %v10119_v39, %v8454_v0  ;;  %v8485_v43 = vor.u32 %v10128_v33, %v8484_v20  ;;  %v8429_v55 = vor.u32 %v10114_v4, %v8428_v44  ;;  %v8662_v39 = vld [vmem:[#allocation7 + $0x1f8] sm:$0xf0]  ;;  %v8580_v33 = vld [vmem:[#allocation7 + $0x150] sm:$0xf] }
 0x3b4   : > { %v8661_v0 = vor.u32 %v10172_v59, %v8660_v9  ;;  %v8665_v45 = vor.u32 %v10171_v47, %v8662_v39  ;;  %v8582_v44 = vld [vmem:[#allocation7 + $0x158] sm:$0xf0]  ;;  %v8633_v50 = vor.u32 %v10163_v42, %v8630_v18  ;;  %v10161_v9 = vld [vmem:[#allocation7 + $0x1a4] sm:$0xf]  ;;  %v8622_v59 = vld [vmem:[#allocation7 + $0x1a8] sm:$0xf0] }
 0x3b5   : > { %3908 = vmatpush.bf16.msrb.mxu3 %v3796_v41  ;;  %v8444_v41 = vld [vmem:[#allocation7 + $0x40] sm:$0xf]  ;;  %v8564_v47 = vld [vmem:[#allocation7 + $0x130] sm:$0xf]  ;;  %v10148_v39 = vld [vmem:[#allocation7 + $0x134] sm:$0xf0] }
 0x3b6   : > { %3889 = vmatpush.bf16.msrb.mxu2 %v3797_v16  ;;  %v8446_v16 = vld [vmem:[#allocation7 + $0x48] sm:$0xf0]  ;;  %v10202_v42 = vld [vmem:[#allocation7 + $0x2e4] sm:$0xf0] }
 0x3b7   : > { %4212 = vmatpush.bf16.msrb.mxu0 %v8465_v14  ;;  %4231 = vmatpush.bf16.msrb.mxu1 %v8521_v2  ;;  %v10111_v2 = vld [vmem:[#allocation7 + $0x14] sm:$0xf]  ;;  %v8422_v14 = vld [vmem:[#allocation7 + $0x18] sm:$0xf0] }
 0x3b8   : > { %v8425_v57 = vor.u32 %v10111_v2, %v8422_v14  ;;  %v8620_v2 = vld [vmem:[#allocation7 + $0x1a0] sm:$0xf]  ;;  %v10162_v14 = vld [vmem:[#allocation7 + $0x1a4] sm:$0xf0] }
 0x3b9   : > { %3909 = vmatpush.bf16.msrb.mxu3 %v3794_v23  ;;  %v8445_v23 = vor.u32 %v10118_v40, %v8444_v41  ;;  %v8414_v41 = vld [vmem:[#allocation7 + $0x8] sm:$0xf0]  ;;  %v8652_v40 = vld [vmem:[#allocation7 + $0x1e0] sm:$0xf] }
 0x3ba   : > { %3890 = vmatpush.bf16.msrb.mxu2 %v3795_v3  ;;  %v8449_v3 = vor.u32 %v10117_v52, %v8446_v16  ;;  %v10170_v52 = vld [vmem:[#allocation7 + $0x1e4] sm:$0xf0]  ;;  %v10169_v16 = vld [vmem:[#allocation7 + $0x1e4] sm:$0xf] }
 0x3bb   : > { %4213 = vmatpush.bf16.msrb.mxu0 %v8457_v35  ;;  %4232 = vmatpush.bf16.msrb.mxu1 %v8513_v27  ;;  %v8413_v35 = vor.u32 %v10110_v10, %v8412_v60  ;;  %v8653_v27 = vor.u32 %v10170_v52, %v8652_v40  ;;  %v8657_v11 = vor.u32 %v10169_v16, %v8654_v24  ;;  %v10147_v60 = vld [vmem:[#allocation7 + $0x134] sm:$0xf]  ;;  %v8566_v10 = vld [vmem:[#allocation7 + $0x138] sm:$0xf0]  ;;  %v8556_v24 = vld [vmem:[#allocation7 + $0x120] sm:$0xf] }
 0x3bc   : > { %8387 = vmatmul.msk.bf16.gmra.mxu3 %vm3812_vm5, %v3811_v37  ;;  %8409 = vmatmul.msk.bf16.gmra.mxu1 %vm3812_vm5, %v3935_v17  ;;  %v8614_v40 = vld [vmem:[#allocation7 + $0x198] sm:$0xf0] }
 0x3bd   : > { %4193 = vmatpush.bf16.msra.mxu3 %v8533_v56  ;;  %v8497_v56 = vor.u32 %v10129_v21, %v8494_v32  ;;  %v8588_v21 = vld [vmem:[#allocation7 + $0x160] sm:$0xf]  ;;  %v10153_v32 = vld [vmem:[#allocation7 + $0x164] sm:$0xf] }
 0x3be   : > { %3891 = vmatpush.bf16.msrb.mxu2 %v3793_v38  ;;  %v3875_v38 = vunpack.c.l.b16 %v8390_v63  ;;  %v8644_v63 = vld [vmem:[#allocation7 + $0x1d0] sm:$0xf] }
 0x3bf   : > { %4214 = vmatpush.bf16.msrb.mxu0 %v8449_v3  ;;  %4233 = vmatpush.bf16.msrb.mxu1 %v8505_v1  ;;  %v8598_v3 = vld [vmem:[#allocation7 + $0x178] sm:$0xf0]  ;;  %v10168_v1 = vld [vmem:[#allocation7 + $0x1d4] sm:$0xf0] }
 0x3c0   : > { %v3877_v31 = vpack.c.b16 %v3875_v38, %v3875_v38  ;;  %v10167_v38 = vld [vmem:[#allocation7 + $0x1d4] sm:$0xf] }
 0x3c1   : > { %8385 = vmatmul.msk.bf16.gmra.mxu2 %vm3812_vm5, %v3811_v37  ;;  %4194 = vmatpush.bf16.msra.mxu3 %v8525_v30  ;;  %v10130_v37 = vld [vmem:[#allocation7 + $0xa4] sm:$0xf0]  ;;  %v8486_v30 = vld [vmem:[#allocation7 + $0x98] sm:$0xf0] }
 0x3c2   : > { %4175 = vmatpush.bf16.msra.mxu2 %v8469_v19  ;;  %8407 = vmatmul.msk.bf16.gmra.mxu0 %vm3812_vm5, %v3935_v17  ;;  %v8493_v28 = vor.u32 %v10130_v37, %v8492_v29  ;;  %v8489_v19 = vor.u32 %v10127_v8, %v8486_v30  ;;  %v10156_v17 = vld [vmem:[#allocation7 + $0x174] sm:$0xf0]  ;;  %v8645_v29 = vor.u32 %v10168_v1, %v8644_v63  ;;  %v10158_v1 = vld [vmem:[#allocation7 + $0x184] sm:$0xf0] }
 0x3c3   : > { %4234 = vmatpush.bf16.msrb.mxu1 %v8497_v56  ;;  %4215 = vmatpush.bf16.msrb.mxu0 %v8441_v15  ;;  %v8597_v53 = vor.u32 %v10156_v17, %v8596_v12  ;;  %v8593_v56 = vor.u32 %v10153_v32, %v8590_v48  ;;  %v8638_v15 = vld [vmem:[#allocation7 + $0x1c8] sm:$0xf0]  ;;  %v10152_v8 = vld [vmem:[#allocation7 + $0x154] sm:$0xf0]  ;;  %v10146_v12 = vld [vmem:[#allocation7 + $0x124] sm:$0xf0] }
 0x3c4   : > { %v8641_v30 = vor.u32 %v10165_v58, %v8638_v15  ;;  %v10145_v17 = vld [vmem:[#allocation7 + $0x124] sm:$0xf]  ;;  %v8550_v48 = vld [vmem:[#allocation7 + $0x118] sm:$0xf0]  ;;  %v10203_v58 = vld [vmem:[#allocation7 + $0x2f4] sm:$0xf] }
 0x3c5   : > { %4195 = vmatpush.bf16.msra.mxu3 %v8517_v7 }
 0x3c6   : > { %4176 = vmatpush.bf16.msra.mxu2 %v8461_v26  ;;  %v10112_v26 = vld [vmem:[#allocation7 + $0x14] sm:$0xf0] }
 0x3c7   : > { %4235 = vmatpush.bf16.msrb.mxu1 %v8489_v19  ;;  %4216 = vmatpush.bf16.msrb.mxu0 %v8433_v13  ;;  %v8421_v7 = vor.u32 %v10112_v26, %v8420_v34  ;;  %v10151_v19 = vld [vmem:[#allocation7 + $0x154] sm:$0xf]  ;;  %v8574_v26 = vld [vmem:[#allocation7 + $0x148] sm:$0xf0] }
 0x3c8   : > { %v8585_v4 = vor.u32 %v10151_v19, %v8582_v44  ;;  %v10142_v19 = vld [vmem:[#allocation7 + $0x104] sm:$0xf0]  ;;  %v10141_v44 = vld [vmem:[#allocation7 + $0x104] sm:$0xf] }
 0x3c9   : > { %4196 = vmatpush.bf16.msra.mxu3 %v8509_v46 }
 0x3ca   : > { %4177 = vmatpush.bf16.msra.mxu2 %v8453_v54  ;;  %v10109_v54 = vld [vmem:[#allocation7 + $0x4] sm:$0xf] }
 0x3cb   : > { %4217 = vmatpush.bf16.msrb.mxu0 %v8425_v57  ;;  %v8417_v46 = vor.u32 %v10109_v54, %v8414_v41  ;;  %v8621_v57 = vor.u32 %v10162_v14, %v8620_v2  ;;  %v8612_v54 = vld [vmem:[#allocation7 + $0x190] sm:$0xf]  ;;  %v10160_v41 = vld [vmem:[#allocation7 + $0x194] sm:$0xf0] }
 0x3cc   : > { %8397 = vmatmul.msk.bf16.vlgmr.msrb.gmra.mxu3 %vm3812_vm5, %v10107_v62  ;;  %v8613_v52 = vor.u32 %v10160_v41, %v8612_v54  ;;  %v10185_v54 = vld [vmem:[#allocation7 + $0x264] sm:$0xf]  ;;  %v8764_v41 = vld [vmem:[#allocation7 + $0x2c0] sm:$0xf] }
 0x3cd   : > { %4197 = vmatpush.bf16.msra.mxu3 %v8501_v25 }
 0x3ce   : > { %4178 = vmatpush.bf16.msra.mxu2 %v8445_v23  ;;  %v10155_v23 = vld [vmem:[#allocation7 + $0x174] sm:$0xf] }
 0x3cf   : > { %4218 = vmatpush.bf16.msrb.mxu0 %v8417_v46  ;;  %v8601_v25 = vor.u32 %v10155_v23, %v8598_v3  ;;  %v10159_v46 = vld [vmem:[#allocation7 + $0x194] sm:$0xf] }
 0x3d1   : > { %8395 = vmatmul.msk.bf16.vlgmr.msrb.gmra.mxu2 %vm3812_vm5, %v10107_v62  ;;  %4198 = vmatpush.bf16.msra.mxu3 %v8493_v28  ;;  %v8478_v62 = vld [vmem:[#allocation7 + $0x88] sm:$0xf0]  ;;  %v10154_v28 = vld [vmem:[#allocation7 + $0x164] sm:$0xf0] }
 0x3d2   : > { %4179 = vmatpush.bf16.msra.mxu2 %v8437_v61  ;;  %v8481_v51 = vor.u32 %v10125_v49, %v8478_v62  ;;  %v8589_v36 = vor.u32 %v10154_v28, %v8588_v21  ;;  %v8636_v61 = vld [vmem:[#allocation7 + $0x1c0] sm:$0xf]  ;;  %v10149_v62 = vld [vmem:[#allocation7 + $0x144] sm:$0xf]  ;;  %v10144_v21 = vld [vmem:[#allocation7 + $0x114] sm:$0xf0] }
 0x3d3   : > { %4487 = vmatpush.bf16.msra.mxu0 %v8601_v25  ;;  %v8637_v20 = vor.u32 %v10166_v5, %v8636_v61  ;;  %v8572_v49 = vld [vmem:[#allocation7 + $0x140] sm:$0xf]  ;;  %v10204_v5 = vld [vmem:[#allocation7 + $0x2f4] sm:$0xf0] }
 0x3d4   : > { %4236 = vmatpush.bf16.msrb.mxu1 %v8481_v51  ;;  %v8577_v51 = vor.u32 %v10149_v62, %v8574_v26  ;;  %v8604_v25 = vld [vmem:[#allocation7 + $0x180] sm:$0xf]  ;;  %v8724_v62 = vld [vmem:[#allocation7 + $0x270] sm:$0xf]  ;;  %v10188_v26 = vld [vmem:[#allocation7 + $0x274] sm:$0xf0] }
 0x3d5   : > { %4199 = vmatpush.bf16.msra.mxu3 %v8485_v43  ;;  %v8581_v43 = vor.u32 %v10152_v8, %v8580_v33  ;;  %v8725_v2 = vor.u32 %v10188_v26, %v8724_v62  ;;  %v10191_v62 = vld [vmem:[#allocation7 + $0x294] sm:$0xf]  ;;  %v8684_v26 = vld [vmem:[#allocation7 + $0x220] sm:$0xf] }
 0x3d6   : > { %4180 = vmatpush.bf16.msra.mxu2 %v8429_v55  ;;  %v10164_v55 = vld [vmem:[#allocation7 + $0x1b4] sm:$0xf0] }
 0x3d7   : > { %4488 = vmatpush.bf16.msra.mxu0 %v8593_v56  ;;  %v8629_v13 = vor.u32 %v10164_v55, %v8628_v6  ;;  %v8788_v56 = vld [vmem:[#allocation7 + $0x2f0] sm:$0xf]  ;;  %v8542_v6 = vld [vmem:[#allocation7 + $0x108] sm:$0xf0]  ;;  %v8780_v55 = vld [vmem:[#allocation7 + $0x2e0] sm:$0xf] }
 0x3d8   : > { %4505 = vmatpush.bf16.msra.mxu1 %v8665_v45  ;;  %v8565_v45 = vor.u32 %v10148_v39, %v8564_v47  ;;  %v8789_v33 = vor.u32 %v10204_v5, %v8788_v56  ;;  %v8545_v18 = vor.u32 %v10141_v44, %v8542_v6  ;;  %v8774_v39 = vld [vmem:[#allocation7 + $0x2d8] sm:$0xf0]  ;;  %v10181_v56 = vld [vmem:[#allocation7 + $0x244] sm:$0xf]  ;;  %v8748_v5 = vld [vmem:[#allocation7 + $0x2a0] sm:$0xf] }
 0x3d9   : > { %4200 = vmatpush.bf16.msra.mxu3 %v8477_v22  ;;  %v10150_v22 = vld [vmem:[#allocation7 + $0x144] sm:$0xf0]  ;;  %v8692_v44 = vld [vmem:[#allocation7 + $0x230] sm:$0xf]  ;;  %v10179_v6 = vld [vmem:[#allocation7 + $0x234] sm:$0xf] }
 0x3da   : > { %4181 = vmatpush.bf16.msra.mxu2 %v8421_v7  ;;  %v8573_v34 = vor.u32 %v10150_v22, %v8572_v49  ;;  %v10201_v49 = vld [vmem:[#allocation7 + $0x2e4] sm:$0xf]  ;;  %v8782_v22 = vld [vmem:[#allocation7 + $0x2e8] sm:$0xf0] }
 0x3db   : > { %4489 = vmatpush.bf16.msra.mxu0 %v8585_v4 }
 0x3dc   : > { %8398 = vmatmul.msk.bf16.gmra.mxu3 %vm3812_vm5, %v3877_v31  ;;  %4506 = vmatpush.bf16.msra.mxu1 %v8657_v11  ;;  %v8557_v11 = vor.u32 %v10146_v12, %v8556_v24  ;;  %v8708_v24 = vld [vmem:[#allocation7 + $0x250] sm:$0xf]  ;;  %v10184_v12 = vld [vmem:[#allocation7 + $0x254] sm:$0xf0] }
 0x3dd   : > { %4469 = vmatpush.bf16.msrb.mxu3 %v8661_v0  ;;  %v8625_v0 = vor.u32 %v10161_v9, %v8622_v59  ;;  %v8772_v9 = vld [vmem:[#allocation7 + $0x2d0] sm:$0xf]  ;;  %v10199_v59 = vld [vmem:[#allocation7 + $0x2d4] sm:$0xf] }
 0x3de   : > { %4182 = vmatpush.bf16.msra.mxu2 %v8413_v35  ;;  %v8569_v35 = vor.u32 %v10147_v60, %v8566_v10  ;;  %v8777_v60 = vor.u32 %v10199_v59, %v8774_v39  ;;  %v8732_v59 = vld [vmem:[#allocation7 + $0x280] sm:$0xf] }
 0x3df   : > { %4490 = vmatpush.bf16.msra.mxu0 %v8577_v51  ;;  %v10187_v51 = vld [vmem:[#allocation7 + $0x274] sm:$0xf] }
 0x3e1   : > { %8396 = vmatmul.msk.bf16.gmra.mxu2 %vm3812_vm5, %v3877_v31  ;;  %4470 = vmatpush.bf16.msrb.mxu3 %v8653_v27  ;;  %v8646_v31 = vld [vmem:[#allocation7 + $0x1d8] sm:$0xf0]  ;;  %v8617_v27 = vor.u32 %v10159_v46, %v8614_v40 }
 0x3e2   : > { %4451 = vmatpush.bf16.msrb.mxu2 %v8597_v53  ;;  %v8649_v37 = vor.u32 %v10167_v38, %v8646_v31  ;;  %v8558_v53 = vld [vmem:[#allocation7 + $0x128] sm:$0xf0]  ;;  %v10157_v38 = vld [vmem:[#allocation7 + $0x184] sm:$0xf]  ;;  %v8605_v31 = vor.u32 %v10158_v1, %v8604_v25  ;;  %v8709_v25 = vor.u32 %v10184_v12, %v8708_v24 }
 0x3e3   : > { %4491 = vmatpush.bf16.msra.mxu0 %v8569_v35  ;;  %v8561_v23 = vor.u32 %v10145_v17, %v8558_v53  ;;  %v8718_v35 = vld [vmem:[#allocation7 + $0x268] sm:$0xf0]  ;;  %v10183_v17 = vld [vmem:[#allocation7 + $0x254] sm:$0xf] }
 0x3e4   : > { %4507 = vmatpush.bf16.msra.mxu1 %v8649_v37  ;;  %v8548_v37 = vld [vmem:[#allocation7 + $0x110] sm:$0xf]  ;;  %v8721_v40 = vor.u32 %v10185_v54, %v8718_v35  ;;  %v10176_v54 = vld [vmem:[#allocation7 + $0x214] sm:$0xf0]  ;;  %v10175_v35 = vld [vmem:[#allocation7 + $0x214] sm:$0xf] }
 0x3e5   : > { %4471 = vmatpush.bf16.msrb.mxu3 %v8645_v29  ;;  %v8606_v29 = vld [vmem:[#allocation7 + $0x188] sm:$0xf0]  ;;  %v8549_v32 = vor.u32 %v10144_v21, %v8548_v37  ;;  %v8758_v37 = vld [vmem:[#allocation7 + $0x2b8] sm:$0xf0]  ;;  %v8700_v21 = vld [vmem:[#allocation7 + $0x240] sm:$0xf] }
 0x3e6   : > { %4452 = vmatpush.bf16.msrb.mxu2 %v8589_v36  ;;  %v8609_v28 = vor.u32 %v10157_v38, %v8606_v29  ;;  %v10143_v36 = vld [vmem:[#allocation7 + $0x114] sm:$0xf]  ;;  %v8756_v38 = vld [vmem:[#allocation7 + $0x2b0] sm:$0xf] }
 0x3e7   : > { %4492 = vmatpush.bf16.msra.mxu0 %v8561_v23  ;;  %v8553_v61 = vor.u32 %v10143_v36, %v8550_v48  ;;  %v10195_v29 = vld [vmem:[#allocation7 + $0x2b4] sm:$0xf] }
 0x3e8   : > { %4508 = vmatpush.bf16.msra.mxu1 %v8641_v30  ;;  %v8761_v48 = vor.u32 %v10195_v29, %v8758_v37  ;;  %v10173_v29 = vld [vmem:[#allocation7 + $0x204] sm:$0xf]  ;;  %v8670_v37 = vld [vmem:[#allocation7 + $0x208] sm:$0xf0] }
 0x3e9   : > { %4472 = vmatpush.bf16.msrb.mxu3 %v8637_v20  ;;  %v8790_v20 = vld [vmem:[#allocation7 + $0x2f8] sm:$0xf0] }
 0x3ea   : > { %4453 = vmatpush.bf16.msrb.mxu2 %v8581_v43  ;;  %v8793_v8 = vor.u32 %v10203_v58, %v8790_v20  ;;  %v8540_v43 = vld [vmem:[#allocation7 + $0x100] sm:$0xf] }
 0x3eb   : > { %4493 = vmatpush.bf16.msra.mxu0 %v8553_v61  ;;  %v8541_v4 = vor.u32 %v10142_v19, %v8540_v43  ;;  %v8702_v61 = vld [vmem:[#allocation7 + $0x248] sm:$0xf0] }
 0x3ec   : > { %4509 = vmatpush.bf16.msra.mxu1 %v8633_v50  ;;  %v8781_v50 = vor.u32 %v10202_v42, %v8780_v55  ;;  %v8750_v43 = vld [vmem:[#allocation7 + $0x2a8] sm:$0xf0] }
 0x3ed   : > { %4473 = vmatpush.bf16.msrb.mxu3 %v8629_v13 }
 0x3ee   : > { %4454 = vmatpush.bf16.msrb.mxu2 %v8573_v34  ;;  %v8785_v34 = vor.u32 %v10201_v49, %v8782_v22 }
 0x3ef   : > { %4494 = vmatpush.bf16.msra.mxu0 %v8545_v18  ;;  %v8740_v18 = vld [vmem:[#allocation7 + $0x290] sm:$0xf] }
 0x3f0   : > { %4510 = vmatpush.bf16.msra.mxu1 %v8625_v0  ;;  %v8716_v0 = vld [vmem:[#allocation7 + $0x260] sm:$0xf] }
 0x3f1   : > { %4474 = vmatpush.bf16.msrb.mxu3 %v8621_v57  ;;  %v10200_v57 = vld [vmem:[#allocation7 + $0x2d4] sm:$0xf0] }
 0x3f2   : > { %4455 = vmatpush.bf16.msrb.mxu2 %v8565_v45  ;;  %v8773_v47 = vor.u32 %v10200_v57, %v8772_v9  ;;  %v10186_v45 = vld [vmem:[#allocation7 + $0x264] sm:$0xf0] }
 0x3f3   : > { %v8717_v10 = vor.u32 %v10186_v45, %v8716_v0  ;;  %v10189_v45 = vld [vmem:[#allocation7 + $0x284] sm:$0xf] }
 0x3f4   : > { %4511 = vmatpush.bf16.msra.mxu1 %v8617_v27  ;;  %v8766_v27 = vld [vmem:[#allocation7 + $0x2c8] sm:$0xf0] }
 0x3f5   : > { %4475 = vmatpush.bf16.msrb.mxu3 %v8613_v52  ;;  %v10198_v52 = vld [vmem:[#allocation7 + $0x2c4] sm:$0xf0] }
 0x3f6   : > { %4456 = vmatpush.bf16.msrb.mxu2 %v8557_v11  ;;  %v8710_v11 = vld [vmem:[#allocation7 + $0x258] sm:$0xf0]  ;;  %v8765_v23 = vor.u32 %v10198_v52, %v8764_v41 }
 0x3f7   : > { %v8713_v1 = vor.u32 %v10183_v17, %v8710_v11  ;;  %v8678_v41 = vld [vmem:[#allocation7 + $0x218] sm:$0xf0]  ;;  %v8916_v11 = vld [vmem:[#allocation9 + $0xf0] sm:$0xf] }
 0x3f8   : > { %4512 = vmatpush.bf16.msra.mxu1 %v8609_v28  ;;  %v10182_v28 = vld [vmem:[#allocation7 + $0x244] sm:$0xf0]  ;;  %v8681_v17 = vor.u32 %v10175_v35, %v8678_v41 }
 0x3f9   : > { %4476 = vmatpush.bf16.msrb.mxu3 %v8605_v31  ;;  %v10196_v31 = vld [vmem:[#allocation7 + $0x2b4] sm:$0xf0]  ;;  %v8701_v20 = vor.u32 %v10182_v28, %v8700_v21  ;;  %v8908_v21 = vld [vmem:[#allocation9 + $0xe0] sm:$0xf] }
 0x3fa   : > { %4457 = vmatpush.bf16.msrb.mxu2 %v8549_v32  ;;  %v8757_v36 = vor.u32 %v10196_v31, %v8756_v38 }
 0x3fe   : > { %4458 = vmatpush.bf16.msrb.mxu2 %v8541_v4  ;;  %v10180_v4 = vld [vmem:[#allocation7 + $0x234] sm:$0xf0] }
 0x3ff   : > { %v8693_v49 = vor.u32 %v10180_v4, %v8692_v44  ;;  %v8854_v44 = vld [vmem:[#allocation9 + $0x78] sm:$0xf0]  ;;  %v8900_v4 = vld [vmem:[#allocation9 + $0xd0] sm:$0xf] }
 0x42f   : > { %v3853_v7 = vpop.f32.mrf.mxu3 }
 0x434   : > { %v3835_v16 = vpop.f32.mrf.mxu2 }
 0x437   : > { %v3855_v3 = vpop.f32.mrf.mxu3 }
 0x438   : > { %v3863_v63 = vpack.c.bf16 %v3855_v3, %v3853_v7  ;;  %v8726_v7 = vld [vmem:[#allocation7 + $0x278] sm:$0xf0] }
 0x439   : > { %v8729_v14 = vor.u32 %v10187_v51, %v8726_v7  ;;  %v10178_v51 = vld [vmem:[#allocation7 + $0x224] sm:$0xf0]  ;;  %v10177_v7 = vld [vmem:[#allocation7 + $0x224] sm:$0xf] }
 0x43a   : > { %4201 = vmatmul.bf16.vlgmr.msra.gmra.mxu3 %v3863_v63  ;;  %4237 = vmatmul.bf16.vlgmr.msrb.gmra.mxu1 %v3863_v63  ;;  %v8685_v39 = vor.u32 %v10178_v51, %v8684_v26  ;;  %v8846_v26 = vld [vmem:[#allocation9 + $0x68] sm:$0xf0] }
 0x43b   : > { %4740 = vmatpush.bf16.msra.mxu3 %v8789_v33  ;;  %4776 = vmatpush.bf16.msrb.mxu1 %v8793_v8  ;;  %v12522_v33 = vpop.f32.mrf.mxu1  ;;  %v10194_v8 = vld [vmem:[#allocation7 + $0x2a4] sm:$0xf0] }
 0x43c   : > { %v3837_v15 = vpop.f32.mrf.mxu2  ;;  %v8749_v55 = vor.u32 %v10194_v8, %v8748_v5  ;;  %v10220_v8 = vld [vmem:[#allocation9 + $0x74] sm:$0xf0] }
 0x43d   : > { %v3862_v30 = vpack.c.bf16 %v3837_v15, %v3835_v16  ;;  %v10197_v16 = vld [vmem:[#allocation7 + $0x2c4] sm:$0xf]  ;;  %v8705_v15 = vor.u32 %v10181_v56, %v8702_v61  ;;  %v8910_v61 = vld [vmem:[#allocation9 + $0xe8] sm:$0xf0] }
 0x43e   : > { %v8769_v3 = vor.u32 %v10197_v16, %v8766_v27  ;;  %v12528_v16 = vpop.f32.mrf.mxu0  ;;  %v10233_v56 = vld [vmem:[#allocation9 + $0xe4] sm:$0xf] }
 0x43f   : > { %v3858_v13 = vpop.f32.mrf.mxu3  ;;  %4183 = vmatmul.bf16.vlgmr.msra.gmra.mxu2 %v3862_v30  ;;  %4219 = vmatmul.bf16.vlgmr.msrb.gmra.mxu0 %v3862_v30  ;;  %v10193_v30 = vld [vmem:[#allocation7 + $0x2a4] sm:$0xf] }
 0x440   : > { %4741 = vmatpush.bf16.msra.mxu3 %v8781_v50  ;;  %4777 = vmatpush.bf16.msrb.mxu1 %v8785_v34  ;;  %v3865_v63 = vpack.c.bf16 %v3858_v13, %v3858_v13  ;;  %v8753_v42 = vor.u32 %v10193_v30, %v8750_v43  ;;  %v8694_v13 = vld [vmem:[#allocation7 + $0x238] sm:$0xf0]  ;;  %v10192_v50 = vld [vmem:[#allocation7 + $0x294] sm:$0xf0]  ;;  %v10219_v30 = vld [vmem:[#allocation9 + $0x74] sm:$0xf] }
 0x441   : > { %4722 = vmatpush.bf16.msra.mxu2 %v8725_v2  ;;  %4758 = vmatpush.bf16.msrb.mxu0 %v8729_v14  ;;  %v8697_v22 = vor.u32 %v10179_v6, %v8694_v13  ;;  %v8742_v34 = vld [vmem:[#allocation7 + $0x298] sm:$0xf0]  ;;  %v8686_v2 = vld [vmem:[#allocation7 + $0x228] sm:$0xf0]  ;;  %v8741_v9 = vor.u32 %v10192_v50, %v8740_v18  ;;  %v10232_v6 = vld [vmem:[#allocation9 + $0xd4] sm:$0xf0] }
 0x442   : > { %v8745_v57 = vor.u32 %v10191_v62, %v8742_v34  ;;  %v8689_v0 = vor.u32 %v10177_v7, %v8686_v2  ;;  %v8902_v13 = vld [vmem:[#allocation9 + $0xd8] sm:$0xf0]  ;;  %v8844_v18 = vld [vmem:[#allocation9 + $0x60] sm:$0xf]  ;;  %v10218_v62 = vld [vmem:[#allocation9 + $0x64] sm:$0xf0] }
 0x443   : > { %v10217_v34 = vld [vmem:[#allocation9 + $0x64] sm:$0xf]  ;;  %v8845_v51 = vor.u32 %v10218_v62, %v8844_v18  ;;  %v8892_v2 = vld [vmem:[#allocation9 + $0xc0] sm:$0xf] }
 0x444   : > { %v3840_v46 = vpop.f32.mrf.mxu2  ;;  %4742 = vmatpush.bf16.msra.mxu3 %v8773_v47  ;;  %4778 = vmatpush.bf16.msrb.mxu1 %v8777_v60  ;;  %v10190_v47 = vld [vmem:[#allocation7 + $0x284] sm:$0xf0]  ;;  %v8734_v60 = vld [vmem:[#allocation7 + $0x288] sm:$0xf0]  ;;  %v8849_v7 = vor.u32 %v10217_v34, %v8846_v26  ;;  %v10209_v18 = vld [vmem:[#allocation9 + $0x24] sm:$0xf] }
 0x445   : > { %4723 = vmatpush.bf16.msra.mxu2 %v8717_v10  ;;  %4759 = vmatpush.bf16.msrb.mxu0 %v8721_v40  ;;  %v3864_v58 = vpack.c.bf16 %v3840_v46, %v3840_v46  ;;  %v8676_v10 = vld [vmem:[#allocation7 + $0x210] sm:$0xf]  ;;  %v12524_v40 = vpop.f32.mrf.mxu1  ;;  %v8733_v27 = vor.u32 %v10190_v47, %v8732_v59  ;;  %v8737_v24 = vor.u32 %v10189_v45, %v8734_v60  ;;  %v8894_v59 = vld [vmem:[#allocation9 + $0xc8] sm:$0xf0]  ;;  %v8838_v45 = vld [vmem:[#allocation9 + $0x58] sm:$0xf0] }
 0x446   : > { %v8677_v12 = vor.u32 %v10176_v54, %v8676_v10  ;;  %v12538_v50 = vpop.f32.mrf.mxu0  ;;  %v8836_v47 = vld [vmem:[#allocation9 + $0x50] sm:$0xf]  ;;  %v8860_v26 = vld [vmem:[#allocation9 + $0x80] sm:$0xf] }
 0x447   : > { %v3860_v53 = vpop.f32.mrf.mxu3 }
 0x448   : > { %4743 = vmatpush.bf16.msra.mxu3 %v8765_v23  ;;  %4779 = vmatpush.bf16.msrb.mxu1 %v8769_v3  ;;  %v10236_v53 = vld [vmem:[#allocation9 + $0xf4] sm:$0xf0]  ;;  %v10235_v23 = vld [vmem:[#allocation9 + $0xf4] sm:$0xf] }
 0x449   : > { %4724 = vmatpush.bf16.msra.mxu2 %v8709_v25  ;;  %4760 = vmatpush.bf16.msrb.mxu0 %v8713_v1  ;;  %v8917_v3 = vor.u32 %v10236_v53, %v8916_v11  ;;  %v8668_v25 = vld [vmem:[#allocation7 + $0x200] sm:$0xf]  ;;  %v10174_v1 = vld [vmem:[#allocation7 + $0x204] sm:$0xf0] }
 0x44a   : > { %4206 = vmatmul.bf16.gmra.mxu3 %v3865_v63  ;;  %4242 = vmatmul.bf16.gmra.mxu1 %v3865_v63  ;;  %v8918_v63 = vld [vmem:[#allocation9 + $0xf8] sm:$0xf0] }
 0x44b   : > { %v8921_v31 = vor.u32 %v10235_v23, %v8918_v63  ;;  %v8886_v23 = vld [vmem:[#allocation9 + $0xb8] sm:$0xf0]  ;;  %v10214_v63 = vld [vmem:[#allocation9 + $0x44] sm:$0xf0] }
 0x44c   : > { %v3842_v32 = vpop.f32.mrf.mxu2  ;;  %4744 = vmatpush.bf16.msra.mxu3 %v8757_v36  ;;  %4780 = vmatpush.bf16.msrb.mxu1 %v8761_v48  ;;  %v8673_v36 = vor.u32 %v10173_v29, %v8670_v37  ;;  %v10234_v48 = vld [vmem:[#allocation9 + $0xe4] sm:$0xf0]  ;;  %v8830_v29 = vld [vmem:[#allocation9 + $0x48] sm:$0xf0]  ;;  %v8876_v37 = vld [vmem:[#allocation9 + $0xa0] sm:$0xf] }
 0x44d   : > { %4725 = vmatpush.bf16.msra.mxu2 %v8701_v20  ;;  %4761 = vmatpush.bf16.msrb.mxu0 %v8705_v15  ;;  %v8669_v32 = vor.u32 %v10174_v1, %v8668_v25  ;;  %v8909_v5 = vor.u32 %v10234_v48, %v8908_v21  ;;  %v8852_v15 = vld [vmem:[#allocation9 + $0x70] sm:$0xf]  ;;  %v12536_v43 = vpop.f32.mrf.mxu1  ;;  %v10225_v48 = vld [vmem:[#allocation9 + $0xa4] sm:$0xf] }
 0x44e   : > { %v12544_v11 = vpop.f32.mrf.mxu0 }
 0x44f   : > { %v3911_v19 = vpop.f32.mrf.mxu3  ;;  %4188 = vmatmul.bf16.gmra.mxu2 %v3864_v58  ;;  %4224 = vmatmul.bf16.gmra.mxu0 %v3864_v58  ;;  %v8913_v58 = vor.u32 %v10233_v56, %v8910_v61  ;;  %v8878_v56 = vld [vmem:[#allocation9 + $0xa8] sm:$0xf0]  ;;  %v8820_v61 = vld [vmem:[#allocation9 + $0x30] sm:$0xf] }
 0x450   : > { %4745 = vmatpush.bf16.msra.mxu3 %v8749_v55  ;;  %4781 = vmatpush.bf16.msrb.mxu1 %v8753_v42  ;;  %v8857_v55 = vor.u32 %v10219_v30, %v8854_v44  ;;  %v10231_v42 = vld [vmem:[#allocation9 + $0xd4] sm:$0xf]  ;;  %v8868_v30 = vld [vmem:[#allocation9 + $0x90] sm:$0xf] }
 0x451   : > { %4726 = vmatpush.bf16.msra.mxu2 %v8693_v49  ;;  %4762 = vmatpush.bf16.msrb.mxu0 %v8697_v22  ;;  %v8901_v49 = vor.u32 %v10232_v6, %v8900_v4  ;;  %v8905_v22 = vor.u32 %v10231_v42, %v8902_v13  ;;  %v10223_v6 = vld [vmem:[#allocation9 + $0x94] sm:$0xf]  ;;  %v8812_v42 = vld [vmem:[#allocation9 + $0x20] sm:$0xf]  ;;  %v10210_v13 = vld [vmem:[#allocation9 + $0x24] sm:$0xf0] }
 0x454   : > { %v3893_v14 = vpop.f32.mrf.mxu2  ;;  %4746 = vmatpush.bf16.msra.mxu3 %v8741_v9  ;;  %4782 = vmatpush.bf16.msrb.mxu1 %v8745_v57  ;;  %v10229_v57 = vld [vmem:[#allocation9 + $0xc4] sm:$0xf] }
 0x455   : > { %4727 = vmatpush.bf16.msra.mxu2 %v8685_v39  ;;  %4763 = vmatpush.bf16.msrb.mxu0 %v8689_v0  ;;  %v10216_v39 = vld [vmem:[#allocation9 + $0x54] sm:$0xf0]  ;;  %v10215_v0 = vld [vmem:[#allocation9 + $0x54] sm:$0xf]  ;;  %v8897_v35 = vor.u32 %v10229_v57, %v8894_v59  ;;  %v3976_v41 = vpop.f32.mrf.mxu1  ;;  %v8804_v57 = vld [vmem:[#allocation9 + $0x10] sm:$0xf] }
 0x456   : > { %v10208_v59 = vld [vmem:[#allocation9 + $0x14] sm:$0xf0]  ;;  %v8796_v41 = vld [vmem:[#allocation9] sm:$0xf] }
 0x457   : > { %v3913_v46 = vpop.f32.mrf.mxu3 }
 0x458   : > { %v12526_v52 = vpack.c.bf16 %v3913_v46, %v3911_v19  ;;  %4747 = vmatpush.bf16.msra.mxu3 %v8733_v27  ;;  %4783 = vmatpush.bf16.msrb.mxu1 %v8737_v24  ;;  %v8853_v19 = vor.u32 %v10220_v8, %v8852_v15  ;;  %v8837_v46 = vor.u32 %v10216_v39, %v8836_v47  ;;  %v8884_v24 = vld [vmem:[#allocation9 + $0xb0] sm:$0xf]  ;;  %v8822_v8 = vld [vmem:[#allocation9 + $0x38] sm:$0xf0]  ;;  %v10207_v47 = vld [vmem:[#allocation9 + $0x14] sm:$0xf] }
 0x459   : > { %4728 = vmatpush.bf16.msra.mxu2 %v8677_v12  ;;  %4764 = vmatpush.bf16.msrb.mxu0 %v8681_v17  ;;  %v8841_v27 = vor.u32 %v10215_v0, %v8838_v45  ;;  %v10228_v12 = vld [vmem:[#allocation9 + $0xb4] sm:$0xf0]  ;;  %v10227_v17 = vld [vmem:[#allocation9 + $0xb4] sm:$0xf]  ;;  %v8881_v15 = vor.u32 %v10225_v48, %v8878_v56  ;;  %v8806_v39 = vld [vmem:[#allocation9 + $0x18] sm:$0xf0]  ;;  %v3979_v0 = vpack.c.bf16 %v12524_v40, %v12522_v33 }
 0x45a   : > { %4477 = vmatmul.bf16.vlgmr.msrb.gmra.mxu3 %v12526_v52  ;;  %4513 = vmatmul.bf16.vlgmr.msra.gmra.mxu1 %v12526_v52  ;;  %v8885_v1 = vor.u32 %v10228_v12, %v8884_v24  ;;  %v8798_v24 = vld [vmem:[#allocation9 + $0x8] sm:$0xf0]  ;;  %v3978_v12 = vpack.c.bf16 %v12538_v50, %v12528_v16 }
 0x45c   : > { %v3895_v38 = vpop.f32.mrf.mxu2  ;;  %5075 = vmatpush.bf16.msrb.mxu3 %v8917_v3  ;;  %5111 = vmatpush.bf16.msra.mxu1 %v8921_v31  ;;  %v8828_v3 = vld [vmem:[#allocation9 + $0x40] sm:$0xf]  ;;  %v10213_v31 = vld [vmem:[#allocation9 + $0x44] sm:$0xf] }
 0x45d   : > { %v12532_v28 = vpack.c.bf16 %v3895_v38, %v3893_v14  ;;  %4729 = vmatpush.bf16.msra.mxu2 %v8669_v32  ;;  %4765 = vmatpush.bf16.msrb.mxu0 %v8673_v36  ;;  %v10230_v14 = vld [vmem:[#allocation9 + $0xc4] sm:$0xf0]  ;;  %v8889_v38 = vor.u32 %v10227_v17, %v8886_v23  ;;  %v8829_v21 = vor.u32 %v10214_v63, %v8828_v3 }
 0x45e   : > { %v8893_v54 = vor.u32 %v10230_v14, %v8892_v2  ;;  %v8833_v32 = vor.u32 %v10213_v31, %v8830_v29  ;;  %v10226_v36 = vld [vmem:[#allocation9 + $0xa4] sm:$0xf0]  ;;  %v10221_v14 = vld [vmem:[#allocation9 + $0x84] sm:$0xf]  ;;  %v3981_v17 = vpack.c.bf16 %v12536_v43, %v12536_v43  ;;  %v3980_v23 = vpack.c.bf16 %v12544_v11, %v12544_v11 }
 0x45f   : > { %4459 = vmatmul.bf16.vlgmr.msrb.gmra.mxu2 %v12532_v28  ;;  %4495 = vmatmul.bf16.vlgmr.msra.gmra.mxu0 %v12532_v28  ;;  %v3916_v20 = vpop.f32.mrf.mxu3 }
 0x460   : > { %5076 = vmatpush.bf16.msrb.mxu3 %v8909_v5  ;;  %5112 = vmatpush.bf16.msra.mxu1 %v8913_v58  ;;  %v12540_v60 = vpack.c.bf16 %v3916_v20, %v3916_v20  ;;  %v10212_v5 = vld [vmem:[#allocation9 + $0x34] sm:$0xf0]  ;;  %v10211_v58 = vld [vmem:[#allocation9 + $0x34] sm:$0xf]  ;;  %v8877_v20 = vor.u32 %v10226_v36, %v8876_v37 }
 0x461   : > { %5057 = vmatpush.bf16.msrb.mxu2 %v8853_v19  ;;  %5093 = vmatpush.bf16.msra.mxu0 %v8857_v55  ;;  %v10224_v19 = vld [vmem:[#allocation9 + $0x94] sm:$0xf0]  ;;  %v8821_v44 = vor.u32 %v10212_v5, %v8820_v61  ;;  %v8825_v4 = vor.u32 %v10211_v58, %v8822_v8  ;;  %v8870_v55 = vld [vmem:[#allocation9 + $0x98] sm:$0xf0]  ;;  %v763_v5 = vld [vmem:[#allocation4 + $0x10] sm:$0x11] }
 0x462   : > { %v8869_v62 = vor.u32 %v10224_v19, %v8868_v30  ;;  %v8873_v34 = vor.u32 %v10223_v6, %v8870_v55 }
 0x464   : > { %v3898_v9 = vpop.f32.mrf.mxu2  ;;  %5077 = vmatpush.bf16.msrb.mxu3 %v8901_v49  ;;  %5113 = vmatpush.bf16.msra.mxu1 %v8905_v22  ;;  %v8814_v49 = vld [vmem:[#allocation9 + $0x28] sm:$0xf0]  ;;  %v3958_v22 = vpop.f32.mrf.mxu0 }
 0x465   : > { %5058 = vmatpush.bf16.msrb.mxu2 %v8845_v51  ;;  %5094 = vmatpush.bf16.msra.mxu0 %v8849_v7  ;;  %v12546_v53 = vpack.c.bf16 %v3898_v9, %v3898_v9  ;;  %v10222_v51 = vld [vmem:[#allocation9 + $0x84] sm:$0xf0]  ;;  %v8813_v7 = vor.u32 %v10210_v13, %v8812_v42  ;;  %v8817_v2 = vor.u32 %v10209_v18, %v8814_v49  ;;  %v8862_v9 = vld [vmem:[#allocation9 + $0x88] sm:$0xf0]  ;;  %v3982_v22 = vld [vmem:[%s13255_s9] sm:$0x3] }
 0x466   : > { %v8861_v45 = vor.u32 %v10222_v51, %v8860_v26 }
 0x467   : > { %v3918_v10 = vpop.f32.mrf.mxu3 }
 0x468   : > { %5078 = vmatpush.bf16.msrb.mxu3 %v8893_v54  ;;  %5114 = vmatpush.bf16.msra.mxu1 %v8897_v35  ;;  %v8865_v10 = vor.u32 %v10221_v14, %v8862_v9  ;;  %v8805_v54 = vor.u32 %v10208_v59, %v8804_v57  ;;  %v8809_v35 = vor.u32 %v10207_v47, %v8806_v39 }
 0x469   : > { %5059 = vmatpush.bf16.msrb.mxu2 %v8837_v46  ;;  %5095 = vmatpush.bf16.msra.mxu0 %v8841_v27  ;;  %v10206_v46 = vld [vmem:[#allocation9 + $0x4] sm:$0xf0]  ;;  %v10205_v27 = vld [vmem:[#allocation9 + $0x4] sm:$0xf] }
 0x46a   : > { %4482 = vmatmul.bf16.gmra.mxu3 %v12540_v60  ;;  %4518 = vmatmul.bf16.gmra.mxu1 %v12540_v60  ;;  %v8797_v33 = vor.u32 %v10206_v46, %v8796_v41  ;;  %v8801_v40 = vor.u32 %v10205_v27, %v8798_v24 }
 0x46c   : > { %v3900_v25 = vpop.f32.mrf.mxu2  ;;  %5079 = vmatpush.bf16.msrb.mxu3 %v8885_v1  ;;  %5115 = vmatpush.bf16.msra.mxu1 %v8889_v38 }
 0x46d   : > { %5060 = vmatpush.bf16.msrb.mxu2 %v8829_v21  ;;  %5096 = vmatpush.bf16.msra.mxu0 %v8833_v32 }
 0x46f   : > { %4464 = vmatmul.bf16.gmra.mxu2 %v12546_v53  ;;  %4500 = vmatmul.bf16.gmra.mxu0 %v12546_v53 }
 0x470   : > { %5080 = vmatpush.bf16.msrb.mxu3 %v8877_v20  ;;  %5116 = vmatpush.bf16.msra.mxu1 %v8881_v15  ;;  %v764_v15 = vsel %vm11107_vm11, 0, %v763_v5  ;;  %v9036_v5 = vld [vmem:[#allocation10 + $0x1e0] sm:$0xf] }
 0x471   : > { %5061 = vmatpush.bf16.msrb.mxu2 %v8821_v44  ;;  %5097 = vmatpush.bf16.msra.mxu0 %v8825_v4  ;;  %765 = vst [vmem:[#allocation4 + $0x10] sm:$0x11] %v764_v15 }
 0x474   : > { %5081 = vmatpush.bf16.msrb.mxu3 %v8869_v62  ;;  %5117 = vmatpush.bf16.msra.mxu1 %v8873_v34  ;;  %v12585_v34 = vperm.slane %v3982_v22, 1 }
 0x475   : > { %5062 = vmatpush.bf16.msrb.mxu2 %v8813_v7  ;;  %5098 = vmatpush.bf16.msra.mxu0 %v8817_v2  ;;  %v12587_v7 = vperm.slane %v3982_v22, 0  ;;  %v9038_v22 = vld [vmem:[#allocation10 + $0x1e8] sm:$0xf0] }
 0x478   : > { %5082 = vmatpush.bf16.msrb.mxu3 %v8861_v45  ;;  %5118 = vmatpush.bf16.msra.mxu1 %v8865_v10 }
 0x479   : > { %5063 = vmatpush.bf16.msrb.mxu2 %v8805_v54  ;;  %5099 = vmatpush.bf16.msra.mxu0 %v8809_v35 }
 0x47a   : > { %4748 = vmatmul.bf16.vlgmr.msra.gmra.mxu3 %v3979_v0  ;;  %4784 = vmatmul.bf16.vlgmr.msrb.gmra.mxu1 %v3979_v0 }
 0x47d   : > { %5064 = vmatpush.bf16.msrb.mxu2 %v8797_v33  ;;  %5100 = vmatpush.bf16.msra.mxu0 %v8801_v40  ;;  %v8980_v33 = vld [vmem:[#allocation10 + $0x170] sm:$0xf]  ;;  %v10284_v40 = vld [vmem:[#allocation10 + $0x174] sm:$0xf0] }
 0x47f   : > { %4730 = vmatmul.bf16.vlgmr.msra.gmra.mxu2 %v3978_v12  ;;  %4766 = vmatmul.bf16.vlgmr.msrb.gmra.mxu0 %v3978_v12 }
 0x48a   : > { %4753 = vmatmul.bf16.gmra.mxu3 %v3981_v17  ;;  %4789 = vmatmul.bf16.gmra.mxu1 %v3981_v17  ;;  %v9044_v17 = vld [vmem:[#allocation10 + $0x1f0] sm:$0xf] }
 0x48f   : > { %4735 = vmatmul.bf16.gmra.mxu2 %v3980_v23  ;;  %4771 = vmatmul.bf16.gmra.mxu0 %v3980_v23 }
 0x49a   : > { %5083 = vmatmul.bf16.vlgmr.msrb.gmra.mxu3 %v12526_v52  ;;  %5119 = vmatmul.bf16.vlgmr.msra.gmra.mxu1 %v12526_v52 }
 0x49f   : > { %5065 = vmatmul.bf16.vlgmr.msrb.gmra.mxu2 %v12532_v28  ;;  %5101 = vmatmul.bf16.vlgmr.msra.gmra.mxu0 %v12532_v28 }
 0x4aa   : > { %5088 = vmatmul.bf16.gmra.mxu3 %v12540_v60  ;;  %5124 = vmatmul.bf16.gmra.mxu1 %v12540_v60 }
 0x4af   : > { %5070 = vmatmul.bf16.gmra.mxu2 %v12546_v53  ;;  %5106 = vmatmul.bf16.gmra.mxu0 %v12546_v53 }
 0x4b7   : > { %v4238_v16 = vpop.f32.mrf.mxu1 }
 0x4bc   : > { %v4220_v43 = vpop.f32.mrf.mxu0 }
 0x4bd   : > { %v4202_v50 = vpop.f32.mrf.mxu3  ;;  %v4239_v11 = vadd.f32 %v4238_v16, %v4220_v43 }
 0x4bf   : > { %v4240_v3 = vpop.f32.mrf.mxu1  ;;  %v4253_v9 = vadd.f32 %v12585_v34, %v4239_v11  ;;  %v8981_v11 = vor.u32 %v10284_v40, %v8980_v33  ;;  %v10295_v40 = vld [vmem:[#allocation10 + $0x1d4] sm:$0xf] }
 0x4c1   : > { %5409 = vmatpush.bf16.msra.mxu2 %v8981_v11 }
 0x4c2   : > { %v4184_v63 = vpop.f32.mrf.mxu2 }
 0x4c3   : > { %v4203_v51 = vadd.f32 %v4202_v50, %v4184_v63  ;;  %v10283_v63 = vld [vmem:[#allocation10 + $0x174] sm:$0xf] }
 0x4c4   : > { %v4222_v25 = vpop.f32.mrf.mxu0 }
 0x4c5   : > { %v4204_v52 = vpop.f32.mrf.mxu3  ;;  %v4241_v57 = vadd.f32 %v4240_v3, %v4222_v25  ;;  %v4252_v0 = vadd.f32 %v12587_v7, %v4203_v51  ;;  %v10300_v3 = vld [vmem:[#allocation10 + $0x1f4] sm:$0xf0]  ;;  %v8982_v25 = vld [vmem:[#allocation10 + $0x178] sm:$0xf0] }
 0x4c7   : > { %v4243_v1 = vpop.f32.mrf.mxu1  ;;  %v4255_v35 = vadd.f32 %v12585_v34, %v4241_v57 }
 0x4ca   : > { %v4186_v38 = vpop.f32.mrf.mxu2 }
 0x4cb   : > { %v4205_v24 = vadd.f32 %v4204_v52, %v4186_v38 }
 0x4cc   : > { %v4225_v31 = vpop.f32.mrf.mxu0 }
 0x4cd   : > { %v12566_v28 = vpop.f32.mrf.mxu3  ;;  %v12568_v29 = vadd.f32 %v4243_v1, %v4225_v31  ;;  %v9045_v31 = vor.u32 %v10300_v3, %v9044_v17 }
 0x4cf   : > { %v4245_v60 = vpop.f32.mrf.mxu1  ;;  %5428 = vmatpush.bf16.msra.mxu3 %v9045_v31  ;;  %v10294_v31 = vld [vmem:[#allocation10 + $0x1c4] sm:$0xf0] }
 0x4d0   : > { %v8985_v60 = vor.u32 %v10283_v63, %v8982_v25 }
 0x4d2   : > { %v12570_v37 = vpop.f32.mrf.mxu2  ;;  %5447 = vmatpush.bf16.msrb.mxu0 %v8985_v60 }
 0x4d4   : > { %v4227_v21 = vpop.f32.mrf.mxu0 }
 0x4d5   : > { %v4209_v53 = vpop.f32.mrf.mxu3  ;;  %v10299_v21 = vld [vmem:[#allocation10 + $0x1f4] sm:$0xf] }
 0x4d6   : > { %v9046_v53 = vld [vmem:[#allocation10 + $0x1f8] sm:$0xf0] }
 0x4d7   : > { %v4514_v32 = vpop.f32.mrf.mxu1 }
 0x4da   : > { %v4191_v36 = vpop.f32.mrf.mxu2 }
 0x4dc   : > { %v4496_v48 = vpop.f32.mrf.mxu0 }
 0x4dd   : > { %v4478_v56 = vpop.f32.mrf.mxu3  ;;  %v4515_v2 = vadd.f32 %v4514_v32, %v4496_v48  ;;  %v8972_v32 = vld [vmem:[#allocation10 + $0x160] sm:$0xf] }
 0x4df   : > { %v4516_v61 = vpop.f32.mrf.mxu1  ;;  %v4524_v45 = vadd.f32 %v4515_v2, %v4253_v9  ;;  %v10280_v9 = vld [vmem:[#allocation10 + $0x154] sm:$0xf0] }
 0x4e2   : > { %v4460_v58 = vpop.f32.mrf.mxu2 }
 0x4e3   : > { %v4479_v59 = vadd.f32 %v4478_v56, %v4460_v58  ;;  %v9049_v56 = vor.u32 %v10299_v21, %v9046_v53  ;;  %v4254_v58 = vadd.f32 %v12587_v7, %v4205_v24  ;;  %v10277_v53 = vld [vmem:[#allocation10 + $0x144] sm:$0xf] }
 0x4e4   : > { %v4498_v8 = vpop.f32.mrf.mxu0 }
 0x4e5   : > { %v4480_v30 = vpop.f32.mrf.mxu3  ;;  %v4517_v10 = vadd.f32 %v4516_v61, %v4498_v8  ;;  %v4523_v41 = vadd.f32 %v4479_v59, %v4252_v0  ;;  %v10282_v61 = vld [vmem:[#allocation10 + $0x164] sm:$0xf0]  ;;  %5466 = vmatpush.bf16.msrb.mxu1 %v9049_v56  ;;  %v9028_v0 = vld [vmem:[#allocation10 + $0x1d0] sm:$0xf] }
 0x4e6   : > { %v8973_v15 = vor.u32 %v10282_v61, %v8972_v32  ;;  %v10298_v8 = vld [vmem:[#allocation10 + $0x1e4] sm:$0xf0]  ;;  %v8958_v32 = vld [vmem:[#allocation10 + $0x148] sm:$0xf0] }
 0x4e7   : > { %v12574_v19 = vpop.f32.mrf.mxu1  ;;  %v4526_v23 = vadd.f32 %v4517_v10, %v4255_v35  ;;  %v4822_v10 = vld [vmem:[#allocation4] sm:$0x11] }
 0x4e8   : > { %5410 = vmatpush.bf16.msra.mxu2 %v8973_v15 }
 0x4ea   : > { %v4462_v44 = vpop.f32.mrf.mxu2 }
 0x4eb   : > { %v4481_v1 = vadd.f32 %v4480_v30, %v4462_v44  ;;  %v10281_v30 = vld [vmem:[#allocation10 + $0x164] sm:$0xf]  ;;  %v8974_v44 = vld [vmem:[#allocation10 + $0x168] sm:$0xf0] }
 0x4ec   : > { %v12576_v4 = vpop.f32.mrf.mxu0 }
 0x4ed   : > { %v12578_v6 = vpop.f32.mrf.mxu3  ;;  %v4520_v57 = vadd.f32 %v12574_v19, %v12576_v4  ;;  %v10279_v19 = vld [vmem:[#allocation10 + $0x154] sm:$0xf]  ;;  %v8966_v4 = vld [vmem:[#allocation10 + $0x158] sm:$0xf0] }
 0x4ee   : > { %v8969_v17 = vor.u32 %v10279_v19, %v8966_v4  ;;  %v9004_v19 = vld [vmem:[#allocation10 + $0x1a0] sm:$0xf]  ;;  %v10290_v4 = vld [vmem:[#allocation10 + $0x1a4] sm:$0xf0] }
 0x4ef   : > { %v4521_v55 = vpop.f32.mrf.mxu1 }
 0x4f2   : > { %v12580_v42 = vpop.f32.mrf.mxu2 }
 0x4f4   : > { %v4503_v13 = vpop.f32.mrf.mxu0 }
 0x4f5   : > { %v4485_v18 = vpop.f32.mrf.mxu3  ;;  %v9037_v13 = vor.u32 %v10298_v8, %v9036_v5  ;;  %v9022_v5 = vld [vmem:[#allocation10 + $0x1c8] sm:$0xf0] }
 0x4f6   : > { %v8977_v18 = vor.u32 %v10281_v30, %v8974_v44  ;;  %v8961_v44 = vor.u32 %v10277_v53, %v8958_v32 }
 0x4f7   : > { %v4785_v49 = vpop.f32.mrf.mxu1  ;;  %5429 = vmatpush.bf16.msra.mxu3 %v9037_v13  ;;  %v10276_v13 = vld [vmem:[#allocation10 + $0x134] sm:$0xf0] }
 0x4f8   : > { %5448 = vmatpush.bf16.msrb.mxu0 %v8977_v18  ;;  %v9012_v18 = vld [vmem:[#allocation10 + $0x1b0] sm:$0xf] }
 0x4fa   : > { %v4467_v62 = vpop.f32.mrf.mxu2 }
 0x4fb   : > { %v4208_v62 = vadd.f32 %v12566_v28, %v12570_v37  ;;  %v4484_v28 = vadd.f32 %v12578_v6, %v12580_v42  ;;  %v4819_v37 = vld [vmem:[#allocation4 + $0x10] sm:$0xff] }
 0x4fc   : > { %v4767_v26 = vpop.f32.mrf.mxu0  ;;  %v4891_v42 = vld [vmem:[%s13257_s11] sm:$0x3]  ;;  %5449 = vmatpush.bf16.msrb.mxu0 %v8969_v17  ;;  %v9006_v17 = vld [vmem:[#allocation10 + $0x1a8] sm:$0xf0] }
 0x4fd   : > { %v4749_v14 = vpop.f32.mrf.mxu3  ;;  %v4786_v47 = vadd.f32 %v4785_v49, %v4767_v26  ;;  %v10297_v49 = vld [vmem:[#allocation10 + $0x1e4] sm:$0xf]  ;;  %v4525_v26 = vadd.f32 %v4481_v1, %v4254_v58  ;;  %v9020_v1 = vld [vmem:[#allocation10 + $0x1c0] sm:$0xf]  ;;  %v12614_v61 = vperm.slane %v4891_v42, 1  ;;  %v12617_v30 = vperm.slane %v4891_v42, 0 }
 0x4fe   : > { %v9041_v2 = vor.u32 %v10297_v49, %v9038_v22  ;;  %v9021_v21 = vor.u32 %v10294_v31, %v9020_v1  ;;  %v8948_v58 = vld [vmem:[#allocation10 + $0x130] sm:$0xf]  ;;  %v10289_v42 = vld [vmem:[#allocation10 + $0x1a4] sm:$0xf]  ;;  %v10288_v31 = vld [vmem:[#allocation10 + $0x194] sm:$0xf0] }
 0x4ff   : > { %v4787_v39 = vpop.f32.mrf.mxu1  ;;  %v4795_v46 = vadd.f32 %v4786_v47, %v4524_v45  ;;  %v4257_v45 = vadd.f32 %v12585_v34, %v12568_v29  ;;  %v9030_v29 = vld [vmem:[#allocation10 + $0x1d8] sm:$0xf0]  ;;  %v4256_v34 = vadd.f32 %v12587_v7, %v4208_v62  ;;  %v8949_v62 = vor.u32 %v10276_v13, %v8948_v58 }
 0x500   : > { %5467 = vmatpush.bf16.msrb.mxu1 %v9041_v2  ;;  %5450 = vmatpush.bf16.msrb.mxu0 %v8961_v44  ;;  %v8924_v44 = vld [vmem:[#allocation10 + $0x100] sm:$0xf] }
 0x501   : > { %v4801_v36 = vmax.f32 %v4795_v46, 0.0  ;;  %v4527_v60 = vadd.f32 %v4484_v28, %v4256_v34  ;;  %v9005_v34 = vor.u32 %v10290_v4, %v9004_v19  ;;  %v10268_v19 = vld [vmem:[#allocation10 + $0xf4] sm:$0xf0] }
 0x502   : > { %v4731_v54 = vpop.f32.mrf.mxu2 }
 0x503   : > { %v4750_v27 = vadd.f32 %v4749_v14, %v4731_v54  ;;  %v8964_v14 = vld [vmem:[#allocation10 + $0x150] sm:$0xf] }
 0x504   : > { %v4769_v12 = vpop.f32.mrf.mxu0  ;;  %v8965_v35 = vor.u32 %v10280_v9, %v8964_v14  ;;  %v10275_v9 = vld [vmem:[#allocation10 + $0x134] sm:$0xf] }
 0x505   : > { %v4794_v16 = vadd.f32 %v4750_v27, %v4523_v41  ;;  %v4751_v43 = vpop.f32.mrf.mxu3  ;;  %v4788_v50 = vadd.f32 %v4787_v39, %v4769_v12  ;;  %v10296_v41 = vld [vmem:[#allocation10 + $0x1d4] sm:$0xf0] }
 0x506   : > { %v9029_v33 = vor.u32 %v10296_v41, %v9028_v0  ;;  %5411 = vmatpush.bf16.msra.mxu2 %v8965_v35  ;;  %v10274_v41 = vld [vmem:[#allocation10 + $0x124] sm:$0xf0] }
 0x507   : > { %v4800_v52 = vmax.f32 %v4794_v16, 0.0  ;;  %v12592_v38 = vadd.f32 %v4788_v50, %v4526_v23  ;;  %v4790_v48 = vpop.f32.mrf.mxu1  ;;  %v9033_v23 = vor.u32 %v10295_v40, %v9030_v29  ;;  %v8956_v16 = vld [vmem:[#allocation10 + $0x140] sm:$0xf]  ;;  %v4528_v50 = vadd.f32 %v4520_v57, %v4257_v45  ;;  %v8950_v57 = vld [vmem:[#allocation10 + $0x138] sm:$0xf0] }
 0x508   : > { %5430 = vmatpush.bf16.msra.mxu3 %v9029_v33  ;;  %v8953_v28 = vor.u32 %v10275_v9, %v8950_v57  ;;  %v10273_v40 = vld [vmem:[#allocation10 + $0x124] sm:$0xf]  ;;  %v8942_v29 = vld [vmem:[#allocation10 + $0x128] sm:$0xf0] }
 0x509   : > { %v4806_v55 = vpack.c.bf16 %v4801_v36, %v4800_v52  ;;  %v4803_v47 = vmax.f32 %v12592_v38, 0.0  ;;  %v10293_v36 = vld [vmem:[#allocation10 + $0x1c4] sm:$0xf]  ;;  %5468 = vmatpush.bf16.msrb.mxu1 %v9033_v23  ;;  %v8932_v23 = vld [vmem:[#allocation10 + $0x110] sm:$0xf] }
 0x50a   : > { %v4733_v51 = vpop.f32.mrf.mxu2  ;;  %5451 = vmatpush.bf16.msrb.mxu0 %v8953_v28  ;;  %v8934_v52 = vld [vmem:[#allocation10 + $0x118] sm:$0xf0] }
 0x50b   : > { %v4810_v59 = vshrl.u32 %v4806_v55, 16  ;;  %v4752_v39 = vadd.f32 %v4751_v43, %v4733_v51  ;;  %v4813_v27 = vshll.u32 %v4806_v55, 16  ;;  %v10278_v43 = vld [vmem:[#allocation10 + $0x144] sm:$0xf0]  ;;  %v9025_v55 = vor.u32 %v10293_v36, %v9022_v5  ;;  %v4836_v51 = vld [vmem:[#allocation4] sm:$0xee] }
 0x50c   : > { %v4772_v54 = vpop.f32.mrf.mxu0  ;;  %v8957_v7 = vor.u32 %v10278_v43, %v8956_v16  ;;  %5431 = vmatpush.bf16.msra.mxu3 %v9021_v21 }
 0x50d   : > { %v4812_v46 = vrot.slane %v4810_v59, 7  ;;  %v4796_v24 = vadd.f32 %v4752_v39, %v4525_v26  ;;  %v4754_v12 = vpop.f32.mrf.mxu3  ;;  %v4791_v6 = vadd.f32 %v4790_v48, %v4772_v54  ;;  %v10292_v26 = vld [vmem:[#allocation10 + $0x1b4] sm:$0xf0]  ;;  %v10291_v59 = vld [vmem:[#allocation10 + $0x1b4] sm:$0xf]  ;;  %5469 = vmatpush.bf16.msrb.mxu1 %v9025_v55 }
 0x50e   : > { %5412 = vmatpush.bf16.msra.mxu2 %v8957_v7  ;;  %v9013_v14 = vor.u32 %v10292_v26, %v9012_v18  ;;  %v4839_v54 = vld [vmem:[#allocation4 + $0x18] sm:$0x33]  ;;  %v4856_v26 = vld [vmem:[#allocation4 + $0x8] sm:$0x77] }
 0x50f   : > { %v4815_v11 = vor.u32 %v4813_v27, %v4812_v46  ;;  %v4816_v3 = vrot.slane %v4812_v46, 4  ;;  %v4802_v63 = vmax.f32 %v4796_v24, 0.0  ;;  %v4792_v25 = vpop.f32.mrf.mxu1  ;;  %v4799_v15 = vadd.f32 %v4791_v6, %v4528_v50 }
 0x510   : > { %5432 = vmatpush.bf16.msra.mxu3 %v9013_v14  ;;  %v8945_v6 = vor.u32 %v10273_v40, %v8942_v29  ;;  %v8996_v25 = vld [vmem:[#allocation10 + $0x190] sm:$0xf]  ;;  %v8926_v14 = vld [vmem:[#allocation10 + $0x108] sm:$0xf0]  ;;  %v10251_v40 = vld [vmem:[#allocation10 + $0x74] sm:$0xf] }
 0x511   : > { %v12610_v38 = vsel %vm11300_vm13, %v4815_v11, %v4819_v37  ;;  %v4823_v48 = vsel %vm11107_vm11, %v4816_v3, %v4822_v10  ;;  %v4807_v56 = vpack.c.bf16 %v4803_v47, %v4802_v63  ;;  %v9014_v37 = vld [vmem:[#allocation10 + $0x1b8] sm:$0xf0]  ;;  %v8940_v10 = vld [vmem:[#allocation10 + $0x120] sm:$0xf]  ;;  %v4805_v27 = vmax.f32 %v4799_v15, 0.0 }
 0x512   : > { %4821 = vst [vmem:[#allocation4 + $0x10] sm:$0xff] %v12610_v38  ;;  %v4736_v8 = vpop.f32.mrf.mxu2  ;;  %v9017_v35 = vor.u32 %v10291_v59, %v9014_v37  ;;  %5413 = vmatpush.bf16.msra.mxu2 %v8949_v62  ;;  %v8941_v33 = vor.u32 %v10274_v41, %v8940_v10  ;;  %v9009_v3 = vor.u32 %v10289_v42, %v9006_v17  ;;  %v10272_v63 = vld [vmem:[#allocation10 + $0x114] sm:$0xf0]  ;;  %v8988_v62 = vld [vmem:[#allocation10 + $0x180] sm:$0xf]  ;;  %v5203_v10 = vunpack.c.l.b16 %v12610_v38 }
 0x513   : > { %4824 = vst [vmem:[#allocation4] sm:$0x11] %v4823_v48  ;;  %v4826_v49 = vshrl.u32 %v4807_v56, 16  ;;  %v4829_v20 = vshll.u32 %v4807_v56, 16  ;;  %v4755_v22 = vadd.f32 %v4754_v12, %v4736_v8  ;;  %v8933_v36 = vor.u32 %v10272_v63, %v8932_v23  ;;  %v10287_v48 = vld [vmem:[#allocation10 + $0x194] sm:$0xf]  ;;  %5452 = vmatpush.bf16.msrb.mxu0 %v8945_v6 }
 0x514   : > { %v4774_v2 = vpop.f32.mrf.mxu0  ;;  %5470 = vmatpush.bf16.msrb.mxu1 %v9017_v35  ;;  %v4853_v56 = vld [vmem:[#allocation4 + $0x18] sm:$0xcc]  ;;  %5433 = vmatpush.bf16.msra.mxu3 %v9005_v34  ;;  %v8997_v58 = vor.u32 %v10288_v31, %v8996_v25  ;;  %v9172_v41 = vld [vmem:[#allocation10 + $0xf0] sm:$0xf]  ;;  %v10267_v23 = vld [vmem:[#allocation10 + $0xf4] sm:$0xf] }
 0x515   : > { %v4828_v47 = vrot.slane %v4826_v49, 6  ;;  %v4831_v39 = vrot.slane %v4829_v20, 7  ;;  %v4798_v0 = vadd.f32 %v4755_v22, %v4527_v60  ;;  %v4756_v45 = vpop.f32.mrf.mxu3  ;;  %v10271_v60 = vld [vmem:[#allocation10 + $0x114] sm:$0xf]  ;;  %v8998_v8 = vld [vmem:[#allocation10 + $0x198] sm:$0xf0]  ;;  %v9173_v42 = vor.u32 %v10268_v19, %v9172_v41 }
 0x516   : > { %5414 = vmatpush.bf16.msra.mxu2 %v8941_v33  ;;  %v8937_v15 = vor.u32 %v10271_v60, %v8934_v52  ;;  %v9001_v20 = vor.u32 %v10287_v48, %v8998_v8  ;;  %v10270_v22 = vld [vmem:[#allocation10 + $0x104] sm:$0xf0]  ;;  %v10269_v2 = vld [vmem:[#allocation10 + $0x104] sm:$0xf]  ;;  %v9108_v45 = vld [vmem:[#allocation10 + $0x70] sm:$0xf] }
 0x517   : > { %v4832_v46 = vor.u32 %v4831_v39, %v4828_v47  ;;  %v4804_v24 = vmax.f32 %v4798_v0, 0.0  ;;  %v5120_v12 = vpop.f32.mrf.mxu1  ;;  %v8925_v47 = vor.u32 %v10270_v22, %v8924_v44  ;;  %v10285_v39 = vld [vmem:[#allocation10 + $0x184] sm:$0xf]  ;;  %v8990_v0 = vld [vmem:[#allocation10 + $0x188] sm:$0xf0]  ;;  %v8929_v37 = vor.u32 %v10269_v2, %v8926_v14 }
 0x518   : > { %5471 = vmatpush.bf16.msrb.mxu1 %v9009_v3  ;;  %5434 = vmatpush.bf16.msra.mxu3 %v8997_v58  ;;  %v10252_v35 = vld [vmem:[#allocation10 + $0x74] sm:$0xf0]  ;;  %v9110_v29 = vld [vmem:[#allocation10 + $0x78] sm:$0xf0]  ;;  %v9100_v63 = vld [vmem:[#allocation10 + $0x60] sm:$0xf] }
 0x519   : > { %v4833_v16 = vrot.slane %v4832_v46, 4  ;;  %v4837_v50 = vsel %vm11445_vm14, %v4832_v46, %v4836_v51  ;;  %v4808_v11 = vpack.c.bf16 %v4805_v27, %v4804_v24  ;;  %v10286_v51 = vld [vmem:[#allocation10 + $0x184] sm:$0xf0]  ;;  %5453 = vmatpush.bf16.msrb.mxu0 %v8937_v15  ;;  %v8993_v24 = vor.u32 %v10285_v39, %v8990_v0  ;;  %v9102_v48 = vld [vmem:[#allocation10 + $0x68] sm:$0xf0]  ;;  %vm13425_vm14 = vmmov %vm13358_vm1 }
 0x51a   : > { %4838 = vst [vmem:[#allocation4] sm:$0xee] %v4837_v50  ;;  %v4738_v1 = vpop.f32.mrf.mxu2  ;;  %5415 = vmatpush.bf16.msra.mxu2 %v8933_v36  ;;  %v8989_v28 = vor.u32 %v10286_v51, %v8988_v62  ;;  %v9109_v33 = vor.u32 %v10252_v35, %v9108_v45  ;;  %v9113_v17 = vor.u32 %v10251_v40, %v9110_v29  ;;  %v10250_v25 = vld [vmem:[#allocation10 + $0x64] sm:$0xf0]  ;;  %v9092_v8 = vld [vmem:[#allocation10 + $0x50] sm:$0xf] }
 0x51b   : > { %v4840_v21 = vsel %vm11555_vm0, %v4833_v16, %v4839_v54  ;;  %v4843_v53 = vshrl.u32 %v4808_v11, 16  ;;  %v4846_v32 = vshll.u32 %v4808_v11, 16  ;;  %v5204_v54 = vunpack.c.h.b16 %v12610_v38  ;;  %v9174_v16 = vld [vmem:[#allocation10 + $0xf8] sm:$0xf0]  ;;  %v9164_v1 = vld [vmem:[#allocation10 + $0xe0] sm:$0xf] }
 0x51c   : > { %4841 = vst [vmem:[#allocation4 + $0x18] sm:$0x33] %v4840_v21  ;;  %v5102_v5 = vpop.f32.mrf.mxu0  ;;  %5472 = vmatpush.bf16.msrb.mxu1 %v9001_v20  ;;  %v9177_v3 = vor.u32 %v10267_v23, %v9174_v16  ;;  %5435 = vmatpush.bf16.msra.mxu3 %v8989_v28  ;;  %v10266_v21 = vld [vmem:[#allocation10 + $0xe4] sm:$0xf0]  ;;  %v9101_v52 = vor.u32 %v10250_v25, %v9100_v63  ;;  %v10264_v20 = vld [vmem:[#allocation10 + $0xd4] sm:$0xf0] }
 0x51d   : > { %v4845_v55 = vrot.slane %v4843_v53, 5  ;;  %v4848_v13 = vrot.slane %v4846_v32, 6  ;;  %v5084_v18 = vpop.f32.mrf.mxu3  ;;  %v5103_v49 = vadd.f32 %v5102_v5, %v12614_v61  ;;  %5454 = vmatpush.bf16.msrb.mxu0 %v8929_v37  ;;  %v10249_v53 = vld [vmem:[#allocation10 + $0x64] sm:$0xf]  ;;  %v9166_v5 = vld [vmem:[#allocation10 + $0xe8] sm:$0xf0]  ;;  %v9165_v15 = vor.u32 %v10266_v21, %v9164_v1 }
 0x51e   : > { %5416 = vmatpush.bf16.msra.mxu2 %v8925_v47  ;;  %v9094_v51 = vld [vmem:[#allocation10 + $0x58] sm:$0xf0]  ;;  %v10263_v47 = vld [vmem:[#allocation10 + $0xd4] sm:$0xf]  ;;  %v9084_v37 = vld [vmem:[#allocation10 + $0x40] sm:$0xf] }
 0x51f   : > { %v4849_v9 = vor.u32 %v4848_v13, %v4845_v55  ;;  %v12624_v57 = vadd.f32 %v5120_v12, %v5103_v49  ;;  %v12626_v59 = vpop.f32.mrf.mxu1  ;;  %v9105_v55 = vor.u32 %v10249_v53, %v9102_v48  ;;  %v9156_v49 = vld [vmem:[#allocation10 + $0xd0] sm:$0xf]  ;;  %v9158_v39 = vld [vmem:[#allocation10 + $0xd8] sm:$0xf0]  ;;  %v10262_v19 = vld [vmem:[#allocation10 + $0xc4] sm:$0xf0] }
 0x520   : > { %5473 = vmatpush.bf16.msrb.mxu1 %v8993_v24  ;;  %5673 = vmatpush.bf16.msrb.mxu3 %v9173_v42  ;;  %v9157_v45 = vor.u32 %v10264_v20, %v9156_v49  ;;  %v9161_v41 = vor.u32 %v10263_v47, %v9158_v39  ;;  %v9086_v29 = vld [vmem:[#allocation10 + $0x48] sm:$0xf0]  ;;  %v10244_v48 = vld [vmem:[#allocation10 + $0x34] sm:$0xf0]  ;;  %v9142_v49 = vld [vmem:[#allocation10 + $0xb8] sm:$0xf0] }
 0x521   : > { %v4850_v4 = vrot.slane %v4849_v9, 4  ;;  %v4854_v27 = vsel %vm11549_vm2, %v4849_v9, %v4853_v56  ;;  %v12632_v12 = vld [vmem:[#allocation4] sm:$0xff]  ;;  %5692 = vmatpush.bf16.msra.mxu0 %v9113_v17  ;;  %v9150_v42 = vld [vmem:[#allocation10 + $0xc8] sm:$0xf0]  ;;  %vm13423_vm11 = vsmask.f32 7424  ;;  %vm13426_vm2 = vmmov %vm13358_vm1 }
 0x522   : > { %4855 = vst [vmem:[#allocation4 + $0x18] sm:$0xcc] %v4854_v27  ;;  %v5066_v34 = vpop.f32.mrf.mxu2  ;;  %v5205_v6 = vunpack.c.l.b16 %v12632_v12  ;;  %v5206_v38 = vunpack.c.h.b16 %v12632_v12  ;;  %5654 = vmatpush.bf16.msrb.mxu2 %v9109_v33  ;;  %v10265_v56 = vld [vmem:[#allocation10 + $0xe4] sm:$0xf]  ;;  %v9068_v39 = vld [vmem:[#allocation10 + $0x20] sm:$0xf]  ;;  %vm13424_vm13 = vmmov %vm13423_vm11 }
 0x523   : > { %v4857_v50 = vsel %vm11613_vm4, %v4850_v4, %v4856_v26  ;;  %v5067_v11 = vadd.f32 %v5066_v34, %v12617_v30  ;;  %v9169_v13 = vor.u32 %v10265_v56, %v9166_v5  ;;  %v10247_v26 = vld [vmem:[#allocation10 + $0x54] sm:$0xf]  ;;  %v10245_v4 = vld [vmem:[#allocation10 + $0x44] sm:$0xf]  ;;  %v9140_v56 = vld [vmem:[#allocation10 + $0xb0] sm:$0xf] }
 0x524   : > { %4858 = vst [vmem:[#allocation4 + $0x8] sm:$0x77] %v4857_v50  ;;  %v12639_v31 = vpop.f32.mrf.mxu0  ;;  %v12643_v60 = vpack.c.b16 %v5205_v6, %v5203_v10  ;;  %v12647_v7 = vpack.c.b16 %v5206_v38, %v5204_v54  ;;  %5711 = vmatpush.bf16.msra.mxu1 %v9177_v3  ;;  %5674 = vmatpush.bf16.msrb.mxu3 %v9165_v15  ;;  %v10246_v10 = vld [vmem:[#allocation10 + $0x44] sm:$0xf0]  ;;  %v9148_v54 = vld [vmem:[#allocation10 + $0xc0] sm:$0xf] }
 0x525   : > { %v12649_v32 = vadd.f32 %v5084_v18, %v5067_v11  ;;  %v12651_v36 = vpop.f32.mrf.mxu3  ;;  %v10248_v18 = vld [vmem:[#allocation10 + $0x54] sm:$0xf0]  ;;  %5693 = vmatpush.bf16.msra.mxu0 %v9105_v55  ;;  %v9097_v28 = vor.u32 %v10247_v26, %v9094_v51  ;;  %v10261_v34 = vld [vmem:[#allocation10 + $0xc4] sm:$0xf]  ;;  %v9085_v43 = vor.u32 %v10246_v10, %v9084_v37  ;;  %v9149_v50 = vor.u32 %v10262_v19, %v9148_v54  ;;  %v10243_v55 = vld [vmem:[#allocation10 + $0x34] sm:$0xf] }
 0x526   : > { %v5216_v58 = vshrl.u32 %v12643_v60, 16  ;;  %v5218_v22 = vshll.u32 %v12643_v60, 16  ;;  %v5228_v62 = vshrl.u32 %v12647_v7, 16  ;;  %v5230_v14 = vshll.u32 %v12647_v7, 16  ;;  %5655 = vmatpush.bf16.msrb.mxu2 %v9101_v52  ;;  %v9076_v52 = vld [vmem:[#allocation10 + $0x30] sm:$0xf] }
 0x527   : > { %v5125_v44 = vpop.f32.mrf.mxu1  ;;  %v9093_v9 = vor.u32 %v10248_v18, %v9092_v8  ;;  %v9089_v25 = vor.u32 %v10245_v4, %v9086_v29  ;;  %v9153_v53 = vor.u32 %v10261_v34, %v9150_v42  ;;  %v10260_v8 = vld [vmem:[#allocation10 + $0xb4] sm:$0xf0]  ;;  %v10259_v18 = vld [vmem:[#allocation10 + $0xb4] sm:$0xf]  ;;  %v9132_v54 = vld [vmem:[#allocation10 + $0xa0] sm:$0xf] }
 0x528   : > { %5712 = vmatpush.bf16.msra.mxu1 %v9169_v13  ;;  %v5220_v16 = vrot.slane %v5218_v22, 1  ;;  %v5232_v63 = vrot.slane %v5230_v14, 1  ;;  %5675 = vmatpush.bf16.msrb.mxu3 %v9157_v45  ;;  %v9078_v13 = vld [vmem:[#allocation10 + $0x38] sm:$0xf0]  ;;  %v9141_v47 = vor.u32 %v10260_v8, %v9140_v56  ;;  %v10242_v45 = vld [vmem:[#allocation10 + $0x24] sm:$0xf0] }
 0x529   : > { %v12656_v2 = vld [vmem:[#allocation4 + $0x18] sm:$0xff]  ;;  %5694 = vmatpush.bf16.msra.mxu0 %v9097_v28  ;;  %v9081_v10 = vor.u32 %v10243_v55, %v9078_v13  ;;  %v9069_v29 = vor.u32 %v10242_v45, %v9068_v39  ;;  %v9060_v42 = vld [vmem:[#allocation10 + $0x10] sm:$0xf]  ;;  %v9116_v13 = vld [vmem:[#allocation10 + $0x80] sm:$0xf]  ;;  %vm6041_vm0 = vcmask 1045504  }
 0x52a   : > { %v12659_v0 = vpop.f32.mrf.mxu2  ;;  %v5207_v27 = vunpack.c.l.b16 %v12656_v2  ;;  %v5208_v33 = vunpack.c.h.b16 %v12656_v2  ;;  %5656 = vmatpush.bf16.msrb.mxu2 %v9093_v9  ;;  %v5233_v26 = vor.u32 %v5232_v63, %v5228_v62  ;;  %v9077_v9 = vor.u32 %v10244_v48, %v9076_v52  ;;  %v10239_v63 = vld [vmem:[#allocation10 + $0x14] sm:$0xf]  ;;  %v9236_v45 = vld [vmem:[#allocation10 + $0x270] sm:$0xf] }
 0x52b   : > { %v5165_v35 = vld [vmem:[#allocation4 + $0x8] sm:$0x77]  ;;  %v9145_v62 = vor.u32 %v10259_v18, %v9142_v49  ;;  %v10237_v49 = vld [vmem:[#allocation10 + $0x4] sm:$0xf]  ;;  %v10323_v12 = vld [vmem:[#allocation10 + $0x2b4] sm:$0xf] }
 0x52c   : > { %v5107_v46 = vpop.f32.mrf.mxu0  ;;  %v5209_v24 = vunpack.c.l.b16 %v5165_v35  ;;  %v5210_v40 = vunpack.c.h.b16 %v5165_v35  ;;  %5713 = vmatpush.bf16.msra.mxu1 %v9161_v41  ;;  %5676 = vmatpush.bf16.msrb.mxu3 %v9149_v50  ;;  %v10258_v35 = vld [vmem:[#allocation10 + $0xa4] sm:$0xf0]  ;;  %v10241_v41 = vld [vmem:[#allocation10 + $0x24] sm:$0xf]  ;;  %v10256_v50 = vld [vmem:[#allocation10 + $0x94] sm:$0xf0] }
 0x52d   : > { %v5089_v17 = vpop.f32.mrf.mxu3  ;;  %v5108_v23 = vadd.f32 %v5107_v46, %v12614_v61  ;;  %5695 = vmatpush.bf16.msra.mxu0 %v9089_v25  ;;  %v9070_v46 = vld [vmem:[#allocation10 + $0x28] sm:$0xf0]  ;;  %v9133_v34 = vor.u32 %v10258_v35, %v9132_v54  ;;  %v9062_v25 = vld [vmem:[#allocation10 + $0x18] sm:$0xf0]  ;;  %v10254_v18 = vld [vmem:[#allocation10 + $0x84] sm:$0xf0] }
 0x52e   : > { %v12666_v11 = vpack.c.b16 %v5209_v24, %v5207_v27  ;;  %v12670_v3 = vpack.c.b16 %v5210_v40, %v5208_v33  ;;  %5657 = vmatpush.bf16.msrb.mxu2 %v9085_v43  ;;  %v10257_v24 = vld [vmem:[#allocation10 + $0xa4] sm:$0xf]  ;;  %v9134_v40 = vld [vmem:[#allocation10 + $0xa8] sm:$0xf0]  ;;  %v9065_v8 = vor.u32 %v10239_v63, %v9062_v25  ;;  %v9117_v39 = vor.u32 %v10254_v18, %v9116_v13  ;;  %v10315_v54 = vld [vmem:[#allocation10 + $0x274] sm:$0xf] }
 0x52f   : > { %v12672_v1 = vadd.f32 %v5125_v44, %v5108_v23  ;;  %v5127_v21 = vpop.f32.mrf.mxu1  ;;  %v5221_v44 = vor.u32 %v5220_v16, %v5216_v58  ;;  %v10240_v23 = vld [vmem:[#allocation10 + $0x14] sm:$0xf0]  ;;  %v9073_v16 = vor.u32 %v10241_v41, %v9070_v46  ;;  %v9137_v43 = vor.u32 %v10257_v24, %v9134_v40  ;;  %v9238_v35 = vld [vmem:[#allocation10 + $0x278] sm:$0xf0]  ;;  %v10331_v41 = vld [vmem:[#allocation10 + $0x2f4] sm:$0xf] }
 0x530   : > { %v5223_v5 = vshll.u32 %v12666_v11, 16  ;;  %v5235_v15 = vshll.u32 %v12670_v3, 16  ;;  %5714 = vmatpush.bf16.msra.mxu1 %v9153_v53  ;;  %5677 = vmatpush.bf16.msrb.mxu3 %v9141_v47  ;;  %v10255_v21 = vld [vmem:[#allocation10 + $0x94] sm:$0xf]  ;;  %v9126_v53 = vld [vmem:[#allocation10 + $0x98] sm:$0xf0]  ;;  %v9061_v48 = vor.u32 %v10240_v23, %v9060_v42  ;;  %v9241_v23 = vor.u32 %v10315_v54, %v9238_v35 }
 0x531   : > { %5696 = vmatpush.bf16.msra.mxu0 %v9081_v10  ;;  %v9129_v55 = vor.u32 %v10255_v21, %v9126_v53  ;;  %v9300_v10 = vld [vmem:[#allocation10 + $0x2f0] sm:$0xf]  ;;  %v10314_v42 = vld [vmem:[#allocation10 + $0x264] sm:$0xf0]  ;;  %v9230_v63 = vld [vmem:[#allocation10 + $0x268] sm:$0xf0] }
 0x532   : > { %v5071_v20 = vpop.f32.mrf.mxu2  ;;  %v12678_v22 = vrot.slane %v5223_v5, 1  ;;  %v12680_v51 = vrot.slane %v5235_v15, 1  ;;  %5658 = vmatpush.bf16.msrb.mxu2 %v9077_v9  ;;  %v9052_v5 = vld [vmem:[#allocation10] sm:$0xf]  ;;  %v10238_v15 = vld [vmem:[#allocation10 + $0x4] sm:$0xf0] }
 0x533   : > { %v5072_v14 = vadd.f32 %v5071_v20, %v12617_v30  ;;  %v9054_v20 = vld [vmem:[#allocation10 + $0x8] sm:$0xf0]  ;;  %v5242_v9 = vshrl.u32 %v12670_v3, 16  ;;  %v9053_v47 = vor.u32 %v10238_v15, %v9052_v5  ;;  %v10329_v25 = vld [vmem:[#allocation10 + $0x2e4] sm:$0xf]  ;;  %vm13427_vm4 = vcmask 1043456  }
 0x534   : > { %v5109_v28 = vpop.f32.mrf.mxu0  ;;  %v5226_v37 = vsel %vm13423_vm11, %v5221_v44, %v12678_v22  ;;  %v5238_v58 = vsel %vm13424_vm13, %v5233_v26, %v12680_v51  ;;  %5715 = vmatpush.bf16.msra.mxu1 %v9145_v62  ;;  %5678 = vmatpush.bf16.msrb.mxu3 %v9133_v34  ;;  %v10253_v44 = vld [vmem:[#allocation10 + $0x84] sm:$0xf]  ;;  %v9118_v26 = vld [vmem:[#allocation10 + $0x88] sm:$0xf0]  ;;  %v10332_v62 = vld [vmem:[#allocation10 + $0x2f4] sm:$0xf0] }
 0x535   : > { %v12687_v19 = vadd.f32 %v5089_v17, %v5072_v14  ;;  %v5091_v4 = vpop.f32.mrf.mxu3  ;;  %5417 = vmatmul.bf16.vlgmr.msra.gmra.mxu2 %v5226_v37  ;;  %5436 = vmatmul.bf16.vlgmr.msra.gmra.mxu3 %v5238_v58  ;;  %v9124_v17 = vld [vmem:[#allocation10 + $0x90] sm:$0xf]  ;;  %v5239_v14 = vshrl.u32 %v12666_v11, 16  ;;  %v10316_v28 = vld [vmem:[#allocation10 + $0x274] sm:$0xf0]  ;;  %v5244_v24 = vor.u32 %v5242_v9, %v12680_v51  ;;  %vm13428_vm1 = vmmov %vm13427_vm4 }
 0x536   : > { %5455 = vmatmul.bf16.vlgmr.msrb.gmra.mxu0 %v5226_v37  ;;  %5474 = vmatmul.bf16.vlgmr.msrb.gmra.mxu1 %v5238_v58  ;;  %v9125_v56 = vor.u32 %v10256_v50, %v9124_v17  ;;  %v9057_v37 = vor.u32 %v10237_v49, %v9054_v20  ;;  %v9121_v58 = vor.u32 %v10253_v44, %v9118_v26  ;;  %v9302_v4 = vld [vmem:[#allocation10 + $0x2f8] sm:$0xf0]  ;;  %v9228_v34 = vld [vmem:[#allocation10 + $0x260] sm:$0xf]  ;;  %v10330_v17 = vld [vmem:[#allocation10 + $0x2e4] sm:$0xf0] }
 0x537   : > { %5659 = vmatpush.bf16.msrb.mxu2 %v9069_v29  ;;  %5697 = vmatpush.bf16.msra.mxu0 %v9073_v16  ;;  %v5241_v46 = vor.u32 %v5239_v14, %v12678_v22  ;;  %v9237_v40 = vor.u32 %v10316_v28, %v9236_v45  ;;  %v9301_v29 = vor.u32 %v10332_v62, %v9300_v10  ;;  %v10313_v50 = vld [vmem:[#allocation10 + $0x264] sm:$0xf]  ;;  %v9294_v22 = vld [vmem:[#allocation10 + $0x2e8] sm:$0xf0]  ;;  %v9220_v53 = vld [vmem:[#allocation10 + $0x250] sm:$0xf] }
 0x538   : > { %5716 = vmatpush.bf16.msra.mxu1 %v9137_v43  ;;  %5679 = vmatpush.bf16.msrb.mxu3 %v9125_v56  ;;  %v9305_v16 = vor.u32 %v10331_v41, %v9302_v4  ;;  %v9292_v43 = vld [vmem:[#allocation10 + $0x2e0] sm:$0xf]  ;;  %v9229_v51 = vor.u32 %v10314_v42, %v9228_v34  ;;  %v9233_v56 = vor.u32 %v10313_v50, %v9230_v63  ;;  %v9284_v15 = vld [vmem:[#allocation10 + $0x2d0] sm:$0xf]  ;;  %v9222_v13 = vld [vmem:[#allocation10 + $0x258] sm:$0xf0] }
 0x539   : > { %v9293_v21 = vor.u32 %v10330_v17, %v9292_v43  ;;  %v9297_v5 = vor.u32 %v10329_v25, %v9294_v22  ;;  %v10327_v18 = vld [vmem:[#allocation10 + $0x2d4] sm:$0xf]  ;;  %v9286_v49 = vld [vmem:[#allocation10 + $0x2d8] sm:$0xf0]  ;;  %v9212_v14 = vld [vmem:[#allocation10 + $0x240] sm:$0xf] }
 0x53a   : > { %v5073_v52 = vpop.f32.mrf.mxu2  ;;  %v10310_v9 = vld [vmem:[#allocation10 + $0x244] sm:$0xf0]  ;;  %v9289_v45 = vor.u32 %v10327_v18, %v9286_v49  ;;  %v9276_v28 = vld [vmem:[#allocation10 + $0x2c0] sm:$0xf]  ;;  %v9214_v62 = vld [vmem:[#allocation10 + $0x248] sm:$0xf0] }
 0x53b   : > { %5660 = vmatpush.bf16.msrb.mxu2 %v9061_v48  ;;  %5698 = vmatpush.bf16.msra.mxu0 %v9065_v8  ;;  %v10312_v52 = vld [vmem:[#allocation10 + $0x254] sm:$0xf0]  ;;  %v5730_v48 = vld [vmem:[#allocation4 + $0x10] sm:$0xee]  ;;  %v10325_v54 = vld [vmem:[#allocation10 + $0x2c4] sm:$0xf] }
 0x53c   : > { %5717 = vmatpush.bf16.msra.mxu1 %v9129_v55  ;;  %5680 = vmatpush.bf16.msrb.mxu3 %v9117_v39  ;;  %v10328_v8 = vld [vmem:[#allocation10 + $0x2d4] sm:$0xf0]  ;;  %v10311_v55 = vld [vmem:[#allocation10 + $0x254] sm:$0xf]  ;;  %v5765_v20 = vunpack.c.l.b16 %v5730_v48  ;;  %v9221_v44 = vor.u32 %v10312_v52, %v9220_v53  ;;  %v9278_v35 = vld [vmem:[#allocation10 + $0x2c8] sm:$0xf0] }
 0x53d   : > { %v9285_v26 = vor.u32 %v10328_v8, %v9284_v15  ;;  %v9225_v39 = vor.u32 %v10311_v55, %v9222_v13  ;;  %v9204_v4 = vld [vmem:[#allocation10 + $0x230] sm:$0xf]  ;;  %v10324_v34 = vld [vmem:[#allocation10 + $0x2b4] sm:$0xf0]  ;;  %v12698_v17 = vrot.slane %v12666_v11, 1  ;;  %v12701_v63 = vrot.slane %v12670_v3, 1  ;;  %vm13429_vm6 = vmmov %vm13428_vm1 }
 0x53e   : > { %v5767_v10 = vpack.c.b16 %v5205_v6, %v5765_v20  ;;  %v9206_v6 = vld [vmem:[#allocation10 + $0x238] sm:$0xf0]  ;;  %v10306_v53 = vld [vmem:[#allocation10 + $0x224] sm:$0xf0]  ;;  %v9260_v3 = vld [vmem:[#allocation10 + $0x2a0] sm:$0xf] }
 0x53f   : > { %5661 = vmatpush.bf16.msrb.mxu2 %v9053_v47  ;;  %5699 = vmatpush.bf16.msra.mxu0 %v9057_v37  ;;  %v5766_v47 = vunpack.c.h.b16 %v5730_v48  ;;  %v10326_v37 = vld [vmem:[#allocation10 + $0x2c4] sm:$0xf0]  ;;  %v9198_v15 = vld [vmem:[#allocation10 + $0x228] sm:$0xf0]  ;;  %v10321_v8 = vld [vmem:[#allocation10 + $0x2a4] sm:$0xf] }
 0x540   : > { %5718 = vmatpush.bf16.msra.mxu1 %v9121_v58  ;;  %5958 = vmatpush.bf16.msra.mxu3 %v9301_v29  ;;  %v10309_v58 = vld [vmem:[#allocation10 + $0x244] sm:$0xf]  ;;  %v9268_v29 = vld [vmem:[#allocation10 + $0x2b0] sm:$0xf]  ;;  %v5769_v43 = vrot.slane %v5767_v10, 1  ;;  %vm13430_vm12 = vmmov %vm13428_vm1 }
 0x541   : > { %v5768_v41 = vpack.c.b16 %v5206_v38, %v5766_v47  ;;  %v9217_v42 = vor.u32 %v10309_v58, %v9214_v62  ;;  %v9270_v38 = vld [vmem:[#allocation10 + $0x2b8] sm:$0xf0]  ;;  %v9262_v55 = vld [vmem:[#allocation10 + $0x2a8] sm:$0xf0]  ;;  %v9188_v49 = vld [vmem:[#allocation10 + $0x210] sm:$0xf] }
 0x542   : > { %v12705_v25 = vsel %vm13425_vm14, %v5769_v43, %v12698_v17  ;;  %v9273_v48 = vor.u32 %v10323_v12, %v9270_v38  ;;  %v10304_v20 = vld [vmem:[#allocation10 + $0x214] sm:$0xf0]  ;;  %v10303_v47 = vld [vmem:[#allocation10 + $0x214] sm:$0xf]  ;;  %v9180_v58 = vld [vmem:[#allocation10 + $0x200] sm:$0xf] }
 0x543   : > { %5939 = vmatpush.bf16.msra.mxu2 %v9237_v40  ;;  %5977 = vmatpush.bf16.msrb.mxu0 %v9241_v23  ;;  %v10308_v40 = vld [vmem:[#allocation10 + $0x234] sm:$0xf0]  ;;  %v9281_v23 = vor.u32 %v10325_v54, %v9278_v35  ;;  %v5772_v50 = vrot.slane %v5768_v41, 1  ;;  %v10302_v10 = vld [vmem:[#allocation10 + $0x204] sm:$0xf0] }
 0x544   : > { %5996 = vmatpush.bf16.msrb.mxu1 %v9305_v16  ;;  %5959 = vmatpush.bf16.msra.mxu3 %v9293_v21  ;;  %v10307_v16 = vld [vmem:[#allocation10 + $0x234] sm:$0xf]  ;;  %v9205_v22 = vor.u32 %v10308_v40, %v9204_v4  ;;  %v9196_v21 = vld [vmem:[#allocation10 + $0x220] sm:$0xf]  ;;  %v10318_v41 = vld [vmem:[#allocation10 + $0x284] sm:$0xf0] }
 0x545   : > { %5422 = vmatmul.bf16.gmra.mxu2 %v5241_v46  ;;  %5441 = vmatmul.bf16.gmra.mxu3 %v5244_v24  ;;  %v12709_v11 = vsel %vm13426_vm2, %v5772_v50, %v12701_v63  ;;  %v9209_v52 = vor.u32 %v10307_v16, %v9206_v6  ;;  %v9197_v13 = vor.u32 %v10306_v53, %v9196_v21  ;;  %v9244_v35 = vld [vmem:[#allocation10 + $0x280] sm:$0xf]  ;;  %v10301_v4 = vld [vmem:[#allocation10 + $0x204] sm:$0xf]  ;;  %v9246_v40 = vld [vmem:[#allocation10 + $0x288] sm:$0xf0] }
 0x546   : > { %5460 = vmatmul.bf16.gmra.mxu0 %v5241_v46  ;;  %5479 = vmatmul.bf16.gmra.mxu1 %v5244_v24  ;;  %v9213_v46 = vor.u32 %v10310_v9, %v9212_v14  ;;  %v9277_v24 = vor.u32 %v10326_v37, %v9276_v28  ;;  %v9252_v14 = vld [vmem:[#allocation10 + $0x290] sm:$0xf]  ;;  %v10320_v9 = vld [vmem:[#allocation10 + $0x294] sm:$0xf0]  ;;  %v9254_v28 = vld [vmem:[#allocation10 + $0x298] sm:$0xf0] }
 0x547   : > { %5940 = vmatpush.bf16.msra.mxu2 %v9229_v51  ;;  %5978 = vmatpush.bf16.msrb.mxu0 %v9233_v56  ;;  %v9269_v51 = vor.u32 %v10324_v34, %v9268_v29  ;;  %v10322_v56 = vld [vmem:[#allocation10 + $0x2a4] sm:$0xf0] }
 0x548   : > { %5997 = vmatpush.bf16.msrb.mxu1 %v9297_v5  ;;  %5960 = vmatpush.bf16.msra.mxu3 %v9285_v26  ;;  %v10305_v5 = vld [vmem:[#allocation10 + $0x224] sm:$0xf]  ;;  %v9261_v18 = vor.u32 %v10322_v56, %v9260_v3  ;;  %v9265_v26 = vor.u32 %v10321_v8, %v9262_v55  ;;  %v5132_v37 = vld [vmem:[#allocation4 + $0x8] sm:$0x33] }
 0x549   : > { %v5486_v29 = vunpack.c.l.b16 %v5132_v37  ;;  %v5487_v34 = vunpack.c.h.b16 %v5132_v37 }
 0x54b   : > { %5941 = vmatpush.bf16.msra.mxu2 %v9221_v44  ;;  %5979 = vmatpush.bf16.msrb.mxu0 %v9225_v39  ;;  %v9201_v44 = vor.u32 %v10305_v5, %v9198_v15  ;;  %v9190_v39 = vld [vmem:[#allocation10 + $0x218] sm:$0xf0]  ;;  %v5488_v43 = vpack.c.b16 %v5486_v29, %v5207_v27  ;;  %v5489_v12 = vpack.c.b16 %v5487_v34, %v5208_v33 }
 0x54c   : > { %5998 = vmatpush.bf16.msrb.mxu1 %v9289_v45  ;;  %5961 = vmatpush.bf16.msra.mxu3 %v9277_v24  ;;  %v10319_v45 = vld [vmem:[#allocation10 + $0x294] sm:$0xf]  ;;  %v9193_v62 = vor.u32 %v10303_v47, %v9190_v39  ;;  %v10317_v24 = vld [vmem:[#allocation10 + $0x284] sm:$0xf] }
 0x54d   : > { %v9257_v54 = vor.u32 %v10319_v45, %v9254_v28  ;;  %v9249_v6 = vor.u32 %v10317_v24, %v9246_v40 }
 0x54f   : > { %5942 = vmatpush.bf16.msra.mxu2 %v9213_v46  ;;  %5980 = vmatpush.bf16.msrb.mxu0 %v9217_v42  ;;  %v9182_v46 = vld [vmem:[#allocation10 + $0x208] sm:$0xf0]  ;;  %v9181_v42 = vor.u32 %v10302_v10, %v9180_v58 }
 0x550   : > { %5999 = vmatpush.bf16.msrb.mxu1 %v9281_v23  ;;  %5962 = vmatpush.bf16.msra.mxu3 %v9269_v51  ;;  %v9245_v23 = vor.u32 %v10318_v41, %v9244_v35  ;;  %v9185_v16 = vor.u32 %v10301_v4, %v9182_v46  ;;  %v6023_v4 = vld [vmem:[%s13259_s13] sm:$0x3] }
 0x551   : > { %v12736_v29 = vperm.slane %v6023_v4, 1 }
 0x553   : > { %5943 = vmatpush.bf16.msra.mxu2 %v9205_v22  ;;  %5981 = vmatpush.bf16.msrb.mxu0 %v9209_v52 }
 0x554   : > { %6000 = vmatpush.bf16.msrb.mxu1 %v9273_v48  ;;  %5963 = vmatpush.bf16.msra.mxu3 %v9261_v18 }
 0x555   : > { %5662 = vmatmul.bf16.vlgmr.msrb.gmra.mxu2 %v12643_v60  ;;  %5681 = vmatmul.bf16.vlgmr.msrb.gmra.mxu3 %v12647_v7 }
 0x556   : > { %5700 = vmatmul.bf16.vlgmr.msra.gmra.mxu0 %v12643_v60  ;;  %5719 = vmatmul.bf16.vlgmr.msra.gmra.mxu1 %v12647_v7  ;;  %v9189_v60 = vor.u32 %v10304_v20, %v9188_v49  ;;  %v9253_v7 = vor.u32 %v10320_v9, %v9252_v14 }
 0x557   : > { %5944 = vmatpush.bf16.msra.mxu2 %v9197_v13  ;;  %5982 = vmatpush.bf16.msrb.mxu0 %v9201_v44 }
 0x558   : > { %6001 = vmatpush.bf16.msrb.mxu1 %v9265_v26  ;;  %5964 = vmatpush.bf16.msra.mxu3 %v9253_v7 }
 0x55b   : > { %5945 = vmatpush.bf16.msra.mxu2 %v9189_v60  ;;  %5983 = vmatpush.bf16.msrb.mxu0 %v9193_v62 }
 0x55c   : > { %6002 = vmatpush.bf16.msrb.mxu1 %v9257_v54  ;;  %5965 = vmatpush.bf16.msra.mxu3 %v9245_v23 }
 0x55f   : > { %5946 = vmatpush.bf16.msra.mxu2 %v9181_v42  ;;  %5984 = vmatpush.bf16.msrb.mxu0 %v9185_v16 }
 0x560   : > { %6003 = vmatpush.bf16.msrb.mxu1 %v9249_v6 }
 0x565   : > { %5667 = vmatmul.bf16.gmra.mxu2 %v5488_v43  ;;  %5686 = vmatmul.bf16.gmra.mxu3 %v5489_v12 }
 0x566   : > { %5705 = vmatmul.bf16.gmra.mxu0 %v5488_v43  ;;  %5724 = vmatmul.bf16.gmra.mxu1 %v5489_v12  ;;  %v12739_v43 = vperm.slane %v6023_v4, 0 }
 0x575   : > { %5947 = vmatmul.bf16.vlgmr.msra.gmra.mxu2 %v12705_v25  ;;  %5966 = vmatmul.bf16.vlgmr.msra.gmra.mxu3 %v12709_v11 }
 0x576   : > { %5985 = vmatmul.bf16.vlgmr.msrb.gmra.mxu0 %v12705_v25  ;;  %6004 = vmatmul.bf16.vlgmr.msrb.gmra.mxu1 %v12709_v11 }
 0x585   : > { %5952 = vmatmul.bf16.gmra.mxu2 %v12698_v17  ;;  %5971 = vmatmul.bf16.gmra.mxu3 %v12701_v63 }
 0x586   : > { %5990 = vmatmul.bf16.gmra.mxu0 %v12698_v17  ;;  %6009 = vmatmul.bf16.gmra.mxu1 %v12701_v63 }
 0x5b3   : > { %v5456_v2 = vpop.f32.mrf.mxu0  ;;  %v5475_v27 = vpop.f32.mrf.mxu1 }
 0x5b4   : > { %v5476_v33 = vadd.f32 %v5475_v27, %v5456_v2 }
 0x5b8   : > { %v5418_v38 = vpop.f32.mrf.mxu2  ;;  %v5437_v50 = vpop.f32.mrf.mxu3 }
 0x5b9   : > { %v5438_v22 = vadd.f32 %v5437_v50, %v5418_v38 }
 0x5bb   : > { %v5458_v51 = vpop.f32.mrf.mxu0  ;;  %v5477_v21 = vpop.f32.mrf.mxu1 }
 0x5bc   : > { %v5478_v53 = vadd.f32 %v5477_v21, %v5458_v51 }
 0x5c0   : > { %v5420_v25 = vpop.f32.mrf.mxu2  ;;  %v5439_v52 = vpop.f32.mrf.mxu3 }
 0x5c1   : > { %v5440_v11 = vadd.f32 %v5439_v52, %v5420_v25 }
 0x5c3   : > { %v5461_v48 = vpop.f32.mrf.mxu0  ;;  %v5480_v3 = vpop.f32.mrf.mxu1 }
 0x5c4   : > { %v5481_v56 = vadd.f32 %v5480_v3, %v5461_v48 }
 0x5c8   : > { %v5423_v5 = vpop.f32.mrf.mxu2  ;;  %v5442_v15 = vpop.f32.mrf.mxu3 }
 0x5c9   : > { %v5443_v17 = vadd.f32 %v5442_v15, %v5423_v5 }
 0x5cb   : > { %v5463_v8 = vpop.f32.mrf.mxu0  ;;  %v5482_v63 = vpop.f32.mrf.mxu1 }
 0x5d0   : > { %v12727_v55 = vpop.f32.mrf.mxu2  ;;  %v12729_v13 = vpop.f32.mrf.mxu3 }
 0x5d3   : > { %v5701_v18 = vpop.f32.mrf.mxu0  ;;  %v5720_v49 = vpop.f32.mrf.mxu1 }
 0x5d4   : > { %v5702_v20 = vadd.f32 %v5701_v18, %v5476_v33 }
 0x5d6   : > { %v5721_v44 = vadd.f32 %v5720_v49, %v5702_v20 }
 0x5d8   : > { %v5663_v26 = vpop.f32.mrf.mxu2  ;;  %v5682_v14 = vpop.f32.mrf.mxu3 }
 0x5d9   : > { %v5664_v9 = vadd.f32 %v5663_v26, %v5438_v22 }
 0x5db   : > { %v5683_v47 = vadd.f32 %v5682_v14, %v5664_v9  ;;  %v5703_v39 = vpop.f32.mrf.mxu0  ;;  %v5722_v45 = vpop.f32.mrf.mxu1 }
 0x5dc   : > { %v5704_v33 = vadd.f32 %v5703_v39, %v5478_v53 }
 0x5de   : > { %v5723_v51 = vadd.f32 %v5722_v45, %v5704_v33 }
 0x5e0   : > { %v5665_v28 = vpop.f32.mrf.mxu2  ;;  %v5684_v37 = vpop.f32.mrf.mxu3 }
 0x5e1   : > { %v5666_v48 = vadd.f32 %v5665_v28, %v5440_v11 }
 0x5e3   : > { %v5706_v60 = vpop.f32.mrf.mxu0  ;;  %v5725_v7 = vpop.f32.mrf.mxu1  ;;  %v5685_v26 = vadd.f32 %v5684_v37, %v5666_v48  ;;  %v9390_v48 = vld [vmem:[%s13261_s15 + $0xa0] sm:$0xf] }
 0x5e4   : > { %v5707_v21 = vadd.f32 %v5706_v60, %v5481_v56 }
 0x5e6   : > { %v5726_v20 = vadd.f32 %v5725_v7, %v5707_v21 }
 0x5e8   : > { %v5668_v58 = vpop.f32.mrf.mxu2  ;;  %v5687_v10 = vpop.f32.mrf.mxu3 }
 0x5e9   : > { %v5669_v14 = vadd.f32 %v5668_v58, %v5443_v17  ;;  %v5445_v17 = vadd.f32 %v12729_v13, %v12727_v55  ;;  %v10395_v55 = vld [vmem:[%s13261_s15 + $0x1ec] sm:$0xf0] }
 0x5eb   : > { %v5708_v62 = vpop.f32.mrf.mxu0  ;;  %v5727_v54 = vpop.f32.mrf.mxu1  ;;  %v5688_v60 = vadd.f32 %v5687_v10, %v5669_v14  ;;  %v9374_v14 = vld [vmem:[%s13261_s15 + $0x80] sm:$0xf] }
 0x5f0   : > { %v5670_v35 = vpop.f32.mrf.mxu2  ;;  %v12731_v41 = vpop.f32.mrf.mxu3 }
 0x5f1   : > { %v5671_v13 = vadd.f32 %v5670_v35, %v5445_v17 }
 0x5f3   : > { %v5986_v46 = vpop.f32.mrf.mxu0  ;;  %v6005_v24 = vpop.f32.mrf.mxu1  ;;  %v5690_v21 = vadd.f32 %v12731_v41, %v5671_v13  ;;  %v10343_v13 = vld [vmem:[%s13261_s15 + $0x4c] sm:$0xf0] }
 0x5f4   : > { %v6006_v40 = vadd.f32 %v6005_v24, %v5986_v46  ;;  %v9550_v24 = vld [vmem:[%s13261_s15 + $0x1e0] sm:$0xf] }
 0x5f6   : > { %v6016_v34 = vadd.f32 %v6006_v40, %v5721_v44  ;;  %v5483_v44 = vadd.f32 %v5482_v63, %v5463_v8 }
 0x5f8   : > { %v6030_v42 = vadd.f32 %v12736_v29, %v6016_v34  ;;  %v5948_v23 = vpop.f32.mrf.mxu2  ;;  %v5967_v16 = vpop.f32.mrf.mxu3 }
 0x5f9   : > { %v5968_v6 = vadd.f32 %v5967_v16, %v5948_v23 }
 0x5fa   : > { %v12742_v38 = vadd.f32 %v6030_v42, %v12624_v57  ;;  %v5105_v57 = vadd.f32 %v12639_v31, %v12614_v61  ;;  %v9422_v61 = vld [vmem:[%s13261_s15 + $0xe0] sm:$0xf]  ;;  %v10363_v31 = vld [vmem:[%s13261_s15 + $0xec] sm:$0xf0] }
 0x5fb   : > { %v6015_v12 = vadd.f32 %v5968_v6, %v5683_v47  ;;  %v5988_v2 = vpop.f32.mrf.mxu0  ;;  %v6007_v27 = vpop.f32.mrf.mxu1  ;;  %v5709_v47 = vadd.f32 %v5708_v62, %v5483_v44  ;;  %v9423_v37 = vor.u32 %v10363_v31, %v9422_v61 }
 0x5fc   : > { %v6008_v22 = vadd.f32 %v6007_v27, %v5988_v2  ;;  %v5123_v28 = vadd.f32 %v12626_v59, %v5105_v57  ;;  %v5069_v59 = vadd.f32 %v12659_v0, %v12617_v30  ;;  %v9551_v30 = vor.u32 %v10395_v55, %v9550_v24  ;;  %v9406_v0 = vld [vmem:[%s13261_s15 + $0xc0] sm:$0xf]  ;;  %v10391_v2 = vld [vmem:[%s13261_s15 + $0x1cc] sm:$0xf0] }
 0x5fd   : > { %v6029_v50 = vadd.f32 %v12739_v43, %v6015_v12  ;;  %v5728_v58 = vadd.f32 %v5727_v54, %v5709_v47  ;;  %6510 = vmatpush.bf16.msra.mxu0 %v9423_v37  ;;  %v10359_v54 = vld [vmem:[%s13261_s15 + $0xcc] sm:$0xf0]  ;;  %v6068_v35 = vmax.f32 %v12742_v38, 0.0  ;;  %v9534_v12 = vld [vmem:[%s13261_s15 + $0x1c0] sm:$0xf] }
 0x5fe   : > { %v6018_v5 = vadd.f32 %v6008_v22, %v5723_v51  ;;  %v9407_v16 = vor.u32 %v10359_v54, %v9406_v0  ;;  %6523 = vmatpush.bf16.msra.mxu1 %v9551_v30  ;;  %v9535_v22 = vor.u32 %v10391_v2, %v9534_v12  ;;  %v5087_v51 = vadd.f32 %v12651_v36, %v5069_v59  ;;  %v10387_v57 = vld [vmem:[%s13261_s15 + $0x1ac] sm:$0xf0]  ;;  %v10393_v37 = vld [vmem:[%s13261_s15 + $0x1e4] sm:$0xf]  ;;  %v9326_v12 = vld [vmem:[%s13261_s15 + $0x20] sm:$0xf] }
 0x5ff   : > { %v12746_v3 = vadd.f32 %v6029_v50, %v12649_v32  ;;  %v10389_v30 = vld [vmem:[%s13261_s15 + $0x1c4] sm:$0xf]  ;;  %v10339_v2 = vld [vmem:[%s13261_s15 + $0x2c] sm:$0xf0] }
 0x600   : > { %v5950_v25 = vpop.f32.mrf.mxu2  ;;  %v5969_v52 = vpop.f32.mrf.mxu3  ;;  %v6032_v56 = vadd.f32 %v12736_v29, %v6018_v5  ;;  %v10355_v5 = vld [vmem:[%s13261_s15 + $0xac] sm:$0xf0] }
 0x601   : > { %v5970_v15 = vadd.f32 %v5969_v52, %v5950_v25  ;;  %6511 = vmatpush.bf16.msra.mxu0 %v9407_v16  ;;  %v9391_v36 = vor.u32 %v10355_v5, %v9390_v48  ;;  %v10375_v16 = vld [vmem:[%s13261_s15 + $0x14c] sm:$0xf0]  ;;  %v9454_v48 = vld [vmem:[%s13261_s15 + $0x120] sm:$0xf] }
 0x602   : > { %v6045_v8 = vrot.slane %v6032_v56, 2  ;;  %6524 = vmatpush.bf16.msra.mxu1 %v9535_v22  ;;  %v10371_v5 = vld [vmem:[%s13261_s15 + $0x12c] sm:$0xf0] }
 0x603   : > { %v5991_v18 = vpop.f32.mrf.mxu0  ;;  %v6010_v49 = vpop.f32.mrf.mxu1  ;;  %v6017_v11 = vadd.f32 %v5970_v15, %v5685_v26 }
 0x604   : > { %v6011_v53 = vadd.f32 %v6010_v49, %v5991_v18 }
 0x605   : > { %v6031_v10 = vadd.f32 %v12739_v43, %v6017_v11  ;;  %6512 = vmatpush.bf16.msra.mxu0 %v9391_v36  ;;  %v10351_v11 = vld [vmem:[%s13261_s15 + $0x8c] sm:$0xf0] }
 0x606   : > { %v6020_v9 = vadd.f32 %v6011_v53, %v5726_v20  ;;  %v9518_v53 = vld [vmem:[%s13261_s15 + $0x1a0] sm:$0xf] }
 0x607   : > { %v6042_v27 = vrot.slane %v6031_v10, 2  ;;  %v9519_v26 = vor.u32 %v10387_v57, %v9518_v53  ;;  %v9552_v10 = vld [vmem:[%s13261_s15 + $0x1f0] sm:$0xf0]  ;;  %v10381_v57 = vld [vmem:[%s13261_s15 + $0x184] sm:$0xf] }
 0x608   : > { %v12752_v32 = vadd.f32 %v12736_v29, %v6020_v9  ;;  %v5953_v39 = vpop.f32.mrf.mxu2  ;;  %v5972_v45 = vpop.f32.mrf.mxu3  ;;  %v6067_v9 = vmax.f32 %v12746_v3, 0.0  ;;  %v10383_v3 = vld [vmem:[%s13261_s15 + $0x18c] sm:$0xf0] }
 0x609   : > { %v5973_v7 = vadd.f32 %v5972_v45, %v5953_v39  ;;  %v9375_v45 = vor.u32 %v10351_v11, %v9374_v14  ;;  %6525 = vmatpush.bf16.msra.mxu1 %v9519_v26  ;;  %v10364_v14 = vld [vmem:[%s13261_s15 + $0xf4] sm:$0xf0]  ;;  %v9558_v11 = vld [vmem:[%s13261_s15 + $0x1e8] sm:$0xf] }
 0x60a   : > { %v6046_v63 = vrot.slane %v12752_v32, 2  ;;  %v6056_v41 = vrot.slane %v12752_v32, 4 }
 0x60b   : > { %v6019_v62 = vadd.f32 %v5973_v7, %v5688_v60  ;;  %v5993_v4 = vpop.f32.mrf.mxu0  ;;  %v6012_v46 = vpop.f32.mrf.mxu1  ;;  %v9502_v60 = vld [vmem:[%s13261_s15 + $0x180] sm:$0xf]  ;;  %6513 = vmatpush.bf16.msra.mxu0 %v9375_v45 }
 0x60c   : > { %v6013_v40 = vadd.f32 %v6012_v46, %v5993_v4  ;;  %v6047_v34 = vsel %vm6041_vm0, %v6045_v8, %v6046_v63  ;;  %v9503_v17 = vor.u32 %v10383_v3, %v9502_v60  ;;  %v10379_v4 = vld [vmem:[%s13261_s15 + $0x16c] sm:$0xf0]  ;;  %v9414_v60 = vld [vmem:[%s13261_s15 + $0xc8] sm:$0xf]  ;;  %v10360_v3 = vld [vmem:[%s13261_s15 + $0xd4] sm:$0xf0] }
 0x60d   : > { %v6033_v42 = vadd.f32 %v12739_v43, %v6019_v62  ;;  %v6064_v23 = vadd.f32 %v6047_v34, %v5123_v28  ;;  %v9486_v62 = vld [vmem:[%s13261_s15 + $0x160] sm:$0xf]  ;;  %v9555_v34 = vor.u32 %v10393_v37, %v9552_v10  ;;  %v10373_v10 = vld [vmem:[%s13261_s15 + $0x144] sm:$0xf] }
 0x60e   : > { %v6022_v6 = vadd.f32 %v6013_v40, %v5728_v58  ;;  %6526 = vmatpush.bf16.msra.mxu1 %v9503_v17  ;;  %v9487_v24 = vor.u32 %v10379_v4, %v9486_v62  ;;  %v10361_v40 = vld [vmem:[%s13261_s15 + $0xe4] sm:$0xf]  ;;  %v9488_v17 = vld [vmem:[%s13261_s15 + $0x170] sm:$0xf0] }
 0x60f   : > { %v6043_v33 = vrot.slane %v6033_v42, 2  ;;  %v6070_v50 = vmax.f32 %v6064_v23, 0.0  ;;  %v6053_v7 = vrot.slane %v6033_v42, 4  ;;  %v9536_v42 = vld [vmem:[%s13261_s15 + $0x1d0] sm:$0xf0] }
 0x610   : > { %v6036_v25 = vadd.f32 %v12736_v29, %v6022_v6  ;;  %v5955_v38 = vpop.f32.mrf.mxu2  ;;  %v5974_v52 = vpop.f32.mrf.mxu3  ;;  %v9470_v23 = vld [vmem:[%s13261_s15 + $0x140] sm:$0xf]  ;;  %v9424_v6 = vld [vmem:[%s13261_s15 + $0xf0] sm:$0xf0]  ;;  %v9539_v22 = vor.u32 %v10389_v30, %v9536_v42  ;;  %v10345_v4 = vld [vmem:[%s13261_s15 + $0x64] sm:$0xf] }
 0x611   : > { %v5975_v15 = vadd.f32 %v5974_v52, %v5955_v38  ;;  %v6075_v18 = vpack.c.bf16 %v6070_v50, %v6068_v35  ;;  %v6044_v49 = vsel %vm6041_vm0, %v6042_v27, %v6043_v33  ;;  %v9471_v35 = vor.u32 %v10375_v16, %v9470_v23  ;;  %v6073_v33 = vld [vmem:[%s13260_s14] sm:$0x3]  ;;  %v9520_v38 = vld [vmem:[%s13261_s15 + $0x1b0] sm:$0xf0]  ;;  %v10365_v42 = vld [vmem:[%s13261_s15 + $0x104] sm:$0xf] }
 0x612   : > { %v6057_v20 = vrot.slane %v6036_v25, 4  ;;  %v6063_v29 = vadd.f32 %v6044_v49, %v5087_v51  ;;  %6527 = vmatpush.bf16.msra.mxu1 %v9487_v24  ;;  %v9327_v50 = vor.u32 %v10339_v2, %v9326_v12  ;;  %v9427_v51 = vor.u32 %v10361_v40, %v9424_v6  ;;  %v10385_v25 = vld [vmem:[%s13261_s15 + $0x1a4] sm:$0xf]  ;;  %v9408_v52 = vld [vmem:[%s13261_s15 + $0xd0] sm:$0xf0] }
 0x613   : > { %v6021_v44 = vadd.f32 %v5975_v15, %v5690_v21  ;;  %v10357_v21 = vld [vmem:[%s13261_s15 + $0xc4] sm:$0xf]  ;;  %v9455_v15 = vor.u32 %v10371_v5, %v9454_v48  ;;  %v9392_v49 = vld [vmem:[%s13261_s15 + $0xb0] sm:$0xf0]  ;;  %v9523_v36 = vor.u32 %v10385_v25, %v9520_v38  ;;  %v10394_v6 = vld [vmem:[%s13261_s15 + $0x1ec] sm:$0xf] }
 0x614   : > { %v6058_v56 = vsel %vm13427_vm4, %v6056_v41, %v6057_v20  ;;  %v6069_v47 = vmax.f32 %v6063_v29, 0.0  ;;  %v9310_v41 = vld [vmem:[%s13261_s15] sm:$0xf]  ;;  %v10335_v20 = vld [vmem:[%s13261_s15 + $0xc] sm:$0xf0]  ;;  %v9411_v53 = vor.u32 %v10357_v21, %v9408_v52 }
 0x615   : > { %v6035_v32 = vadd.f32 %v12739_v43, %v6021_v44  ;;  %v6066_v39 = vadd.f32 %v6058_v56, %v12672_v1  ;;  %v9358_v43 = vld [vmem:[%s13261_s15 + $0x60] sm:$0xf]  ;;  %v10347_v1 = vld [vmem:[%s13261_s15 + $0x6c] sm:$0xf0]  ;;  %v9430_v29 = vld [vmem:[%s13261_s15 + $0xe8] sm:$0xf]  ;;  %v9311_v26 = vor.u32 %v10335_v20, %v9310_v41 }
 0x616   : > { %v6074_v28 = vpack.c.bf16 %v6069_v47, %v6067_v9  ;;  %v9359_v59 = vor.u32 %v10347_v1, %v9358_v43  ;;  %6528 = vmatpush.bf16.msra.mxu1 %v9471_v35  ;;  %v9504_v44 = vld [vmem:[%s13261_s15 + $0x190] sm:$0xf0]  ;;  %v9431_v56 = vor.u32 %v10364_v14, %v9430_v29  ;;  %v9438_v9 = vld [vmem:[%s13261_s15 + $0x100] sm:$0xf]  ;;  %v10367_v47 = vld [vmem:[%s13261_s15 + $0x10c] sm:$0xf0]  ;;  %v9415_v43 = vor.u32 %v10360_v3, %v9414_v60 }
 0x617   : > { %v6054_v61 = vrot.slane %v6035_v32, 4  ;;  %v6072_v31 = vmax.f32 %v6066_v39, 0.0  ;;  %v9439_v32 = vor.u32 %v10367_v47, %v9438_v9  ;;  %v10396_v39 = vld [vmem:[%s13261_s15 + $0x1f4] sm:$0xf0]  ;;  %v9507_v45 = vor.u32 %v10381_v57, %v9504_v44  ;;  %v9376_v1 = vld [vmem:[%s13261_s15 + $0x90] sm:$0xf0] }
 0x618   : > { %6514 = vmatpush.bf16.msra.mxu0 %v9359_v59  ;;  %v9472_v62 = vld [vmem:[%s13261_s15 + $0x150] sm:$0xf0]  ;;  %v10341_v40 = vld [vmem:[%s13261_s15 + $0x44] sm:$0xf]  ;;  %v9560_v35 = vld [vmem:[%s13261_s15 + $0x1f8] sm:$0xf0] }
 0x619   : > { %v6077_v8 = vpack.c.bf16 %v6072_v31, %v6072_v31  ;;  %v6055_v63 = vsel %vm13428_vm1, %v6053_v7, %v6054_v61  ;;  %v10349_v61 = vld [vmem:[%s13261_s15 + $0x84] sm:$0xf]  ;;  %v9475_v24 = vor.u32 %v10373_v10, %v9472_v62  ;;  %v9440_v23 = vld [vmem:[%s13261_s15 + $0x110] sm:$0xf0]  ;;  %v10362_v21 = vld [vmem:[%s13261_s15 + $0xec] sm:$0xf] }
 0x61a   : > { %v6065_v58 = vadd.f32 %v6055_v63, %v12687_v19  ;;  %v9342_v19 = vld [vmem:[%s13261_s15 + $0x40] sm:$0xf]  ;;  %6529 = vmatpush.bf16.msra.mxu1 %v9455_v15  ;;  %v10377_v31 = vld [vmem:[%s13261_s15 + $0x164] sm:$0xf]  ;;  %v10392_v63 = vld [vmem:[%s13261_s15 + $0x1d4] sm:$0xf0]  ;;  %v9443_v12 = vor.u32 %v10365_v42, %v9440_v23 }
 0x61b   : > { %v6086_v46 = vsel %vm13429_vm6, %v6077_v8, 0  ;;  %v9343_v0 = vor.u32 %v10343_v13, %v9342_v19  ;;  %v9542_v8 = vld [vmem:[%s13261_s15 + $0x1c8] sm:$0xf]  ;;  %v9491_v59 = vor.u32 %v10377_v31, %v9488_v17  ;;  %v9456_v13 = vld [vmem:[%s13261_s15 + $0x130] sm:$0xf0] }
 0x61c   : > { %6107 = vmatpush.bf16.msrb.mxu3 %v6086_v46  ;;  %v6071_v55 = vmax.f32 %v6065_v58, 0.0  ;;  %v9543_v37 = vor.u32 %v10392_v63, %v9542_v8  ;;  %v9379_v58 = vor.u32 %v10349_v61, %v9376_v1  ;;  %v9360_v46 = vld [vmem:[%s13261_s15 + $0x70] sm:$0xf0]  ;;  %v9432_v25 = vld [vmem:[%s13261_s15 + $0xf8] sm:$0xf0] }
 0x61d   : > { %6515 = vmatpush.bf16.msra.mxu0 %v9343_v0  ;;  %v9363_v19 = vor.u32 %v10345_v4, %v9360_v46  ;;  %v9328_v16 = vld [vmem:[%s13261_s15 + $0x30] sm:$0xf0]  ;;  %v9435_v48 = vor.u32 %v10362_v21, %v9432_v25  ;;  %v10386_v5 = vld [vmem:[%s13261_s15 + $0x1ac] sm:$0xf]  ;;  %v9528_v15 = vld [vmem:[%s13261_s15 + $0x1b8] sm:$0xf0] }
 0x61e   : > { %v6076_v54 = vpack.c.bf16 %v6071_v55, %v6071_v55  ;;  %6530 = vmatpush.bf16.msra.mxu1 %v9439_v32  ;;  %v10369_v55 = vld [vmem:[%s13261_s15 + $0x124] sm:$0xf]  ;;  %v10354_v20 = vld [vmem:[%s13261_s15 + $0xac] sm:$0xf]  ;;  %v9400_v29 = vld [vmem:[%s13261_s15 + $0xb8] sm:$0xf0] }
 0x61f   : > { %v9459_v30 = vor.u32 %v10369_v55, %v9456_v13  ;;  %v9398_v57 = vld [vmem:[%s13261_s15 + $0xa8] sm:$0xf]  ;;  %v10356_v44 = vld [vmem:[%s13261_s15 + $0xb4] sm:$0xf0]  ;;  %v9368_v61 = vld [vmem:[%s13261_s15 + $0x78] sm:$0xf0] }
 0x620   : > { %6108 = vmatpush.bf16.msrb.mxu3 %v6075_v18  ;;  %v6083_v27 = vsel %vm13430_vm12, %v6076_v54, 0  ;;  %v10353_v18 = vld [vmem:[%s13261_s15 + $0xa4] sm:$0xf]  ;;  %v9399_v14 = vor.u32 %v10356_v44, %v9398_v57  ;;  %v9526_v9 = vld [vmem:[%s13261_s15 + $0x1a8] sm:$0xf] }
 0x621   : > { %6094 = vmatpush.bf16.msrb.mxu2 %v6083_v27  ;;  %6516 = vmatpush.bf16.msra.mxu0 %v9327_v50  ;;  %v9395_v7 = vor.u32 %v10353_v18, %v9392_v49  ;;  %v10337_v54 = vld [vmem:[%s13261_s15 + $0x24] sm:$0xf]  ;;  %v9312_v50 = vld [vmem:[%s13261_s15 + $0x10] sm:$0xf0]  ;;  %v10358_v18 = vld [vmem:[%s13261_s15 + $0xcc] sm:$0xf] }
 0x622   : > { %v9331_v2 = vor.u32 %v10337_v54, %v9328_v16  ;;  %v10333_v27 = vld [vmem:[%s13261_s15 + $0x4] sm:$0xf]  ;;  %v9416_v49 = vld [vmem:[%s13261_s15 + $0xd8] sm:$0xf0]  ;;  %v10388_v47 = vld [vmem:[%s13261_s15 + $0x1b4] sm:$0xf0] }
 0x623   : > { %9307 = vmatmul.msk.bf16.vlgmr.msrb.gmra.mxu3 %vm6078_vm10, %v6073_v33  ;;  %v9315_v38 = vor.u32 %v10333_v27, %v9312_v50  ;;  %v9419_v41 = vor.u32 %v10358_v18, %v9416_v49  ;;  %v9527_v32 = vor.u32 %v10388_v47, %v9526_v9  ;;  %v10352_v3 = vld [vmem:[%s13261_s15 + $0x94] sm:$0xf0]  ;;  %v10378_v8 = vld [vmem:[%s13261_s15 + $0x16c] sm:$0xf]  ;;  %v9352_v4 = vld [vmem:[%s13261_s15 + $0x58] sm:$0xf0] }
 0x624   : > { %6549 = vmatpush.bf16.msra.mxu3 %v9555_v34  ;;  %v9344_v34 = vld [vmem:[%s13261_s15 + $0x50] sm:$0xf0]  ;;  %v10384_v1 = vld [vmem:[%s13261_s15 + $0x194] sm:$0xf0]  ;;  %v10342_v62 = vld [vmem:[%s13261_s15 + $0x4c] sm:$0xf] }
 0x625   : > { %6095 = vmatpush.bf16.msrb.mxu2 %v6074_v28  ;;  %6517 = vmatpush.bf16.msra.mxu0 %v9311_v26  ;;  %v9559_v28 = vor.u32 %v10396_v39, %v9558_v11  ;;  %v9347_v0 = vor.u32 %v10341_v40, %v9344_v34  ;;  %v10350_v26 = vld [vmem:[%s13261_s15 + $0x8c] sm:$0xf]  ;;  %v9494_v46 = vld [vmem:[%s13261_s15 + $0x168] sm:$0xf]  ;;  %v9480_v13 = vld [vmem:[%s13261_s15 + $0x158] sm:$0xf0]  ;;  %v9355_v40 = vor.u32 %v10342_v62, %v9352_v4 }
 0x626   : > { %v10382_v39 = vld [vmem:[%s13261_s15 + $0x18c] sm:$0xf]  ;;  %v9336_v23 = vld [vmem:[%s13261_s15 + $0x38] sm:$0xf0]  ;;  %v9478_v16 = vld [vmem:[%s13261_s15 + $0x148] sm:$0xf] }
 0x627   : > { %6575 = vmatpush.bf16.msrb.mxu1 %v9559_v28  ;;  %v9382_v28 = vld [vmem:[%s13261_s15 + $0x88] sm:$0xf]  ;;  %v10374_v55 = vld [vmem:[%s13261_s15 + $0x14c] sm:$0xf]  ;;  %v9320_v25 = vld [vmem:[%s13261_s15 + $0x18] sm:$0xf0] }
 0x628   : > { %6550 = vmatpush.bf16.msra.mxu3 %v9539_v22  ;;  %9306 = vmatmul.msk.bf16.vlgmr.msrb.gmra.mxu2 %vm6078_vm10, %v6073_v33  ;;  %v9563_v33 = vor.u32 %v10394_v6, %v9560_v35  ;;  %v10390_v22 = vld [vmem:[%s13261_s15 + $0x1cc] sm:$0xf]  ;;  %v9383_v31 = vor.u32 %v10352_v3, %v9382_v28  ;;  %v9483_v42 = vor.u32 %v10374_v55, %v9480_v13  ;;  %v10376_v6 = vld [vmem:[%s13261_s15 + $0x154] sm:$0xf0]  ;;  %v9334_v50 = vld [vmem:[%s13261_s15 + $0x28] sm:$0xf] }
 0x629   : > { %6536 = vmatpush.bf16.msra.mxu2 %v9427_v51  ;;  %6562 = vmatpush.bf16.msrb.mxu0 %v9431_v56  ;;  %v9544_v51 = vld [vmem:[%s13261_s15 + $0x1d8] sm:$0xf0]  ;;  %v10338_v54 = vld [vmem:[%s13261_s15 + $0x2c] sm:$0xf]  ;;  %v10368_v57 = vld [vmem:[%s13261_s15 + $0x114] sm:$0xf0] }
 0x62a   : > { %v9547_v52 = vor.u32 %v10390_v22, %v9544_v51  ;;  %v9384_v56 = vld [vmem:[%s13261_s15 + $0x98] sm:$0xf0]  ;;  %v10370_v35 = vld [vmem:[%s13261_s15 + $0x12c] sm:$0xf]  ;;  %v9339_v27 = vor.u32 %v10338_v54, %v9336_v23  ;;  %v10340_v22 = vld [vmem:[%s13261_s15 + $0x34] sm:$0xf0] }
 0x62b   : > { %6576 = vmatpush.bf16.msrb.mxu1 %v9543_v37  ;;  %v9387_v11 = vor.u32 %v10350_v26, %v9384_v56  ;;  %v9496_v37 = vld [vmem:[%s13261_s15 + $0x178] sm:$0xf0]  ;;  %v10334_v51 = vld [vmem:[%s13261_s15 + $0xc] sm:$0xf]  ;;  %v9814_v26 = vld [vmem:[#allocation12 + $0x1f0] sm:$0xf] }
 0x62c   : > { %6551 = vmatpush.bf16.msra.mxu3 %v9523_v36  ;;  %v9531_v36 = vor.u32 %v10386_v5, %v9528_v15  ;;  %v9499_v10 = vor.u32 %v10378_v8, %v9496_v37  ;;  %v9448_v5 = vld [vmem:[%s13261_s15 + $0x118] sm:$0xf0]  ;;  %v9335_v15 = vor.u32 %v10340_v22, %v9334_v50  ;;  %v9323_v18 = vor.u32 %v10334_v51, %v9320_v25  ;;  %v9686_v56 = vld [vmem:[#allocation12 + $0xf0] sm:$0xf]  ;;  %v10428_v9 = vld [vmem:[#allocation12 + $0xf4] sm:$0xf0] }
 0x62d   : > { %6537 = vmatpush.bf16.msra.mxu2 %v9411_v53  ;;  %6563 = vmatpush.bf16.msrb.mxu0 %v9415_v43  ;;  %v9403_v53 = vor.u32 %v10354_v20, %v9400_v29  ;;  %v9510_v43 = vld [vmem:[%s13261_s15 + $0x188] sm:$0xf]  ;;  %v10336_v20 = vld [vmem:[%s13261_s15 + $0x14] sm:$0xf0]  ;;  %v9606_v54 = vld [vmem:[#allocation12 + $0x50] sm:$0xf] }
 0x62e   : > { %v9511_v63 = vor.u32 %v10384_v1, %v9510_v43  ;;  %v9446_v29 = vld [vmem:[%s13261_s15 + $0x108] sm:$0xf]  ;;  %v10442_v37 = vld [vmem:[#allocation12 + $0x164] sm:$0xf0]  ;;  %v9726_v22 = vld [vmem:[#allocation12 + $0x140] sm:$0xf] }
 0x62f   : > { %6577 = vmatpush.bf16.msrb.mxu1 %v9527_v32  ;;  %v9447_v44 = vor.u32 %v10368_v57, %v9446_v29  ;;  %v9687_v32 = vor.u32 %v10428_v9, %v9686_v56  ;;  %v10444_v28 = vld [vmem:[#allocation12 + $0x174] sm:$0xf0]  ;;  %v10438_v51 = vld [vmem:[#allocation12 + $0x144] sm:$0xf0] }
 0x630   : > { %6552 = vmatpush.bf16.msra.mxu3 %v9507_v45  ;;  %v9512_v45 = vld [vmem:[%s13261_s15 + $0x198] sm:$0xf0]  ;;  %v10412_v3 = vld [vmem:[#allocation12 + $0x74] sm:$0xf0]  ;;  %v10406_v25 = vld [vmem:[#allocation12 + $0x44] sm:$0xf0] }
 0x631   : > { %6538 = vmatpush.bf16.msra.mxu2 %v9395_v7  ;;  %6564 = vmatpush.bf16.msrb.mxu0 %v9399_v14  ;;  %v9515_v60 = vor.u32 %v10382_v39, %v9512_v45  ;;  %v10346_v7 = vld [vmem:[%s13261_s15 + $0x6c] sm:$0xf]  ;;  %v10460_v14 = vld [vmem:[#allocation12 + $0x1f4] sm:$0xf0]  ;;  %v9750_v45 = vld [vmem:[#allocation12 + $0x170] sm:$0xf] }
 0x632   : > { %v9371_v17 = vor.u32 %v10346_v7, %v9368_v61  ;;  %v9806_v7 = vld [vmem:[#allocation12 + $0x1e0] sm:$0xf]  ;;  %v10458_v61 = vld [vmem:[#allocation12 + $0x1e4] sm:$0xf0]  ;;  %v9751_v1 = vor.u32 %v10444_v28, %v9750_v45  ;;  %v10424_v55 = vld [vmem:[#allocation12 + $0xd4] sm:$0xf0] }
 0x633   : > { %6578 = vmatpush.bf16.msrb.mxu1 %v9511_v63  ;;  %v9742_v63 = vld [vmem:[#allocation12 + $0x160] sm:$0xf]  ;;  %v9807_v62 = vor.u32 %v10458_v61, %v9806_v7  ;;  %v10434_v9 = vld [vmem:[#allocation12 + $0x124] sm:$0xf0]  ;;  %v9702_v61 = vld [vmem:[#allocation12 + $0x110] sm:$0xf] }
 0x634   : > { %6553 = vmatpush.bf16.msra.mxu3 %v9491_v59  ;;  %v9366_v59 = vld [vmem:[%s13261_s15 + $0x68] sm:$0xf]  ;;  %v9774_v45 = vld [vmem:[#allocation12 + $0x1a0] sm:$0xf]  ;;  %v10450_v28 = vld [vmem:[#allocation12 + $0x1a4] sm:$0xf0] }
 0x635   : > { %6539 = vmatpush.bf16.msra.mxu2 %v9379_v58  ;;  %v10348_v58 = vld [vmem:[%s13261_s15 + $0x74] sm:$0xf0]  ;;  %6565 = vmatpush.bf16.msrb.mxu0 %v9383_v31  ;;  %v9678_v31 = vld [vmem:[#allocation12 + $0xe0] sm:$0xf] }
 0x636   : > { %v10418_v7 = vld [vmem:[#allocation12 + $0xa4] sm:$0xf0] }
 0x638   : > { %6554 = vmatpush.bf16.msra.mxu3 %v9475_v24  ;;  %v9367_v24 = vor.u32 %v10348_v58, %v9366_v59  ;;  %v9614_v58 = vld [vmem:[#allocation12 + $0x60] sm:$0xf] }
 0x639   : > { %6540 = vmatpush.bf16.msra.mxu2 %v9363_v19  ;;  %v10380_v19 = vld [vmem:[%s13261_s15 + $0x174] sm:$0xf0] }
 0x63a   : > { %v9495_v34 = vor.u32 %v10380_v19, %v9494_v46  ;;  %6566 = vmatpush.bf16.msrb.mxu0 %v9367_v24  ;;  %v9798_v46 = vld [vmem:[#allocation12 + $0x1d0] sm:$0xf]  ;;  %v10456_v24 = vld [vmem:[#allocation12 + $0x1d4] sm:$0xf0] }
 0x63b   : > { %v9670_v19 = vld [vmem:[#allocation12 + $0xd0] sm:$0xf]  ;;  %v9799_v23 = vor.u32 %v10456_v24, %v9798_v46  ;;  %v10430_v46 = vld [vmem:[#allocation12 + $0x104] sm:$0xf0] }
 0x63c   : > { %6555 = vmatpush.bf16.msra.mxu3 %v9459_v30  ;;  %v9350_v30 = vld [vmem:[%s13261_s15 + $0x48] sm:$0xf]  ;;  %6579 = vmatpush.bf16.msrb.mxu1 %v9495_v34 }
 0x63d   : > { %6541 = vmatpush.bf16.msra.mxu2 %v9347_v0  ;;  %v10344_v0 = vld [vmem:[%s13261_s15 + $0x54] sm:$0xf0] }
 0x640   : > { %6556 = vmatpush.bf16.msra.mxu3 %v9443_v12  ;;  %v9464_v12 = vld [vmem:[%s13261_s15 + $0x138] sm:$0xf0] }
 0x641   : > { %6542 = vmatpush.bf16.msra.mxu2 %v9331_v2  ;;  %v9351_v2 = vor.u32 %v10344_v0, %v9350_v30  ;;  %v9467_v21 = vor.u32 %v10370_v35, %v9464_v12  ;;  %v9734_v30 = vld [vmem:[#allocation12 + $0x150] sm:$0xf]  ;;  %v10440_v0 = vld [vmem:[#allocation12 + $0x154] sm:$0xf0]  ;;  %v10454_v35 = vld [vmem:[#allocation12 + $0x1c4] sm:$0xf0] }
 0x642   : > { %v9662_v12 = vld [vmem:[#allocation12 + $0xc0] sm:$0xf] }
 0x643   : > { %6567 = vmatpush.bf16.msrb.mxu0 %v9351_v2  ;;  %v10422_v2 = vld [vmem:[#allocation12 + $0xc4] sm:$0xf0] }
 0x644   : > { %6601 = vmatpush.bf16.msrb.mxu3 %v9563_v33  ;;  %v9479_v33 = vor.u32 %v10376_v6, %v9478_v16  ;;  %v9671_v16 = vor.u32 %v10424_v55, %v9670_v19  ;;  %v9790_v6 = vld [vmem:[#allocation12 + $0x1c0] sm:$0xf]  ;;  %v10443_v55 = vld [vmem:[#allocation12 + $0x174] sm:$0xf] }
 0x645   : > { %6543 = vmatpush.bf16.msra.mxu2 %v9315_v38  ;;  %v9462_v38 = vld [vmem:[%s13261_s15 + $0x128] sm:$0xf] }
 0x646   : > { %6580 = vmatpush.bf16.msrb.mxu1 %v9479_v33  ;;  %v9735_v33 = vor.u32 %v10440_v0, %v9734_v30  ;;  %v10398_v30 = vld [vmem:[#allocation12 + $0x4] sm:$0xf0]  ;;  %v9758_v0 = vld [vmem:[#allocation12 + $0x180] sm:$0xf] }
 0x647   : > { %6568 = vmatpush.bf16.msrb.mxu0 %v9335_v15  ;;  %v9727_v15 = vor.u32 %v10438_v51, %v9726_v22  ;;  %v10427_v51 = vld [vmem:[#allocation12 + $0xf4] sm:$0xf] }
 0x648   : > { %6602 = vmatpush.bf16.msrb.mxu3 %v9547_v52  ;;  %v10372_v52 = vld [vmem:[%s13261_s15 + $0x134] sm:$0xf0] }
 0x649   : > { %6588 = vmatpush.bf16.msrb.mxu2 %v9435_v48  ;;  %v10366_v48 = vld [vmem:[%s13261_s15 + $0x10c] sm:$0xf]  ;;  %v9463_v49 = vor.u32 %v10372_v52, %v9462_v38  ;;  %v9791_v38 = vor.u32 %v10454_v35, %v9790_v6  ;;  %v9663_v52 = vor.u32 %v10422_v2, %v9662_v12  ;;  %v10459_v35 = vld [vmem:[#allocation12 + $0x1f4] sm:$0xf] }
 0x64a   : > { %v9624_v6 = vld [vmem:[#allocation12 + $0x78] sm:$0xf0] }
 0x64b   : > { %6581 = vmatpush.bf16.msrb.mxu1 %v9463_v49  ;;  %v9718_v49 = vld [vmem:[#allocation12 + $0x130] sm:$0xf]  ;;  %v9816_v2 = vld [vmem:[#allocation12 + $0x1f8] sm:$0xf0] }
 0x64c   : > { %6603 = vmatpush.bf16.msrb.mxu3 %v9531_v36  ;;  %v9451_v36 = vor.u32 %v10366_v48, %v9448_v5  ;;  %v9782_v48 = vld [vmem:[#allocation12 + $0x1b0] sm:$0xf]  ;;  %v10452_v5 = vld [vmem:[#allocation12 + $0x1b4] sm:$0xf0] }
 0x64d   : > { %6589 = vmatpush.bf16.msrb.mxu2 %v9419_v41  ;;  %v9318_v41 = vld [vmem:[%s13261_s15 + $0x8] sm:$0xf]  ;;  %v9783_v29 = vor.u32 %v10452_v5, %v9782_v48  ;;  %v10409_v48 = vld [vmem:[#allocation12 + $0x64] sm:$0xf] }
 0x64f   : > { %6582 = vmatpush.bf16.msrb.mxu1 %v9447_v44  ;;  %v9654_v44 = vld [vmem:[#allocation12 + $0xb0] sm:$0xf] }
 0x650   : > { %6604 = vmatpush.bf16.msrb.mxu3 %v9515_v60  ;;  %v9622_v60 = vld [vmem:[#allocation12 + $0x70] sm:$0xf] }
 0x651   : > { %6590 = vmatpush.bf16.msrb.mxu2 %v9403_v53  ;;  %v9319_v53 = vor.u32 %v10336_v20, %v9318_v41  ;;  %v9623_v8 = vor.u32 %v10412_v3, %v9622_v60  ;;  %v9590_v41 = vld [vmem:[#allocation12 + $0x30] sm:$0xf]  ;;  %v10404_v20 = vld [vmem:[#allocation12 + $0x34] sm:$0xf0]  ;;  %v9775_v60 = vor.u32 %v10450_v28, %v9774_v45  ;;  %v9646_v3 = vld [vmem:[#allocation12 + $0xa0] sm:$0xf] }
 0x652   : > { %v9591_v57 = vor.u32 %v10404_v20, %v9590_v41  ;;  %v10425_v20 = vld [vmem:[#allocation12 + $0xe4] sm:$0xf]  ;;  %v9800_v28 = vld [vmem:[#allocation12 + $0x1d8] sm:$0xf0] }
 0x653   : > { %6569 = vmatpush.bf16.msrb.mxu0 %v9319_v53 }
 0x654   : > { %6605 = vmatpush.bf16.msrb.mxu3 %v9499_v10  ;;  %v10410_v10 = vld [vmem:[#allocation12 + $0x64] sm:$0xf0] }
 0x655   : > { %6591 = vmatpush.bf16.msrb.mxu2 %v9387_v11  ;;  %v9815_v11 = vor.u32 %v10460_v14, %v9814_v26  ;;  %v9615_v34 = vor.u32 %v10410_v10, %v9614_v58  ;;  %v10420_v26 = vld [vmem:[#allocation12 + $0xb4] sm:$0xf0]  ;;  %v9710_v14 = vld [vmem:[#allocation12 + $0x120] sm:$0xf]  ;;  %v9638_v58 = vld [vmem:[#allocation12 + $0x90] sm:$0xf] }
 0x656   : > { %v9655_v56 = vor.u32 %v10420_v26, %v9654_v44  ;;  %v10439_v44 = vld [vmem:[#allocation12 + $0x154] sm:$0xf]  ;;  %v9736_v26 = vld [vmem:[#allocation12 + $0x158] sm:$0xf0] }
 0x658   : > { %6606 = vmatpush.bf16.msrb.mxu3 %v9483_v42  ;;  %v10408_v42 = vld [vmem:[#allocation12 + $0x54] sm:$0xf0] }
 0x659   : > { %6592 = vmatpush.bf16.msrb.mxu2 %v9371_v17  ;;  %v10426_v17 = vld [vmem:[#allocation12 + $0xe4] sm:$0xf0]  ;;  %v9607_v50 = vor.u32 %v10408_v42, %v9606_v54 }
 0x65a   : > { %v9679_v4 = vor.u32 %v10426_v17, %v9678_v31  ;;  %v9647_v31 = vor.u32 %v10418_v7, %v9646_v3  ;;  %v10432_v17 = vld [vmem:[#allocation12 + $0x114] sm:$0xf0]  ;;  %v10446_v54 = vld [vmem:[#allocation12 + $0x184] sm:$0xf0]  ;;  %v9672_v3 = vld [vmem:[#allocation12 + $0xd8] sm:$0xf0] }
 0x65c   : > { %6607 = vmatpush.bf16.msrb.mxu3 %v9467_v21  ;;  %v9598_v21 = vld [vmem:[#allocation12 + $0x40] sm:$0xf] }
 0x65d   : > { %6593 = vmatpush.bf16.msrb.mxu2 %v9355_v40  ;;  %v9743_v40 = vor.u32 %v10442_v37, %v9742_v63  ;;  %v9766_v37 = vld [vmem:[#allocation12 + $0x190] sm:$0xf] }
 0x660   : > { %6608 = vmatpush.bf16.msrb.mxu3 %v9451_v36  ;;  %v10436_v36 = vld [vmem:[#allocation12 + $0x134] sm:$0xf0] }
 0x661   : > { %6594 = vmatpush.bf16.msrb.mxu2 %v9339_v27  ;;  %v9719_v53 = vor.u32 %v10436_v36, %v9718_v49  ;;  %v9808_v49 = vld [vmem:[#allocation12 + $0x1e8] sm:$0xf0] }
 0x665   : > { %6595 = vmatpush.bf16.msrb.mxu2 %v9323_v18  ;;  %v9599_v18 = vor.u32 %v10406_v25, %v9598_v21  ;;  %v9688_v21 = vld [vmem:[#allocation12 + $0xf8] sm:$0xf0]  ;;  %v10441_v25 = vld [vmem:[#allocation12 + $0x164] sm:$0xf] }
 0x6a6   : > { %v6110_v47 = vpop.f32.mrf.mxu3 }
 0x6a7   : > { %v13166_v39 = vpack.c.bf16 %v6110_v47, %v6110_v47  ;;  %v9711_v47 = vor.u32 %v10434_v9, %v9710_v14  ;;  %v9739_v14 = vor.u32 %v10439_v44, %v9736_v26  ;;  %v10399_v26 = vld [vmem:[#allocation12 + $0x14] sm:$0xf] }
 0x6a9   : > { %6557 = vmatmul.bf16.vlgmr.msra.gmra.mxu3 %v13166_v39  ;;  %6531 = vmatmul.bf16.vlgmr.msra.gmra.mxu1 %v13166_v39 }
 0x6aa   : > { %7051 = vmatpush.bf16.msra.mxu3 %v9815_v11  ;;  %7025 = vmatpush.bf16.msra.mxu1 %v9687_v32  ;;  %v9582_v11 = vld [vmem:[#allocation12 + $0x20] sm:$0xf]  ;;  %v10402_v32 = vld [vmem:[#allocation12 + $0x24] sm:$0xf0] }
 0x6ab   : > { %v6097_v43 = vpop.f32.mrf.mxu2 }
 0x6ac   : > { %v6114_v59 = vpack.c.bf16 %v6097_v43, %v6097_v43  ;;  %v9574_v43 = vld [vmem:[#allocation12 + $0x10] sm:$0xf] }
 0x6ae   : > { %6544 = vmatmul.bf16.vlgmr.msra.gmra.mxu2 %v6114_v59  ;;  %6518 = vmatmul.bf16.vlgmr.msra.gmra.mxu0 %v6114_v59  ;;  %v6112_v13 = vpop.f32.mrf.mxu3 }
 0x6af   : > { %7038 = vmatpush.bf16.msra.mxu2 %v9751_v1  ;;  %7012 = vmatpush.bf16.msra.mxu0 %v9623_v8  ;;  %v10400_v1 = vld [vmem:[#allocation12 + $0x14] sm:$0xf0]  ;;  %v9703_v8 = vor.u32 %v10432_v17, %v9702_v61  ;;  %v9752_v13 = vld [vmem:[#allocation12 + $0x178] sm:$0xf0]  ;;  %v9728_v17 = vld [vmem:[#allocation12 + $0x148] sm:$0xf0] }
 0x6b0   : > { %7052 = vmatpush.bf16.msra.mxu3 %v9807_v62  ;;  %7026 = vmatpush.bf16.msra.mxu1 %v9679_v4  ;;  %v9575_v63 = vor.u32 %v10400_v1, %v9574_v43  ;;  %v10416_v62 = vld [vmem:[#allocation12 + $0x94] sm:$0xf0]  ;;  %v9694_v4 = vld [vmem:[#allocation12 + $0x100] sm:$0xf]  ;;  %v10405_v43 = vld [vmem:[#allocation12 + $0x44] sm:$0xf] }
 0x6b1   : > { %v9639_v24 = vor.u32 %v10416_v62, %v9638_v58  ;;  %v9695_v19 = vor.u32 %v10430_v46, %v9694_v4  ;;  %v10421_v46 = vld [vmem:[#allocation12 + $0xc4] sm:$0xf] }
 0x6b3   : > { %v6099_v27 = vpop.f32.mrf.mxu2  ;;  %7039 = vmatpush.bf16.msra.mxu2 %v9743_v40  ;;  %7013 = vmatpush.bf16.msra.mxu0 %v9615_v34  ;;  %v9566_v40 = vld [vmem:[#allocation12] sm:$0xf]  ;;  %v9755_v34 = vor.u32 %v10443_v55, %v9752_v13  ;;  %v9720_v13 = vld [vmem:[#allocation12 + $0x138] sm:$0xf0] }
 0x6b4   : > { %7053 = vmatpush.bf16.msra.mxu3 %v9799_v23  ;;  %7027 = vmatpush.bf16.msra.mxu1 %v9671_v16  ;;  %v9567_v42 = vor.u32 %v10398_v30, %v9566_v40  ;;  %v9759_v23 = vor.u32 %v10446_v54, %v9758_v0  ;;  %v10411_v16 = vld [vmem:[#allocation12 + $0x74] sm:$0xf]  ;;  %v9630_v27 = vld [vmem:[#allocation12 + $0x80] sm:$0xf] }
 0x6b5   : > { %v9627_v12 = vor.u32 %v10411_v16, %v9624_v6  ;;  %v10403_v40 = vld [vmem:[#allocation12 + $0x34] sm:$0xf] }
 0x6b6   : > { %v10419_v16 = vld [vmem:[#allocation12 + $0xb4] sm:$0xf] }
 0x6b7   : > { %7040 = vmatpush.bf16.msra.mxu2 %v9735_v33  ;;  %7014 = vmatpush.bf16.msra.mxu0 %v9607_v50  ;;  %v10414_v33 = vld [vmem:[#allocation12 + $0x84] sm:$0xf0]  ;;  %v9819_v50 = vor.u32 %v10459_v35, %v9816_v2  ;;  %v9656_v35 = vld [vmem:[#allocation12 + $0xb8] sm:$0xf0]  ;;  %v9712_v2 = vld [vmem:[#allocation12 + $0x128] sm:$0xf0] }
 0x6b8   : > { %7054 = vmatpush.bf16.msra.mxu3 %v9791_v38  ;;  %7028 = vmatpush.bf16.msra.mxu1 %v9663_v52  ;;  %v9631_v22 = vor.u32 %v10414_v33, %v9630_v27  ;;  %v9691_v38 = vor.u32 %v10427_v51, %v9688_v21  ;;  %v9744_v52 = vld [vmem:[#allocation12 + $0x168] sm:$0xf0]  ;;  %v9659_v21 = vor.u32 %v10419_v16, %v9656_v35 }
 0x6b9   : > { %6609 = vmatmul.bf16.vlgmr.msrb.gmra.mxu3 %v13166_v39  ;;  %6583 = vmatmul.bf16.vlgmr.msrb.gmra.mxu1 %v13166_v39  ;;  %v9583_v39 = vor.u32 %v10402_v32, %v9582_v11  ;;  %v9747_v5 = vor.u32 %v10441_v25, %v9744_v52  ;;  %v10407_v11 = vld [vmem:[#allocation12 + $0x54] sm:$0xf]  ;;  %v9608_v32 = vld [vmem:[#allocation12 + $0x58] sm:$0xf0]  ;;  %v9776_v52 = vld [vmem:[#allocation12 + $0x1a8] sm:$0xf0] }
 0x6ba   : > { %v9611_v45 = vor.u32 %v10407_v11, %v9608_v32  ;;  %v10415_v32 = vld [vmem:[#allocation12 + $0x94] sm:$0xf] }
 0x6bb   : > { %7041 = vmatpush.bf16.msra.mxu2 %v9727_v15  ;;  %7015 = vmatpush.bf16.msra.mxu0 %v9599_v18  ;;  %v9616_v15 = vld [vmem:[#allocation12 + $0x68] sm:$0xf0]  ;;  %v10457_v18 = vld [vmem:[#allocation12 + $0x1e4] sm:$0xf] }
 0x6bc   : > { %7055 = vmatpush.bf16.msra.mxu3 %v9783_v29  ;;  %7029 = vmatpush.bf16.msra.mxu1 %v9655_v56  ;;  %v9619_v36 = vor.u32 %v10409_v48, %v9616_v15  ;;  %v9811_v41 = vor.u32 %v10457_v18, %v9808_v49  ;;  %v9680_v29 = vld [vmem:[#allocation12 + $0xe8] sm:$0xf0]  ;;  %v10417_v48 = vld [vmem:[#allocation12 + $0xa4] sm:$0xf]  ;;  %v10431_v49 = vld [vmem:[#allocation12 + $0x114] sm:$0xf] }
 0x6bd   : > { %v9648_v18 = vld [vmem:[#allocation12 + $0xa8] sm:$0xf0] }
 0x6be   : > { %6596 = vmatmul.bf16.vlgmr.msrb.gmra.mxu2 %v6114_v59  ;;  %6570 = vmatmul.bf16.vlgmr.msrb.gmra.mxu0 %v6114_v59  ;;  %v10448_v59 = vld [vmem:[#allocation12 + $0x194] sm:$0xf0] }
 0x6bf   : > { %7042 = vmatpush.bf16.msra.mxu2 %v9719_v53  ;;  %7016 = vmatpush.bf16.msra.mxu0 %v9591_v57  ;;  %v9767_v10 = vor.u32 %v10448_v59, %v9766_v37  ;;  %v13175_v53 = vld [vmem:[%s13262_s16] sm:$0xf]  ;;  %v9683_v57 = vor.u32 %v10425_v20, %v9680_v29  ;;  %v10453_v37 = vld [vmem:[#allocation12 + $0x1c4] sm:$0xf]  ;;  %v9792_v59 = vld [vmem:[#allocation12 + $0x1c8] sm:$0xf0] }
 0x6c0   : > { %7056 = vmatpush.bf16.msra.mxu3 %v9775_v60  ;;  %7030 = vmatpush.bf16.msra.mxu1 %v9647_v31  ;;  %v6182_v9 = vperm.slane %v13175_v53, 0  ;;  %v10423_v60 = vld [vmem:[#allocation12 + $0xd4] sm:$0xf]  ;;  %v10437_v31 = vld [vmem:[#allocation12 + $0x144] sm:$0xf]  ;;  %v9795_v4 = vor.u32 %v10453_v37, %v9792_v59 }
 0x6c1   : > { %v9675_v61 = vor.u32 %v10423_v60, %v9672_v3  ;;  %v10429_v60 = vld [vmem:[#allocation12 + $0x104] sm:$0xf]  ;;  %v9696_v3 = vld [vmem:[#allocation12 + $0x108] sm:$0xf0] }
 0x6c2   : > { %v9699_v37 = vor.u32 %v10429_v60, %v9696_v3  ;;  %v10445_v59 = vld [vmem:[#allocation12 + $0x184] sm:$0xf] }
 0x6c3   : > { %7043 = vmatpush.bf16.msra.mxu2 %v9711_v47  ;;  %7017 = vmatpush.bf16.msra.mxu0 %v9583_v39  ;;  %v6183_v47 = vperm.slane %v13175_v53, 1  ;;  %v10455_v39 = vld [vmem:[#allocation12 + $0x1d4] sm:$0xf] }
 0x6c4   : > { %7057 = vmatpush.bf16.msra.mxu3 %v9767_v10  ;;  %7031 = vmatpush.bf16.msra.mxu1 %v9639_v24  ;;  %v9803_v7 = vor.u32 %v10455_v39, %v9800_v28  ;;  %v9664_v24 = vld [vmem:[#allocation12 + $0xc8] sm:$0xf0]  ;;  %v9640_v39 = vld [vmem:[#allocation12 + $0x98] sm:$0xf0] }
 0x6c5   : > { %v9667_v55 = vor.u32 %v10421_v46, %v9664_v24 }
 0x6c7   : > { %7044 = vmatpush.bf16.msra.mxu2 %v9703_v8  ;;  %7018 = vmatpush.bf16.msra.mxu0 %v9575_v63  ;;  %v9731_v8 = vor.u32 %v10437_v31, %v9728_v17  ;;  %v9600_v63 = vld [vmem:[#allocation12 + $0x48] sm:$0xf0]  ;;  %v6184_v31 = vperm.slane %v13175_v53, 2 }
 0x6c8   : > { %7058 = vmatpush.bf16.msra.mxu3 %v9759_v23  ;;  %7032 = vmatpush.bf16.msra.mxu1 %v9631_v22  ;;  %v9603_v62 = vor.u32 %v10405_v43, %v9600_v63  ;;  %v9784_v23 = vld [vmem:[#allocation12 + $0x1b8] sm:$0xf0]  ;;  %v9584_v22 = vld [vmem:[#allocation12 + $0x28] sm:$0xf0]  ;;  %v10397_v43 = vld [vmem:[#allocation12 + $0x4] sm:$0xf]  ;;  %v9643_v63 = vor.u32 %v10415_v32, %v9640_v39 }
 0x6cb   : > { %7045 = vmatpush.bf16.msra.mxu2 %v9695_v19  ;;  %7019 = vmatpush.bf16.msra.mxu0 %v9567_v42  ;;  %v10435_v19 = vld [vmem:[#allocation12 + $0x134] sm:$0xf] }
 0x6cc   : > { %7103 = vmatpush.bf16.msrb.mxu3 %v9819_v50  ;;  %7077 = vmatpush.bf16.msrb.mxu1 %v9691_v38  ;;  %v9723_v54 = vor.u32 %v10435_v19, %v9720_v13  ;;  %v10451_v42 = vld [vmem:[#allocation12 + $0x1b4] sm:$0xf]  ;;  %v10401_v50 = vld [vmem:[#allocation12 + $0x24] sm:$0xf]  ;;  %v10468_v13 = vld [vmem:[%s13265_s19 + $0x38] sm:$0xff] }
 0x6cd   : > { %v9787_v33 = vor.u32 %v10451_v42, %v9784_v23  ;;  %v10449_v38 = vld [vmem:[#allocation12 + $0x1a4] sm:$0xf]  ;;  %v9587_v20 = vor.u32 %v10401_v50, %v9584_v22 }
 0x6ce   : > { %v9779_v44 = vor.u32 %v10449_v38, %v9776_v52  ;;  %v10467_v50 = vld [vmem:[%s13265_s19 + $0x30] sm:$0xff]  ;;  %v10465_v38 = vld [vmem:[%s13265_s19 + $0x20] sm:$0xff] }
 0x6cf   : > { %7090 = vmatpush.bf16.msrb.mxu2 %v9755_v34  ;;  %7064 = vmatpush.bf16.msrb.mxu0 %v9627_v12  ;;  %v9592_v34 = vld [vmem:[#allocation12 + $0x38] sm:$0xf0]  ;;  %v10433_v12 = vld [vmem:[#allocation12 + $0x124] sm:$0xf]  ;;  %v10473_v52 = vld [vmem:[%s13265_s19 + $0x60] sm:$0xff] }
 0x6d0   : > { %7104 = vmatpush.bf16.msrb.mxu3 %v9811_v41  ;;  %7078 = vmatpush.bf16.msrb.mxu1 %v9683_v57  ;;  %v9595_v6 = vor.u32 %v10403_v40, %v9592_v34  ;;  %v9715_v25 = vor.u32 %v10433_v12, %v9712_v2  ;;  %v10475_v22 = vld [vmem:[%s13265_s19 + $0x70] sm:$0xff] }
 0x6d3   : > { %7091 = vmatpush.bf16.msrb.mxu2 %v9747_v5  ;;  %7065 = vmatpush.bf16.msrb.mxu0 %v9619_v36  ;;  %v9704_v36 = vld [vmem:[#allocation12 + $0x118] sm:$0xf0] }
 0x6d4   : > { %7105 = vmatpush.bf16.msrb.mxu3 %v9803_v7  ;;  %7079 = vmatpush.bf16.msrb.mxu1 %v9675_v61  ;;  %v9707_v11 = vor.u32 %v10431_v49, %v9704_v36  ;;  %v10463_v49 = vld [vmem:[%s13265_s19 + $0x10] sm:$0xff] }
 0x6d5   : > { %v10471_v36 = vld [vmem:[%s13265_s19 + $0x50] sm:$0xff] }
 0x6d7   : > { %7092 = vmatpush.bf16.msrb.mxu2 %v9739_v14  ;;  %7066 = vmatpush.bf16.msrb.mxu0 %v9611_v45  ;;  %v9576_v14 = vld [vmem:[#allocation12 + $0x18] sm:$0xf0] }
 0x6d8   : > { %7106 = vmatpush.bf16.msrb.mxu3 %v9795_v4  ;;  %7080 = vmatpush.bf16.msrb.mxu1 %v9667_v55  ;;  %v9579_v7 = vor.u32 %v10399_v26, %v9576_v14  ;;  %v10461_v14 = vld [vmem:[%s13265_s19] sm:$0xff] }
 0x6db   : > { %7093 = vmatpush.bf16.msrb.mxu2 %v9731_v8  ;;  %7067 = vmatpush.bf16.msrb.mxu0 %v9603_v62  ;;  %v9632_v62 = vld [vmem:[#allocation12 + $0x88] sm:$0xf0] }
 0x6dc   : > { %7107 = vmatpush.bf16.msrb.mxu3 %v9787_v33  ;;  %7081 = vmatpush.bf16.msrb.mxu1 %v9659_v21  ;;  %v10466_v21 = vld [vmem:[%s13265_s19 + $0x28] sm:$0xff] }
 0x6df   : > { %7094 = vmatpush.bf16.msrb.mxu2 %v9723_v54  ;;  %7068 = vmatpush.bf16.msrb.mxu0 %v9595_v6  ;;  %v10476_v54 = vld [vmem:[%s13265_s19 + $0x78] sm:$0xff] }
 0x6e0   : > { %7108 = vmatpush.bf16.msrb.mxu3 %v9779_v44  ;;  %v10470_v44 = vld [vmem:[%s13265_s19 + $0x48] sm:$0xff] }
 0x6e3   : > { %7095 = vmatpush.bf16.msrb.mxu2 %v9715_v25  ;;  %7069 = vmatpush.bf16.msrb.mxu0 %v9587_v20  ;;  %v10474_v25 = vld [vmem:[%s13265_s19 + $0x68] sm:$0xff]  ;;  %v6686_v20 = vld [vmem:[%s13264_s18] sm:$0x3] }
 0x6e4   : > { %v6688_v26 = vperm.slane %v6686_v20, 0 }
 0x6e7   : > { %7096 = vmatpush.bf16.msrb.mxu2 %v9707_v11  ;;  %7070 = vmatpush.bf16.msrb.mxu0 %v9579_v7 }
 0x6eb   : > { %7097 = vmatpush.bf16.msrb.mxu2 %v9699_v37 }
 0x726   : > { %v6532_v56 = vpop.f32.mrf.mxu1 }
 0x72b   : > { %v6519_v1 = vpop.f32.mrf.mxu0 }
 0x72c   : > { %v6520_v58 = vadd.f32 %v6519_v1, %v6182_v9  ;;  %v6558_v10 = vpop.f32.mrf.mxu3  ;;  %v9651_v9 = vor.u32 %v10417_v48, %v9648_v18  ;;  %v9568_v1 = vld [vmem:[#allocation12 + $0x8] sm:$0xf0] }
 0x72d   : > { %v9571_v46 = vor.u32 %v10397_v43, %v9568_v1 }
 0x72e   : > { %v6533_v30 = vadd.f32 %v6532_v56, %v6520_v58  ;;  %v6534_v0 = vpop.f32.mrf.mxu1  ;;  %v10447_v56 = vld [vmem:[#allocation12 + $0x194] sm:$0xf]  ;;  %7082 = vmatpush.bf16.msrb.mxu1 %v9651_v9  ;;  %v9760_v58 = vld [vmem:[#allocation12 + $0x188] sm:$0xf0] }
 0x72f   : > { %v9763_v55 = vor.u32 %v10445_v59, %v9760_v58  ;;  %7071 = vmatpush.bf16.msrb.mxu0 %v9571_v46 }
 0x730   : > { %v6614_v27 = vmax.f32 %v6533_v30, 0.0  ;;  %v6185_v30 = vperm.slane %v13175_v53, 3 }
 0x731   : > { %v6545_v51 = vpop.f32.mrf.mxu2 }
 0x732   : > { %v13179_v5 = vpack.c.bf16 %v6614_v27, %v6614_v27  ;;  %v6546_v15 = vadd.f32 %v6545_v51, %v6183_v47  ;;  %v9768_v47 = vld [vmem:[#allocation12 + $0x198] sm:$0xf0]  ;;  %7083 = vmatpush.bf16.msrb.mxu1 %v9643_v63 }
 0x733   : > { %v6521_v41 = vpop.f32.mrf.mxu0  ;;  %v9771_v17 = vor.u32 %v10447_v56, %v9768_v47  ;;  %v10469_v56 = vld [vmem:[%s13265_s19 + $0x40] sm:$0xff] }
 0x734   : > { %v6559_v29 = vadd.f32 %v6558_v10, %v6546_v15  ;;  %v6560_v57 = vpop.f32.mrf.mxu3  ;;  %7020 = vmatmul.bf16.vlgmr.msra.gmra.mxu0 %v13179_v5  ;;  %v10413_v10 = vld [vmem:[#allocation12 + $0x84] sm:$0xf]  ;;  %v10472_v15 = vld [vmem:[%s13265_s19 + $0x58] sm:$0xff] }
 0x735   : > { %7109 = vmatpush.bf16.msrb.mxu3 %v9771_v17  ;;  %v9635_v40 = vor.u32 %v10413_v10, %v9632_v62  ;;  %7252 = vmatpush.bf16.msra.mxu0 %v10468_v13  ;;  %v10462_v57 = vld [vmem:[%s13265_s19 + $0x8] sm:$0xff]  ;;  %v6689_v17 = vperm.slane %v6686_v20, 1 }
 0x736   : > { %v6615_v45 = vmax.f32 %v6559_v29, 0.0  ;;  %v6584_v28 = vpop.f32.mrf.mxu1 }
 0x737   : > { %7084 = vmatpush.bf16.msrb.mxu1 %v9635_v40 }
 0x738   : > { %v6619_v61 = vpack.c.bf16 %v6615_v45, %v6615_v45 }
 0x739   : > { %v6547_v8 = vpop.f32.mrf.mxu2  ;;  %7110 = vmatpush.bf16.msrb.mxu3 %v9763_v55  ;;  %7253 = vmatpush.bf16.msra.mxu0 %v10467_v50  ;;  %v10552_v55 = vld [vmem:[%s13431_s4] ss:$0 sm:$0xff] }
 0x73a   : > { %7033 = vmatmul.bf16.vlgmr.msra.gmra.mxu1 %v6619_v61 }
 0x73b   : > { %v6571_v4 = vpop.f32.mrf.mxu0  ;;  %7265 = vmatpush.bf16.msra.mxu1 %v10476_v54 }
 0x73c   : > { %v6572_v24 = vadd.f32 %v6571_v4, %v6184_v31  ;;  %v6610_v19 = vpop.f32.mrf.mxu3 }
 0x73d   : > { %7254 = vmatpush.bf16.msra.mxu0 %v10466_v21 }
 0x73e   : > { %v6585_v34 = vadd.f32 %v6584_v28, %v6572_v24  ;;  %v6586_v0 = vpop.f32.mrf.mxu1 }
 0x73f   : > { %7266 = vmatpush.bf16.msra.mxu1 %v10475_v22 }
 0x740   : > { %v6616_v42 = vmax.f32 %v6585_v34, 0.0 }
 0x741   : > { %v6597_v23 = vpop.f32.mrf.mxu2  ;;  %7255 = vmatpush.bf16.msra.mxu0 %v10465_v38 }
 0x742   : > { %v6620_v16 = vpack.c.bf16 %v6616_v42, %v6616_v42  ;;  %v6598_v6 = vadd.f32 %v6597_v23, %v6185_v30 }
 0x743   : > { %v6573_v35 = vpop.f32.mrf.mxu0  ;;  %7267 = vmatpush.bf16.msra.mxu1 %v10474_v25 }
 0x744   : > { %v6611_v12 = vadd.f32 %v6610_v19, %v6598_v6  ;;  %7046 = vmatmul.bf16.vlgmr.msra.gmra.mxu2 %v6620_v16  ;;  %7072 = vmatmul.bf16.vlgmr.msrb.gmra.mxu0 %v13179_v5  ;;  %v6612_v53 = vpop.f32.mrf.mxu3  ;;  %v10464_v5 = vld [vmem:[%s13265_s19 + $0x18] sm:$0xff] }
 0x745   : > { %7256 = vmatpush.bf16.msra.mxu0 %v10464_v5 }
 0x746   : > { %v6617_v2 = vmax.f32 %v6611_v12, 0.0 }
 0x747   : > { %7268 = vmatpush.bf16.msra.mxu1 %v10473_v52 }
 0x748   : > { %v6621_v27 = vpack.c.bf16 %v6617_v2, %v6617_v2 }
 0x749   : > { %v6599_v33 = vpop.f32.mrf.mxu2  ;;  %7257 = vmatpush.bf16.msra.mxu0 %v10463_v49 }
 0x74a   : > { %7059 = vmatmul.bf16.vlgmr.msra.gmra.mxu3 %v6621_v27  ;;  %7085 = vmatmul.bf16.vlgmr.msrb.gmra.mxu1 %v6619_v61 }
 0x74b   : > { %7269 = vmatpush.bf16.msra.mxu1 %v10472_v15 }
 0x74d   : > { %7258 = vmatpush.bf16.msra.mxu0 %v10462_v57 }
 0x74f   : > { %7270 = vmatpush.bf16.msra.mxu1 %v10471_v36 }
 0x751   : > { %7259 = vmatpush.bf16.msra.mxu0 %v10461_v14 }
 0x753   : > { %7271 = vmatpush.bf16.msra.mxu1 %v10470_v44 }
 0x754   : > { %7098 = vmatmul.bf16.vlgmr.msrb.gmra.mxu2 %v6620_v16 }
 0x757   : > { %7272 = vmatpush.bf16.msra.mxu1 %v10469_v56 }
 0x75a   : > { %7111 = vmatmul.bf16.vlgmr.msrb.gmra.mxu3 %v6621_v27 }
 0x7b1   : > { %v7021_v51 = vpop.f32.mrf.mxu0 }
 0x7b2   : > { %v7022_v47 = vadd.f32 %v7021_v51, %v6688_v26 }
 0x7b7   : > { %v7034_v48 = vpop.f32.mrf.mxu1 }
 0x7b8   : > { %v7035_v39 = vadd.f32 %v7034_v48, %v7022_v47 }
 0x7b9   : > { %v7023_v18 = vpop.f32.mrf.mxu0 }
 0x7bf   : > { %v7036_v41 = vpop.f32.mrf.mxu1 }
 0x7c1   : > { %v7073_v29 = vpop.f32.mrf.mxu0 }
 0x7c2   : > { %v7074_v8 = vadd.f32 %v7073_v29, %v6689_v17 }
 0x7c7   : > { %v7047_v9 = vpop.f32.mrf.mxu2  ;;  %v7086_v11 = vpop.f32.mrf.mxu1 }
 0x7c8   : > { %v7048_v45 = vadd.f32 %v7047_v9, %v7035_v39  ;;  %v7087_v63 = vadd.f32 %v7086_v11, %v7074_v8 }
 0x7c9   : > { %v7075_v32 = vpop.f32.mrf.mxu0 }
 0x7cd   : > { %v7060_v28 = vpop.f32.mrf.mxu3 }
 0x7ce   : > { %v7061_v60 = vadd.f32 %v7060_v28, %v7048_v45 }
 0x7cf   : > { %v7049_v3 = vpop.f32.mrf.mxu2  ;;  %v7088_v7 = vpop.f32.mrf.mxu1 }
 0x7d0   : > { %v7116_v61 = vmax.f32 %v7061_v60, 0.0 }
 0x7d2   : > { %v7118_v31 = vpack.c.bf16 %v7116_v61, %v7116_v61 }
 0x7d4   : > { %7260 = vmatmul.bf16.vlgmr.msra.gmra.mxu0 %v7118_v31 }
 0x7d5   : > { %v7062_v43 = vpop.f32.mrf.mxu3 }
 0x7d7   : > { %v7099_v1 = vpop.f32.mrf.mxu2 }
 0x7d8   : > { %v7100_v37 = vadd.f32 %v7099_v1, %v7087_v63 }
 0x7dd   : > { %v7112_v59 = vpop.f32.mrf.mxu3 }
 0x7de   : > { %v7113_v58 = vadd.f32 %v7112_v59, %v7100_v37 }
 0x7df   : > { %v7101_v10 = vpop.f32.mrf.mxu2 }
 0x7e0   : > { %v7117_v62 = vmax.f32 %v7113_v58, 0.0 }
 0x7e2   : > { %v7119_v4 = vpack.c.bf16 %v7117_v62, %v7117_v62 }
 0x7e4   : > { %7273 = vmatmul.bf16.vlgmr.msra.gmra.mxu1 %v7119_v4 }
 0x7e5   : > { %v7114_v46 = vpop.f32.mrf.mxu3 }
 0x851   : > { %v7261_v24 = vpop.f32.mrf.mxu0 }
 0x852   : > { %v7262_v13 = vadd.f32 %v10552_v55, %v7261_v24 }
 0x859   : > { %v7263_v19 = vpop.f32.mrf.mxu0 }
 0x861   : > { %v7274_v40 = vpop.f32.mrf.mxu1 }
 0x862   : > { %v7275_v34 = vadd.f32 %v7274_v40, %v7262_v13 }
 0x864   : > { %7279 = vst.msk [vmem:[%s737_s22] sm:$0x7] %vm7278_vm3, %v7275_v34 }
 0x869   : > { %v7276_v30 = vpop.f32.mrf.mxu1 }
 0x86a PF: > { %s13433_s1 = sld [smem:[#allocation16_spill]] }
 0x870   : > { %s34_s2 = sadd.s32 1, %s13433_s1  }
 0x871   : > { %p31_p7 = scmp.ge.s32.totalorder %s34_s2, 4  }
 0x873   :  { %33 = sbr.rel (!%p31_p7) target bundleno = 14 (0xe), region = 167 }
 0x878   :  { %7299 = vsyncpa [#allocation6], 1 }
 0x879   :  { %7301 = vsyncpa [#allocation6 + $0x1], 1 }
 0x87a   :  { %7302 = vsyncpa [#allocation8], 1 }
 0x87b   :  { %7303 = vsyncpa [#allocation11], 1 }

</bundles_post_ra>
